<compile_context>
chip_gen: v7x
topology: tpu7x:2x2x1
jax: 0.10.0
libtpu: 0.0.40
codegen_flags: <defaults>
</compile_context>

<pallas_src>
import jax
import jax.numpy as jnp
from jax import lax
from jax.experimental import pallas as pl
from jax.experimental.pallas import tpu as pltpu

K = 7
PAD = (K - 1) // 2
TAPS = 2 * K * K          # 98 weights per branch (2 in-channels x 7 x 7)
ONE_THIRD = 1.0 / 3.0


def _conv_gate(pad_ref, a, b, w_ref, w_base, bias):
    """7x7 same-padding cross-correlation (2ch -> 1ch) on a zero-padded plane.

    pad_ref: (2, a + 2*PAD, b + 2*PAD) VMEM scratch holding [max, mean] planes.
    Returns sigmoid(conv + bias) / 3 with shape (a, b).  BN scale is already
    folded into the weights by the wrapper.

    kj (the lane shift) is the outermost spatial loop: one lane-offset slice is
    loaded per (channel, kj) and reused by all 7 ki taps as sublane-offset
    slices of that already-shifted plane.
    """
    acc = jnp.zeros((a, b), jnp.float32)
    for c in range(2):
        for kj in range(K):
            col = pad_ref[c, :, kj:kj + b]            # (a + 2*PAD, b), one lane shift
            for ki in range(K):
                w = w_ref[w_base + c * K * K + ki * K + kj]
                acc = acc + w * col[ki:ki + a, :]     # cheap sublane-offset slice
    return jax.nn.sigmoid(acc + bias) * ONE_THIRD


def _triplet_kernel(w_ref, b_ref, x_ref, o_ref, pad_cw, pad_hc, pad_hw):
    # w_ref : (3*98,) f32 SMEM -- BN-folded conv weights [cw | hc(tap-transposed) | hw]
    # b_ref : (3,)    f32 SMEM -- folded BatchNorm biases [cw, hc, hw]
    # x_ref / o_ref : (NB, C, H, W) f32 VMEM block (NB batch elements, NCHW)
    # pad_* : zero-padded ZPool scratch planes, one per branch
    NB, C, H, W = x_ref.shape
    inv_c, inv_h, inv_w = 1.0 / C, 1.0 / H, 1.0 / W

    # Zero only the PAD-wide halo strips, once per grid step.  The interiors are
    # fully overwritten for every element below and the halo is never written,
    # so it stays zero for the whole step.  (Per-step, not program_id==0-gated:
    # the parallel batch axis may be megacore-partitioned.)
    for pad, a, b in ((pad_cw, C, W), (pad_hc, C, H), (pad_hw, H, W)):
        pad[:, 0:PAD, :] = jnp.zeros((2, PAD, b + 2 * PAD), jnp.float32)
        pad[:, PAD + a:PAD + a + PAD, :] = jnp.zeros((2, PAD, b + 2 * PAD), jnp.float32)
        pad[:, :, 0:PAD] = jnp.zeros((2, a + 2 * PAD, PAD), jnp.float32)
        pad[:, :, PAD + b:PAD + b + PAD] = jnp.zeros((2, a + 2 * PAD, PAD), jnp.float32)

    @pl.loop(0, NB)
    def _(i):
        x = x_ref[i]                                   # (C, H, W)

        # ZPool ([max, mean]) for the three branches, from the resident block.
        pad_cw[0, PAD:PAD + C, PAD:PAD + W] = jnp.max(x, axis=1)          # pool over H -> (C, W)
        pad_cw[1, PAD:PAD + C, PAD:PAD + W] = jnp.sum(x, axis=1) * inv_h
        pad_hc[0, PAD:PAD + C, PAD:PAD + H] = jnp.max(x, axis=2)          # pool over W -> (C, H)
        pad_hc[1, PAD:PAD + C, PAD:PAD + H] = jnp.sum(x, axis=2) * inv_w
        pad_hw[0, PAD:PAD + H, PAD:PAD + W] = jnp.max(x, axis=0)          # pool over C -> (H, W)
        pad_hw[1, PAD:PAD + H, PAD:PAD + W] = jnp.sum(x, axis=0) * inv_c

        # Per-branch gates: conv7x7 -> +bias -> sigmoid -> * (1/3).
        # NOTE: the hc branch runs on the (C, H) plane (taps transposed in the
        # wrapper); for very large C (>=128) the (H, C) orientation would avoid
        # the lane->sublane relayout in the broadcast below.
        g_cw = _conv_gate(pad_cw, C, W, w_ref, 0 * TAPS, b_ref[0])        # (C, W)
        g_hc = _conv_gate(pad_hc, C, H, w_ref, 1 * TAPS, b_ref[1])        # (C, H)
        g_hw = _conv_gate(pad_hw, H, W, w_ref, 2 * TAPS, b_ref[2])        # (H, W)

        # Fused TripletAttention average, written once per element.
        o_ref[i] = x * (g_hw[None, :, :] + g_cw[:, None, :] + g_hc[:, :, None])


def _pick_nb(n, elem_bytes):
    """Batch elements per grid step: as big as possible (amortize per-step
    overhead / tiny-DMA inefficiency) under a ~10 MiB block cap, keeping >= 2
    grid steps when there is enough total work to use both v7x TensorCores."""
    max_block_bytes = 10 << 20
    nb = min(n, max(1, max_block_bytes // elem_bytes))
    if nb == n and n >= 2 and n * elem_bytes >= (2 << 20):
        nb = max(1, n // 2)
    while n % nb:                   # round down to a divisor of N
        nb -= 1
    return nb


def triplet_attention(x, w_cw, w_hc, w_hw, bn_scales, bn_biases):
    """x: (N, C, H, W) f32 NCHW (same as the PyTorch module).
    w_*: (1, 2, 7, 7) conv weights for the cw / hc / hw AttentionGates.
    bn_scales / bn_biases: (3,) eval-mode folded BatchNorm scale & bias, order [cw, hc, hw].
    """
    N, C, H, W = x.shape
    x = x.astype(jnp.float32)
    bn_scales = jnp.asarray(bn_scales, jnp.float32)
    bn_biases = jnp.asarray(bn_biases, jnp.float32)

    # Fold BN scale into the conv weights; transpose the hc branch's taps so its
    # conv runs on the (C, H) plane produced directly by the W-reduction.
    w_cw_f = (w_cw.astype(jnp.float32) * bn_scales[0]).reshape(-1)
    w_hc_f = (jnp.transpose(w_hc.astype(jnp.float32), (0, 1, 3, 2)) * bn_scales[1]).reshape(-1)
    w_hw_f = (w_hw.astype(jnp.float32) * bn_scales[2]).reshape(-1)
    w_all = jnp.concatenate([w_cw_f, w_hc_f, w_hw_f])                    # (294,)

    elem_bytes = C * H * W * 4
    nb = _pick_nb(N, elem_bytes)
    grid = (N // nb,)

    # VMEM budget: 2-deep buffering on both x and out blocks + the three padded
    # scratch planes + headroom for in-kernel temporaries; clamp to 90% of the
    # physical VMEM of the chip we are actually on (64 MiB on v7x, 128 on v5e/v6e).
    scratch_bytes = 4 * 2 * ((C + 2 * PAD) * (W + 2 * PAD)
                             + (C + 2 * PAD) * (H + 2 * PAD)
                             + (H + 2 * PAD) * (W + 2 * PAD))
    block_bytes = nb * elem_bytes
    need = 4 * block_bytes + scratch_bytes + 2 * elem_bytes + (2 << 20)
    try:
        phys_vmem = int(pltpu.get_tpu_info().vmem_capacity_bytes)
    except Exception:
        phys_vmem = 64 << 20          # conservative fallback (v7x per-TC VMEM)
    vmem_limit = int(min(max(need, 32 << 20), int(phys_vmem * 0.9)))
    # TODO(synk): single-element blocks > ~12 MiB (e.g. 64x224x224 f32) would need
    # an inner H-chunk pipeline to keep 2-deep buffering within v7x's 64 MiB.

    return pl.pallas_call(
        _triplet_kernel,
        out_shape=jax.ShapeDtypeStruct((N, C, H, W), jnp.float32),
        grid=grid,
        in_specs=[
            pl.BlockSpec(memory_space=pltpu.MemorySpace.SMEM),           # folded conv weights
            pl.BlockSpec(memory_space=pltpu.MemorySpace.SMEM),           # per-branch BN biases
            pl.BlockSpec((nb, C, H, W), lambda n: (n, 0, 0, 0)),         # x, NB batch elements
        ],
        out_specs=pl.BlockSpec((nb, C, H, W), lambda n: (n, 0, 0, 0)),
        scratch_shapes=[
            pltpu.VMEM((2, C + 2 * PAD, W + 2 * PAD), jnp.float32),      # cw pooled (padded)
            pltpu.VMEM((2, C + 2 * PAD, H + 2 * PAD), jnp.float32),      # hc pooled (padded, transposed)
            pltpu.VMEM((2, H + 2 * PAD, W + 2 * PAD), jnp.float32),      # hw pooled (padded)
        ],
        compiler_params=pltpu.CompilerParams(
            dimension_semantics=("parallel",),
            vmem_limit_bytes=vmem_limit),
    )(w_all, bn_biases, x)


# ---------------- pure-JAX reference (for correctness check) ----------------
def _gate_ref(x_view, w, bn_scale, bn_bias):
    pooled = jnp.stack([jnp.max(x_view, axis=1), jnp.mean(x_view, axis=1)], axis=1)
    y = lax.conv_general_dilated(
        pooled, w, window_strides=(1, 1),
        padding=[(PAD, PAD), (PAD, PAD)],
        dimension_numbers=("NCHW", "OIHW", "NCHW"))
    y = y * bn_scale + bn_bias
    return x_view * jax.nn.sigmoid(y)


def triplet_attention_ref(x, w_cw, w_hc, w_hw, bn_scales, bn_biases):
    xp1 = jnp.transpose(x, (0, 2, 1, 3))
    o1 = jnp.transpose(_gate_ref(xp1, w_cw, bn_scales[0], bn_biases[0]), (0, 2, 1, 3))
    xp2 = jnp.transpose(x, (0, 3, 2, 1))
    o2 = jnp.transpose(_gate_ref(xp2, w_hc, bn_scales[1], bn_biases[1]), (0, 3, 2, 1))
    o3 = _gate_ref(x, w_hw, bn_scales[2], bn_biases[2])
    return (1.0 / 3.0) * (o3 + o1 + o2)


if __name__ == "__main__":
    key = jax.random.PRNGKey(0)
    kx, k1, k2, k3 = jax.random.split(key, 4)

    N, C, H, W = 2, 4, 16, 16
    x = jax.random.normal(kx, (N, C, H, W), dtype=jnp.float32)

    # Deterministic synthetic conv weights, one per AttentionGate: (1, 2, 7, 7).
    w_cw = jax.random.normal(k1, (1, 2, K, K), dtype=jnp.float32) * 0.1
    w_hc = jax.random.normal(k2, (1, 2, K, K), dtype=jnp.float32) * 0.1
    w_hw = jax.random.normal(k3, (1, 2, K, K), dtype=jnp.float32) * 0.1

    # Eval-mode BatchNorm2d(1) defaults folded into per-branch scale/bias.
    eps = 1e-5
    s = 1.0 / jnp.sqrt(jnp.float32(1.0 + eps))        # gamma=1, running_var=1
    bn_scales = jnp.array([s, s, s], dtype=jnp.float32)
    bn_biases = jnp.zeros((3,), dtype=jnp.float32)    # beta=0, running_mean=0

    out = triplet_attention(x, w_cw, w_hc, w_hw, bn_scales, bn_biases)
    out = jax.block_until_ready(out)

    ref = triplet_attention_ref(x, w_cw, w_hc, w_hw, bn_scales, bn_biases)
    assert out.shape == (N, C, H, W)
    assert jnp.allclose(out, ref, atol=1e-4, rtol=1e-4), "mismatch vs JAX reference"

    print("KERNEL_OK")
</pallas_src>

<mosaic_0001>
module attributes {stable_mosaic.version = 11 : i64} {
  func.func @_triplet_kernel(%arg0: i32, %arg1: memref<294xf32, #tpu.memory_space<smem>>, %arg2: memref<3xf32, #tpu.memory_space<smem>>, %arg3: memref<2x4x16x16xf32, #tpu.memory_space<vmem>>, %arg4: memref<2x4x16x16xf32, #tpu.memory_space<vmem>>, %arg5: memref<2x10x22xf32, #tpu.memory_space<vmem>>, %arg6: memref<2x10x22xf32, #tpu.memory_space<vmem>>, %arg7: memref<2x22x22xf32, #tpu.memory_space<vmem>>) attributes {dimension_semantics = [#tpu.dimension_semantics<parallel>], iteration_bounds = array<i64: 1>, scalar_prefetch = 0 : i64, scratch_operands = 3 : i64, tpu.core_type = #tpu.core_type<tc>, window_params = [{transform_indices = @transform_0, window_bounds = array<i64: 294>}, {transform_indices = @transform_1, window_bounds = array<i64: 3>}, {transform_indices = @transform_2, window_bounds = array<i64: 2, 4, 16, 16>}, {transform_indices = @transform_3, window_bounds = array<i64: 2, 4, 16, 16>}]} {
    %cst = arith.constant 0.000000e+00 : f32
    %0 = vector.broadcast %cst : f32 to vector<2x3x22xf32>
    %c0 = arith.constant 0 : index
    %c0_0 = arith.constant 0 : index
    %c0_1 = arith.constant 0 : index
    %1 = vector.load %arg5[%c0, %c0_0, %c0_1] : memref<2x10x22xf32, #tpu.memory_space<vmem>>, vector<2x3x22xf32>
    tpu.vector_store %arg5[%c0, %c0_0, %c0_1], %0 {strides = array<i32>} : memref<2x10x22xf32, #tpu.memory_space<vmem>>, vector<2x3x22xf32>,
    %cst_2 = arith.constant 0.000000e+00 : f32
    %2 = vector.broadcast %cst_2 : f32 to vector<2x3x22xf32>
    %c0_3 = arith.constant 0 : index
    %c7 = arith.constant 7 : index
    %c0_4 = arith.constant 0 : index
    %3 = vector.load %arg5[%c0_3, %c7, %c0_4] : memref<2x10x22xf32, #tpu.memory_space<vmem>>, vector<2x3x22xf32>
    tpu.vector_store %arg5[%c0_3, %c7, %c0_4], %2 {strides = array<i32>} : memref<2x10x22xf32, #tpu.memory_space<vmem>>, vector<2x3x22xf32>,
    %cst_5 = arith.constant 0.000000e+00 : f32
    %4 = vector.broadcast %cst_5 : f32 to vector<2x10x3xf32>
    %c0_6 = arith.constant 0 : index
    %c0_7 = arith.constant 0 : index
    %c0_8 = arith.constant 0 : index
    %5 = vector.load %arg5[%c0_6, %c0_7, %c0_8] : memref<2x10x22xf32, #tpu.memory_space<vmem>>, vector<2x10x3xf32>
    tpu.vector_store %arg5[%c0_6, %c0_7, %c0_8], %4 {strides = array<i32>} : memref<2x10x22xf32, #tpu.memory_space<vmem>>, vector<2x10x3xf32>,
    %cst_9 = arith.constant 0.000000e+00 : f32
    %6 = vector.broadcast %cst_9 : f32 to vector<2x10x3xf32>
    %c0_10 = arith.constant 0 : index
    %c0_11 = arith.constant 0 : index
    %c19 = arith.constant 19 : index
    %7 = vector.load %arg5[%c0_10, %c0_11, %c19] : memref<2x10x22xf32, #tpu.memory_space<vmem>>, vector<2x10x3xf32>
    tpu.vector_store %arg5[%c0_10, %c0_11, %c19], %6 {strides = array<i32>} : memref<2x10x22xf32, #tpu.memory_space<vmem>>, vector<2x10x3xf32>,
    %cst_12 = arith.constant 0.000000e+00 : f32
    %8 = vector.broadcast %cst_12 : f32 to vector<2x3x22xf32>
    %c0_13 = arith.constant 0 : index
    %c0_14 = arith.constant 0 : index
    %c0_15 = arith.constant 0 : index
    %9 = vector.load %arg6[%c0_13, %c0_14, %c0_15] : memref<2x10x22xf32, #tpu.memory_space<vmem>>, vector<2x3x22xf32>
    tpu.vector_store %arg6[%c0_13, %c0_14, %c0_15], %8 {strides = array<i32>} : memref<2x10x22xf32, #tpu.memory_space<vmem>>, vector<2x3x22xf32>,
    %cst_16 = arith.constant 0.000000e+00 : f32
    %10 = vector.broadcast %cst_16 : f32 to vector<2x3x22xf32>
    %c0_17 = arith.constant 0 : index
    %c7_18 = arith.constant 7 : index
    %c0_19 = arith.constant 0 : index
    %11 = vector.load %arg6[%c0_17, %c7_18, %c0_19] : memref<2x10x22xf32, #tpu.memory_space<vmem>>, vector<2x3x22xf32>
    tpu.vector_store %arg6[%c0_17, %c7_18, %c0_19], %10 {strides = array<i32>} : memref<2x10x22xf32, #tpu.memory_space<vmem>>, vector<2x3x22xf32>,
    %cst_20 = arith.constant 0.000000e+00 : f32
    %12 = vector.broadcast %cst_20 : f32 to vector<2x10x3xf32>
    %c0_21 = arith.constant 0 : index
    %c0_22 = arith.constant 0 : index
    %c0_23 = arith.constant 0 : index
    %13 = vector.load %arg6[%c0_21, %c0_22, %c0_23] : memref<2x10x22xf32, #tpu.memory_space<vmem>>, vector<2x10x3xf32>
    tpu.vector_store %arg6[%c0_21, %c0_22, %c0_23], %12 {strides = array<i32>} : memref<2x10x22xf32, #tpu.memory_space<vmem>>, vector<2x10x3xf32>,
    %cst_24 = arith.constant 0.000000e+00 : f32
    %14 = vector.broadcast %cst_24 : f32 to vector<2x10x3xf32>
    %c0_25 = arith.constant 0 : index
    %c0_26 = arith.constant 0 : index
    %c19_27 = arith.constant 19 : index
    %15 = vector.load %arg6[%c0_25, %c0_26, %c19_27] : memref<2x10x22xf32, #tpu.memory_space<vmem>>, vector<2x10x3xf32>
    tpu.vector_store %arg6[%c0_25, %c0_26, %c19_27], %14 {strides = array<i32>} : memref<2x10x22xf32, #tpu.memory_space<vmem>>, vector<2x10x3xf32>,
    %cst_28 = arith.constant 0.000000e+00 : f32
    %16 = vector.broadcast %cst_28 : f32 to vector<2x3x22xf32>
    %c0_29 = arith.constant 0 : index
    %c0_30 = arith.constant 0 : index
    %c0_31 = arith.constant 0 : index
    %17 = vector.load %arg7[%c0_29, %c0_30, %c0_31] : memref<2x22x22xf32, #tpu.memory_space<vmem>>, vector<2x3x22xf32>
    tpu.vector_store %arg7[%c0_29, %c0_30, %c0_31], %16 {strides = array<i32>} : memref<2x22x22xf32, #tpu.memory_space<vmem>>, vector<2x3x22xf32>,
    %cst_32 = arith.constant 0.000000e+00 : f32
    %18 = vector.broadcast %cst_32 : f32 to vector<2x3x22xf32>
    %c0_33 = arith.constant 0 : index
    %c19_34 = arith.constant 19 : index
    %c0_35 = arith.constant 0 : index
    %19 = vector.load %arg7[%c0_33, %c19_34, %c0_35] : memref<2x22x22xf32, #tpu.memory_space<vmem>>, vector<2x3x22xf32>
    tpu.vector_store %arg7[%c0_33, %c19_34, %c0_35], %18 {strides = array<i32>} : memref<2x22x22xf32, #tpu.memory_space<vmem>>, vector<2x3x22xf32>,
    %cst_36 = arith.constant 0.000000e+00 : f32
    %20 = vector.broadcast %cst_36 : f32 to vector<2x22x3xf32>
    %c0_37 = arith.constant 0 : index
    %c0_38 = arith.constant 0 : index
    %c0_39 = arith.constant 0 : index
    %21 = vector.load %arg7[%c0_37, %c0_38, %c0_39] : memref<2x22x22xf32, #tpu.memory_space<vmem>>, vector<2x22x3xf32>
    tpu.vector_store %arg7[%c0_37, %c0_38, %c0_39], %20 {strides = array<i32>} : memref<2x22x22xf32, #tpu.memory_space<vmem>>, vector<2x22x3xf32>,
    %cst_40 = arith.constant 0.000000e+00 : f32
    %22 = vector.broadcast %cst_40 : f32 to vector<2x22x3xf32>
    %c0_41 = arith.constant 0 : index
    %c0_42 = arith.constant 0 : index
    %c19_43 = arith.constant 19 : index
    %23 = vector.load %arg7[%c0_41, %c0_42, %c19_43] : memref<2x22x22xf32, #tpu.memory_space<vmem>>, vector<2x22x3xf32>
    tpu.vector_store %arg7[%c0_41, %c0_42, %c19_43], %22 {strides = array<i32>} : memref<2x22x22xf32, #tpu.memory_space<vmem>>, vector<2x22x3xf32>,
    %c0_i32 = arith.constant 0 : i32
    %c2_i32 = arith.constant 2 : i32
    %24 = arith.addi %c0_i32, %c2_i32 : i32
    %c1_i32 = arith.constant 1 : i32
    scf.for %arg8 = %c0_i32 to %24 step %c1_i32  : i32 {
      %c1_i32_45 = arith.constant 1 : i32
      %25 = arith.muli %arg8, %c1_i32_45 : i32
      %c0_i32_46 = arith.constant 0 : i32
      %26 = arith.addi %c0_i32_46, %25 : i32
      %27 = arith.index_cast %26 : i32 to index
      %c0_47 = arith.constant 0 : index
      %c0_48 = arith.constant 0 : index
      %c0_49 = arith.constant 0 : index
      %28 = vector.load %arg3[%27, %c0_47, %c0_48, %c0_49] : memref<2x4x16x16xf32, #tpu.memory_space<vmem>>, vector<1x4x16x16xf32>
      %29 = vector.shape_cast %28 : vector<1x4x16x16xf32> to vector<4x16x16xf32>
      %cst_50 = arith.constant dense<0xFF800000> : vector<4x16xf32>
      %30 = vector.multi_reduction <maximumf>, %29, %cst_50 [1] : vector<4x16x16xf32> to vector<4x16xf32>
      %c0_51 = arith.constant 0 : index
      %c3 = arith.constant 3 : index
      %c3_52 = arith.constant 3 : index
      %31 = vector.load %arg5[%c0_51, %c3, %c3_52] : memref<2x10x22xf32, #tpu.memory_space<vmem>>, vector<1x4x16xf32>
      %32 = vector.shape_cast %31 : vector<1x4x16xf32> to vector<4x16xf32>
      %33 = vector.shape_cast %30 : vector<4x16xf32> to vector<1x4x16xf32>
      tpu.vector_store %arg5[%c0_51, %c3, %c3_52], %33 {strides = array<i32>} : memref<2x10x22xf32, #tpu.memory_space<vmem>>, vector<1x4x16xf32>,
      %cst_53 = arith.constant dense<0.000000e+00> : vector<4x16xf32>
      %34 = vector.multi_reduction <add>, %29, %cst_53 [1] : vector<4x16x16xf32> to vector<4x16xf32>
      %cst_54 = arith.constant 6.250000e-02 : f32
      %35 = vector.broadcast %cst_54 : f32 to vector<4x16xf32>
      %36 = arith.mulf %34, %35 : vector<4x16xf32>
      %c1 = arith.constant 1 : index
      %c3_55 = arith.constant 3 : index
      %c3_56 = arith.constant 3 : index
      %37 = vector.load %arg5[%c1, %c3_55, %c3_56] : memref<2x10x22xf32, #tpu.memory_space<vmem>>, vector<1x4x16xf32>
      %38 = vector.shape_cast %37 : vector<1x4x16xf32> to vector<4x16xf32>
      %39 = vector.shape_cast %36 : vector<4x16xf32> to vector<1x4x16xf32>
      tpu.vector_store %arg5[%c1, %c3_55, %c3_56], %39 {strides = array<i32>} : memref<2x10x22xf32, #tpu.memory_space<vmem>>, vector<1x4x16xf32>,
      %cst_57 = arith.constant dense<0xFF800000> : vector<4x16xf32>
      %40 = vector.multi_reduction <maximumf>, %29, %cst_57 [2] : vector<4x16x16xf32> to vector<4x16xf32>
      %c0_58 = arith.constant 0 : index
      %c3_59 = arith.constant 3 : index
      %c3_60 = arith.constant 3 : index
      %41 = vector.load %arg6[%c0_58, %c3_59, %c3_60] : memref<2x10x22xf32, #tpu.memory_space<vmem>>, vector<1x4x16xf32>
      %42 = vector.shape_cast %41 : vector<1x4x16xf32> to vector<4x16xf32>
      %43 = vector.shape_cast %40 : vector<4x16xf32> to vector<1x4x16xf32>
      tpu.vector_store %arg6[%c0_58, %c3_59, %c3_60], %43 {strides = array<i32>} : memref<2x10x22xf32, #tpu.memory_space<vmem>>, vector<1x4x16xf32>,
      %cst_61 = arith.constant dense<0.000000e+00> : vector<4x16xf32>
      %44 = vector.multi_reduction <add>, %29, %cst_61 [2] : vector<4x16x16xf32> to vector<4x16xf32>
      %cst_62 = arith.constant 6.250000e-02 : f32
      %45 = vector.broadcast %cst_62 : f32 to vector<4x16xf32>
      %46 = arith.mulf %44, %45 : vector<4x16xf32>
      %c1_63 = arith.constant 1 : index
      %c3_64 = arith.constant 3 : index
      %c3_65 = arith.constant 3 : index
      %47 = vector.load %arg6[%c1_63, %c3_64, %c3_65] : memref<2x10x22xf32, #tpu.memory_space<vmem>>, vector<1x4x16xf32>
      %48 = vector.shape_cast %47 : vector<1x4x16xf32> to vector<4x16xf32>
      %49 = vector.shape_cast %46 : vector<4x16xf32> to vector<1x4x16xf32>
      tpu.vector_store %arg6[%c1_63, %c3_64, %c3_65], %49 {strides = array<i32>} : memref<2x10x22xf32, #tpu.memory_space<vmem>>, vector<1x4x16xf32>,
      %cst_66 = arith.constant dense<0xFF800000> : vector<16x16xf32>
      %50 = vector.multi_reduction <maximumf>, %29, %cst_66 [0] : vector<4x16x16xf32> to vector<16x16xf32>
      %c0_67 = arith.constant 0 : index
      %c3_68 = arith.constant 3 : index
      %c3_69 = arith.constant 3 : index
      %51 = vector.load %arg7[%c0_67, %c3_68, %c3_69] : memref<2x22x22xf32, #tpu.memory_space<vmem>>, vector<1x16x16xf32>
      %52 = vector.shape_cast %51 : vector<1x16x16xf32> to vector<16x16xf32>
      %53 = vector.shape_cast %50 : vector<16x16xf32> to vector<1x16x16xf32>
      tpu.vector_store %arg7[%c0_67, %c3_68, %c3_69], %53 {strides = array<i32>} : memref<2x22x22xf32, #tpu.memory_space<vmem>>, vector<1x16x16xf32>,
      %cst_70 = arith.constant dense<0.000000e+00> : vector<16x16xf32>
      %54 = vector.multi_reduction <add>, %29, %cst_70 [0] : vector<4x16x16xf32> to vector<16x16xf32>
      %cst_71 = arith.constant 2.500000e-01 : f32
      %55 = vector.broadcast %cst_71 : f32 to vector<16x16xf32>
      %56 = arith.mulf %54, %55 : vector<16x16xf32>
      %c1_72 = arith.constant 1 : index
      %c3_73 = arith.constant 3 : index
      %c3_74 = arith.constant 3 : index
      %57 = vector.load %arg7[%c1_72, %c3_73, %c3_74] : memref<2x22x22xf32, #tpu.memory_space<vmem>>, vector<1x16x16xf32>
      %58 = vector.shape_cast %57 : vector<1x16x16xf32> to vector<16x16xf32>
      %59 = vector.shape_cast %56 : vector<16x16xf32> to vector<1x16x16xf32>
      tpu.vector_store %arg7[%c1_72, %c3_73, %c3_74], %59 {strides = array<i32>} : memref<2x22x22xf32, #tpu.memory_space<vmem>>, vector<1x16x16xf32>,
      %c0_75 = arith.constant 0 : index
      %60 = memref.load %arg2[%c0_75] : memref<3xf32, #tpu.memory_space<smem>>
      %cst_76 = arith.constant 0.000000e+00 : f32
      %61 = vector.broadcast %cst_76 : f32 to vector<4x16xf32>
      %c0_77 = arith.constant 0 : index
      %c0_78 = arith.constant 0 : index
      %c0_79 = arith.constant 0 : index
      %62 = vector.load %arg5[%c0_77, %c0_78, %c0_79] : memref<2x10x22xf32, #tpu.memory_space<vmem>>, vector<1x10x16xf32>
      %63 = vector.shape_cast %62 : vector<1x10x16xf32> to vector<10x16xf32>
      %c0_80 = arith.constant 0 : index
      %64 = memref.load %arg1[%c0_80] : memref<294xf32, #tpu.memory_space<smem>>
      %65 = vector.extract_strided_slice %63 {offsets = [0, 0], sizes = [4, 16], strides = [1, 1]} : vector<10x16xf32> to vector<4x16xf32>
      %66 = vector.broadcast %64 : f32 to vector<4x16xf32>
      %67 = arith.mulf %66, %65 : vector<4x16xf32>
      %68 = arith.addf %61, %67 : vector<4x16xf32>
      %c7_81 = arith.constant 7 : index
      %69 = memref.load %arg1[%c7_81] : memref<294xf32, #tpu.memory_space<smem>>
      %70 = vector.extract_strided_slice %63 {offsets = [1, 0], sizes = [4, 16], strides = [1, 1]} : vector<10x16xf32> to vector<4x16xf32>
      %71 = vector.broadcast %69 : f32 to vector<4x16xf32>
      %72 = arith.mulf %71, %70 : vector<4x16xf32>
      %73 = arith.addf %68, %72 : vector<4x16xf32>
      %c14 = arith.constant 14 : index
      %74 = memref.load %arg1[%c14] : memref<294xf32, #tpu.memory_space<smem>>
      %75 = vector.extract_strided_slice %63 {offsets = [2, 0], sizes = [4, 16], strides = [1, 1]} : vector<10x16xf32> to vector<4x16xf32>
      %76 = vector.broadcast %74 : f32 to vector<4x16xf32>
      %77 = arith.mulf %76, %75 : vector<4x16xf32>
      %78 = arith.addf %73, %77 : vector<4x16xf32>
      %c21 = arith.constant 21 : index
      %79 = memref.load %arg1[%c21] : memref<294xf32, #tpu.memory_space<smem>>
      %80 = vector.extract_strided_slice %63 {offsets = [3, 0], sizes = [4, 16], strides = [1, 1]} : vector<10x16xf32> to vector<4x16xf32>
      %81 = vector.broadcast %79 : f32 to vector<4x16xf32>
      %82 = arith.mulf %81, %80 : vector<4x16xf32>
      %83 = arith.addf %78, %82 : vector<4x16xf32>
      %c28 = arith.constant 28 : index
      %84 = memref.load %arg1[%c28] : memref<294xf32, #tpu.memory_space<smem>>
      %85 = vector.extract_strided_slice %63 {offsets = [4, 0], sizes = [4, 16], strides = [1, 1]} : vector<10x16xf32> to vector<4x16xf32>
      %86 = vector.broadcast %84 : f32 to vector<4x16xf32>
      %87 = arith.mulf %86, %85 : vector<4x16xf32>
      %88 = arith.addf %83, %87 : vector<4x16xf32>
      %c35 = arith.constant 35 : index
      %89 = memref.load %arg1[%c35] : memref<294xf32, #tpu.memory_space<smem>>
      %90 = vector.extract_strided_slice %63 {offsets = [5, 0], sizes = [4, 16], strides = [1, 1]} : vector<10x16xf32> to vector<4x16xf32>
      %91 = vector.broadcast %89 : f32 to vector<4x16xf32>
      %92 = arith.mulf %91, %90 : vector<4x16xf32>
      %93 = arith.addf %88, %92 : vector<4x16xf32>
      %c42 = arith.constant 42 : index
      %94 = memref.load %arg1[%c42] : memref<294xf32, #tpu.memory_space<smem>>
      %95 = vector.extract_strided_slice %63 {offsets = [6, 0], sizes = [4, 16], strides = [1, 1]} : vector<10x16xf32> to vector<4x16xf32>
      %96 = vector.broadcast %94 : f32 to vector<4x16xf32>
      %97 = arith.mulf %96, %95 : vector<4x16xf32>
      %98 = arith.addf %93, %97 : vector<4x16xf32>
      %c0_82 = arith.constant 0 : index
      %c0_83 = arith.constant 0 : index
      %c1_84 = arith.constant 1 : index
      %99 = vector.load %arg5[%c0_82, %c0_83, %c1_84] : memref<2x10x22xf32, #tpu.memory_space<vmem>>, vector<1x10x16xf32>
      %100 = vector.shape_cast %99 : vector<1x10x16xf32> to vector<10x16xf32>
      %c1_85 = arith.constant 1 : index
      %101 = memref.load %arg1[%c1_85] : memref<294xf32, #tpu.memory_space<smem>>
      %102 = vector.extract_strided_slice %100 {offsets = [0, 0], sizes = [4, 16], strides = [1, 1]} : vector<10x16xf32> to vector<4x16xf32>
      %103 = vector.broadcast %101 : f32 to vector<4x16xf32>
      %104 = arith.mulf %103, %102 : vector<4x16xf32>
      %105 = arith.addf %98, %104 : vector<4x16xf32>
      %c8 = arith.constant 8 : index
      %106 = memref.load %arg1[%c8] : memref<294xf32, #tpu.memory_space<smem>>
      %107 = vector.extract_strided_slice %100 {offsets = [1, 0], sizes = [4, 16], strides = [1, 1]} : vector<10x16xf32> to vector<4x16xf32>
      %108 = vector.broadcast %106 : f32 to vector<4x16xf32>
      %109 = arith.mulf %108, %107 : vector<4x16xf32>
      %110 = arith.addf %105, %109 : vector<4x16xf32>
      %c15 = arith.constant 15 : index
      %111 = memref.load %arg1[%c15] : memref<294xf32, #tpu.memory_space<smem>>
      %112 = vector.extract_strided_slice %100 {offsets = [2, 0], sizes = [4, 16], strides = [1, 1]} : vector<10x16xf32> to vector<4x16xf32>
      %113 = vector.broadcast %111 : f32 to vector<4x16xf32>
      %114 = arith.mulf %113, %112 : vector<4x16xf32>
      %115 = arith.addf %110, %114 : vector<4x16xf32>
      %c22 = arith.constant 22 : index
      %116 = memref.load %arg1[%c22] : memref<294xf32, #tpu.memory_space<smem>>
      %117 = vector.extract_strided_slice %100 {offsets = [3, 0], sizes = [4, 16], strides = [1, 1]} : vector<10x16xf32> to vector<4x16xf32>
      %118 = vector.broadcast %116 : f32 to vector<4x16xf32>
      %119 = arith.mulf %118, %117 : vector<4x16xf32>
      %120 = arith.addf %115, %119 : vector<4x16xf32>
      %c29 = arith.constant 29 : index
      %121 = memref.load %arg1[%c29] : memref<294xf32, #tpu.memory_space<smem>>
      %122 = vector.extract_strided_slice %100 {offsets = [4, 0], sizes = [4, 16], strides = [1, 1]} : vector<10x16xf32> to vector<4x16xf32>
      %123 = vector.broadcast %121 : f32 to vector<4x16xf32>
      %124 = arith.mulf %123, %122 : vector<4x16xf32>
      %125 = arith.addf %120, %124 : vector<4x16xf32>
      %c36 = arith.constant 36 : index
      %126 = memref.load %arg1[%c36] : memref<294xf32, #tpu.memory_space<smem>>
      %127 = vector.extract_strided_slice %100 {offsets = [5, 0], sizes = [4, 16], strides = [1, 1]} : vector<10x16xf32> to vector<4x16xf32>
      %128 = vector.broadcast %126 : f32 to vector<4x16xf32>
      %129 = arith.mulf %128, %127 : vector<4x16xf32>
      %130 = arith.addf %125, %129 : vector<4x16xf32>
      %c43 = arith.constant 43 : index
      %131 = memref.load %arg1[%c43] : memref<294xf32, #tpu.memory_space<smem>>
      %132 = vector.extract_strided_slice %100 {offsets = [6, 0], sizes = [4, 16], strides = [1, 1]} : vector<10x16xf32> to vector<4x16xf32>
      %133 = vector.broadcast %131 : f32 to vector<4x16xf32>
      %134 = arith.mulf %133, %132 : vector<4x16xf32>
      %135 = arith.addf %130, %134 : vector<4x16xf32>
      %c0_86 = arith.constant 0 : index
      %c0_87 = arith.constant 0 : index
      %c2 = arith.constant 2 : index
      %136 = vector.load %arg5[%c0_86, %c0_87, %c2] : memref<2x10x22xf32, #tpu.memory_space<vmem>>, vector<1x10x16xf32>
      %137 = vector.shape_cast %136 : vector<1x10x16xf32> to vector<10x16xf32>
      %c2_88 = arith.constant 2 : index
      %138 = memref.load %arg1[%c2_88] : memref<294xf32, #tpu.memory_space<smem>>
      %139 = vector.extract_strided_slice %137 {offsets = [0, 0], sizes = [4, 16], strides = [1, 1]} : vector<10x16xf32> to vector<4x16xf32>
      %140 = vector.broadcast %138 : f32 to vector<4x16xf32>
      %141 = arith.mulf %140, %139 : vector<4x16xf32>
      %142 = arith.addf %135, %141 : vector<4x16xf32>
      %c9 = arith.constant 9 : index
      %143 = memref.load %arg1[%c9] : memref<294xf32, #tpu.memory_space<smem>>
      %144 = vector.extract_strided_slice %137 {offsets = [1, 0], sizes = [4, 16], strides = [1, 1]} : vector<10x16xf32> to vector<4x16xf32>
      %145 = vector.broadcast %143 : f32 to vector<4x16xf32>
      %146 = arith.mulf %145, %144 : vector<4x16xf32>
      %147 = arith.addf %142, %146 : vector<4x16xf32>
      %c16 = arith.constant 16 : index
      %148 = memref.load %arg1[%c16] : memref<294xf32, #tpu.memory_space<smem>>
      %149 = vector.extract_strided_slice %137 {offsets = [2, 0], sizes = [4, 16], strides = [1, 1]} : vector<10x16xf32> to vector<4x16xf32>
      %150 = vector.broadcast %148 : f32 to vector<4x16xf32>
      %151 = arith.mulf %150, %149 : vector<4x16xf32>
      %152 = arith.addf %147, %151 : vector<4x16xf32>
      %c23 = arith.constant 23 : index
      %153 = memref.load %arg1[%c23] : memref<294xf32, #tpu.memory_space<smem>>
      %154 = vector.extract_strided_slice %137 {offsets = [3, 0], sizes = [4, 16], strides = [1, 1]} : vector<10x16xf32> to vector<4x16xf32>
      %155 = vector.broadcast %153 : f32 to vector<4x16xf32>
      %156 = arith.mulf %155, %154 : vector<4x16xf32>
      %157 = arith.addf %152, %156 : vector<4x16xf32>
      %c30 = arith.constant 30 : index
      %158 = memref.load %arg1[%c30] : memref<294xf32, #tpu.memory_space<smem>>
      %159 = vector.extract_strided_slice %137 {offsets = [4, 0], sizes = [4, 16], strides = [1, 1]} : vector<10x16xf32> to vector<4x16xf32>
      %160 = vector.broadcast %158 : f32 to vector<4x16xf32>
      %161 = arith.mulf %160, %159 : vector<4x16xf32>
      %162 = arith.addf %157, %161 : vector<4x16xf32>
      %c37 = arith.constant 37 : index
      %163 = memref.load %arg1[%c37] : memref<294xf32, #tpu.memory_space<smem>>
      %164 = vector.extract_strided_slice %137 {offsets = [5, 0], sizes = [4, 16], strides = [1, 1]} : vector<10x16xf32> to vector<4x16xf32>
      %165 = vector.broadcast %163 : f32 to vector<4x16xf32>
      %166 = arith.mulf %165, %164 : vector<4x16xf32>
      %167 = arith.addf %162, %166 : vector<4x16xf32>
      %c44 = arith.constant 44 : index
      %168 = memref.load %arg1[%c44] : memref<294xf32, #tpu.memory_space<smem>>
      %169 = vector.extract_strided_slice %137 {offsets = [6, 0], sizes = [4, 16], strides = [1, 1]} : vector<10x16xf32> to vector<4x16xf32>
      %170 = vector.broadcast %168 : f32 to vector<4x16xf32>
      %171 = arith.mulf %170, %169 : vector<4x16xf32>
      %172 = arith.addf %167, %171 : vector<4x16xf32>
      %c0_89 = arith.constant 0 : index
      %c0_90 = arith.constant 0 : index
      %c3_91 = arith.constant 3 : index
      %173 = vector.load %arg5[%c0_89, %c0_90, %c3_91] : memref<2x10x22xf32, #tpu.memory_space<vmem>>, vector<1x10x16xf32>
      %174 = vector.shape_cast %173 : vector<1x10x16xf32> to vector<10x16xf32>
      %c3_92 = arith.constant 3 : index
      %175 = memref.load %arg1[%c3_92] : memref<294xf32, #tpu.memory_space<smem>>
      %176 = vector.extract_strided_slice %174 {offsets = [0, 0], sizes = [4, 16], strides = [1, 1]} : vector<10x16xf32> to vector<4x16xf32>
      %177 = vector.broadcast %175 : f32 to vector<4x16xf32>
      %178 = arith.mulf %177, %176 : vector<4x16xf32>
      %179 = arith.addf %172, %178 : vector<4x16xf32>
      %c10 = arith.constant 10 : index
      %180 = memref.load %arg1[%c10] : memref<294xf32, #tpu.memory_space<smem>>
      %181 = vector.extract_strided_slice %174 {offsets = [1, 0], sizes = [4, 16], strides = [1, 1]} : vector<10x16xf32> to vector<4x16xf32>
      %182 = vector.broadcast %180 : f32 to vector<4x16xf32>
      %183 = arith.mulf %182, %181 : vector<4x16xf32>
      %184 = arith.addf %179, %183 : vector<4x16xf32>
      %c17 = arith.constant 17 : index
      %185 = memref.load %arg1[%c17] : memref<294xf32, #tpu.memory_space<smem>>
      %186 = vector.extract_strided_slice %174 {offsets = [2, 0], sizes = [4, 16], strides = [1, 1]} : vector<10x16xf32> to vector<4x16xf32>
      %187 = vector.broadcast %185 : f32 to vector<4x16xf32>
      %188 = arith.mulf %187, %186 : vector<4x16xf32>
      %189 = arith.addf %184, %188 : vector<4x16xf32>
      %c24 = arith.constant 24 : index
      %190 = memref.load %arg1[%c24] : memref<294xf32, #tpu.memory_space<smem>>
      %191 = vector.extract_strided_slice %174 {offsets = [3, 0], sizes = [4, 16], strides = [1, 1]} : vector<10x16xf32> to vector<4x16xf32>
      %192 = vector.broadcast %190 : f32 to vector<4x16xf32>
      %193 = arith.mulf %192, %191 : vector<4x16xf32>
      %194 = arith.addf %189, %193 : vector<4x16xf32>
      %c31 = arith.constant 31 : index
      %195 = memref.load %arg1[%c31] : memref<294xf32, #tpu.memory_space<smem>>
      %196 = vector.extract_strided_slice %174 {offsets = [4, 0], sizes = [4, 16], strides = [1, 1]} : vector<10x16xf32> to vector<4x16xf32>
      %197 = vector.broadcast %195 : f32 to vector<4x16xf32>
      %198 = arith.mulf %197, %196 : vector<4x16xf32>
      %199 = arith.addf %194, %198 : vector<4x16xf32>
      %c38 = arith.constant 38 : index
      %200 = memref.load %arg1[%c38] : memref<294xf32, #tpu.memory_space<smem>>
      %201 = vector.extract_strided_slice %174 {offsets = [5, 0], sizes = [4, 16], strides = [1, 1]} : vector<10x16xf32> to vector<4x16xf32>
      %202 = vector.broadcast %200 : f32 to vector<4x16xf32>
      %203 = arith.mulf %202, %201 : vector<4x16xf32>
      %204 = arith.addf %199, %203 : vector<4x16xf32>
      %c45 = arith.constant 45 : index
      %205 = memref.load %arg1[%c45] : memref<294xf32, #tpu.memory_space<smem>>
      %206 = vector.extract_strided_slice %174 {offsets = [6, 0], sizes = [4, 16], strides = [1, 1]} : vector<10x16xf32> to vector<4x16xf32>
      %207 = vector.broadcast %205 : f32 to vector<4x16xf32>
      %208 = arith.mulf %207, %206 : vector<4x16xf32>
      %209 = arith.addf %204, %208 : vector<4x16xf32>
      %c0_93 = arith.constant 0 : index
      %c0_94 = arith.constant 0 : index
      %c4 = arith.constant 4 : index
      %210 = vector.load %arg5[%c0_93, %c0_94, %c4] : memref<2x10x22xf32, #tpu.memory_space<vmem>>, vector<1x10x16xf32>
      %211 = vector.shape_cast %210 : vector<1x10x16xf32> to vector<10x16xf32>
      %c4_95 = arith.constant 4 : index
      %212 = memref.load %arg1[%c4_95] : memref<294xf32, #tpu.memory_space<smem>>
      %213 = vector.extract_strided_slice %211 {offsets = [0, 0], sizes = [4, 16], strides = [1, 1]} : vector<10x16xf32> to vector<4x16xf32>
      %214 = vector.broadcast %212 : f32 to vector<4x16xf32>
      %215 = arith.mulf %214, %213 : vector<4x16xf32>
      %216 = arith.addf %209, %215 : vector<4x16xf32>
      %c11 = arith.constant 11 : index
      %217 = memref.load %arg1[%c11] : memref<294xf32, #tpu.memory_space<smem>>
      %218 = vector.extract_strided_slice %211 {offsets = [1, 0], sizes = [4, 16], strides = [1, 1]} : vector<10x16xf32> to vector<4x16xf32>
      %219 = vector.broadcast %217 : f32 to vector<4x16xf32>
      %220 = arith.mulf %219, %218 : vector<4x16xf32>
      %221 = arith.addf %216, %220 : vector<4x16xf32>
      %c18 = arith.constant 18 : index
      %222 = memref.load %arg1[%c18] : memref<294xf32, #tpu.memory_space<smem>>
      %223 = vector.extract_strided_slice %211 {offsets = [2, 0], sizes = [4, 16], strides = [1, 1]} : vector<10x16xf32> to vector<4x16xf32>
      %224 = vector.broadcast %222 : f32 to vector<4x16xf32>
      %225 = arith.mulf %224, %223 : vector<4x16xf32>
      %226 = arith.addf %221, %225 : vector<4x16xf32>
      %c25 = arith.constant 25 : index
      %227 = memref.load %arg1[%c25] : memref<294xf32, #tpu.memory_space<smem>>
      %228 = vector.extract_strided_slice %211 {offsets = [3, 0], sizes = [4, 16], strides = [1, 1]} : vector<10x16xf32> to vector<4x16xf32>
      %229 = vector.broadcast %227 : f32 to vector<4x16xf32>
      %230 = arith.mulf %229, %228 : vector<4x16xf32>
      %231 = arith.addf %226, %230 : vector<4x16xf32>
      %c32 = arith.constant 32 : index
      %232 = memref.load %arg1[%c32] : memref<294xf32, #tpu.memory_space<smem>>
      %233 = vector.extract_strided_slice %211 {offsets = [4, 0], sizes = [4, 16], strides = [1, 1]} : vector<10x16xf32> to vector<4x16xf32>
      %234 = vector.broadcast %232 : f32 to vector<4x16xf32>
      %235 = arith.mulf %234, %233 : vector<4x16xf32>
      %236 = arith.addf %231, %235 : vector<4x16xf32>
      %c39 = arith.constant 39 : index
      %237 = memref.load %arg1[%c39] : memref<294xf32, #tpu.memory_space<smem>>
      %238 = vector.extract_strided_slice %211 {offsets = [5, 0], sizes = [4, 16], strides = [1, 1]} : vector<10x16xf32> to vector<4x16xf32>
      %239 = vector.broadcast %237 : f32 to vector<4x16xf32>
      %240 = arith.mulf %239, %238 : vector<4x16xf32>
      %241 = arith.addf %236, %240 : vector<4x16xf32>
      %c46 = arith.constant 46 : index
      %242 = memref.load %arg1[%c46] : memref<294xf32, #tpu.memory_space<smem>>
      %243 = vector.extract_strided_slice %211 {offsets = [6, 0], sizes = [4, 16], strides = [1, 1]} : vector<10x16xf32> to vector<4x16xf32>
      %244 = vector.broadcast %242 : f32 to vector<4x16xf32>
      %245 = arith.mulf %244, %243 : vector<4x16xf32>
      %246 = arith.addf %241, %245 : vector<4x16xf32>
      %c0_96 = arith.constant 0 : index
      %c0_97 = arith.constant 0 : index
      %c5 = arith.constant 5 : index
      %247 = vector.load %arg5[%c0_96, %c0_97, %c5] : memref<2x10x22xf32, #tpu.memory_space<vmem>>, vector<1x10x16xf32>
      %248 = vector.shape_cast %247 : vector<1x10x16xf32> to vector<10x16xf32>
      %c5_98 = arith.constant 5 : index
      %249 = memref.load %arg1[%c5_98] : memref<294xf32, #tpu.memory_space<smem>>
      %250 = vector.extract_strided_slice %248 {offsets = [0, 0], sizes = [4, 16], strides = [1, 1]} : vector<10x16xf32> to vector<4x16xf32>
      %251 = vector.broadcast %249 : f32 to vector<4x16xf32>
      %252 = arith.mulf %251, %250 : vector<4x16xf32>
      %253 = arith.addf %246, %252 : vector<4x16xf32>
      %c12 = arith.constant 12 : index
      %254 = memref.load %arg1[%c12] : memref<294xf32, #tpu.memory_space<smem>>
      %255 = vector.extract_strided_slice %248 {offsets = [1, 0], sizes = [4, 16], strides = [1, 1]} : vector<10x16xf32> to vector<4x16xf32>
      %256 = vector.broadcast %254 : f32 to vector<4x16xf32>
      %257 = arith.mulf %256, %255 : vector<4x16xf32>
      %258 = arith.addf %253, %257 : vector<4x16xf32>
      %c19_99 = arith.constant 19 : index
      %259 = memref.load %arg1[%c19_99] : memref<294xf32, #tpu.memory_space<smem>>
      %260 = vector.extract_strided_slice %248 {offsets = [2, 0], sizes = [4, 16], strides = [1, 1]} : vector<10x16xf32> to vector<4x16xf32>
      %261 = vector.broadcast %259 : f32 to vector<4x16xf32>
      %262 = arith.mulf %261, %260 : vector<4x16xf32>
      %263 = arith.addf %258, %262 : vector<4x16xf32>
      %c26 = arith.constant 26 : index
      %264 = memref.load %arg1[%c26] : memref<294xf32, #tpu.memory_space<smem>>
      %265 = vector.extract_strided_slice %248 {offsets = [3, 0], sizes = [4, 16], strides = [1, 1]} : vector<10x16xf32> to vector<4x16xf32>
      %266 = vector.broadcast %264 : f32 to vector<4x16xf32>
      %267 = arith.mulf %266, %265 : vector<4x16xf32>
      %268 = arith.addf %263, %267 : vector<4x16xf32>
      %c33 = arith.constant 33 : index
      %269 = memref.load %arg1[%c33] : memref<294xf32, #tpu.memory_space<smem>>
      %270 = vector.extract_strided_slice %248 {offsets = [4, 0], sizes = [4, 16], strides = [1, 1]} : vector<10x16xf32> to vector<4x16xf32>
      %271 = vector.broadcast %269 : f32 to vector<4x16xf32>
      %272 = arith.mulf %271, %270 : vector<4x16xf32>
      %273 = arith.addf %268, %272 : vector<4x16xf32>
      %c40 = arith.constant 40 : index
      %274 = memref.load %arg1[%c40] : memref<294xf32, #tpu.memory_space<smem>>
      %275 = vector.extract_strided_slice %248 {offsets = [5, 0], sizes = [4, 16], strides = [1, 1]} : vector<10x16xf32> to vector<4x16xf32>
      %276 = vector.broadcast %274 : f32 to vector<4x16xf32>
      %277 = arith.mulf %276, %275 : vector<4x16xf32>
      %278 = arith.addf %273, %277 : vector<4x16xf32>
      %c47 = arith.constant 47 : index
      %279 = memref.load %arg1[%c47] : memref<294xf32, #tpu.memory_space<smem>>
      %280 = vector.extract_strided_slice %248 {offsets = [6, 0], sizes = [4, 16], strides = [1, 1]} : vector<10x16xf32> to vector<4x16xf32>
      %281 = vector.broadcast %279 : f32 to vector<4x16xf32>
      %282 = arith.mulf %281, %280 : vector<4x16xf32>
      %283 = arith.addf %278, %282 : vector<4x16xf32>
      %c0_100 = arith.constant 0 : index
      %c0_101 = arith.constant 0 : index
      %c6 = arith.constant 6 : index
      %284 = vector.load %arg5[%c0_100, %c0_101, %c6] : memref<2x10x22xf32, #tpu.memory_space<vmem>>, vector<1x10x16xf32>
      %285 = vector.shape_cast %284 : vector<1x10x16xf32> to vector<10x16xf32>
      %c6_102 = arith.constant 6 : index
      %286 = memref.load %arg1[%c6_102] : memref<294xf32, #tpu.memory_space<smem>>
      %287 = vector.extract_strided_slice %285 {offsets = [0, 0], sizes = [4, 16], strides = [1, 1]} : vector<10x16xf32> to vector<4x16xf32>
      %288 = vector.broadcast %286 : f32 to vector<4x16xf32>
      %289 = arith.mulf %288, %287 : vector<4x16xf32>
      %290 = arith.addf %283, %289 : vector<4x16xf32>
      %c13 = arith.constant 13 : index
      %291 = memref.load %arg1[%c13] : memref<294xf32, #tpu.memory_space<smem>>
      %292 = vector.extract_strided_slice %285 {offsets = [1, 0], sizes = [4, 16], strides = [1, 1]} : vector<10x16xf32> to vector<4x16xf32>
      %293 = vector.broadcast %291 : f32 to vector<4x16xf32>
      %294 = arith.mulf %293, %292 : vector<4x16xf32>
      %295 = arith.addf %290, %294 : vector<4x16xf32>
      %c20 = arith.constant 20 : index
      %296 = memref.load %arg1[%c20] : memref<294xf32, #tpu.memory_space<smem>>
      %297 = vector.extract_strided_slice %285 {offsets = [2, 0], sizes = [4, 16], strides = [1, 1]} : vector<10x16xf32> to vector<4x16xf32>
      %298 = vector.broadcast %296 : f32 to vector<4x16xf32>
      %299 = arith.mulf %298, %297 : vector<4x16xf32>
      %300 = arith.addf %295, %299 : vector<4x16xf32>
      %c27 = arith.constant 27 : index
      %301 = memref.load %arg1[%c27] : memref<294xf32, #tpu.memory_space<smem>>
      %302 = vector.extract_strided_slice %285 {offsets = [3, 0], sizes = [4, 16], strides = [1, 1]} : vector<10x16xf32> to vector<4x16xf32>
      %303 = vector.broadcast %301 : f32 to vector<4x16xf32>
      %304 = arith.mulf %303, %302 : vector<4x16xf32>
      %305 = arith.addf %300, %304 : vector<4x16xf32>
      %c34 = arith.constant 34 : index
      %306 = memref.load %arg1[%c34] : memref<294xf32, #tpu.memory_space<smem>>
      %307 = vector.extract_strided_slice %285 {offsets = [4, 0], sizes = [4, 16], strides = [1, 1]} : vector<10x16xf32> to vector<4x16xf32>
      %308 = vector.broadcast %306 : f32 to vector<4x16xf32>
      %309 = arith.mulf %308, %307 : vector<4x16xf32>
      %310 = arith.addf %305, %309 : vector<4x16xf32>
      %c41 = arith.constant 41 : index
      %311 = memref.load %arg1[%c41] : memref<294xf32, #tpu.memory_space<smem>>
      %312 = vector.extract_strided_slice %285 {offsets = [5, 0], sizes = [4, 16], strides = [1, 1]} : vector<10x16xf32> to vector<4x16xf32>
      %313 = vector.broadcast %311 : f32 to vector<4x16xf32>
      %314 = arith.mulf %313, %312 : vector<4x16xf32>
      %315 = arith.addf %310, %314 : vector<4x16xf32>
      %c48 = arith.constant 48 : index
      %316 = memref.load %arg1[%c48] : memref<294xf32, #tpu.memory_space<smem>>
      %317 = vector.extract_strided_slice %285 {offsets = [6, 0], sizes = [4, 16], strides = [1, 1]} : vector<10x16xf32> to vector<4x16xf32>
      %318 = vector.broadcast %316 : f32 to vector<4x16xf32>
      %319 = arith.mulf %318, %317 : vector<4x16xf32>
      %320 = arith.addf %315, %319 : vector<4x16xf32>
      %c1_103 = arith.constant 1 : index
      %c0_104 = arith.constant 0 : index
      %c0_105 = arith.constant 0 : index
      %321 = vector.load %arg5[%c1_103, %c0_104, %c0_105] : memref<2x10x22xf32, #tpu.memory_space<vmem>>, vector<1x10x16xf32>
      %322 = vector.shape_cast %321 : vector<1x10x16xf32> to vector<10x16xf32>
      %c49 = arith.constant 49 : index
      %323 = memref.load %arg1[%c49] : memref<294xf32, #tpu.memory_space<smem>>
      %324 = vector.extract_strided_slice %322 {offsets = [0, 0], sizes = [4, 16], strides = [1, 1]} : vector<10x16xf32> to vector<4x16xf32>
      %325 = vector.broadcast %323 : f32 to vector<4x16xf32>
      %326 = arith.mulf %325, %324 : vector<4x16xf32>
      %327 = arith.addf %320, %326 : vector<4x16xf32>
      %c56 = arith.constant 56 : index
      %328 = memref.load %arg1[%c56] : memref<294xf32, #tpu.memory_space<smem>>
      %329 = vector.extract_strided_slice %322 {offsets = [1, 0], sizes = [4, 16], strides = [1, 1]} : vector<10x16xf32> to vector<4x16xf32>
      %330 = vector.broadcast %328 : f32 to vector<4x16xf32>
      %331 = arith.mulf %330, %329 : vector<4x16xf32>
      %332 = arith.addf %327, %331 : vector<4x16xf32>
      %c63 = arith.constant 63 : index
      %333 = memref.load %arg1[%c63] : memref<294xf32, #tpu.memory_space<smem>>
      %334 = vector.extract_strided_slice %322 {offsets = [2, 0], sizes = [4, 16], strides = [1, 1]} : vector<10x16xf32> to vector<4x16xf32>
      %335 = vector.broadcast %333 : f32 to vector<4x16xf32>
      %336 = arith.mulf %335, %334 : vector<4x16xf32>
      %337 = arith.addf %332, %336 : vector<4x16xf32>
      %c70 = arith.constant 70 : index
      %338 = memref.load %arg1[%c70] : memref<294xf32, #tpu.memory_space<smem>>
      %339 = vector.extract_strided_slice %322 {offsets = [3, 0], sizes = [4, 16], strides = [1, 1]} : vector<10x16xf32> to vector<4x16xf32>
      %340 = vector.broadcast %338 : f32 to vector<4x16xf32>
      %341 = arith.mulf %340, %339 : vector<4x16xf32>
      %342 = arith.addf %337, %341 : vector<4x16xf32>
      %c77 = arith.constant 77 : index
      %343 = memref.load %arg1[%c77] : memref<294xf32, #tpu.memory_space<smem>>
      %344 = vector.extract_strided_slice %322 {offsets = [4, 0], sizes = [4, 16], strides = [1, 1]} : vector<10x16xf32> to vector<4x16xf32>
      %345 = vector.broadcast %343 : f32 to vector<4x16xf32>
      %346 = arith.mulf %345, %344 : vector<4x16xf32>
      %347 = arith.addf %342, %346 : vector<4x16xf32>
      %c84 = arith.constant 84 : index
      %348 = memref.load %arg1[%c84] : memref<294xf32, #tpu.memory_space<smem>>
      %349 = vector.extract_strided_slice %322 {offsets = [5, 0], sizes = [4, 16], strides = [1, 1]} : vector<10x16xf32> to vector<4x16xf32>
      %350 = vector.broadcast %348 : f32 to vector<4x16xf32>
      %351 = arith.mulf %350, %349 : vector<4x16xf32>
      %352 = arith.addf %347, %351 : vector<4x16xf32>
      %c91 = arith.constant 91 : index
      %353 = memref.load %arg1[%c91] : memref<294xf32, #tpu.memory_space<smem>>
      %354 = vector.extract_strided_slice %322 {offsets = [6, 0], sizes = [4, 16], strides = [1, 1]} : vector<10x16xf32> to vector<4x16xf32>
      %355 = vector.broadcast %353 : f32 to vector<4x16xf32>
      %356 = arith.mulf %355, %354 : vector<4x16xf32>
      %357 = arith.addf %352, %356 : vector<4x16xf32>
      %c1_106 = arith.constant 1 : index
      %c0_107 = arith.constant 0 : index
      %c1_108 = arith.constant 1 : index
      %358 = vector.load %arg5[%c1_106, %c0_107, %c1_108] : memref<2x10x22xf32, #tpu.memory_space<vmem>>, vector<1x10x16xf32>
      %359 = vector.shape_cast %358 : vector<1x10x16xf32> to vector<10x16xf32>
      %c50 = arith.constant 50 : index
      %360 = memref.load %arg1[%c50] : memref<294xf32, #tpu.memory_space<smem>>
      %361 = vector.extract_strided_slice %359 {offsets = [0, 0], sizes = [4, 16], strides = [1, 1]} : vector<10x16xf32> to vector<4x16xf32>
      %362 = vector.broadcast %360 : f32 to vector<4x16xf32>
      %363 = arith.mulf %362, %361 : vector<4x16xf32>
      %364 = arith.addf %357, %363 : vector<4x16xf32>
      %c57 = arith.constant 57 : index
      %365 = memref.load %arg1[%c57] : memref<294xf32, #tpu.memory_space<smem>>
      %366 = vector.extract_strided_slice %359 {offsets = [1, 0], sizes = [4, 16], strides = [1, 1]} : vector<10x16xf32> to vector<4x16xf32>
      %367 = vector.broadcast %365 : f32 to vector<4x16xf32>
      %368 = arith.mulf %367, %366 : vector<4x16xf32>
      %369 = arith.addf %364, %368 : vector<4x16xf32>
      %c64 = arith.constant 64 : index
      %370 = memref.load %arg1[%c64] : memref<294xf32, #tpu.memory_space<smem>>
      %371 = vector.extract_strided_slice %359 {offsets = [2, 0], sizes = [4, 16], strides = [1, 1]} : vector<10x16xf32> to vector<4x16xf32>
      %372 = vector.broadcast %370 : f32 to vector<4x16xf32>
      %373 = arith.mulf %372, %371 : vector<4x16xf32>
      %374 = arith.addf %369, %373 : vector<4x16xf32>
      %c71 = arith.constant 71 : index
      %375 = memref.load %arg1[%c71] : memref<294xf32, #tpu.memory_space<smem>>
      %376 = vector.extract_strided_slice %359 {offsets = [3, 0], sizes = [4, 16], strides = [1, 1]} : vector<10x16xf32> to vector<4x16xf32>
      %377 = vector.broadcast %375 : f32 to vector<4x16xf32>
      %378 = arith.mulf %377, %376 : vector<4x16xf32>
      %379 = arith.addf %374, %378 : vector<4x16xf32>
      %c78 = arith.constant 78 : index
      %380 = memref.load %arg1[%c78] : memref<294xf32, #tpu.memory_space<smem>>
      %381 = vector.extract_strided_slice %359 {offsets = [4, 0], sizes = [4, 16], strides = [1, 1]} : vector<10x16xf32> to vector<4x16xf32>
      %382 = vector.broadcast %380 : f32 to vector<4x16xf32>
      %383 = arith.mulf %382, %381 : vector<4x16xf32>
      %384 = arith.addf %379, %383 : vector<4x16xf32>
      %c85 = arith.constant 85 : index
      %385 = memref.load %arg1[%c85] : memref<294xf32, #tpu.memory_space<smem>>
      %386 = vector.extract_strided_slice %359 {offsets = [5, 0], sizes = [4, 16], strides = [1, 1]} : vector<10x16xf32> to vector<4x16xf32>
      %387 = vector.broadcast %385 : f32 to vector<4x16xf32>
      %388 = arith.mulf %387, %386 : vector<4x16xf32>
      %389 = arith.addf %384, %388 : vector<4x16xf32>
      %c92 = arith.constant 92 : index
      %390 = memref.load %arg1[%c92] : memref<294xf32, #tpu.memory_space<smem>>
      %391 = vector.extract_strided_slice %359 {offsets = [6, 0], sizes = [4, 16], strides = [1, 1]} : vector<10x16xf32> to vector<4x16xf32>
      %392 = vector.broadcast %390 : f32 to vector<4x16xf32>
      %393 = arith.mulf %392, %391 : vector<4x16xf32>
      %394 = arith.addf %389, %393 : vector<4x16xf32>
      %c1_109 = arith.constant 1 : index
      %c0_110 = arith.constant 0 : index
      %c2_111 = arith.constant 2 : index
      %395 = vector.load %arg5[%c1_109, %c0_110, %c2_111] : memref<2x10x22xf32, #tpu.memory_space<vmem>>, vector<1x10x16xf32>
      %396 = vector.shape_cast %395 : vector<1x10x16xf32> to vector<10x16xf32>
      %c51 = arith.constant 51 : index
      %397 = memref.load %arg1[%c51] : memref<294xf32, #tpu.memory_space<smem>>
      %398 = vector.extract_strided_slice %396 {offsets = [0, 0], sizes = [4, 16], strides = [1, 1]} : vector<10x16xf32> to vector<4x16xf32>
      %399 = vector.broadcast %397 : f32 to vector<4x16xf32>
      %400 = arith.mulf %399, %398 : vector<4x16xf32>
      %401 = arith.addf %394, %400 : vector<4x16xf32>
      %c58 = arith.constant 58 : index
      %402 = memref.load %arg1[%c58] : memref<294xf32, #tpu.memory_space<smem>>
      %403 = vector.extract_strided_slice %396 {offsets = [1, 0], sizes = [4, 16], strides = [1, 1]} : vector<10x16xf32> to vector<4x16xf32>
      %404 = vector.broadcast %402 : f32 to vector<4x16xf32>
      %405 = arith.mulf %404, %403 : vector<4x16xf32>
      %406 = arith.addf %401, %405 : vector<4x16xf32>
      %c65 = arith.constant 65 : index
      %407 = memref.load %arg1[%c65] : memref<294xf32, #tpu.memory_space<smem>>
      %408 = vector.extract_strided_slice %396 {offsets = [2, 0], sizes = [4, 16], strides = [1, 1]} : vector<10x16xf32> to vector<4x16xf32>
      %409 = vector.broadcast %407 : f32 to vector<4x16xf32>
      %410 = arith.mulf %409, %408 : vector<4x16xf32>
      %411 = arith.addf %406, %410 : vector<4x16xf32>
      %c72 = arith.constant 72 : index
      %412 = memref.load %arg1[%c72] : memref<294xf32, #tpu.memory_space<smem>>
      %413 = vector.extract_strided_slice %396 {offsets = [3, 0], sizes = [4, 16], strides = [1, 1]} : vector<10x16xf32> to vector<4x16xf32>
      %414 = vector.broadcast %412 : f32 to vector<4x16xf32>
      %415 = arith.mulf %414, %413 : vector<4x16xf32>
      %416 = arith.addf %411, %415 : vector<4x16xf32>
      %c79 = arith.constant 79 : index
      %417 = memref.load %arg1[%c79] : memref<294xf32, #tpu.memory_space<smem>>
      %418 = vector.extract_strided_slice %396 {offsets = [4, 0], sizes = [4, 16], strides = [1, 1]} : vector<10x16xf32> to vector<4x16xf32>
      %419 = vector.broadcast %417 : f32 to vector<4x16xf32>
      %420 = arith.mulf %419, %418 : vector<4x16xf32>
      %421 = arith.addf %416, %420 : vector<4x16xf32>
      %c86 = arith.constant 86 : index
      %422 = memref.load %arg1[%c86] : memref<294xf32, #tpu.memory_space<smem>>
      %423 = vector.extract_strided_slice %396 {offsets = [5, 0], sizes = [4, 16], strides = [1, 1]} : vector<10x16xf32> to vector<4x16xf32>
      %424 = vector.broadcast %422 : f32 to vector<4x16xf32>
      %425 = arith.mulf %424, %423 : vector<4x16xf32>
      %426 = arith.addf %421, %425 : vector<4x16xf32>
      %c93 = arith.constant 93 : index
      %427 = memref.load %arg1[%c93] : memref<294xf32, #tpu.memory_space<smem>>
      %428 = vector.extract_strided_slice %396 {offsets = [6, 0], sizes = [4, 16], strides = [1, 1]} : vector<10x16xf32> to vector<4x16xf32>
      %429 = vector.broadcast %427 : f32 to vector<4x16xf32>
      %430 = arith.mulf %429, %428 : vector<4x16xf32>
      %431 = arith.addf %426, %430 : vector<4x16xf32>
      %c1_112 = arith.constant 1 : index
      %c0_113 = arith.constant 0 : index
      %c3_114 = arith.constant 3 : index
      %432 = vector.load %arg5[%c1_112, %c0_113, %c3_114] : memref<2x10x22xf32, #tpu.memory_space<vmem>>, vector<1x10x16xf32>
      %433 = vector.shape_cast %432 : vector<1x10x16xf32> to vector<10x16xf32>
      %c52 = arith.constant 52 : index
      %434 = memref.load %arg1[%c52] : memref<294xf32, #tpu.memory_space<smem>>
      %435 = vector.extract_strided_slice %433 {offsets = [0, 0], sizes = [4, 16], strides = [1, 1]} : vector<10x16xf32> to vector<4x16xf32>
      %436 = vector.broadcast %434 : f32 to vector<4x16xf32>
      %437 = arith.mulf %436, %435 : vector<4x16xf32>
      %438 = arith.addf %431, %437 : vector<4x16xf32>
      %c59 = arith.constant 59 : index
      %439 = memref.load %arg1[%c59] : memref<294xf32, #tpu.memory_space<smem>>
      %440 = vector.extract_strided_slice %433 {offsets = [1, 0], sizes = [4, 16], strides = [1, 1]} : vector<10x16xf32> to vector<4x16xf32>
      %441 = vector.broadcast %439 : f32 to vector<4x16xf32>
      %442 = arith.mulf %441, %440 : vector<4x16xf32>
      %443 = arith.addf %438, %442 : vector<4x16xf32>
      %c66 = arith.constant 66 : index
      %444 = memref.load %arg1[%c66] : memref<294xf32, #tpu.memory_space<smem>>
      %445 = vector.extract_strided_slice %433 {offsets = [2, 0], sizes = [4, 16], strides = [1, 1]} : vector<10x16xf32> to vector<4x16xf32>
      %446 = vector.broadcast %444 : f32 to vector<4x16xf32>
      %447 = arith.mulf %446, %445 : vector<4x16xf32>
      %448 = arith.addf %443, %447 : vector<4x16xf32>
      %c73 = arith.constant 73 : index
      %449 = memref.load %arg1[%c73] : memref<294xf32, #tpu.memory_space<smem>>
      %450 = vector.extract_strided_slice %433 {offsets = [3, 0], sizes = [4, 16], strides = [1, 1]} : vector<10x16xf32> to vector<4x16xf32>
      %451 = vector.broadcast %449 : f32 to vector<4x16xf32>
      %452 = arith.mulf %451, %450 : vector<4x16xf32>
      %453 = arith.addf %448, %452 : vector<4x16xf32>
      %c80 = arith.constant 80 : index
      %454 = memref.load %arg1[%c80] : memref<294xf32, #tpu.memory_space<smem>>
      %455 = vector.extract_strided_slice %433 {offsets = [4, 0], sizes = [4, 16], strides = [1, 1]} : vector<10x16xf32> to vector<4x16xf32>
      %456 = vector.broadcast %454 : f32 to vector<4x16xf32>
      %457 = arith.mulf %456, %455 : vector<4x16xf32>
      %458 = arith.addf %453, %457 : vector<4x16xf32>
      %c87 = arith.constant 87 : index
      %459 = memref.load %arg1[%c87] : memref<294xf32, #tpu.memory_space<smem>>
      %460 = vector.extract_strided_slice %433 {offsets = [5, 0], sizes = [4, 16], strides = [1, 1]} : vector<10x16xf32> to vector<4x16xf32>
      %461 = vector.broadcast %459 : f32 to vector<4x16xf32>
      %462 = arith.mulf %461, %460 : vector<4x16xf32>
      %463 = arith.addf %458, %462 : vector<4x16xf32>
      %c94 = arith.constant 94 : index
      %464 = memref.load %arg1[%c94] : memref<294xf32, #tpu.memory_space<smem>>
      %465 = vector.extract_strided_slice %433 {offsets = [6, 0], sizes = [4, 16], strides = [1, 1]} : vector<10x16xf32> to vector<4x16xf32>
      %466 = vector.broadcast %464 : f32 to vector<4x16xf32>
      %467 = arith.mulf %466, %465 : vector<4x16xf32>
      %468 = arith.addf %463, %467 : vector<4x16xf32>
      %c1_115 = arith.constant 1 : index
      %c0_116 = arith.constant 0 : index
      %c4_117 = arith.constant 4 : index
      %469 = vector.load %arg5[%c1_115, %c0_116, %c4_117] : memref<2x10x22xf32, #tpu.memory_space<vmem>>, vector<1x10x16xf32>
      %470 = vector.shape_cast %469 : vector<1x10x16xf32> to vector<10x16xf32>
      %c53 = arith.constant 53 : index
      %471 = memref.load %arg1[%c53] : memref<294xf32, #tpu.memory_space<smem>>
      %472 = vector.extract_strided_slice %470 {offsets = [0, 0], sizes = [4, 16], strides = [1, 1]} : vector<10x16xf32> to vector<4x16xf32>
      %473 = vector.broadcast %471 : f32 to vector<4x16xf32>
      %474 = arith.mulf %473, %472 : vector<4x16xf32>
      %475 = arith.addf %468, %474 : vector<4x16xf32>
      %c60 = arith.constant 60 : index
      %476 = memref.load %arg1[%c60] : memref<294xf32, #tpu.memory_space<smem>>
      %477 = vector.extract_strided_slice %470 {offsets = [1, 0], sizes = [4, 16], strides = [1, 1]} : vector<10x16xf32> to vector<4x16xf32>
      %478 = vector.broadcast %476 : f32 to vector<4x16xf32>
      %479 = arith.mulf %478, %477 : vector<4x16xf32>
      %480 = arith.addf %475, %479 : vector<4x16xf32>
      %c67 = arith.constant 67 : index
      %481 = memref.load %arg1[%c67] : memref<294xf32, #tpu.memory_space<smem>>
      %482 = vector.extract_strided_slice %470 {offsets = [2, 0], sizes = [4, 16], strides = [1, 1]} : vector<10x16xf32> to vector<4x16xf32>
      %483 = vector.broadcast %481 : f32 to vector<4x16xf32>
      %484 = arith.mulf %483, %482 : vector<4x16xf32>
      %485 = arith.addf %480, %484 : vector<4x16xf32>
      %c74 = arith.constant 74 : index
      %486 = memref.load %arg1[%c74] : memref<294xf32, #tpu.memory_space<smem>>
      %487 = vector.extract_strided_slice %470 {offsets = [3, 0], sizes = [4, 16], strides = [1, 1]} : vector<10x16xf32> to vector<4x16xf32>
      %488 = vector.broadcast %486 : f32 to vector<4x16xf32>
      %489 = arith.mulf %488, %487 : vector<4x16xf32>
      %490 = arith.addf %485, %489 : vector<4x16xf32>
      %c81 = arith.constant 81 : index
      %491 = memref.load %arg1[%c81] : memref<294xf32, #tpu.memory_space<smem>>
      %492 = vector.extract_strided_slice %470 {offsets = [4, 0], sizes = [4, 16], strides = [1, 1]} : vector<10x16xf32> to vector<4x16xf32>
      %493 = vector.broadcast %491 : f32 to vector<4x16xf32>
      %494 = arith.mulf %493, %492 : vector<4x16xf32>
      %495 = arith.addf %490, %494 : vector<4x16xf32>
      %c88 = arith.constant 88 : index
      %496 = memref.load %arg1[%c88] : memref<294xf32, #tpu.memory_space<smem>>
      %497 = vector.extract_strided_slice %470 {offsets = [5, 0], sizes = [4, 16], strides = [1, 1]} : vector<10x16xf32> to vector<4x16xf32>
      %498 = vector.broadcast %496 : f32 to vector<4x16xf32>
      %499 = arith.mulf %498, %497 : vector<4x16xf32>
      %500 = arith.addf %495, %499 : vector<4x16xf32>
      %c95 = arith.constant 95 : index
      %501 = memref.load %arg1[%c95] : memref<294xf32, #tpu.memory_space<smem>>
      %502 = vector.extract_strided_slice %470 {offsets = [6, 0], sizes = [4, 16], strides = [1, 1]} : vector<10x16xf32> to vector<4x16xf32>
      %503 = vector.broadcast %501 : f32 to vector<4x16xf32>
      %504 = arith.mulf %503, %502 : vector<4x16xf32>
      %505 = arith.addf %500, %504 : vector<4x16xf32>
      %c1_118 = arith.constant 1 : index
      %c0_119 = arith.constant 0 : index
      %c5_120 = arith.constant 5 : index
      %506 = vector.load %arg5[%c1_118, %c0_119, %c5_120] : memref<2x10x22xf32, #tpu.memory_space<vmem>>, vector<1x10x16xf32>
      %507 = vector.shape_cast %506 : vector<1x10x16xf32> to vector<10x16xf32>
      %c54 = arith.constant 54 : index
      %508 = memref.load %arg1[%c54] : memref<294xf32, #tpu.memory_space<smem>>
      %509 = vector.extract_strided_slice %507 {offsets = [0, 0], sizes = [4, 16], strides = [1, 1]} : vector<10x16xf32> to vector<4x16xf32>
      %510 = vector.broadcast %508 : f32 to vector<4x16xf32>
      %511 = arith.mulf %510, %509 : vector<4x16xf32>
      %512 = arith.addf %505, %511 : vector<4x16xf32>
      %c61 = arith.constant 61 : index
      %513 = memref.load %arg1[%c61] : memref<294xf32, #tpu.memory_space<smem>>
      %514 = vector.extract_strided_slice %507 {offsets = [1, 0], sizes = [4, 16], strides = [1, 1]} : vector<10x16xf32> to vector<4x16xf32>
      %515 = vector.broadcast %513 : f32 to vector<4x16xf32>
      %516 = arith.mulf %515, %514 : vector<4x16xf32>
      %517 = arith.addf %512, %516 : vector<4x16xf32>
      %c68 = arith.constant 68 : index
      %518 = memref.load %arg1[%c68] : memref<294xf32, #tpu.memory_space<smem>>
      %519 = vector.extract_strided_slice %507 {offsets = [2, 0], sizes = [4, 16], strides = [1, 1]} : vector<10x16xf32> to vector<4x16xf32>
      %520 = vector.broadcast %518 : f32 to vector<4x16xf32>
      %521 = arith.mulf %520, %519 : vector<4x16xf32>
      %522 = arith.addf %517, %521 : vector<4x16xf32>
      %c75 = arith.constant 75 : index
      %523 = memref.load %arg1[%c75] : memref<294xf32, #tpu.memory_space<smem>>
      %524 = vector.extract_strided_slice %507 {offsets = [3, 0], sizes = [4, 16], strides = [1, 1]} : vector<10x16xf32> to vector<4x16xf32>
      %525 = vector.broadcast %523 : f32 to vector<4x16xf32>
      %526 = arith.mulf %525, %524 : vector<4x16xf32>
      %527 = arith.addf %522, %526 : vector<4x16xf32>
      %c82 = arith.constant 82 : index
      %528 = memref.load %arg1[%c82] : memref<294xf32, #tpu.memory_space<smem>>
      %529 = vector.extract_strided_slice %507 {offsets = [4, 0], sizes = [4, 16], strides = [1, 1]} : vector<10x16xf32> to vector<4x16xf32>
      %530 = vector.broadcast %528 : f32 to vector<4x16xf32>
      %531 = arith.mulf %530, %529 : vector<4x16xf32>
      %532 = arith.addf %527, %531 : vector<4x16xf32>
      %c89 = arith.constant 89 : index
      %533 = memref.load %arg1[%c89] : memref<294xf32, #tpu.memory_space<smem>>
      %534 = vector.extract_strided_slice %507 {offsets = [5, 0], sizes = [4, 16], strides = [1, 1]} : vector<10x16xf32> to vector<4x16xf32>
      %535 = vector.broadcast %533 : f32 to vector<4x16xf32>
      %536 = arith.mulf %535, %534 : vector<4x16xf32>
      %537 = arith.addf %532, %536 : vector<4x16xf32>
      %c96 = arith.constant 96 : index
      %538 = memref.load %arg1[%c96] : memref<294xf32, #tpu.memory_space<smem>>
      %539 = vector.extract_strided_slice %507 {offsets = [6, 0], sizes = [4, 16], strides = [1, 1]} : vector<10x16xf32> to vector<4x16xf32>
      %540 = vector.broadcast %538 : f32 to vector<4x16xf32>
      %541 = arith.mulf %540, %539 : vector<4x16xf32>
      %542 = arith.addf %537, %541 : vector<4x16xf32>
      %c1_121 = arith.constant 1 : index
      %c0_122 = arith.constant 0 : index
      %c6_123 = arith.constant 6 : index
      %543 = vector.load %arg5[%c1_121, %c0_122, %c6_123] : memref<2x10x22xf32, #tpu.memory_space<vmem>>, vector<1x10x16xf32>
      %544 = vector.shape_cast %543 : vector<1x10x16xf32> to vector<10x16xf32>
      %c55 = arith.constant 55 : index
      %545 = memref.load %arg1[%c55] : memref<294xf32, #tpu.memory_space<smem>>
      %546 = vector.extract_strided_slice %544 {offsets = [0, 0], sizes = [4, 16], strides = [1, 1]} : vector<10x16xf32> to vector<4x16xf32>
      %547 = vector.broadcast %545 : f32 to vector<4x16xf32>
      %548 = arith.mulf %547, %546 : vector<4x16xf32>
      %549 = arith.addf %542, %548 : vector<4x16xf32>
      %c62 = arith.constant 62 : index
      %550 = memref.load %arg1[%c62] : memref<294xf32, #tpu.memory_space<smem>>
      %551 = vector.extract_strided_slice %544 {offsets = [1, 0], sizes = [4, 16], strides = [1, 1]} : vector<10x16xf32> to vector<4x16xf32>
      %552 = vector.broadcast %550 : f32 to vector<4x16xf32>
      %553 = arith.mulf %552, %551 : vector<4x16xf32>
      %554 = arith.addf %549, %553 : vector<4x16xf32>
      %c69 = arith.constant 69 : index
      %555 = memref.load %arg1[%c69] : memref<294xf32, #tpu.memory_space<smem>>
      %556 = vector.extract_strided_slice %544 {offsets = [2, 0], sizes = [4, 16], strides = [1, 1]} : vector<10x16xf32> to vector<4x16xf32>
      %557 = vector.broadcast %555 : f32 to vector<4x16xf32>
      %558 = arith.mulf %557, %556 : vector<4x16xf32>
      %559 = arith.addf %554, %558 : vector<4x16xf32>
      %c76 = arith.constant 76 : index
      %560 = memref.load %arg1[%c76] : memref<294xf32, #tpu.memory_space<smem>>
      %561 = vector.extract_strided_slice %544 {offsets = [3, 0], sizes = [4, 16], strides = [1, 1]} : vector<10x16xf32> to vector<4x16xf32>
      %562 = vector.broadcast %560 : f32 to vector<4x16xf32>
      %563 = arith.mulf %562, %561 : vector<4x16xf32>
      %564 = arith.addf %559, %563 : vector<4x16xf32>
      %c83 = arith.constant 83 : index
      %565 = memref.load %arg1[%c83] : memref<294xf32, #tpu.memory_space<smem>>
      %566 = vector.extract_strided_slice %544 {offsets = [4, 0], sizes = [4, 16], strides = [1, 1]} : vector<10x16xf32> to vector<4x16xf32>
      %567 = vector.broadcast %565 : f32 to vector<4x16xf32>
      %568 = arith.mulf %567, %566 : vector<4x16xf32>
      %569 = arith.addf %564, %568 : vector<4x16xf32>
      %c90 = arith.constant 90 : index
      %570 = memref.load %arg1[%c90] : memref<294xf32, #tpu.memory_space<smem>>
      %571 = vector.extract_strided_slice %544 {offsets = [5, 0], sizes = [4, 16], strides = [1, 1]} : vector<10x16xf32> to vector<4x16xf32>
      %572 = vector.broadcast %570 : f32 to vector<4x16xf32>
      %573 = arith.mulf %572, %571 : vector<4x16xf32>
      %574 = arith.addf %569, %573 : vector<4x16xf32>
      %c97 = arith.constant 97 : index
      %575 = memref.load %arg1[%c97] : memref<294xf32, #tpu.memory_space<smem>>
      %576 = vector.extract_strided_slice %544 {offsets = [6, 0], sizes = [4, 16], strides = [1, 1]} : vector<10x16xf32> to vector<4x16xf32>
      %577 = vector.broadcast %575 : f32 to vector<4x16xf32>
      %578 = arith.mulf %577, %576 : vector<4x16xf32>
      %579 = arith.addf %574, %578 : vector<4x16xf32>
      %580 = vector.broadcast %60 : f32 to vector<4x16xf32>
      %581 = arith.addf %579, %580 : vector<4x16xf32>
      %582 = arith.negf %581 : vector<4x16xf32>
      %583 = math.exp %582 : vector<4x16xf32>
      %cst_124 = arith.constant 1.000000e+00 : f32
      %584 = vector.broadcast %cst_124 : f32 to vector<4x16xf32>
      %585 = arith.addf %584, %583 : vector<4x16xf32>
      %586 = arith.divf %584, %585 : vector<4x16xf32>
      %cst_125 = arith.constant 0.333333343 : f32
      %587 = vector.broadcast %cst_125 : f32 to vector<4x16xf32>
      %588 = arith.mulf %586, %587 : vector<4x16xf32>
      %c1_126 = arith.constant 1 : index
      %589 = memref.load %arg2[%c1_126] : memref<3xf32, #tpu.memory_space<smem>>
      %cst_127 = arith.constant 0.000000e+00 : f32
      %590 = vector.broadcast %cst_127 : f32 to vector<4x16xf32>
      %c0_128 = arith.constant 0 : index
      %c0_129 = arith.constant 0 : index
      %c0_130 = arith.constant 0 : index
      %591 = vector.load %arg6[%c0_128, %c0_129, %c0_130] : memref<2x10x22xf32, #tpu.memory_space<vmem>>, vector<1x10x16xf32>
      %592 = vector.shape_cast %591 : vector<1x10x16xf32> to vector<10x16xf32>
      %c98 = arith.constant 98 : index
      %593 = memref.load %arg1[%c98] : memref<294xf32, #tpu.memory_space<smem>>
      %594 = vector.extract_strided_slice %592 {offsets = [0, 0], sizes = [4, 16], strides = [1, 1]} : vector<10x16xf32> to vector<4x16xf32>
      %595 = vector.broadcast %593 : f32 to vector<4x16xf32>
      %596 = arith.mulf %595, %594 : vector<4x16xf32>
      %597 = arith.addf %590, %596 : vector<4x16xf32>
      %c105 = arith.constant 105 : index
      %598 = memref.load %arg1[%c105] : memref<294xf32, #tpu.memory_space<smem>>
      %599 = vector.extract_strided_slice %592 {offsets = [1, 0], sizes = [4, 16], strides = [1, 1]} : vector<10x16xf32> to vector<4x16xf32>
      %600 = vector.broadcast %598 : f32 to vector<4x16xf32>
      %601 = arith.mulf %600, %599 : vector<4x16xf32>
      %602 = arith.addf %597, %601 : vector<4x16xf32>
      %c112 = arith.constant 112 : index
      %603 = memref.load %arg1[%c112] : memref<294xf32, #tpu.memory_space<smem>>
      %604 = vector.extract_strided_slice %592 {offsets = [2, 0], sizes = [4, 16], strides = [1, 1]} : vector<10x16xf32> to vector<4x16xf32>
      %605 = vector.broadcast %603 : f32 to vector<4x16xf32>
      %606 = arith.mulf %605, %604 : vector<4x16xf32>
      %607 = arith.addf %602, %606 : vector<4x16xf32>
      %c119 = arith.constant 119 : index
      %608 = memref.load %arg1[%c119] : memref<294xf32, #tpu.memory_space<smem>>
      %609 = vector.extract_strided_slice %592 {offsets = [3, 0], sizes = [4, 16], strides = [1, 1]} : vector<10x16xf32> to vector<4x16xf32>
      %610 = vector.broadcast %608 : f32 to vector<4x16xf32>
      %611 = arith.mulf %610, %609 : vector<4x16xf32>
      %612 = arith.addf %607, %611 : vector<4x16xf32>
      %c126 = arith.constant 126 : index
      %613 = memref.load %arg1[%c126] : memref<294xf32, #tpu.memory_space<smem>>
      %614 = vector.extract_strided_slice %592 {offsets = [4, 0], sizes = [4, 16], strides = [1, 1]} : vector<10x16xf32> to vector<4x16xf32>
      %615 = vector.broadcast %613 : f32 to vector<4x16xf32>
      %616 = arith.mulf %615, %614 : vector<4x16xf32>
      %617 = arith.addf %612, %616 : vector<4x16xf32>
      %c133 = arith.constant 133 : index
      %618 = memref.load %arg1[%c133] : memref<294xf32, #tpu.memory_space<smem>>
      %619 = vector.extract_strided_slice %592 {offsets = [5, 0], sizes = [4, 16], strides = [1, 1]} : vector<10x16xf32> to vector<4x16xf32>
      %620 = vector.broadcast %618 : f32 to vector<4x16xf32>
      %621 = arith.mulf %620, %619 : vector<4x16xf32>
      %622 = arith.addf %617, %621 : vector<4x16xf32>
      %c140 = arith.constant 140 : index
      %623 = memref.load %arg1[%c140] : memref<294xf32, #tpu.memory_space<smem>>
      %624 = vector.extract_strided_slice %592 {offsets = [6, 0], sizes = [4, 16], strides = [1, 1]} : vector<10x16xf32> to vector<4x16xf32>
      %625 = vector.broadcast %623 : f32 to vector<4x16xf32>
      %626 = arith.mulf %625, %624 : vector<4x16xf32>
      %627 = arith.addf %622, %626 : vector<4x16xf32>
      %c0_131 = arith.constant 0 : index
      %c0_132 = arith.constant 0 : index
      %c1_133 = arith.constant 1 : index
      %628 = vector.load %arg6[%c0_131, %c0_132, %c1_133] : memref<2x10x22xf32, #tpu.memory_space<vmem>>, vector<1x10x16xf32>
      %629 = vector.shape_cast %628 : vector<1x10x16xf32> to vector<10x16xf32>
      %c99 = arith.constant 99 : index
      %630 = memref.load %arg1[%c99] : memref<294xf32, #tpu.memory_space<smem>>
      %631 = vector.extract_strided_slice %629 {offsets = [0, 0], sizes = [4, 16], strides = [1, 1]} : vector<10x16xf32> to vector<4x16xf32>
      %632 = vector.broadcast %630 : f32 to vector<4x16xf32>
      %633 = arith.mulf %632, %631 : vector<4x16xf32>
      %634 = arith.addf %627, %633 : vector<4x16xf32>
      %c106 = arith.constant 106 : index
      %635 = memref.load %arg1[%c106] : memref<294xf32, #tpu.memory_space<smem>>
      %636 = vector.extract_strided_slice %629 {offsets = [1, 0], sizes = [4, 16], strides = [1, 1]} : vector<10x16xf32> to vector<4x16xf32>
      %637 = vector.broadcast %635 : f32 to vector<4x16xf32>
      %638 = arith.mulf %637, %636 : vector<4x16xf32>
      %639 = arith.addf %634, %638 : vector<4x16xf32>
      %c113 = arith.constant 113 : index
      %640 = memref.load %arg1[%c113] : memref<294xf32, #tpu.memory_space<smem>>
      %641 = vector.extract_strided_slice %629 {offsets = [2, 0], sizes = [4, 16], strides = [1, 1]} : vector<10x16xf32> to vector<4x16xf32>
      %642 = vector.broadcast %640 : f32 to vector<4x16xf32>
      %643 = arith.mulf %642, %641 : vector<4x16xf32>
      %644 = arith.addf %639, %643 : vector<4x16xf32>
      %c120 = arith.constant 120 : index
      %645 = memref.load %arg1[%c120] : memref<294xf32, #tpu.memory_space<smem>>
      %646 = vector.extract_strided_slice %629 {offsets = [3, 0], sizes = [4, 16], strides = [1, 1]} : vector<10x16xf32> to vector<4x16xf32>
      %647 = vector.broadcast %645 : f32 to vector<4x16xf32>
      %648 = arith.mulf %647, %646 : vector<4x16xf32>
      %649 = arith.addf %644, %648 : vector<4x16xf32>
      %c127 = arith.constant 127 : index
      %650 = memref.load %arg1[%c127] : memref<294xf32, #tpu.memory_space<smem>>
      %651 = vector.extract_strided_slice %629 {offsets = [4, 0], sizes = [4, 16], strides = [1, 1]} : vector<10x16xf32> to vector<4x16xf32>
      %652 = vector.broadcast %650 : f32 to vector<4x16xf32>
      %653 = arith.mulf %652, %651 : vector<4x16xf32>
      %654 = arith.addf %649, %653 : vector<4x16xf32>
      %c134 = arith.constant 134 : index
      %655 = memref.load %arg1[%c134] : memref<294xf32, #tpu.memory_space<smem>>
      %656 = vector.extract_strided_slice %629 {offsets = [5, 0], sizes = [4, 16], strides = [1, 1]} : vector<10x16xf32> to vector<4x16xf32>
      %657 = vector.broadcast %655 : f32 to vector<4x16xf32>
      %658 = arith.mulf %657, %656 : vector<4x16xf32>
      %659 = arith.addf %654, %658 : vector<4x16xf32>
      %c141 = arith.constant 141 : index
      %660 = memref.load %arg1[%c141] : memref<294xf32, #tpu.memory_space<smem>>
      %661 = vector.extract_strided_slice %629 {offsets = [6, 0], sizes = [4, 16], strides = [1, 1]} : vector<10x16xf32> to vector<4x16xf32>
      %662 = vector.broadcast %660 : f32 to vector<4x16xf32>
      %663 = arith.mulf %662, %661 : vector<4x16xf32>
      %664 = arith.addf %659, %663 : vector<4x16xf32>
      %c0_134 = arith.constant 0 : index
      %c0_135 = arith.constant 0 : index
      %c2_136 = arith.constant 2 : index
      %665 = vector.load %arg6[%c0_134, %c0_135, %c2_136] : memref<2x10x22xf32, #tpu.memory_space<vmem>>, vector<1x10x16xf32>
      %666 = vector.shape_cast %665 : vector<1x10x16xf32> to vector<10x16xf32>
      %c100 = arith.constant 100 : index
      %667 = memref.load %arg1[%c100] : memref<294xf32, #tpu.memory_space<smem>>
      %668 = vector.extract_strided_slice %666 {offsets = [0, 0], sizes = [4, 16], strides = [1, 1]} : vector<10x16xf32> to vector<4x16xf32>
      %669 = vector.broadcast %667 : f32 to vector<4x16xf32>
      %670 = arith.mulf %669, %668 : vector<4x16xf32>
      %671 = arith.addf %664, %670 : vector<4x16xf32>
      %c107 = arith.constant 107 : index
      %672 = memref.load %arg1[%c107] : memref<294xf32, #tpu.memory_space<smem>>
      %673 = vector.extract_strided_slice %666 {offsets = [1, 0], sizes = [4, 16], strides = [1, 1]} : vector<10x16xf32> to vector<4x16xf32>
      %674 = vector.broadcast %672 : f32 to vector<4x16xf32>
      %675 = arith.mulf %674, %673 : vector<4x16xf32>
      %676 = arith.addf %671, %675 : vector<4x16xf32>
      %c114 = arith.constant 114 : index
      %677 = memref.load %arg1[%c114] : memref<294xf32, #tpu.memory_space<smem>>
      %678 = vector.extract_strided_slice %666 {offsets = [2, 0], sizes = [4, 16], strides = [1, 1]} : vector<10x16xf32> to vector<4x16xf32>
      %679 = vector.broadcast %677 : f32 to vector<4x16xf32>
      %680 = arith.mulf %679, %678 : vector<4x16xf32>
      %681 = arith.addf %676, %680 : vector<4x16xf32>
      %c121 = arith.constant 121 : index
      %682 = memref.load %arg1[%c121] : memref<294xf32, #tpu.memory_space<smem>>
      %683 = vector.extract_strided_slice %666 {offsets = [3, 0], sizes = [4, 16], strides = [1, 1]} : vector<10x16xf32> to vector<4x16xf32>
      %684 = vector.broadcast %682 : f32 to vector<4x16xf32>
      %685 = arith.mulf %684, %683 : vector<4x16xf32>
      %686 = arith.addf %681, %685 : vector<4x16xf32>
      %c128 = arith.constant 128 : index
      %687 = memref.load %arg1[%c128] : memref<294xf32, #tpu.memory_space<smem>>
      %688 = vector.extract_strided_slice %666 {offsets = [4, 0], sizes = [4, 16], strides = [1, 1]} : vector<10x16xf32> to vector<4x16xf32>
      %689 = vector.broadcast %687 : f32 to vector<4x16xf32>
      %690 = arith.mulf %689, %688 : vector<4x16xf32>
      %691 = arith.addf %686, %690 : vector<4x16xf32>
      %c135 = arith.constant 135 : index
      %692 = memref.load %arg1[%c135] : memref<294xf32, #tpu.memory_space<smem>>
      %693 = vector.extract_strided_slice %666 {offsets = [5, 0], sizes = [4, 16], strides = [1, 1]} : vector<10x16xf32> to vector<4x16xf32>
      %694 = vector.broadcast %692 : f32 to vector<4x16xf32>
      %695 = arith.mulf %694, %693 : vector<4x16xf32>
      %696 = arith.addf %691, %695 : vector<4x16xf32>
      %c142 = arith.constant 142 : index
      %697 = memref.load %arg1[%c142] : memref<294xf32, #tpu.memory_space<smem>>
      %698 = vector.extract_strided_slice %666 {offsets = [6, 0], sizes = [4, 16], strides = [1, 1]} : vector<10x16xf32> to vector<4x16xf32>
      %699 = vector.broadcast %697 : f32 to vector<4x16xf32>
      %700 = arith.mulf %699, %698 : vector<4x16xf32>
      %701 = arith.addf %696, %700 : vector<4x16xf32>
      %c0_137 = arith.constant 0 : index
      %c0_138 = arith.constant 0 : index
      %c3_139 = arith.constant 3 : index
      %702 = vector.load %arg6[%c0_137, %c0_138, %c3_139] : memref<2x10x22xf32, #tpu.memory_space<vmem>>, vector<1x10x16xf32>
      %703 = vector.shape_cast %702 : vector<1x10x16xf32> to vector<10x16xf32>
      %c101 = arith.constant 101 : index
      %704 = memref.load %arg1[%c101] : memref<294xf32, #tpu.memory_space<smem>>
      %705 = vector.extract_strided_slice %703 {offsets = [0, 0], sizes = [4, 16], strides = [1, 1]} : vector<10x16xf32> to vector<4x16xf32>
      %706 = vector.broadcast %704 : f32 to vector<4x16xf32>
      %707 = arith.mulf %706, %705 : vector<4x16xf32>
      %708 = arith.addf %701, %707 : vector<4x16xf32>
      %c108 = arith.constant 108 : index
      %709 = memref.load %arg1[%c108] : memref<294xf32, #tpu.memory_space<smem>>
      %710 = vector.extract_strided_slice %703 {offsets = [1, 0], sizes = [4, 16], strides = [1, 1]} : vector<10x16xf32> to vector<4x16xf32>
      %711 = vector.broadcast %709 : f32 to vector<4x16xf32>
      %712 = arith.mulf %711, %710 : vector<4x16xf32>
      %713 = arith.addf %708, %712 : vector<4x16xf32>
      %c115 = arith.constant 115 : index
      %714 = memref.load %arg1[%c115] : memref<294xf32, #tpu.memory_space<smem>>
      %715 = vector.extract_strided_slice %703 {offsets = [2, 0], sizes = [4, 16], strides = [1, 1]} : vector<10x16xf32> to vector<4x16xf32>
      %716 = vector.broadcast %714 : f32 to vector<4x16xf32>
      %717 = arith.mulf %716, %715 : vector<4x16xf32>
      %718 = arith.addf %713, %717 : vector<4x16xf32>
      %c122 = arith.constant 122 : index
      %719 = memref.load %arg1[%c122] : memref<294xf32, #tpu.memory_space<smem>>
      %720 = vector.extract_strided_slice %703 {offsets = [3, 0], sizes = [4, 16], strides = [1, 1]} : vector<10x16xf32> to vector<4x16xf32>
      %721 = vector.broadcast %719 : f32 to vector<4x16xf32>
      %722 = arith.mulf %721, %720 : vector<4x16xf32>
      %723 = arith.addf %718, %722 : vector<4x16xf32>
      %c129 = arith.constant 129 : index
      %724 = memref.load %arg1[%c129] : memref<294xf32, #tpu.memory_space<smem>>
      %725 = vector.extract_strided_slice %703 {offsets = [4, 0], sizes = [4, 16], strides = [1, 1]} : vector<10x16xf32> to vector<4x16xf32>
      %726 = vector.broadcast %724 : f32 to vector<4x16xf32>
      %727 = arith.mulf %726, %725 : vector<4x16xf32>
      %728 = arith.addf %723, %727 : vector<4x16xf32>
      %c136 = arith.constant 136 : index
      %729 = memref.load %arg1[%c136] : memref<294xf32, #tpu.memory_space<smem>>
      %730 = vector.extract_strided_slice %703 {offsets = [5, 0], sizes = [4, 16], strides = [1, 1]} : vector<10x16xf32> to vector<4x16xf32>
      %731 = vector.broadcast %729 : f32 to vector<4x16xf32>
      %732 = arith.mulf %731, %730 : vector<4x16xf32>
      %733 = arith.addf %728, %732 : vector<4x16xf32>
      %c143 = arith.constant 143 : index
      %734 = memref.load %arg1[%c143] : memref<294xf32, #tpu.memory_space<smem>>
      %735 = vector.extract_strided_slice %703 {offsets = [6, 0], sizes = [4, 16], strides = [1, 1]} : vector<10x16xf32> to vector<4x16xf32>
      %736 = vector.broadcast %734 : f32 to vector<4x16xf32>
      %737 = arith.mulf %736, %735 : vector<4x16xf32>
      %738 = arith.addf %733, %737 : vector<4x16xf32>
      %c0_140 = arith.constant 0 : index
      %c0_141 = arith.constant 0 : index
      %c4_142 = arith.constant 4 : index
      %739 = vector.load %arg6[%c0_140, %c0_141, %c4_142] : memref<2x10x22xf32, #tpu.memory_space<vmem>>, vector<1x10x16xf32>
      %740 = vector.shape_cast %739 : vector<1x10x16xf32> to vector<10x16xf32>
      %c102 = arith.constant 102 : index
      %741 = memref.load %arg1[%c102] : memref<294xf32, #tpu.memory_space<smem>>
      %742 = vector.extract_strided_slice %740 {offsets = [0, 0], sizes = [4, 16], strides = [1, 1]} : vector<10x16xf32> to vector<4x16xf32>
      %743 = vector.broadcast %741 : f32 to vector<4x16xf32>
      %744 = arith.mulf %743, %742 : vector<4x16xf32>
      %745 = arith.addf %738, %744 : vector<4x16xf32>
      %c109 = arith.constant 109 : index
      %746 = memref.load %arg1[%c109] : memref<294xf32, #tpu.memory_space<smem>>
      %747 = vector.extract_strided_slice %740 {offsets = [1, 0], sizes = [4, 16], strides = [1, 1]} : vector<10x16xf32> to vector<4x16xf32>
      %748 = vector.broadcast %746 : f32 to vector<4x16xf32>
      %749 = arith.mulf %748, %747 : vector<4x16xf32>
      %750 = arith.addf %745, %749 : vector<4x16xf32>
      %c116 = arith.constant 116 : index
      %751 = memref.load %arg1[%c116] : memref<294xf32, #tpu.memory_space<smem>>
      %752 = vector.extract_strided_slice %740 {offsets = [2, 0], sizes = [4, 16], strides = [1, 1]} : vector<10x16xf32> to vector<4x16xf32>
      %753 = vector.broadcast %751 : f32 to vector<4x16xf32>
      %754 = arith.mulf %753, %752 : vector<4x16xf32>
      %755 = arith.addf %750, %754 : vector<4x16xf32>
      %c123 = arith.constant 123 : index
      %756 = memref.load %arg1[%c123] : memref<294xf32, #tpu.memory_space<smem>>
      %757 = vector.extract_strided_slice %740 {offsets = [3, 0], sizes = [4, 16], strides = [1, 1]} : vector<10x16xf32> to vector<4x16xf32>
      %758 = vector.broadcast %756 : f32 to vector<4x16xf32>
      %759 = arith.mulf %758, %757 : vector<4x16xf32>
      %760 = arith.addf %755, %759 : vector<4x16xf32>
      %c130 = arith.constant 130 : index
      %761 = memref.load %arg1[%c130] : memref<294xf32, #tpu.memory_space<smem>>
      %762 = vector.extract_strided_slice %740 {offsets = [4, 0], sizes = [4, 16], strides = [1, 1]} : vector<10x16xf32> to vector<4x16xf32>
      %763 = vector.broadcast %761 : f32 to vector<4x16xf32>
      %764 = arith.mulf %763, %762 : vector<4x16xf32>
      %765 = arith.addf %760, %764 : vector<4x16xf32>
      %c137 = arith.constant 137 : index
      %766 = memref.load %arg1[%c137] : memref<294xf32, #tpu.memory_space<smem>>
      %767 = vector.extract_strided_slice %740 {offsets = [5, 0], sizes = [4, 16], strides = [1, 1]} : vector<10x16xf32> to vector<4x16xf32>
      %768 = vector.broadcast %766 : f32 to vector<4x16xf32>
      %769 = arith.mulf %768, %767 : vector<4x16xf32>
      %770 = arith.addf %765, %769 : vector<4x16xf32>
      %c144 = arith.constant 144 : index
      %771 = memref.load %arg1[%c144] : memref<294xf32, #tpu.memory_space<smem>>
      %772 = vector.extract_strided_slice %740 {offsets = [6, 0], sizes = [4, 16], strides = [1, 1]} : vector<10x16xf32> to vector<4x16xf32>
      %773 = vector.broadcast %771 : f32 to vector<4x16xf32>
      %774 = arith.mulf %773, %772 : vector<4x16xf32>
      %775 = arith.addf %770, %774 : vector<4x16xf32>
      %c0_143 = arith.constant 0 : index
      %c0_144 = arith.constant 0 : index
      %c5_145 = arith.constant 5 : index
      %776 = vector.load %arg6[%c0_143, %c0_144, %c5_145] : memref<2x10x22xf32, #tpu.memory_space<vmem>>, vector<1x10x16xf32>
      %777 = vector.shape_cast %776 : vector<1x10x16xf32> to vector<10x16xf32>
      %c103 = arith.constant 103 : index
      %778 = memref.load %arg1[%c103] : memref<294xf32, #tpu.memory_space<smem>>
      %779 = vector.extract_strided_slice %777 {offsets = [0, 0], sizes = [4, 16], strides = [1, 1]} : vector<10x16xf32> to vector<4x16xf32>
      %780 = vector.broadcast %778 : f32 to vector<4x16xf32>
      %781 = arith.mulf %780, %779 : vector<4x16xf32>
      %782 = arith.addf %775, %781 : vector<4x16xf32>
      %c110 = arith.constant 110 : index
      %783 = memref.load %arg1[%c110] : memref<294xf32, #tpu.memory_space<smem>>
      %784 = vector.extract_strided_slice %777 {offsets = [1, 0], sizes = [4, 16], strides = [1, 1]} : vector<10x16xf32> to vector<4x16xf32>
      %785 = vector.broadcast %783 : f32 to vector<4x16xf32>
      %786 = arith.mulf %785, %784 : vector<4x16xf32>
      %787 = arith.addf %782, %786 : vector<4x16xf32>
      %c117 = arith.constant 117 : index
      %788 = memref.load %arg1[%c117] : memref<294xf32, #tpu.memory_space<smem>>
      %789 = vector.extract_strided_slice %777 {offsets = [2, 0], sizes = [4, 16], strides = [1, 1]} : vector<10x16xf32> to vector<4x16xf32>
      %790 = vector.broadcast %788 : f32 to vector<4x16xf32>
      %791 = arith.mulf %790, %789 : vector<4x16xf32>
      %792 = arith.addf %787, %791 : vector<4x16xf32>
      %c124 = arith.constant 124 : index
      %793 = memref.load %arg1[%c124] : memref<294xf32, #tpu.memory_space<smem>>
      %794 = vector.extract_strided_slice %777 {offsets = [3, 0], sizes = [4, 16], strides = [1, 1]} : vector<10x16xf32> to vector<4x16xf32>
      %795 = vector.broadcast %793 : f32 to vector<4x16xf32>
      %796 = arith.mulf %795, %794 : vector<4x16xf32>
      %797 = arith.addf %792, %796 : vector<4x16xf32>
      %c131 = arith.constant 131 : index
      %798 = memref.load %arg1[%c131] : memref<294xf32, #tpu.memory_space<smem>>
      %799 = vector.extract_strided_slice %777 {offsets = [4, 0], sizes = [4, 16], strides = [1, 1]} : vector<10x16xf32> to vector<4x16xf32>
      %800 = vector.broadcast %798 : f32 to vector<4x16xf32>
      %801 = arith.mulf %800, %799 : vector<4x16xf32>
      %802 = arith.addf %797, %801 : vector<4x16xf32>
      %c138 = arith.constant 138 : index
      %803 = memref.load %arg1[%c138] : memref<294xf32, #tpu.memory_space<smem>>
      %804 = vector.extract_strided_slice %777 {offsets = [5, 0], sizes = [4, 16], strides = [1, 1]} : vector<10x16xf32> to vector<4x16xf32>
      %805 = vector.broadcast %803 : f32 to vector<4x16xf32>
      %806 = arith.mulf %805, %804 : vector<4x16xf32>
      %807 = arith.addf %802, %806 : vector<4x16xf32>
      %c145 = arith.constant 145 : index
      %808 = memref.load %arg1[%c145] : memref<294xf32, #tpu.memory_space<smem>>
      %809 = vector.extract_strided_slice %777 {offsets = [6, 0], sizes = [4, 16], strides = [1, 1]} : vector<10x16xf32> to vector<4x16xf32>
      %810 = vector.broadcast %808 : f32 to vector<4x16xf32>
      %811 = arith.mulf %810, %809 : vector<4x16xf32>
      %812 = arith.addf %807, %811 : vector<4x16xf32>
      %c0_146 = arith.constant 0 : index
      %c0_147 = arith.constant 0 : index
      %c6_148 = arith.constant 6 : index
      %813 = vector.load %arg6[%c0_146, %c0_147, %c6_148] : memref<2x10x22xf32, #tpu.memory_space<vmem>>, vector<1x10x16xf32>
      %814 = vector.shape_cast %813 : vector<1x10x16xf32> to vector<10x16xf32>
      %c104 = arith.constant 104 : index
      %815 = memref.load %arg1[%c104] : memref<294xf32, #tpu.memory_space<smem>>
      %816 = vector.extract_strided_slice %814 {offsets = [0, 0], sizes = [4, 16], strides = [1, 1]} : vector<10x16xf32> to vector<4x16xf32>
      %817 = vector.broadcast %815 : f32 to vector<4x16xf32>
      %818 = arith.mulf %817, %816 : vector<4x16xf32>
      %819 = arith.addf %812, %818 : vector<4x16xf32>
      %c111 = arith.constant 111 : index
      %820 = memref.load %arg1[%c111] : memref<294xf32, #tpu.memory_space<smem>>
      %821 = vector.extract_strided_slice %814 {offsets = [1, 0], sizes = [4, 16], strides = [1, 1]} : vector<10x16xf32> to vector<4x16xf32>
      %822 = vector.broadcast %820 : f32 to vector<4x16xf32>
      %823 = arith.mulf %822, %821 : vector<4x16xf32>
      %824 = arith.addf %819, %823 : vector<4x16xf32>
      %c118 = arith.constant 118 : index
      %825 = memref.load %arg1[%c118] : memref<294xf32, #tpu.memory_space<smem>>
      %826 = vector.extract_strided_slice %814 {offsets = [2, 0], sizes = [4, 16], strides = [1, 1]} : vector<10x16xf32> to vector<4x16xf32>
      %827 = vector.broadcast %825 : f32 to vector<4x16xf32>
      %828 = arith.mulf %827, %826 : vector<4x16xf32>
      %829 = arith.addf %824, %828 : vector<4x16xf32>
      %c125 = arith.constant 125 : index
      %830 = memref.load %arg1[%c125] : memref<294xf32, #tpu.memory_space<smem>>
      %831 = vector.extract_strided_slice %814 {offsets = [3, 0], sizes = [4, 16], strides = [1, 1]} : vector<10x16xf32> to vector<4x16xf32>
      %832 = vector.broadcast %830 : f32 to vector<4x16xf32>
      %833 = arith.mulf %832, %831 : vector<4x16xf32>
      %834 = arith.addf %829, %833 : vector<4x16xf32>
      %c132 = arith.constant 132 : index
      %835 = memref.load %arg1[%c132] : memref<294xf32, #tpu.memory_space<smem>>
      %836 = vector.extract_strided_slice %814 {offsets = [4, 0], sizes = [4, 16], strides = [1, 1]} : vector<10x16xf32> to vector<4x16xf32>
      %837 = vector.broadcast %835 : f32 to vector<4x16xf32>
      %838 = arith.mulf %837, %836 : vector<4x16xf32>
      %839 = arith.addf %834, %838 : vector<4x16xf32>
      %c139 = arith.constant 139 : index
      %840 = memref.load %arg1[%c139] : memref<294xf32, #tpu.memory_space<smem>>
      %841 = vector.extract_strided_slice %814 {offsets = [5, 0], sizes = [4, 16], strides = [1, 1]} : vector<10x16xf32> to vector<4x16xf32>
      %842 = vector.broadcast %840 : f32 to vector<4x16xf32>
      %843 = arith.mulf %842, %841 : vector<4x16xf32>
      %844 = arith.addf %839, %843 : vector<4x16xf32>
      %c146 = arith.constant 146 : index
      %845 = memref.load %arg1[%c146] : memref<294xf32, #tpu.memory_space<smem>>
      %846 = vector.extract_strided_slice %814 {offsets = [6, 0], sizes = [4, 16], strides = [1, 1]} : vector<10x16xf32> to vector<4x16xf32>
      %847 = vector.broadcast %845 : f32 to vector<4x16xf32>
      %848 = arith.mulf %847, %846 : vector<4x16xf32>
      %849 = arith.addf %844, %848 : vector<4x16xf32>
      %c1_149 = arith.constant 1 : index
      %c0_150 = arith.constant 0 : index
      %c0_151 = arith.constant 0 : index
      %850 = vector.load %arg6[%c1_149, %c0_150, %c0_151] : memref<2x10x22xf32, #tpu.memory_space<vmem>>, vector<1x10x16xf32>
      %851 = vector.shape_cast %850 : vector<1x10x16xf32> to vector<10x16xf32>
      %c147 = arith.constant 147 : index
      %852 = memref.load %arg1[%c147] : memref<294xf32, #tpu.memory_space<smem>>
      %853 = vector.extract_strided_slice %851 {offsets = [0, 0], sizes = [4, 16], strides = [1, 1]} : vector<10x16xf32> to vector<4x16xf32>
      %854 = vector.broadcast %852 : f32 to vector<4x16xf32>
      %855 = arith.mulf %854, %853 : vector<4x16xf32>
      %856 = arith.addf %849, %855 : vector<4x16xf32>
      %c154 = arith.constant 154 : index
      %857 = memref.load %arg1[%c154] : memref<294xf32, #tpu.memory_space<smem>>
      %858 = vector.extract_strided_slice %851 {offsets = [1, 0], sizes = [4, 16], strides = [1, 1]} : vector<10x16xf32> to vector<4x16xf32>
      %859 = vector.broadcast %857 : f32 to vector<4x16xf32>
      %860 = arith.mulf %859, %858 : vector<4x16xf32>
      %861 = arith.addf %856, %860 : vector<4x16xf32>
      %c161 = arith.constant 161 : index
      %862 = memref.load %arg1[%c161] : memref<294xf32, #tpu.memory_space<smem>>
      %863 = vector.extract_strided_slice %851 {offsets = [2, 0], sizes = [4, 16], strides = [1, 1]} : vector<10x16xf32> to vector<4x16xf32>
      %864 = vector.broadcast %862 : f32 to vector<4x16xf32>
      %865 = arith.mulf %864, %863 : vector<4x16xf32>
      %866 = arith.addf %861, %865 : vector<4x16xf32>
      %c168 = arith.constant 168 : index
      %867 = memref.load %arg1[%c168] : memref<294xf32, #tpu.memory_space<smem>>
      %868 = vector.extract_strided_slice %851 {offsets = [3, 0], sizes = [4, 16], strides = [1, 1]} : vector<10x16xf32> to vector<4x16xf32>
      %869 = vector.broadcast %867 : f32 to vector<4x16xf32>
      %870 = arith.mulf %869, %868 : vector<4x16xf32>
      %871 = arith.addf %866, %870 : vector<4x16xf32>
      %c175 = arith.constant 175 : index
      %872 = memref.load %arg1[%c175] : memref<294xf32, #tpu.memory_space<smem>>
      %873 = vector.extract_strided_slice %851 {offsets = [4, 0], sizes = [4, 16], strides = [1, 1]} : vector<10x16xf32> to vector<4x16xf32>
      %874 = vector.broadcast %872 : f32 to vector<4x16xf32>
      %875 = arith.mulf %874, %873 : vector<4x16xf32>
      %876 = arith.addf %871, %875 : vector<4x16xf32>
      %c182 = arith.constant 182 : index
      %877 = memref.load %arg1[%c182] : memref<294xf32, #tpu.memory_space<smem>>
      %878 = vector.extract_strided_slice %851 {offsets = [5, 0], sizes = [4, 16], strides = [1, 1]} : vector<10x16xf32> to vector<4x16xf32>
      %879 = vector.broadcast %877 : f32 to vector<4x16xf32>
      %880 = arith.mulf %879, %878 : vector<4x16xf32>
      %881 = arith.addf %876, %880 : vector<4x16xf32>
      %c189 = arith.constant 189 : index
      %882 = memref.load %arg1[%c189] : memref<294xf32, #tpu.memory_space<smem>>
      %883 = vector.extract_strided_slice %851 {offsets = [6, 0], sizes = [4, 16], strides = [1, 1]} : vector<10x16xf32> to vector<4x16xf32>
      %884 = vector.broadcast %882 : f32 to vector<4x16xf32>
      %885 = arith.mulf %884, %883 : vector<4x16xf32>
      %886 = arith.addf %881, %885 : vector<4x16xf32>
      %c1_152 = arith.constant 1 : index
      %c0_153 = arith.constant 0 : index
      %c1_154 = arith.constant 1 : index
      %887 = vector.load %arg6[%c1_152, %c0_153, %c1_154] : memref<2x10x22xf32, #tpu.memory_space<vmem>>, vector<1x10x16xf32>
      %888 = vector.shape_cast %887 : vector<1x10x16xf32> to vector<10x16xf32>
      %c148 = arith.constant 148 : index
      %889 = memref.load %arg1[%c148] : memref<294xf32, #tpu.memory_space<smem>>
      %890 = vector.extract_strided_slice %888 {offsets = [0, 0], sizes = [4, 16], strides = [1, 1]} : vector<10x16xf32> to vector<4x16xf32>
      %891 = vector.broadcast %889 : f32 to vector<4x16xf32>
      %892 = arith.mulf %891, %890 : vector<4x16xf32>
      %893 = arith.addf %886, %892 : vector<4x16xf32>
      %c155 = arith.constant 155 : index
      %894 = memref.load %arg1[%c155] : memref<294xf32, #tpu.memory_space<smem>>
      %895 = vector.extract_strided_slice %888 {offsets = [1, 0], sizes = [4, 16], strides = [1, 1]} : vector<10x16xf32> to vector<4x16xf32>
      %896 = vector.broadcast %894 : f32 to vector<4x16xf32>
      %897 = arith.mulf %896, %895 : vector<4x16xf32>
      %898 = arith.addf %893, %897 : vector<4x16xf32>
      %c162 = arith.constant 162 : index
      %899 = memref.load %arg1[%c162] : memref<294xf32, #tpu.memory_space<smem>>
      %900 = vector.extract_strided_slice %888 {offsets = [2, 0], sizes = [4, 16], strides = [1, 1]} : vector<10x16xf32> to vector<4x16xf32>
      %901 = vector.broadcast %899 : f32 to vector<4x16xf32>
      %902 = arith.mulf %901, %900 : vector<4x16xf32>
      %903 = arith.addf %898, %902 : vector<4x16xf32>
      %c169 = arith.constant 169 : index
      %904 = memref.load %arg1[%c169] : memref<294xf32, #tpu.memory_space<smem>>
      %905 = vector.extract_strided_slice %888 {offsets = [3, 0], sizes = [4, 16], strides = [1, 1]} : vector<10x16xf32> to vector<4x16xf32>
      %906 = vector.broadcast %904 : f32 to vector<4x16xf32>
      %907 = arith.mulf %906, %905 : vector<4x16xf32>
      %908 = arith.addf %903, %907 : vector<4x16xf32>
      %c176 = arith.constant 176 : index
      %909 = memref.load %arg1[%c176] : memref<294xf32, #tpu.memory_space<smem>>
      %910 = vector.extract_strided_slice %888 {offsets = [4, 0], sizes = [4, 16], strides = [1, 1]} : vector<10x16xf32> to vector<4x16xf32>
      %911 = vector.broadcast %909 : f32 to vector<4x16xf32>
      %912 = arith.mulf %911, %910 : vector<4x16xf32>
      %913 = arith.addf %908, %912 : vector<4x16xf32>
      %c183 = arith.constant 183 : index
      %914 = memref.load %arg1[%c183] : memref<294xf32, #tpu.memory_space<smem>>
      %915 = vector.extract_strided_slice %888 {offsets = [5, 0], sizes = [4, 16], strides = [1, 1]} : vector<10x16xf32> to vector<4x16xf32>
      %916 = vector.broadcast %914 : f32 to vector<4x16xf32>
      %917 = arith.mulf %916, %915 : vector<4x16xf32>
      %918 = arith.addf %913, %917 : vector<4x16xf32>
      %c190 = arith.constant 190 : index
      %919 = memref.load %arg1[%c190] : memref<294xf32, #tpu.memory_space<smem>>
      %920 = vector.extract_strided_slice %888 {offsets = [6, 0], sizes = [4, 16], strides = [1, 1]} : vector<10x16xf32> to vector<4x16xf32>
      %921 = vector.broadcast %919 : f32 to vector<4x16xf32>
      %922 = arith.mulf %921, %920 : vector<4x16xf32>
      %923 = arith.addf %918, %922 : vector<4x16xf32>
      %c1_155 = arith.constant 1 : index
      %c0_156 = arith.constant 0 : index
      %c2_157 = arith.constant 2 : index
      %924 = vector.load %arg6[%c1_155, %c0_156, %c2_157] : memref<2x10x22xf32, #tpu.memory_space<vmem>>, vector<1x10x16xf32>
      %925 = vector.shape_cast %924 : vector<1x10x16xf32> to vector<10x16xf32>
      %c149 = arith.constant 149 : index
      %926 = memref.load %arg1[%c149] : memref<294xf32, #tpu.memory_space<smem>>
      %927 = vector.extract_strided_slice %925 {offsets = [0, 0], sizes = [4, 16], strides = [1, 1]} : vector<10x16xf32> to vector<4x16xf32>
      %928 = vector.broadcast %926 : f32 to vector<4x16xf32>
      %929 = arith.mulf %928, %927 : vector<4x16xf32>
      %930 = arith.addf %923, %929 : vector<4x16xf32>
      %c156 = arith.constant 156 : index
      %931 = memref.load %arg1[%c156] : memref<294xf32, #tpu.memory_space<smem>>
      %932 = vector.extract_strided_slice %925 {offsets = [1, 0], sizes = [4, 16], strides = [1, 1]} : vector<10x16xf32> to vector<4x16xf32>
      %933 = vector.broadcast %931 : f32 to vector<4x16xf32>
      %934 = arith.mulf %933, %932 : vector<4x16xf32>
      %935 = arith.addf %930, %934 : vector<4x16xf32>
      %c163 = arith.constant 163 : index
      %936 = memref.load %arg1[%c163] : memref<294xf32, #tpu.memory_space<smem>>
      %937 = vector.extract_strided_slice %925 {offsets = [2, 0], sizes = [4, 16], strides = [1, 1]} : vector<10x16xf32> to vector<4x16xf32>
      %938 = vector.broadcast %936 : f32 to vector<4x16xf32>
      %939 = arith.mulf %938, %937 : vector<4x16xf32>
      %940 = arith.addf %935, %939 : vector<4x16xf32>
      %c170 = arith.constant 170 : index
      %941 = memref.load %arg1[%c170] : memref<294xf32, #tpu.memory_space<smem>>
      %942 = vector.extract_strided_slice %925 {offsets = [3, 0], sizes = [4, 16], strides = [1, 1]} : vector<10x16xf32> to vector<4x16xf32>
      %943 = vector.broadcast %941 : f32 to vector<4x16xf32>
      %944 = arith.mulf %943, %942 : vector<4x16xf32>
      %945 = arith.addf %940, %944 : vector<4x16xf32>
      %c177 = arith.constant 177 : index
      %946 = memref.load %arg1[%c177] : memref<294xf32, #tpu.memory_space<smem>>
      %947 = vector.extract_strided_slice %925 {offsets = [4, 0], sizes = [4, 16], strides = [1, 1]} : vector<10x16xf32> to vector<4x16xf32>
      %948 = vector.broadcast %946 : f32 to vector<4x16xf32>
      %949 = arith.mulf %948, %947 : vector<4x16xf32>
      %950 = arith.addf %945, %949 : vector<4x16xf32>
      %c184 = arith.constant 184 : index
      %951 = memref.load %arg1[%c184] : memref<294xf32, #tpu.memory_space<smem>>
      %952 = vector.extract_strided_slice %925 {offsets = [5, 0], sizes = [4, 16], strides = [1, 1]} : vector<10x16xf32> to vector<4x16xf32>
      %953 = vector.broadcast %951 : f32 to vector<4x16xf32>
      %954 = arith.mulf %953, %952 : vector<4x16xf32>
      %955 = arith.addf %950, %954 : vector<4x16xf32>
      %c191 = arith.constant 191 : index
      %956 = memref.load %arg1[%c191] : memref<294xf32, #tpu.memory_space<smem>>
      %957 = vector.extract_strided_slice %925 {offsets = [6, 0], sizes = [4, 16], strides = [1, 1]} : vector<10x16xf32> to vector<4x16xf32>
      %958 = vector.broadcast %956 : f32 to vector<4x16xf32>
      %959 = arith.mulf %958, %957 : vector<4x16xf32>
      %960 = arith.addf %955, %959 : vector<4x16xf32>
      %c1_158 = arith.constant 1 : index
      %c0_159 = arith.constant 0 : index
      %c3_160 = arith.constant 3 : index
      %961 = vector.load %arg6[%c1_158, %c0_159, %c3_160] : memref<2x10x22xf32, #tpu.memory_space<vmem>>, vector<1x10x16xf32>
      %962 = vector.shape_cast %961 : vector<1x10x16xf32> to vector<10x16xf32>
      %c150 = arith.constant 150 : index
      %963 = memref.load %arg1[%c150] : memref<294xf32, #tpu.memory_space<smem>>
      %964 = vector.extract_strided_slice %962 {offsets = [0, 0], sizes = [4, 16], strides = [1, 1]} : vector<10x16xf32> to vector<4x16xf32>
      %965 = vector.broadcast %963 : f32 to vector<4x16xf32>
      %966 = arith.mulf %965, %964 : vector<4x16xf32>
      %967 = arith.addf %960, %966 : vector<4x16xf32>
      %c157 = arith.constant 157 : index
      %968 = memref.load %arg1[%c157] : memref<294xf32, #tpu.memory_space<smem>>
      %969 = vector.extract_strided_slice %962 {offsets = [1, 0], sizes = [4, 16], strides = [1, 1]} : vector<10x16xf32> to vector<4x16xf32>
      %970 = vector.broadcast %968 : f32 to vector<4x16xf32>
      %971 = arith.mulf %970, %969 : vector<4x16xf32>
      %972 = arith.addf %967, %971 : vector<4x16xf32>
      %c164 = arith.constant 164 : index
      %973 = memref.load %arg1[%c164] : memref<294xf32, #tpu.memory_space<smem>>
      %974 = vector.extract_strided_slice %962 {offsets = [2, 0], sizes = [4, 16], strides = [1, 1]} : vector<10x16xf32> to vector<4x16xf32>
      %975 = vector.broadcast %973 : f32 to vector<4x16xf32>
      %976 = arith.mulf %975, %974 : vector<4x16xf32>
      %977 = arith.addf %972, %976 : vector<4x16xf32>
      %c171 = arith.constant 171 : index
      %978 = memref.load %arg1[%c171] : memref<294xf32, #tpu.memory_space<smem>>
      %979 = vector.extract_strided_slice %962 {offsets = [3, 0], sizes = [4, 16], strides = [1, 1]} : vector<10x16xf32> to vector<4x16xf32>
      %980 = vector.broadcast %978 : f32 to vector<4x16xf32>
      %981 = arith.mulf %980, %979 : vector<4x16xf32>
      %982 = arith.addf %977, %981 : vector<4x16xf32>
      %c178 = arith.constant 178 : index
      %983 = memref.load %arg1[%c178] : memref<294xf32, #tpu.memory_space<smem>>
      %984 = vector.extract_strided_slice %962 {offsets = [4, 0], sizes = [4, 16], strides = [1, 1]} : vector<10x16xf32> to vector<4x16xf32>
      %985 = vector.broadcast %983 : f32 to vector<4x16xf32>
      %986 = arith.mulf %985, %984 : vector<4x16xf32>
      %987 = arith.addf %982, %986 : vector<4x16xf32>
      %c185 = arith.constant 185 : index
      %988 = memref.load %arg1[%c185] : memref<294xf32, #tpu.memory_space<smem>>
      %989 = vector.extract_strided_slice %962 {offsets = [5, 0], sizes = [4, 16], strides = [1, 1]} : vector<10x16xf32> to vector<4x16xf32>
      %990 = vector.broadcast %988 : f32 to vector<4x16xf32>
      %991 = arith.mulf %990, %989 : vector<4x16xf32>
      %992 = arith.addf %987, %991 : vector<4x16xf32>
      %c192 = arith.constant 192 : index
      %993 = memref.load %arg1[%c192] : memref<294xf32, #tpu.memory_space<smem>>
      %994 = vector.extract_strided_slice %962 {offsets = [6, 0], sizes = [4, 16], strides = [1, 1]} : vector<10x16xf32> to vector<4x16xf32>
      %995 = vector.broadcast %993 : f32 to vector<4x16xf32>
      %996 = arith.mulf %995, %994 : vector<4x16xf32>
      %997 = arith.addf %992, %996 : vector<4x16xf32>
      %c1_161 = arith.constant 1 : index
      %c0_162 = arith.constant 0 : index
      %c4_163 = arith.constant 4 : index
      %998 = vector.load %arg6[%c1_161, %c0_162, %c4_163] : memref<2x10x22xf32, #tpu.memory_space<vmem>>, vector<1x10x16xf32>
      %999 = vector.shape_cast %998 : vector<1x10x16xf32> to vector<10x16xf32>
      %c151 = arith.constant 151 : index
      %1000 = memref.load %arg1[%c151] : memref<294xf32, #tpu.memory_space<smem>>
      %1001 = vector.extract_strided_slice %999 {offsets = [0, 0], sizes = [4, 16], strides = [1, 1]} : vector<10x16xf32> to vector<4x16xf32>
      %1002 = vector.broadcast %1000 : f32 to vector<4x16xf32>
      %1003 = arith.mulf %1002, %1001 : vector<4x16xf32>
      %1004 = arith.addf %997, %1003 : vector<4x16xf32>
      %c158 = arith.constant 158 : index
      %1005 = memref.load %arg1[%c158] : memref<294xf32, #tpu.memory_space<smem>>
      %1006 = vector.extract_strided_slice %999 {offsets = [1, 0], sizes = [4, 16], strides = [1, 1]} : vector<10x16xf32> to vector<4x16xf32>
      %1007 = vector.broadcast %1005 : f32 to vector<4x16xf32>
      %1008 = arith.mulf %1007, %1006 : vector<4x16xf32>
      %1009 = arith.addf %1004, %1008 : vector<4x16xf32>
      %c165 = arith.constant 165 : index
      %1010 = memref.load %arg1[%c165] : memref<294xf32, #tpu.memory_space<smem>>
      %1011 = vector.extract_strided_slice %999 {offsets = [2, 0], sizes = [4, 16], strides = [1, 1]} : vector<10x16xf32> to vector<4x16xf32>
      %1012 = vector.broadcast %1010 : f32 to vector<4x16xf32>
      %1013 = arith.mulf %1012, %1011 : vector<4x16xf32>
      %1014 = arith.addf %1009, %1013 : vector<4x16xf32>
      %c172 = arith.constant 172 : index
      %1015 = memref.load %arg1[%c172] : memref<294xf32, #tpu.memory_space<smem>>
      %1016 = vector.extract_strided_slice %999 {offsets = [3, 0], sizes = [4, 16], strides = [1, 1]} : vector<10x16xf32> to vector<4x16xf32>
      %1017 = vector.broadcast %1015 : f32 to vector<4x16xf32>
      %1018 = arith.mulf %1017, %1016 : vector<4x16xf32>
      %1019 = arith.addf %1014, %1018 : vector<4x16xf32>
      %c179 = arith.constant 179 : index
      %1020 = memref.load %arg1[%c179] : memref<294xf32, #tpu.memory_space<smem>>
      %1021 = vector.extract_strided_slice %999 {offsets = [4, 0], sizes = [4, 16], strides = [1, 1]} : vector<10x16xf32> to vector<4x16xf32>
      %1022 = vector.broadcast %1020 : f32 to vector<4x16xf32>
      %1023 = arith.mulf %1022, %1021 : vector<4x16xf32>
      %1024 = arith.addf %1019, %1023 : vector<4x16xf32>
      %c186 = arith.constant 186 : index
      %1025 = memref.load %arg1[%c186] : memref<294xf32, #tpu.memory_space<smem>>
      %1026 = vector.extract_strided_slice %999 {offsets = [5, 0], sizes = [4, 16], strides = [1, 1]} : vector<10x16xf32> to vector<4x16xf32>
      %1027 = vector.broadcast %1025 : f32 to vector<4x16xf32>
      %1028 = arith.mulf %1027, %1026 : vector<4x16xf32>
      %1029 = arith.addf %1024, %1028 : vector<4x16xf32>
      %c193 = arith.constant 193 : index
      %1030 = memref.load %arg1[%c193] : memref<294xf32, #tpu.memory_space<smem>>
      %1031 = vector.extract_strided_slice %999 {offsets = [6, 0], sizes = [4, 16], strides = [1, 1]} : vector<10x16xf32> to vector<4x16xf32>
      %1032 = vector.broadcast %1030 : f32 to vector<4x16xf32>
      %1033 = arith.mulf %1032, %1031 : vector<4x16xf32>
      %1034 = arith.addf %1029, %1033 : vector<4x16xf32>
      %c1_164 = arith.constant 1 : index
      %c0_165 = arith.constant 0 : index
      %c5_166 = arith.constant 5 : index
      %1035 = vector.load %arg6[%c1_164, %c0_165, %c5_166] : memref<2x10x22xf32, #tpu.memory_space<vmem>>, vector<1x10x16xf32>
      %1036 = vector.shape_cast %1035 : vector<1x10x16xf32> to vector<10x16xf32>
      %c152 = arith.constant 152 : index
      %1037 = memref.load %arg1[%c152] : memref<294xf32, #tpu.memory_space<smem>>
      %1038 = vector.extract_strided_slice %1036 {offsets = [0, 0], sizes = [4, 16], strides = [1, 1]} : vector<10x16xf32> to vector<4x16xf32>
      %1039 = vector.broadcast %1037 : f32 to vector<4x16xf32>
      %1040 = arith.mulf %1039, %1038 : vector<4x16xf32>
      %1041 = arith.addf %1034, %1040 : vector<4x16xf32>
      %c159 = arith.constant 159 : index
      %1042 = memref.load %arg1[%c159] : memref<294xf32, #tpu.memory_space<smem>>
      %1043 = vector.extract_strided_slice %1036 {offsets = [1, 0], sizes = [4, 16], strides = [1, 1]} : vector<10x16xf32> to vector<4x16xf32>
      %1044 = vector.broadcast %1042 : f32 to vector<4x16xf32>
      %1045 = arith.mulf %1044, %1043 : vector<4x16xf32>
      %1046 = arith.addf %1041, %1045 : vector<4x16xf32>
      %c166 = arith.constant 166 : index
      %1047 = memref.load %arg1[%c166] : memref<294xf32, #tpu.memory_space<smem>>
      %1048 = vector.extract_strided_slice %1036 {offsets = [2, 0], sizes = [4, 16], strides = [1, 1]} : vector<10x16xf32> to vector<4x16xf32>
      %1049 = vector.broadcast %1047 : f32 to vector<4x16xf32>
      %1050 = arith.mulf %1049, %1048 : vector<4x16xf32>
      %1051 = arith.addf %1046, %1050 : vector<4x16xf32>
      %c173 = arith.constant 173 : index
      %1052 = memref.load %arg1[%c173] : memref<294xf32, #tpu.memory_space<smem>>
      %1053 = vector.extract_strided_slice %1036 {offsets = [3, 0], sizes = [4, 16], strides = [1, 1]} : vector<10x16xf32> to vector<4x16xf32>
      %1054 = vector.broadcast %1052 : f32 to vector<4x16xf32>
      %1055 = arith.mulf %1054, %1053 : vector<4x16xf32>
      %1056 = arith.addf %1051, %1055 : vector<4x16xf32>
      %c180 = arith.constant 180 : index
      %1057 = memref.load %arg1[%c180] : memref<294xf32, #tpu.memory_space<smem>>
      %1058 = vector.extract_strided_slice %1036 {offsets = [4, 0], sizes = [4, 16], strides = [1, 1]} : vector<10x16xf32> to vector<4x16xf32>
      %1059 = vector.broadcast %1057 : f32 to vector<4x16xf32>
      %1060 = arith.mulf %1059, %1058 : vector<4x16xf32>
      %1061 = arith.addf %1056, %1060 : vector<4x16xf32>
      %c187 = arith.constant 187 : index
      %1062 = memref.load %arg1[%c187] : memref<294xf32, #tpu.memory_space<smem>>
      %1063 = vector.extract_strided_slice %1036 {offsets = [5, 0], sizes = [4, 16], strides = [1, 1]} : vector<10x16xf32> to vector<4x16xf32>
      %1064 = vector.broadcast %1062 : f32 to vector<4x16xf32>
      %1065 = arith.mulf %1064, %1063 : vector<4x16xf32>
      %1066 = arith.addf %1061, %1065 : vector<4x16xf32>
      %c194 = arith.constant 194 : index
      %1067 = memref.load %arg1[%c194] : memref<294xf32, #tpu.memory_space<smem>>
      %1068 = vector.extract_strided_slice %1036 {offsets = [6, 0], sizes = [4, 16], strides = [1, 1]} : vector<10x16xf32> to vector<4x16xf32>
      %1069 = vector.broadcast %1067 : f32 to vector<4x16xf32>
      %1070 = arith.mulf %1069, %1068 : vector<4x16xf32>
      %1071 = arith.addf %1066, %1070 : vector<4x16xf32>
      %c1_167 = arith.constant 1 : index
      %c0_168 = arith.constant 0 : index
      %c6_169 = arith.constant 6 : index
      %1072 = vector.load %arg6[%c1_167, %c0_168, %c6_169] : memref<2x10x22xf32, #tpu.memory_space<vmem>>, vector<1x10x16xf32>
      %1073 = vector.shape_cast %1072 : vector<1x10x16xf32> to vector<10x16xf32>
      %c153 = arith.constant 153 : index
      %1074 = memref.load %arg1[%c153] : memref<294xf32, #tpu.memory_space<smem>>
      %1075 = vector.extract_strided_slice %1073 {offsets = [0, 0], sizes = [4, 16], strides = [1, 1]} : vector<10x16xf32> to vector<4x16xf32>
      %1076 = vector.broadcast %1074 : f32 to vector<4x16xf32>
      %1077 = arith.mulf %1076, %1075 : vector<4x16xf32>
      %1078 = arith.addf %1071, %1077 : vector<4x16xf32>
      %c160 = arith.constant 160 : index
      %1079 = memref.load %arg1[%c160] : memref<294xf32, #tpu.memory_space<smem>>
      %1080 = vector.extract_strided_slice %1073 {offsets = [1, 0], sizes = [4, 16], strides = [1, 1]} : vector<10x16xf32> to vector<4x16xf32>
      %1081 = vector.broadcast %1079 : f32 to vector<4x16xf32>
      %1082 = arith.mulf %1081, %1080 : vector<4x16xf32>
      %1083 = arith.addf %1078, %1082 : vector<4x16xf32>
      %c167 = arith.constant 167 : index
      %1084 = memref.load %arg1[%c167] : memref<294xf32, #tpu.memory_space<smem>>
      %1085 = vector.extract_strided_slice %1073 {offsets = [2, 0], sizes = [4, 16], strides = [1, 1]} : vector<10x16xf32> to vector<4x16xf32>
      %1086 = vector.broadcast %1084 : f32 to vector<4x16xf32>
      %1087 = arith.mulf %1086, %1085 : vector<4x16xf32>
      %1088 = arith.addf %1083, %1087 : vector<4x16xf32>
      %c174 = arith.constant 174 : index
      %1089 = memref.load %arg1[%c174] : memref<294xf32, #tpu.memory_space<smem>>
      %1090 = vector.extract_strided_slice %1073 {offsets = [3, 0], sizes = [4, 16], strides = [1, 1]} : vector<10x16xf32> to vector<4x16xf32>
      %1091 = vector.broadcast %1089 : f32 to vector<4x16xf32>
      %1092 = arith.mulf %1091, %1090 : vector<4x16xf32>
      %1093 = arith.addf %1088, %1092 : vector<4x16xf32>
      %c181 = arith.constant 181 : index
      %1094 = memref.load %arg1[%c181] : memref<294xf32, #tpu.memory_space<smem>>
      %1095 = vector.extract_strided_slice %1073 {offsets = [4, 0], sizes = [4, 16], strides = [1, 1]} : vector<10x16xf32> to vector<4x16xf32>
      %1096 = vector.broadcast %1094 : f32 to vector<4x16xf32>
      %1097 = arith.mulf %1096, %1095 : vector<4x16xf32>
      %1098 = arith.addf %1093, %1097 : vector<4x16xf32>
      %c188 = arith.constant 188 : index
      %1099 = memref.load %arg1[%c188] : memref<294xf32, #tpu.memory_space<smem>>
      %1100 = vector.extract_strided_slice %1073 {offsets = [5, 0], sizes = [4, 16], strides = [1, 1]} : vector<10x16xf32> to vector<4x16xf32>
      %1101 = vector.broadcast %1099 : f32 to vector<4x16xf32>
      %1102 = arith.mulf %1101, %1100 : vector<4x16xf32>
      %1103 = arith.addf %1098, %1102 : vector<4x16xf32>
      %c195 = arith.constant 195 : index
      %1104 = memref.load %arg1[%c195] : memref<294xf32, #tpu.memory_space<smem>>
      %1105 = vector.extract_strided_slice %1073 {offsets = [6, 0], sizes = [4, 16], strides = [1, 1]} : vector<10x16xf32> to vector<4x16xf32>
      %1106 = vector.broadcast %1104 : f32 to vector<4x16xf32>
      %1107 = arith.mulf %1106, %1105 : vector<4x16xf32>
      %1108 = arith.addf %1103, %1107 : vector<4x16xf32>
      %1109 = vector.broadcast %589 : f32 to vector<4x16xf32>
      %1110 = arith.addf %1108, %1109 : vector<4x16xf32>
      %1111 = arith.negf %1110 : vector<4x16xf32>
      %1112 = math.exp %1111 : vector<4x16xf32>
      %cst_170 = arith.constant 1.000000e+00 : f32
      %1113 = vector.broadcast %cst_170 : f32 to vector<4x16xf32>
      %1114 = arith.addf %1113, %1112 : vector<4x16xf32>
      %1115 = arith.divf %1113, %1114 : vector<4x16xf32>
      %cst_171 = arith.constant 0.333333343 : f32
      %1116 = vector.broadcast %cst_171 : f32 to vector<4x16xf32>
      %1117 = arith.mulf %1115, %1116 : vector<4x16xf32>
      %c2_172 = arith.constant 2 : index
      %1118 = memref.load %arg2[%c2_172] : memref<3xf32, #tpu.memory_space<smem>>
      %cst_173 = arith.constant 0.000000e+00 : f32
      %1119 = vector.broadcast %cst_173 : f32 to vector<16x16xf32>
      %c0_174 = arith.constant 0 : index
      %c0_175 = arith.constant 0 : index
      %c0_176 = arith.constant 0 : index
      %1120 = vector.load %arg7[%c0_174, %c0_175, %c0_176] : memref<2x22x22xf32, #tpu.memory_space<vmem>>, vector<1x22x16xf32>
      %1121 = vector.shape_cast %1120 : vector<1x22x16xf32> to vector<22x16xf32>
      %c196 = arith.constant 196 : index
      %1122 = memref.load %arg1[%c196] : memref<294xf32, #tpu.memory_space<smem>>
      %1123 = vector.extract_strided_slice %1121 {offsets = [0, 0], sizes = [16, 16], strides = [1, 1]} : vector<22x16xf32> to vector<16x16xf32>
      %1124 = vector.broadcast %1122 : f32 to vector<16x16xf32>
      %1125 = arith.mulf %1124, %1123 : vector<16x16xf32>
      %1126 = arith.addf %1119, %1125 : vector<16x16xf32>
      %c203 = arith.constant 203 : index
      %1127 = memref.load %arg1[%c203] : memref<294xf32, #tpu.memory_space<smem>>
      %1128 = vector.extract_strided_slice %1121 {offsets = [1, 0], sizes = [16, 16], strides = [1, 1]} : vector<22x16xf32> to vector<16x16xf32>
      %1129 = vector.broadcast %1127 : f32 to vector<16x16xf32>
      %1130 = arith.mulf %1129, %1128 : vector<16x16xf32>
      %1131 = arith.addf %1126, %1130 : vector<16x16xf32>
      %c210 = arith.constant 210 : index
      %1132 = memref.load %arg1[%c210] : memref<294xf32, #tpu.memory_space<smem>>
      %1133 = vector.extract_strided_slice %1121 {offsets = [2, 0], sizes = [16, 16], strides = [1, 1]} : vector<22x16xf32> to vector<16x16xf32>
      %1134 = vector.broadcast %1132 : f32 to vector<16x16xf32>
      %1135 = arith.mulf %1134, %1133 : vector<16x16xf32>
      %1136 = arith.addf %1131, %1135 : vector<16x16xf32>
      %c217 = arith.constant 217 : index
      %1137 = memref.load %arg1[%c217] : memref<294xf32, #tpu.memory_space<smem>>
      %1138 = vector.extract_strided_slice %1121 {offsets = [3, 0], sizes = [16, 16], strides = [1, 1]} : vector<22x16xf32> to vector<16x16xf32>
      %1139 = vector.broadcast %1137 : f32 to vector<16x16xf32>
      %1140 = arith.mulf %1139, %1138 : vector<16x16xf32>
      %1141 = arith.addf %1136, %1140 : vector<16x16xf32>
      %c224 = arith.constant 224 : index
      %1142 = memref.load %arg1[%c224] : memref<294xf32, #tpu.memory_space<smem>>
      %1143 = vector.extract_strided_slice %1121 {offsets = [4, 0], sizes = [16, 16], strides = [1, 1]} : vector<22x16xf32> to vector<16x16xf32>
      %1144 = vector.broadcast %1142 : f32 to vector<16x16xf32>
      %1145 = arith.mulf %1144, %1143 : vector<16x16xf32>
      %1146 = arith.addf %1141, %1145 : vector<16x16xf32>
      %c231 = arith.constant 231 : index
      %1147 = memref.load %arg1[%c231] : memref<294xf32, #tpu.memory_space<smem>>
      %1148 = vector.extract_strided_slice %1121 {offsets = [5, 0], sizes = [16, 16], strides = [1, 1]} : vector<22x16xf32> to vector<16x16xf32>
      %1149 = vector.broadcast %1147 : f32 to vector<16x16xf32>
      %1150 = arith.mulf %1149, %1148 : vector<16x16xf32>
      %1151 = arith.addf %1146, %1150 : vector<16x16xf32>
      %c238 = arith.constant 238 : index
      %1152 = memref.load %arg1[%c238] : memref<294xf32, #tpu.memory_space<smem>>
      %1153 = vector.extract_strided_slice %1121 {offsets = [6, 0], sizes = [16, 16], strides = [1, 1]} : vector<22x16xf32> to vector<16x16xf32>
      %1154 = vector.broadcast %1152 : f32 to vector<16x16xf32>
      %1155 = arith.mulf %1154, %1153 : vector<16x16xf32>
      %1156 = arith.addf %1151, %1155 : vector<16x16xf32>
      %c0_177 = arith.constant 0 : index
      %c0_178 = arith.constant 0 : index
      %c1_179 = arith.constant 1 : index
      %1157 = vector.load %arg7[%c0_177, %c0_178, %c1_179] : memref<2x22x22xf32, #tpu.memory_space<vmem>>, vector<1x22x16xf32>
      %1158 = vector.shape_cast %1157 : vector<1x22x16xf32> to vector<22x16xf32>
      %c197 = arith.constant 197 : index
      %1159 = memref.load %arg1[%c197] : memref<294xf32, #tpu.memory_space<smem>>
      %1160 = vector.extract_strided_slice %1158 {offsets = [0, 0], sizes = [16, 16], strides = [1, 1]} : vector<22x16xf32> to vector<16x16xf32>
      %1161 = vector.broadcast %1159 : f32 to vector<16x16xf32>
      %1162 = arith.mulf %1161, %1160 : vector<16x16xf32>
      %1163 = arith.addf %1156, %1162 : vector<16x16xf32>
      %c204 = arith.constant 204 : index
      %1164 = memref.load %arg1[%c204] : memref<294xf32, #tpu.memory_space<smem>>
      %1165 = vector.extract_strided_slice %1158 {offsets = [1, 0], sizes = [16, 16], strides = [1, 1]} : vector<22x16xf32> to vector<16x16xf32>
      %1166 = vector.broadcast %1164 : f32 to vector<16x16xf32>
      %1167 = arith.mulf %1166, %1165 : vector<16x16xf32>
      %1168 = arith.addf %1163, %1167 : vector<16x16xf32>
      %c211 = arith.constant 211 : index
      %1169 = memref.load %arg1[%c211] : memref<294xf32, #tpu.memory_space<smem>>
      %1170 = vector.extract_strided_slice %1158 {offsets = [2, 0], sizes = [16, 16], strides = [1, 1]} : vector<22x16xf32> to vector<16x16xf32>
      %1171 = vector.broadcast %1169 : f32 to vector<16x16xf32>
      %1172 = arith.mulf %1171, %1170 : vector<16x16xf32>
      %1173 = arith.addf %1168, %1172 : vector<16x16xf32>
      %c218 = arith.constant 218 : index
      %1174 = memref.load %arg1[%c218] : memref<294xf32, #tpu.memory_space<smem>>
      %1175 = vector.extract_strided_slice %1158 {offsets = [3, 0], sizes = [16, 16], strides = [1, 1]} : vector<22x16xf32> to vector<16x16xf32>
      %1176 = vector.broadcast %1174 : f32 to vector<16x16xf32>
      %1177 = arith.mulf %1176, %1175 : vector<16x16xf32>
      %1178 = arith.addf %1173, %1177 : vector<16x16xf32>
      %c225 = arith.constant 225 : index
      %1179 = memref.load %arg1[%c225] : memref<294xf32, #tpu.memory_space<smem>>
      %1180 = vector.extract_strided_slice %1158 {offsets = [4, 0], sizes = [16, 16], strides = [1, 1]} : vector<22x16xf32> to vector<16x16xf32>
      %1181 = vector.broadcast %1179 : f32 to vector<16x16xf32>
      %1182 = arith.mulf %1181, %1180 : vector<16x16xf32>
      %1183 = arith.addf %1178, %1182 : vector<16x16xf32>
      %c232 = arith.constant 232 : index
      %1184 = memref.load %arg1[%c232] : memref<294xf32, #tpu.memory_space<smem>>
      %1185 = vector.extract_strided_slice %1158 {offsets = [5, 0], sizes = [16, 16], strides = [1, 1]} : vector<22x16xf32> to vector<16x16xf32>
      %1186 = vector.broadcast %1184 : f32 to vector<16x16xf32>
      %1187 = arith.mulf %1186, %1185 : vector<16x16xf32>
      %1188 = arith.addf %1183, %1187 : vector<16x16xf32>
      %c239 = arith.constant 239 : index
      %1189 = memref.load %arg1[%c239] : memref<294xf32, #tpu.memory_space<smem>>
      %1190 = vector.extract_strided_slice %1158 {offsets = [6, 0], sizes = [16, 16], strides = [1, 1]} : vector<22x16xf32> to vector<16x16xf32>
      %1191 = vector.broadcast %1189 : f32 to vector<16x16xf32>
      %1192 = arith.mulf %1191, %1190 : vector<16x16xf32>
      %1193 = arith.addf %1188, %1192 : vector<16x16xf32>
      %c0_180 = arith.constant 0 : index
      %c0_181 = arith.constant 0 : index
      %c2_182 = arith.constant 2 : index
      %1194 = vector.load %arg7[%c0_180, %c0_181, %c2_182] : memref<2x22x22xf32, #tpu.memory_space<vmem>>, vector<1x22x16xf32>
      %1195 = vector.shape_cast %1194 : vector<1x22x16xf32> to vector<22x16xf32>
      %c198 = arith.constant 198 : index
      %1196 = memref.load %arg1[%c198] : memref<294xf32, #tpu.memory_space<smem>>
      %1197 = vector.extract_strided_slice %1195 {offsets = [0, 0], sizes = [16, 16], strides = [1, 1]} : vector<22x16xf32> to vector<16x16xf32>
      %1198 = vector.broadcast %1196 : f32 to vector<16x16xf32>
      %1199 = arith.mulf %1198, %1197 : vector<16x16xf32>
      %1200 = arith.addf %1193, %1199 : vector<16x16xf32>
      %c205 = arith.constant 205 : index
      %1201 = memref.load %arg1[%c205] : memref<294xf32, #tpu.memory_space<smem>>
      %1202 = vector.extract_strided_slice %1195 {offsets = [1, 0], sizes = [16, 16], strides = [1, 1]} : vector<22x16xf32> to vector<16x16xf32>
      %1203 = vector.broadcast %1201 : f32 to vector<16x16xf32>
      %1204 = arith.mulf %1203, %1202 : vector<16x16xf32>
      %1205 = arith.addf %1200, %1204 : vector<16x16xf32>
      %c212 = arith.constant 212 : index
      %1206 = memref.load %arg1[%c212] : memref<294xf32, #tpu.memory_space<smem>>
      %1207 = vector.extract_strided_slice %1195 {offsets = [2, 0], sizes = [16, 16], strides = [1, 1]} : vector<22x16xf32> to vector<16x16xf32>
      %1208 = vector.broadcast %1206 : f32 to vector<16x16xf32>
      %1209 = arith.mulf %1208, %1207 : vector<16x16xf32>
      %1210 = arith.addf %1205, %1209 : vector<16x16xf32>
      %c219 = arith.constant 219 : index
      %1211 = memref.load %arg1[%c219] : memref<294xf32, #tpu.memory_space<smem>>
      %1212 = vector.extract_strided_slice %1195 {offsets = [3, 0], sizes = [16, 16], strides = [1, 1]} : vector<22x16xf32> to vector<16x16xf32>
      %1213 = vector.broadcast %1211 : f32 to vector<16x16xf32>
      %1214 = arith.mulf %1213, %1212 : vector<16x16xf32>
      %1215 = arith.addf %1210, %1214 : vector<16x16xf32>
      %c226 = arith.constant 226 : index
      %1216 = memref.load %arg1[%c226] : memref<294xf32, #tpu.memory_space<smem>>
      %1217 = vector.extract_strided_slice %1195 {offsets = [4, 0], sizes = [16, 16], strides = [1, 1]} : vector<22x16xf32> to vector<16x16xf32>
      %1218 = vector.broadcast %1216 : f32 to vector<16x16xf32>
      %1219 = arith.mulf %1218, %1217 : vector<16x16xf32>
      %1220 = arith.addf %1215, %1219 : vector<16x16xf32>
      %c233 = arith.constant 233 : index
      %1221 = memref.load %arg1[%c233] : memref<294xf32, #tpu.memory_space<smem>>
      %1222 = vector.extract_strided_slice %1195 {offsets = [5, 0], sizes = [16, 16], strides = [1, 1]} : vector<22x16xf32> to vector<16x16xf32>
      %1223 = vector.broadcast %1221 : f32 to vector<16x16xf32>
      %1224 = arith.mulf %1223, %1222 : vector<16x16xf32>
      %1225 = arith.addf %1220, %1224 : vector<16x16xf32>
      %c240 = arith.constant 240 : index
      %1226 = memref.load %arg1[%c240] : memref<294xf32, #tpu.memory_space<smem>>
      %1227 = vector.extract_strided_slice %1195 {offsets = [6, 0], sizes = [16, 16], strides = [1, 1]} : vector<22x16xf32> to vector<16x16xf32>
      %1228 = vector.broadcast %1226 : f32 to vector<16x16xf32>
      %1229 = arith.mulf %1228, %1227 : vector<16x16xf32>
      %1230 = arith.addf %1225, %1229 : vector<16x16xf32>
      %c0_183 = arith.constant 0 : index
      %c0_184 = arith.constant 0 : index
      %c3_185 = arith.constant 3 : index
      %1231 = vector.load %arg7[%c0_183, %c0_184, %c3_185] : memref<2x22x22xf32, #tpu.memory_space<vmem>>, vector<1x22x16xf32>
      %1232 = vector.shape_cast %1231 : vector<1x22x16xf32> to vector<22x16xf32>
      %c199 = arith.constant 199 : index
      %1233 = memref.load %arg1[%c199] : memref<294xf32, #tpu.memory_space<smem>>
      %1234 = vector.extract_strided_slice %1232 {offsets = [0, 0], sizes = [16, 16], strides = [1, 1]} : vector<22x16xf32> to vector<16x16xf32>
      %1235 = vector.broadcast %1233 : f32 to vector<16x16xf32>
      %1236 = arith.mulf %1235, %1234 : vector<16x16xf32>
      %1237 = arith.addf %1230, %1236 : vector<16x16xf32>
      %c206 = arith.constant 206 : index
      %1238 = memref.load %arg1[%c206] : memref<294xf32, #tpu.memory_space<smem>>
      %1239 = vector.extract_strided_slice %1232 {offsets = [1, 0], sizes = [16, 16], strides = [1, 1]} : vector<22x16xf32> to vector<16x16xf32>
      %1240 = vector.broadcast %1238 : f32 to vector<16x16xf32>
      %1241 = arith.mulf %1240, %1239 : vector<16x16xf32>
      %1242 = arith.addf %1237, %1241 : vector<16x16xf32>
      %c213 = arith.constant 213 : index
      %1243 = memref.load %arg1[%c213] : memref<294xf32, #tpu.memory_space<smem>>
      %1244 = vector.extract_strided_slice %1232 {offsets = [2, 0], sizes = [16, 16], strides = [1, 1]} : vector<22x16xf32> to vector<16x16xf32>
      %1245 = vector.broadcast %1243 : f32 to vector<16x16xf32>
      %1246 = arith.mulf %1245, %1244 : vector<16x16xf32>
      %1247 = arith.addf %1242, %1246 : vector<16x16xf32>
      %c220 = arith.constant 220 : index
      %1248 = memref.load %arg1[%c220] : memref<294xf32, #tpu.memory_space<smem>>
      %1249 = vector.extract_strided_slice %1232 {offsets = [3, 0], sizes = [16, 16], strides = [1, 1]} : vector<22x16xf32> to vector<16x16xf32>
      %1250 = vector.broadcast %1248 : f32 to vector<16x16xf32>
      %1251 = arith.mulf %1250, %1249 : vector<16x16xf32>
      %1252 = arith.addf %1247, %1251 : vector<16x16xf32>
      %c227 = arith.constant 227 : index
      %1253 = memref.load %arg1[%c227] : memref<294xf32, #tpu.memory_space<smem>>
      %1254 = vector.extract_strided_slice %1232 {offsets = [4, 0], sizes = [16, 16], strides = [1, 1]} : vector<22x16xf32> to vector<16x16xf32>
      %1255 = vector.broadcast %1253 : f32 to vector<16x16xf32>
      %1256 = arith.mulf %1255, %1254 : vector<16x16xf32>
      %1257 = arith.addf %1252, %1256 : vector<16x16xf32>
      %c234 = arith.constant 234 : index
      %1258 = memref.load %arg1[%c234] : memref<294xf32, #tpu.memory_space<smem>>
      %1259 = vector.extract_strided_slice %1232 {offsets = [5, 0], sizes = [16, 16], strides = [1, 1]} : vector<22x16xf32> to vector<16x16xf32>
      %1260 = vector.broadcast %1258 : f32 to vector<16x16xf32>
      %1261 = arith.mulf %1260, %1259 : vector<16x16xf32>
      %1262 = arith.addf %1257, %1261 : vector<16x16xf32>
      %c241 = arith.constant 241 : index
      %1263 = memref.load %arg1[%c241] : memref<294xf32, #tpu.memory_space<smem>>
      %1264 = vector.extract_strided_slice %1232 {offsets = [6, 0], sizes = [16, 16], strides = [1, 1]} : vector<22x16xf32> to vector<16x16xf32>
      %1265 = vector.broadcast %1263 : f32 to vector<16x16xf32>
      %1266 = arith.mulf %1265, %1264 : vector<16x16xf32>
      %1267 = arith.addf %1262, %1266 : vector<16x16xf32>
      %c0_186 = arith.constant 0 : index
      %c0_187 = arith.constant 0 : index
      %c4_188 = arith.constant 4 : index
      %1268 = vector.load %arg7[%c0_186, %c0_187, %c4_188] : memref<2x22x22xf32, #tpu.memory_space<vmem>>, vector<1x22x16xf32>
      %1269 = vector.shape_cast %1268 : vector<1x22x16xf32> to vector<22x16xf32>
      %c200 = arith.constant 200 : index
      %1270 = memref.load %arg1[%c200] : memref<294xf32, #tpu.memory_space<smem>>
      %1271 = vector.extract_strided_slice %1269 {offsets = [0, 0], sizes = [16, 16], strides = [1, 1]} : vector<22x16xf32> to vector<16x16xf32>
      %1272 = vector.broadcast %1270 : f32 to vector<16x16xf32>
      %1273 = arith.mulf %1272, %1271 : vector<16x16xf32>
      %1274 = arith.addf %1267, %1273 : vector<16x16xf32>
      %c207 = arith.constant 207 : index
      %1275 = memref.load %arg1[%c207] : memref<294xf32, #tpu.memory_space<smem>>
      %1276 = vector.extract_strided_slice %1269 {offsets = [1, 0], sizes = [16, 16], strides = [1, 1]} : vector<22x16xf32> to vector<16x16xf32>
      %1277 = vector.broadcast %1275 : f32 to vector<16x16xf32>
      %1278 = arith.mulf %1277, %1276 : vector<16x16xf32>
      %1279 = arith.addf %1274, %1278 : vector<16x16xf32>
      %c214 = arith.constant 214 : index
      %1280 = memref.load %arg1[%c214] : memref<294xf32, #tpu.memory_space<smem>>
      %1281 = vector.extract_strided_slice %1269 {offsets = [2, 0], sizes = [16, 16], strides = [1, 1]} : vector<22x16xf32> to vector<16x16xf32>
      %1282 = vector.broadcast %1280 : f32 to vector<16x16xf32>
      %1283 = arith.mulf %1282, %1281 : vector<16x16xf32>
      %1284 = arith.addf %1279, %1283 : vector<16x16xf32>
      %c221 = arith.constant 221 : index
      %1285 = memref.load %arg1[%c221] : memref<294xf32, #tpu.memory_space<smem>>
      %1286 = vector.extract_strided_slice %1269 {offsets = [3, 0], sizes = [16, 16], strides = [1, 1]} : vector<22x16xf32> to vector<16x16xf32>
      %1287 = vector.broadcast %1285 : f32 to vector<16x16xf32>
      %1288 = arith.mulf %1287, %1286 : vector<16x16xf32>
      %1289 = arith.addf %1284, %1288 : vector<16x16xf32>
      %c228 = arith.constant 228 : index
      %1290 = memref.load %arg1[%c228] : memref<294xf32, #tpu.memory_space<smem>>
      %1291 = vector.extract_strided_slice %1269 {offsets = [4, 0], sizes = [16, 16], strides = [1, 1]} : vector<22x16xf32> to vector<16x16xf32>
      %1292 = vector.broadcast %1290 : f32 to vector<16x16xf32>
      %1293 = arith.mulf %1292, %1291 : vector<16x16xf32>
      %1294 = arith.addf %1289, %1293 : vector<16x16xf32>
      %c235 = arith.constant 235 : index
      %1295 = memref.load %arg1[%c235] : memref<294xf32, #tpu.memory_space<smem>>
      %1296 = vector.extract_strided_slice %1269 {offsets = [5, 0], sizes = [16, 16], strides = [1, 1]} : vector<22x16xf32> to vector<16x16xf32>
      %1297 = vector.broadcast %1295 : f32 to vector<16x16xf32>
      %1298 = arith.mulf %1297, %1296 : vector<16x16xf32>
      %1299 = arith.addf %1294, %1298 : vector<16x16xf32>
      %c242 = arith.constant 242 : index
      %1300 = memref.load %arg1[%c242] : memref<294xf32, #tpu.memory_space<smem>>
      %1301 = vector.extract_strided_slice %1269 {offsets = [6, 0], sizes = [16, 16], strides = [1, 1]} : vector<22x16xf32> to vector<16x16xf32>
      %1302 = vector.broadcast %1300 : f32 to vector<16x16xf32>
      %1303 = arith.mulf %1302, %1301 : vector<16x16xf32>
      %1304 = arith.addf %1299, %1303 : vector<16x16xf32>
      %c0_189 = arith.constant 0 : index
      %c0_190 = arith.constant 0 : index
      %c5_191 = arith.constant 5 : index
      %1305 = vector.load %arg7[%c0_189, %c0_190, %c5_191] : memref<2x22x22xf32, #tpu.memory_space<vmem>>, vector<1x22x16xf32>
      %1306 = vector.shape_cast %1305 : vector<1x22x16xf32> to vector<22x16xf32>
      %c201 = arith.constant 201 : index
      %1307 = memref.load %arg1[%c201] : memref<294xf32, #tpu.memory_space<smem>>
      %1308 = vector.extract_strided_slice %1306 {offsets = [0, 0], sizes = [16, 16], strides = [1, 1]} : vector<22x16xf32> to vector<16x16xf32>
      %1309 = vector.broadcast %1307 : f32 to vector<16x16xf32>
      %1310 = arith.mulf %1309, %1308 : vector<16x16xf32>
      %1311 = arith.addf %1304, %1310 : vector<16x16xf32>
      %c208 = arith.constant 208 : index
      %1312 = memref.load %arg1[%c208] : memref<294xf32, #tpu.memory_space<smem>>
      %1313 = vector.extract_strided_slice %1306 {offsets = [1, 0], sizes = [16, 16], strides = [1, 1]} : vector<22x16xf32> to vector<16x16xf32>
      %1314 = vector.broadcast %1312 : f32 to vector<16x16xf32>
      %1315 = arith.mulf %1314, %1313 : vector<16x16xf32>
      %1316 = arith.addf %1311, %1315 : vector<16x16xf32>
      %c215 = arith.constant 215 : index
      %1317 = memref.load %arg1[%c215] : memref<294xf32, #tpu.memory_space<smem>>
      %1318 = vector.extract_strided_slice %1306 {offsets = [2, 0], sizes = [16, 16], strides = [1, 1]} : vector<22x16xf32> to vector<16x16xf32>
      %1319 = vector.broadcast %1317 : f32 to vector<16x16xf32>
      %1320 = arith.mulf %1319, %1318 : vector<16x16xf32>
      %1321 = arith.addf %1316, %1320 : vector<16x16xf32>
      %c222 = arith.constant 222 : index
      %1322 = memref.load %arg1[%c222] : memref<294xf32, #tpu.memory_space<smem>>
      %1323 = vector.extract_strided_slice %1306 {offsets = [3, 0], sizes = [16, 16], strides = [1, 1]} : vector<22x16xf32> to vector<16x16xf32>
      %1324 = vector.broadcast %1322 : f32 to vector<16x16xf32>
      %1325 = arith.mulf %1324, %1323 : vector<16x16xf32>
      %1326 = arith.addf %1321, %1325 : vector<16x16xf32>
      %c229 = arith.constant 229 : index
      %1327 = memref.load %arg1[%c229] : memref<294xf32, #tpu.memory_space<smem>>
      %1328 = vector.extract_strided_slice %1306 {offsets = [4, 0], sizes = [16, 16], strides = [1, 1]} : vector<22x16xf32> to vector<16x16xf32>
      %1329 = vector.broadcast %1327 : f32 to vector<16x16xf32>
      %1330 = arith.mulf %1329, %1328 : vector<16x16xf32>
      %1331 = arith.addf %1326, %1330 : vector<16x16xf32>
      %c236 = arith.constant 236 : index
      %1332 = memref.load %arg1[%c236] : memref<294xf32, #tpu.memory_space<smem>>
      %1333 = vector.extract_strided_slice %1306 {offsets = [5, 0], sizes = [16, 16], strides = [1, 1]} : vector<22x16xf32> to vector<16x16xf32>
      %1334 = vector.broadcast %1332 : f32 to vector<16x16xf32>
      %1335 = arith.mulf %1334, %1333 : vector<16x16xf32>
      %1336 = arith.addf %1331, %1335 : vector<16x16xf32>
      %c243 = arith.constant 243 : index
      %1337 = memref.load %arg1[%c243] : memref<294xf32, #tpu.memory_space<smem>>
      %1338 = vector.extract_strided_slice %1306 {offsets = [6, 0], sizes = [16, 16], strides = [1, 1]} : vector<22x16xf32> to vector<16x16xf32>
      %1339 = vector.broadcast %1337 : f32 to vector<16x16xf32>
      %1340 = arith.mulf %1339, %1338 : vector<16x16xf32>
      %1341 = arith.addf %1336, %1340 : vector<16x16xf32>
      %c0_192 = arith.constant 0 : index
      %c0_193 = arith.constant 0 : index
      %c6_194 = arith.constant 6 : index
      %1342 = vector.load %arg7[%c0_192, %c0_193, %c6_194] : memref<2x22x22xf32, #tpu.memory_space<vmem>>, vector<1x22x16xf32>
      %1343 = vector.shape_cast %1342 : vector<1x22x16xf32> to vector<22x16xf32>
      %c202 = arith.constant 202 : index
      %1344 = memref.load %arg1[%c202] : memref<294xf32, #tpu.memory_space<smem>>
      %1345 = vector.extract_strided_slice %1343 {offsets = [0, 0], sizes = [16, 16], strides = [1, 1]} : vector<22x16xf32> to vector<16x16xf32>
      %1346 = vector.broadcast %1344 : f32 to vector<16x16xf32>
      %1347 = arith.mulf %1346, %1345 : vector<16x16xf32>
      %1348 = arith.addf %1341, %1347 : vector<16x16xf32>
      %c209 = arith.constant 209 : index
      %1349 = memref.load %arg1[%c209] : memref<294xf32, #tpu.memory_space<smem>>
      %1350 = vector.extract_strided_slice %1343 {offsets = [1, 0], sizes = [16, 16], strides = [1, 1]} : vector<22x16xf32> to vector<16x16xf32>
      %1351 = vector.broadcast %1349 : f32 to vector<16x16xf32>
      %1352 = arith.mulf %1351, %1350 : vector<16x16xf32>
      %1353 = arith.addf %1348, %1352 : vector<16x16xf32>
      %c216 = arith.constant 216 : index
      %1354 = memref.load %arg1[%c216] : memref<294xf32, #tpu.memory_space<smem>>
      %1355 = vector.extract_strided_slice %1343 {offsets = [2, 0], sizes = [16, 16], strides = [1, 1]} : vector<22x16xf32> to vector<16x16xf32>
      %1356 = vector.broadcast %1354 : f32 to vector<16x16xf32>
      %1357 = arith.mulf %1356, %1355 : vector<16x16xf32>
      %1358 = arith.addf %1353, %1357 : vector<16x16xf32>
      %c223 = arith.constant 223 : index
      %1359 = memref.load %arg1[%c223] : memref<294xf32, #tpu.memory_space<smem>>
      %1360 = vector.extract_strided_slice %1343 {offsets = [3, 0], sizes = [16, 16], strides = [1, 1]} : vector<22x16xf32> to vector<16x16xf32>
      %1361 = vector.broadcast %1359 : f32 to vector<16x16xf32>
      %1362 = arith.mulf %1361, %1360 : vector<16x16xf32>
      %1363 = arith.addf %1358, %1362 : vector<16x16xf32>
      %c230 = arith.constant 230 : index
      %1364 = memref.load %arg1[%c230] : memref<294xf32, #tpu.memory_space<smem>>
      %1365 = vector.extract_strided_slice %1343 {offsets = [4, 0], sizes = [16, 16], strides = [1, 1]} : vector<22x16xf32> to vector<16x16xf32>
      %1366 = vector.broadcast %1364 : f32 to vector<16x16xf32>
      %1367 = arith.mulf %1366, %1365 : vector<16x16xf32>
      %1368 = arith.addf %1363, %1367 : vector<16x16xf32>
      %c237 = arith.constant 237 : index
      %1369 = memref.load %arg1[%c237] : memref<294xf32, #tpu.memory_space<smem>>
      %1370 = vector.extract_strided_slice %1343 {offsets = [5, 0], sizes = [16, 16], strides = [1, 1]} : vector<22x16xf32> to vector<16x16xf32>
      %1371 = vector.broadcast %1369 : f32 to vector<16x16xf32>
      %1372 = arith.mulf %1371, %1370 : vector<16x16xf32>
      %1373 = arith.addf %1368, %1372 : vector<16x16xf32>
      %c244 = arith.constant 244 : index
      %1374 = memref.load %arg1[%c244] : memref<294xf32, #tpu.memory_space<smem>>
      %1375 = vector.extract_strided_slice %1343 {offsets = [6, 0], sizes = [16, 16], strides = [1, 1]} : vector<22x16xf32> to vector<16x16xf32>
      %1376 = vector.broadcast %1374 : f32 to vector<16x16xf32>
      %1377 = arith.mulf %1376, %1375 : vector<16x16xf32>
      %1378 = arith.addf %1373, %1377 : vector<16x16xf32>
      %c1_195 = arith.constant 1 : index
      %c0_196 = arith.constant 0 : index
      %c0_197 = arith.constant 0 : index
      %1379 = vector.load %arg7[%c1_195, %c0_196, %c0_197] : memref<2x22x22xf32, #tpu.memory_space<vmem>>, vector<1x22x16xf32>
      %1380 = vector.shape_cast %1379 : vector<1x22x16xf32> to vector<22x16xf32>
      %c245 = arith.constant 245 : index
      %1381 = memref.load %arg1[%c245] : memref<294xf32, #tpu.memory_space<smem>>
      %1382 = vector.extract_strided_slice %1380 {offsets = [0, 0], sizes = [16, 16], strides = [1, 1]} : vector<22x16xf32> to vector<16x16xf32>
      %1383 = vector.broadcast %1381 : f32 to vector<16x16xf32>
      %1384 = arith.mulf %1383, %1382 : vector<16x16xf32>
      %1385 = arith.addf %1378, %1384 : vector<16x16xf32>
      %c252 = arith.constant 252 : index
      %1386 = memref.load %arg1[%c252] : memref<294xf32, #tpu.memory_space<smem>>
      %1387 = vector.extract_strided_slice %1380 {offsets = [1, 0], sizes = [16, 16], strides = [1, 1]} : vector<22x16xf32> to vector<16x16xf32>
      %1388 = vector.broadcast %1386 : f32 to vector<16x16xf32>
      %1389 = arith.mulf %1388, %1387 : vector<16x16xf32>
      %1390 = arith.addf %1385, %1389 : vector<16x16xf32>
      %c259 = arith.constant 259 : index
      %1391 = memref.load %arg1[%c259] : memref<294xf32, #tpu.memory_space<smem>>
      %1392 = vector.extract_strided_slice %1380 {offsets = [2, 0], sizes = [16, 16], strides = [1, 1]} : vector<22x16xf32> to vector<16x16xf32>
      %1393 = vector.broadcast %1391 : f32 to vector<16x16xf32>
      %1394 = arith.mulf %1393, %1392 : vector<16x16xf32>
      %1395 = arith.addf %1390, %1394 : vector<16x16xf32>
      %c266 = arith.constant 266 : index
      %1396 = memref.load %arg1[%c266] : memref<294xf32, #tpu.memory_space<smem>>
      %1397 = vector.extract_strided_slice %1380 {offsets = [3, 0], sizes = [16, 16], strides = [1, 1]} : vector<22x16xf32> to vector<16x16xf32>
      %1398 = vector.broadcast %1396 : f32 to vector<16x16xf32>
      %1399 = arith.mulf %1398, %1397 : vector<16x16xf32>
      %1400 = arith.addf %1395, %1399 : vector<16x16xf32>
      %c273 = arith.constant 273 : index
      %1401 = memref.load %arg1[%c273] : memref<294xf32, #tpu.memory_space<smem>>
      %1402 = vector.extract_strided_slice %1380 {offsets = [4, 0], sizes = [16, 16], strides = [1, 1]} : vector<22x16xf32> to vector<16x16xf32>
      %1403 = vector.broadcast %1401 : f32 to vector<16x16xf32>
      %1404 = arith.mulf %1403, %1402 : vector<16x16xf32>
      %1405 = arith.addf %1400, %1404 : vector<16x16xf32>
      %c280 = arith.constant 280 : index
      %1406 = memref.load %arg1[%c280] : memref<294xf32, #tpu.memory_space<smem>>
      %1407 = vector.extract_strided_slice %1380 {offsets = [5, 0], sizes = [16, 16], strides = [1, 1]} : vector<22x16xf32> to vector<16x16xf32>
      %1408 = vector.broadcast %1406 : f32 to vector<16x16xf32>
      %1409 = arith.mulf %1408, %1407 : vector<16x16xf32>
      %1410 = arith.addf %1405, %1409 : vector<16x16xf32>
      %c287 = arith.constant 287 : index
      %1411 = memref.load %arg1[%c287] : memref<294xf32, #tpu.memory_space<smem>>
      %1412 = vector.extract_strided_slice %1380 {offsets = [6, 0], sizes = [16, 16], strides = [1, 1]} : vector<22x16xf32> to vector<16x16xf32>
      %1413 = vector.broadcast %1411 : f32 to vector<16x16xf32>
      %1414 = arith.mulf %1413, %1412 : vector<16x16xf32>
      %1415 = arith.addf %1410, %1414 : vector<16x16xf32>
      %c1_198 = arith.constant 1 : index
      %c0_199 = arith.constant 0 : index
      %c1_200 = arith.constant 1 : index
      %1416 = vector.load %arg7[%c1_198, %c0_199, %c1_200] : memref<2x22x22xf32, #tpu.memory_space<vmem>>, vector<1x22x16xf32>
      %1417 = vector.shape_cast %1416 : vector<1x22x16xf32> to vector<22x16xf32>
      %c246 = arith.constant 246 : index
      %1418 = memref.load %arg1[%c246] : memref<294xf32, #tpu.memory_space<smem>>
      %1419 = vector.extract_strided_slice %1417 {offsets = [0, 0], sizes = [16, 16], strides = [1, 1]} : vector<22x16xf32> to vector<16x16xf32>
      %1420 = vector.broadcast %1418 : f32 to vector<16x16xf32>
      %1421 = arith.mulf %1420, %1419 : vector<16x16xf32>
      %1422 = arith.addf %1415, %1421 : vector<16x16xf32>
      %c253 = arith.constant 253 : index
      %1423 = memref.load %arg1[%c253] : memref<294xf32, #tpu.memory_space<smem>>
      %1424 = vector.extract_strided_slice %1417 {offsets = [1, 0], sizes = [16, 16], strides = [1, 1]} : vector<22x16xf32> to vector<16x16xf32>
      %1425 = vector.broadcast %1423 : f32 to vector<16x16xf32>
      %1426 = arith.mulf %1425, %1424 : vector<16x16xf32>
      %1427 = arith.addf %1422, %1426 : vector<16x16xf32>
      %c260 = arith.constant 260 : index
      %1428 = memref.load %arg1[%c260] : memref<294xf32, #tpu.memory_space<smem>>
      %1429 = vector.extract_strided_slice %1417 {offsets = [2, 0], sizes = [16, 16], strides = [1, 1]} : vector<22x16xf32> to vector<16x16xf32>
      %1430 = vector.broadcast %1428 : f32 to vector<16x16xf32>
      %1431 = arith.mulf %1430, %1429 : vector<16x16xf32>
      %1432 = arith.addf %1427, %1431 : vector<16x16xf32>
      %c267 = arith.constant 267 : index
      %1433 = memref.load %arg1[%c267] : memref<294xf32, #tpu.memory_space<smem>>
      %1434 = vector.extract_strided_slice %1417 {offsets = [3, 0], sizes = [16, 16], strides = [1, 1]} : vector<22x16xf32> to vector<16x16xf32>
      %1435 = vector.broadcast %1433 : f32 to vector<16x16xf32>
      %1436 = arith.mulf %1435, %1434 : vector<16x16xf32>
      %1437 = arith.addf %1432, %1436 : vector<16x16xf32>
      %c274 = arith.constant 274 : index
      %1438 = memref.load %arg1[%c274] : memref<294xf32, #tpu.memory_space<smem>>
      %1439 = vector.extract_strided_slice %1417 {offsets = [4, 0], sizes = [16, 16], strides = [1, 1]} : vector<22x16xf32> to vector<16x16xf32>
      %1440 = vector.broadcast %1438 : f32 to vector<16x16xf32>
      %1441 = arith.mulf %1440, %1439 : vector<16x16xf32>
      %1442 = arith.addf %1437, %1441 : vector<16x16xf32>
      %c281 = arith.constant 281 : index
      %1443 = memref.load %arg1[%c281] : memref<294xf32, #tpu.memory_space<smem>>
      %1444 = vector.extract_strided_slice %1417 {offsets = [5, 0], sizes = [16, 16], strides = [1, 1]} : vector<22x16xf32> to vector<16x16xf32>
      %1445 = vector.broadcast %1443 : f32 to vector<16x16xf32>
      %1446 = arith.mulf %1445, %1444 : vector<16x16xf32>
      %1447 = arith.addf %1442, %1446 : vector<16x16xf32>
      %c288 = arith.constant 288 : index
      %1448 = memref.load %arg1[%c288] : memref<294xf32, #tpu.memory_space<smem>>
      %1449 = vector.extract_strided_slice %1417 {offsets = [6, 0], sizes = [16, 16], strides = [1, 1]} : vector<22x16xf32> to vector<16x16xf32>
      %1450 = vector.broadcast %1448 : f32 to vector<16x16xf32>
      %1451 = arith.mulf %1450, %1449 : vector<16x16xf32>
      %1452 = arith.addf %1447, %1451 : vector<16x16xf32>
      %c1_201 = arith.constant 1 : index
      %c0_202 = arith.constant 0 : index
      %c2_203 = arith.constant 2 : index
      %1453 = vector.load %arg7[%c1_201, %c0_202, %c2_203] : memref<2x22x22xf32, #tpu.memory_space<vmem>>, vector<1x22x16xf32>
      %1454 = vector.shape_cast %1453 : vector<1x22x16xf32> to vector<22x16xf32>
      %c247 = arith.constant 247 : index
      %1455 = memref.load %arg1[%c247] : memref<294xf32, #tpu.memory_space<smem>>
      %1456 = vector.extract_strided_slice %1454 {offsets = [0, 0], sizes = [16, 16], strides = [1, 1]} : vector<22x16xf32> to vector<16x16xf32>
      %1457 = vector.broadcast %1455 : f32 to vector<16x16xf32>
      %1458 = arith.mulf %1457, %1456 : vector<16x16xf32>
      %1459 = arith.addf %1452, %1458 : vector<16x16xf32>
      %c254 = arith.constant 254 : index
      %1460 = memref.load %arg1[%c254] : memref<294xf32, #tpu.memory_space<smem>>
      %1461 = vector.extract_strided_slice %1454 {offsets = [1, 0], sizes = [16, 16], strides = [1, 1]} : vector<22x16xf32> to vector<16x16xf32>
      %1462 = vector.broadcast %1460 : f32 to vector<16x16xf32>
      %1463 = arith.mulf %1462, %1461 : vector<16x16xf32>
      %1464 = arith.addf %1459, %1463 : vector<16x16xf32>
      %c261 = arith.constant 261 : index
      %1465 = memref.load %arg1[%c261] : memref<294xf32, #tpu.memory_space<smem>>
      %1466 = vector.extract_strided_slice %1454 {offsets = [2, 0], sizes = [16, 16], strides = [1, 1]} : vector<22x16xf32> to vector<16x16xf32>
      %1467 = vector.broadcast %1465 : f32 to vector<16x16xf32>
      %1468 = arith.mulf %1467, %1466 : vector<16x16xf32>
      %1469 = arith.addf %1464, %1468 : vector<16x16xf32>
      %c268 = arith.constant 268 : index
      %1470 = memref.load %arg1[%c268] : memref<294xf32, #tpu.memory_space<smem>>
      %1471 = vector.extract_strided_slice %1454 {offsets = [3, 0], sizes = [16, 16], strides = [1, 1]} : vector<22x16xf32> to vector<16x16xf32>
      %1472 = vector.broadcast %1470 : f32 to vector<16x16xf32>
      %1473 = arith.mulf %1472, %1471 : vector<16x16xf32>
      %1474 = arith.addf %1469, %1473 : vector<16x16xf32>
      %c275 = arith.constant 275 : index
      %1475 = memref.load %arg1[%c275] : memref<294xf32, #tpu.memory_space<smem>>
      %1476 = vector.extract_strided_slice %1454 {offsets = [4, 0], sizes = [16, 16], strides = [1, 1]} : vector<22x16xf32> to vector<16x16xf32>
      %1477 = vector.broadcast %1475 : f32 to vector<16x16xf32>
      %1478 = arith.mulf %1477, %1476 : vector<16x16xf32>
      %1479 = arith.addf %1474, %1478 : vector<16x16xf32>
      %c282 = arith.constant 282 : index
      %1480 = memref.load %arg1[%c282] : memref<294xf32, #tpu.memory_space<smem>>
      %1481 = vector.extract_strided_slice %1454 {offsets = [5, 0], sizes = [16, 16], strides = [1, 1]} : vector<22x16xf32> to vector<16x16xf32>
      %1482 = vector.broadcast %1480 : f32 to vector<16x16xf32>
      %1483 = arith.mulf %1482, %1481 : vector<16x16xf32>
      %1484 = arith.addf %1479, %1483 : vector<16x16xf32>
      %c289 = arith.constant 289 : index
      %1485 = memref.load %arg1[%c289] : memref<294xf32, #tpu.memory_space<smem>>
      %1486 = vector.extract_strided_slice %1454 {offsets = [6, 0], sizes = [16, 16], strides = [1, 1]} : vector<22x16xf32> to vector<16x16xf32>
      %1487 = vector.broadcast %1485 : f32 to vector<16x16xf32>
      %1488 = arith.mulf %1487, %1486 : vector<16x16xf32>
      %1489 = arith.addf %1484, %1488 : vector<16x16xf32>
      %c1_204 = arith.constant 1 : index
      %c0_205 = arith.constant 0 : index
      %c3_206 = arith.constant 3 : index
      %1490 = vector.load %arg7[%c1_204, %c0_205, %c3_206] : memref<2x22x22xf32, #tpu.memory_space<vmem>>, vector<1x22x16xf32>
      %1491 = vector.shape_cast %1490 : vector<1x22x16xf32> to vector<22x16xf32>
      %c248 = arith.constant 248 : index
      %1492 = memref.load %arg1[%c248] : memref<294xf32, #tpu.memory_space<smem>>
      %1493 = vector.extract_strided_slice %1491 {offsets = [0, 0], sizes = [16, 16], strides = [1, 1]} : vector<22x16xf32> to vector<16x16xf32>
      %1494 = vector.broadcast %1492 : f32 to vector<16x16xf32>
      %1495 = arith.mulf %1494, %1493 : vector<16x16xf32>
      %1496 = arith.addf %1489, %1495 : vector<16x16xf32>
      %c255 = arith.constant 255 : index
      %1497 = memref.load %arg1[%c255] : memref<294xf32, #tpu.memory_space<smem>>
      %1498 = vector.extract_strided_slice %1491 {offsets = [1, 0], sizes = [16, 16], strides = [1, 1]} : vector<22x16xf32> to vector<16x16xf32>
      %1499 = vector.broadcast %1497 : f32 to vector<16x16xf32>
      %1500 = arith.mulf %1499, %1498 : vector<16x16xf32>
      %1501 = arith.addf %1496, %1500 : vector<16x16xf32>
      %c262 = arith.constant 262 : index
      %1502 = memref.load %arg1[%c262] : memref<294xf32, #tpu.memory_space<smem>>
      %1503 = vector.extract_strided_slice %1491 {offsets = [2, 0], sizes = [16, 16], strides = [1, 1]} : vector<22x16xf32> to vector<16x16xf32>
      %1504 = vector.broadcast %1502 : f32 to vector<16x16xf32>
      %1505 = arith.mulf %1504, %1503 : vector<16x16xf32>
      %1506 = arith.addf %1501, %1505 : vector<16x16xf32>
      %c269 = arith.constant 269 : index
      %1507 = memref.load %arg1[%c269] : memref<294xf32, #tpu.memory_space<smem>>
      %1508 = vector.extract_strided_slice %1491 {offsets = [3, 0], sizes = [16, 16], strides = [1, 1]} : vector<22x16xf32> to vector<16x16xf32>
      %1509 = vector.broadcast %1507 : f32 to vector<16x16xf32>
      %1510 = arith.mulf %1509, %1508 : vector<16x16xf32>
      %1511 = arith.addf %1506, %1510 : vector<16x16xf32>
      %c276 = arith.constant 276 : index
      %1512 = memref.load %arg1[%c276] : memref<294xf32, #tpu.memory_space<smem>>
      %1513 = vector.extract_strided_slice %1491 {offsets = [4, 0], sizes = [16, 16], strides = [1, 1]} : vector<22x16xf32> to vector<16x16xf32>
      %1514 = vector.broadcast %1512 : f32 to vector<16x16xf32>
      %1515 = arith.mulf %1514, %1513 : vector<16x16xf32>
      %1516 = arith.addf %1511, %1515 : vector<16x16xf32>
      %c283 = arith.constant 283 : index
      %1517 = memref.load %arg1[%c283] : memref<294xf32, #tpu.memory_space<smem>>
      %1518 = vector.extract_strided_slice %1491 {offsets = [5, 0], sizes = [16, 16], strides = [1, 1]} : vector<22x16xf32> to vector<16x16xf32>
      %1519 = vector.broadcast %1517 : f32 to vector<16x16xf32>
      %1520 = arith.mulf %1519, %1518 : vector<16x16xf32>
      %1521 = arith.addf %1516, %1520 : vector<16x16xf32>
      %c290 = arith.constant 290 : index
      %1522 = memref.load %arg1[%c290] : memref<294xf32, #tpu.memory_space<smem>>
      %1523 = vector.extract_strided_slice %1491 {offsets = [6, 0], sizes = [16, 16], strides = [1, 1]} : vector<22x16xf32> to vector<16x16xf32>
      %1524 = vector.broadcast %1522 : f32 to vector<16x16xf32>
      %1525 = arith.mulf %1524, %1523 : vector<16x16xf32>
      %1526 = arith.addf %1521, %1525 : vector<16x16xf32>
      %c1_207 = arith.constant 1 : index
      %c0_208 = arith.constant 0 : index
      %c4_209 = arith.constant 4 : index
      %1527 = vector.load %arg7[%c1_207, %c0_208, %c4_209] : memref<2x22x22xf32, #tpu.memory_space<vmem>>, vector<1x22x16xf32>
      %1528 = vector.shape_cast %1527 : vector<1x22x16xf32> to vector<22x16xf32>
      %c249 = arith.constant 249 : index
      %1529 = memref.load %arg1[%c249] : memref<294xf32, #tpu.memory_space<smem>>
      %1530 = vector.extract_strided_slice %1528 {offsets = [0, 0], sizes = [16, 16], strides = [1, 1]} : vector<22x16xf32> to vector<16x16xf32>
      %1531 = vector.broadcast %1529 : f32 to vector<16x16xf32>
      %1532 = arith.mulf %1531, %1530 : vector<16x16xf32>
      %1533 = arith.addf %1526, %1532 : vector<16x16xf32>
      %c256 = arith.constant 256 : index
      %1534 = memref.load %arg1[%c256] : memref<294xf32, #tpu.memory_space<smem>>
      %1535 = vector.extract_strided_slice %1528 {offsets = [1, 0], sizes = [16, 16], strides = [1, 1]} : vector<22x16xf32> to vector<16x16xf32>
      %1536 = vector.broadcast %1534 : f32 to vector<16x16xf32>
      %1537 = arith.mulf %1536, %1535 : vector<16x16xf32>
      %1538 = arith.addf %1533, %1537 : vector<16x16xf32>
      %c263 = arith.constant 263 : index
      %1539 = memref.load %arg1[%c263] : memref<294xf32, #tpu.memory_space<smem>>
      %1540 = vector.extract_strided_slice %1528 {offsets = [2, 0], sizes = [16, 16], strides = [1, 1]} : vector<22x16xf32> to vector<16x16xf32>
      %1541 = vector.broadcast %1539 : f32 to vector<16x16xf32>
      %1542 = arith.mulf %1541, %1540 : vector<16x16xf32>
      %1543 = arith.addf %1538, %1542 : vector<16x16xf32>
      %c270 = arith.constant 270 : index
      %1544 = memref.load %arg1[%c270] : memref<294xf32, #tpu.memory_space<smem>>
      %1545 = vector.extract_strided_slice %1528 {offsets = [3, 0], sizes = [16, 16], strides = [1, 1]} : vector<22x16xf32> to vector<16x16xf32>
      %1546 = vector.broadcast %1544 : f32 to vector<16x16xf32>
      %1547 = arith.mulf %1546, %1545 : vector<16x16xf32>
      %1548 = arith.addf %1543, %1547 : vector<16x16xf32>
      %c277 = arith.constant 277 : index
      %1549 = memref.load %arg1[%c277] : memref<294xf32, #tpu.memory_space<smem>>
      %1550 = vector.extract_strided_slice %1528 {offsets = [4, 0], sizes = [16, 16], strides = [1, 1]} : vector<22x16xf32> to vector<16x16xf32>
      %1551 = vector.broadcast %1549 : f32 to vector<16x16xf32>
      %1552 = arith.mulf %1551, %1550 : vector<16x16xf32>
      %1553 = arith.addf %1548, %1552 : vector<16x16xf32>
      %c284 = arith.constant 284 : index
      %1554 = memref.load %arg1[%c284] : memref<294xf32, #tpu.memory_space<smem>>
      %1555 = vector.extract_strided_slice %1528 {offsets = [5, 0], sizes = [16, 16], strides = [1, 1]} : vector<22x16xf32> to vector<16x16xf32>
      %1556 = vector.broadcast %1554 : f32 to vector<16x16xf32>
      %1557 = arith.mulf %1556, %1555 : vector<16x16xf32>
      %1558 = arith.addf %1553, %1557 : vector<16x16xf32>
      %c291 = arith.constant 291 : index
      %1559 = memref.load %arg1[%c291] : memref<294xf32, #tpu.memory_space<smem>>
      %1560 = vector.extract_strided_slice %1528 {offsets = [6, 0], sizes = [16, 16], strides = [1, 1]} : vector<22x16xf32> to vector<16x16xf32>
      %1561 = vector.broadcast %1559 : f32 to vector<16x16xf32>
      %1562 = arith.mulf %1561, %1560 : vector<16x16xf32>
      %1563 = arith.addf %1558, %1562 : vector<16x16xf32>
      %c1_210 = arith.constant 1 : index
      %c0_211 = arith.constant 0 : index
      %c5_212 = arith.constant 5 : index
      %1564 = vector.load %arg7[%c1_210, %c0_211, %c5_212] : memref<2x22x22xf32, #tpu.memory_space<vmem>>, vector<1x22x16xf32>
      %1565 = vector.shape_cast %1564 : vector<1x22x16xf32> to vector<22x16xf32>
      %c250 = arith.constant 250 : index
      %1566 = memref.load %arg1[%c250] : memref<294xf32, #tpu.memory_space<smem>>
      %1567 = vector.extract_strided_slice %1565 {offsets = [0, 0], sizes = [16, 16], strides = [1, 1]} : vector<22x16xf32> to vector<16x16xf32>
      %1568 = vector.broadcast %1566 : f32 to vector<16x16xf32>
      %1569 = arith.mulf %1568, %1567 : vector<16x16xf32>
      %1570 = arith.addf %1563, %1569 : vector<16x16xf32>
      %c257 = arith.constant 257 : index
      %1571 = memref.load %arg1[%c257] : memref<294xf32, #tpu.memory_space<smem>>
      %1572 = vector.extract_strided_slice %1565 {offsets = [1, 0], sizes = [16, 16], strides = [1, 1]} : vector<22x16xf32> to vector<16x16xf32>
      %1573 = vector.broadcast %1571 : f32 to vector<16x16xf32>
      %1574 = arith.mulf %1573, %1572 : vector<16x16xf32>
      %1575 = arith.addf %1570, %1574 : vector<16x16xf32>
      %c264 = arith.constant 264 : index
      %1576 = memref.load %arg1[%c264] : memref<294xf32, #tpu.memory_space<smem>>
      %1577 = vector.extract_strided_slice %1565 {offsets = [2, 0], sizes = [16, 16], strides = [1, 1]} : vector<22x16xf32> to vector<16x16xf32>
      %1578 = vector.broadcast %1576 : f32 to vector<16x16xf32>
      %1579 = arith.mulf %1578, %1577 : vector<16x16xf32>
      %1580 = arith.addf %1575, %1579 : vector<16x16xf32>
      %c271 = arith.constant 271 : index
      %1581 = memref.load %arg1[%c271] : memref<294xf32, #tpu.memory_space<smem>>
      %1582 = vector.extract_strided_slice %1565 {offsets = [3, 0], sizes = [16, 16], strides = [1, 1]} : vector<22x16xf32> to vector<16x16xf32>
      %1583 = vector.broadcast %1581 : f32 to vector<16x16xf32>
      %1584 = arith.mulf %1583, %1582 : vector<16x16xf32>
      %1585 = arith.addf %1580, %1584 : vector<16x16xf32>
      %c278 = arith.constant 278 : index
      %1586 = memref.load %arg1[%c278] : memref<294xf32, #tpu.memory_space<smem>>
      %1587 = vector.extract_strided_slice %1565 {offsets = [4, 0], sizes = [16, 16], strides = [1, 1]} : vector<22x16xf32> to vector<16x16xf32>
      %1588 = vector.broadcast %1586 : f32 to vector<16x16xf32>
      %1589 = arith.mulf %1588, %1587 : vector<16x16xf32>
      %1590 = arith.addf %1585, %1589 : vector<16x16xf32>
      %c285 = arith.constant 285 : index
      %1591 = memref.load %arg1[%c285] : memref<294xf32, #tpu.memory_space<smem>>
      %1592 = vector.extract_strided_slice %1565 {offsets = [5, 0], sizes = [16, 16], strides = [1, 1]} : vector<22x16xf32> to vector<16x16xf32>
      %1593 = vector.broadcast %1591 : f32 to vector<16x16xf32>
      %1594 = arith.mulf %1593, %1592 : vector<16x16xf32>
      %1595 = arith.addf %1590, %1594 : vector<16x16xf32>
      %c292 = arith.constant 292 : index
      %1596 = memref.load %arg1[%c292] : memref<294xf32, #tpu.memory_space<smem>>
      %1597 = vector.extract_strided_slice %1565 {offsets = [6, 0], sizes = [16, 16], strides = [1, 1]} : vector<22x16xf32> to vector<16x16xf32>
      %1598 = vector.broadcast %1596 : f32 to vector<16x16xf32>
      %1599 = arith.mulf %1598, %1597 : vector<16x16xf32>
      %1600 = arith.addf %1595, %1599 : vector<16x16xf32>
      %c1_213 = arith.constant 1 : index
      %c0_214 = arith.constant 0 : index
      %c6_215 = arith.constant 6 : index
      %1601 = vector.load %arg7[%c1_213, %c0_214, %c6_215] : memref<2x22x22xf32, #tpu.memory_space<vmem>>, vector<1x22x16xf32>
      %1602 = vector.shape_cast %1601 : vector<1x22x16xf32> to vector<22x16xf32>
      %c251 = arith.constant 251 : index
      %1603 = memref.load %arg1[%c251] : memref<294xf32, #tpu.memory_space<smem>>
      %1604 = vector.extract_strided_slice %1602 {offsets = [0, 0], sizes = [16, 16], strides = [1, 1]} : vector<22x16xf32> to vector<16x16xf32>
      %1605 = vector.broadcast %1603 : f32 to vector<16x16xf32>
      %1606 = arith.mulf %1605, %1604 : vector<16x16xf32>
      %1607 = arith.addf %1600, %1606 : vector<16x16xf32>
      %c258 = arith.constant 258 : index
      %1608 = memref.load %arg1[%c258] : memref<294xf32, #tpu.memory_space<smem>>
      %1609 = vector.extract_strided_slice %1602 {offsets = [1, 0], sizes = [16, 16], strides = [1, 1]} : vector<22x16xf32> to vector<16x16xf32>
      %1610 = vector.broadcast %1608 : f32 to vector<16x16xf32>
      %1611 = arith.mulf %1610, %1609 : vector<16x16xf32>
      %1612 = arith.addf %1607, %1611 : vector<16x16xf32>
      %c265 = arith.constant 265 : index
      %1613 = memref.load %arg1[%c265] : memref<294xf32, #tpu.memory_space<smem>>
      %1614 = vector.extract_strided_slice %1602 {offsets = [2, 0], sizes = [16, 16], strides = [1, 1]} : vector<22x16xf32> to vector<16x16xf32>
      %1615 = vector.broadcast %1613 : f32 to vector<16x16xf32>
      %1616 = arith.mulf %1615, %1614 : vector<16x16xf32>
      %1617 = arith.addf %1612, %1616 : vector<16x16xf32>
      %c272 = arith.constant 272 : index
      %1618 = memref.load %arg1[%c272] : memref<294xf32, #tpu.memory_space<smem>>
      %1619 = vector.extract_strided_slice %1602 {offsets = [3, 0], sizes = [16, 16], strides = [1, 1]} : vector<22x16xf32> to vector<16x16xf32>
      %1620 = vector.broadcast %1618 : f32 to vector<16x16xf32>
      %1621 = arith.mulf %1620, %1619 : vector<16x16xf32>
      %1622 = arith.addf %1617, %1621 : vector<16x16xf32>
      %c279 = arith.constant 279 : index
      %1623 = memref.load %arg1[%c279] : memref<294xf32, #tpu.memory_space<smem>>
      %1624 = vector.extract_strided_slice %1602 {offsets = [4, 0], sizes = [16, 16], strides = [1, 1]} : vector<22x16xf32> to vector<16x16xf32>
      %1625 = vector.broadcast %1623 : f32 to vector<16x16xf32>
      %1626 = arith.mulf %1625, %1624 : vector<16x16xf32>
      %1627 = arith.addf %1622, %1626 : vector<16x16xf32>
      %c286 = arith.constant 286 : index
      %1628 = memref.load %arg1[%c286] : memref<294xf32, #tpu.memory_space<smem>>
      %1629 = vector.extract_strided_slice %1602 {offsets = [5, 0], sizes = [16, 16], strides = [1, 1]} : vector<22x16xf32> to vector<16x16xf32>
      %1630 = vector.broadcast %1628 : f32 to vector<16x16xf32>
      %1631 = arith.mulf %1630, %1629 : vector<16x16xf32>
      %1632 = arith.addf %1627, %1631 : vector<16x16xf32>
      %c293 = arith.constant 293 : index
      %1633 = memref.load %arg1[%c293] : memref<294xf32, #tpu.memory_space<smem>>
      %1634 = vector.extract_strided_slice %1602 {offsets = [6, 0], sizes = [16, 16], strides = [1, 1]} : vector<22x16xf32> to vector<16x16xf32>
      %1635 = vector.broadcast %1633 : f32 to vector<16x16xf32>
      %1636 = arith.mulf %1635, %1634 : vector<16x16xf32>
      %1637 = arith.addf %1632, %1636 : vector<16x16xf32>
      %1638 = vector.broadcast %1118 : f32 to vector<16x16xf32>
      %1639 = arith.addf %1637, %1638 : vector<16x16xf32>
      %1640 = arith.negf %1639 : vector<16x16xf32>
      %1641 = math.exp %1640 : vector<16x16xf32>
      %cst_216 = arith.constant 1.000000e+00 : f32
      %1642 = vector.broadcast %cst_216 : f32 to vector<16x16xf32>
      %1643 = arith.addf %1642, %1641 : vector<16x16xf32>
      %1644 = arith.divf %1642, %1643 : vector<16x16xf32>
      %cst_217 = arith.constant 0.333333343 : f32
      %1645 = vector.broadcast %cst_217 : f32 to vector<16x16xf32>
      %1646 = arith.mulf %1644, %1645 : vector<16x16xf32>
      %1647 = vector.shape_cast %1646 : vector<16x16xf32> to vector<1x16x16xf32>
      %1648 = vector.shape_cast %588 : vector<4x16xf32> to vector<4x1x16xf32>
      %1649 = vector.broadcast %1647 : vector<1x16x16xf32> to vector<4x16x16xf32>
      %1650 = vector.broadcast %1648 : vector<4x1x16xf32> to vector<4x16x16xf32>
      %1651 = arith.addf %1649, %1650 : vector<4x16x16xf32>
      %1652 = vector.shape_cast %1117 : vector<4x16xf32> to vector<4x16x1xf32>
      %1653 = vector.broadcast %1652 : vector<4x16x1xf32> to vector<4x16x16xf32>
      %1654 = arith.addf %1651, %1653 : vector<4x16x16xf32>
      %1655 = arith.mulf %29, %1654 : vector<4x16x16xf32>
      %1656 = arith.index_cast %26 : i32 to index
      %c0_218 = arith.constant 0 : index
      %c0_219 = arith.constant 0 : index
      %c0_220 = arith.constant 0 : index
      %1657 = vector.load %arg4[%1656, %c0_218, %c0_219, %c0_220] : memref<2x4x16x16xf32, #tpu.memory_space<vmem>>, vector<1x4x16x16xf32>
      %1658 = vector.shape_cast %1657 : vector<1x4x16x16xf32> to vector<4x16x16xf32>
      %1659 = vector.shape_cast %1655 : vector<4x16x16xf32> to vector<1x4x16x16xf32>
      tpu.vector_store %arg4[%1656, %c0_218, %c0_219, %c0_220], %1659 {strides = array<i32>} : memref<2x4x16x16xf32, #tpu.memory_space<vmem>>, vector<1x4x16x16xf32>,
    }
    %c2_i32_44 = arith.constant 2 : i32
    return
  }
  func.func @transform_0(%arg0: i32) -> i32 {
    %c0_i32 = arith.constant 0 : i32
    %c0_i32_0 = arith.constant 0 : i32
    return %c0_i32 : i32
  }
  func.func @transform_1(%arg0: i32) -> i32 {
    %c0_i32 = arith.constant 0 : i32
    %c0_i32_0 = arith.constant 0 : i32
    return %c0_i32 : i32
  }
  func.func @transform_2(%arg0: i32) -> (i32, i32, i32, i32) {
    %c0_i32 = arith.constant 0 : i32
    %c0_i32_0 = arith.constant 0 : i32
    %c0_i32_1 = arith.constant 0 : i32
    %c0_i32_2 = arith.constant 0 : i32
    return %arg0, %c0_i32, %c0_i32_0, %c0_i32_1 : i32, i32, i32, i32
  }
  func.func @transform_3(%arg0: i32) -> (i32, i32, i32, i32) {
    %c0_i32 = arith.constant 0 : i32
    %c0_i32_0 = arith.constant 0 : i32
    %c0_i32_1 = arith.constant 0 : i32
    %c0_i32_2 = arith.constant 0 : i32
    return %arg0, %c0_i32, %c0_i32_0, %c0_i32_1 : i32, i32, i32, i32
  }
}

</mosaic_0001>

<bundles_post_ra>
// kernel: tpu_custom_call.1
= control target key start
LH: loop header
LB: loop body
LE: loop exit
PB: predicated region body
PF: predicated region fallthrough
CT: control target
= control target key end

     0   :  { %8 = vsyncpa [#allocation8], 0  ;;  %s8105_s0 = inlined_call_operand.hbm [shape: f32[294], index: 0, kind: input, shape index: {}]   ;;  %s8106_s1 = inlined_call_operand.vmem [shape: f32[3], index: 1, kind: input, shape index: {}]   ;;  %s8107_s2 = inlined_call_operand.hbm [shape: f32[2,4,16,16], index: 2, kind: input, shape index: {}]   ;;  %s8108_s3 = inlined_call_operand.hbm [shape: f32[2,4,16,16], index: 3, kind: output, shape index: {}]  }
   0x1   :  { %9 = vsyncpa [#allocation9], 0 }
   0x2   :  { %10 = vsyncpa [#allocation6], 0 }
   0x3   :  { %11 = vsyncpa [#allocation7], 0  ;;  %s26_s14 = sshll.u32 %s8106_s1, 4  ;;  %s4755_s17 = scalar_lea.hbm %s8105_s0, 48  ;;  %s27_s14 = int_to_ptr.vmem [resolvable:$true] %s26_s14 }
   0x4   :  { %p4756_p0 = scmp.ne.s32.totalorder %s8105_s0, %s4755_s17  ;;  %s4757_s22 = scalar_lea.hbm %s8105_s0, 64 }
   0x5   :  { %p4758_p1 = scmp.lt.u32.totalorder %s4757_s22, %s4755_s17  ;;  %p4759_p2 = scmp.lt.u32.totalorder %s4755_s17, %s8105_s0 }
   0x7   :  { %p4760_p3 = por %p4759_p2, %p4758_p1 }
   0x9   :  { %p4761_p4 = pnand %p4760_p3, %p4756_p0 }
   0xb   :  { %4764 = shalt.err (!%p4761_p4)
}
   0xc   :  { %s4837_s1 = smov [#allocation5]   ;;  %s4765_s27 = scalar_lea.vmem %s27_s14, 16 }
   0xd   :  { %19 = dma.hbm_to_smem %s8105_s0, 48, %s4837_s1, [#allocation8]  }
   0xe   :  { %p4766_p5 = scmp.ne.s32.totalorder %s27_s14, %s4765_s27  ;;  %p4770_p6 = scmp.lt.s32.totalorder %s27_s14, %s27_s14 }
   0xf   :  { %p4771_p7 = scmp.lt.s32.totalorder %s4765_s27, %s4765_s27 }
  0x11   :  { %p4772_p8 = por %p4771_p7, %p4770_p6 }
  0x13   :  { %p4773_p9 = pnand %p4772_p8, %p4766_p5 }
  0x15   :  { %4776 = shalt.err (!%p4773_p9)
}
  0x16   :  { %s4838_s28 = smov [#allocation10]   ;;  %s4839_s29 = smov [#allocation11]  }
  0x17   :  { %29 = dma.vmem_to_smem %s27_s14, 16, %s4838_s28, [#allocation9]  }
  0x18   :  { %s35_s30 = sshll.u32 %s4839_s29, 4  ;;  %s4777_s6 = scalar_lea.hbm %s8107_s2, 2048  ;;  %s36_s30 = int_to_ptr.vmem [resolvable:$true] %s35_s30 }
  0x19   :  { %p4778_p10 = scmp.ne.s32.totalorder %s8107_s2, %s4777_s6  ;;  %p4781_p11 = scmp.lt.u32.totalorder %s4777_s6, %s8107_s2 }
  0x1b   :  { %p4783_p12 = pnand %p4781_p11, %p4778_p10 }
  0x1d   :  { %4786 = shalt.err (!%p4783_p12)
}
  0x1e   :  { %s4787_s10 = scalar_lea.vmem %s36_s30, 2048  ;;  %p4792_p0 = scmp.lt.s32.totalorder %s36_s30, %s36_s30 }
  0x1f   :  { %p4788_p13 = scmp.ne.s32.totalorder %s36_s30, %s4787_s10  ;;  %p4793_p1 = scmp.lt.s32.totalorder %s4787_s10, %s4787_s10 }
  0x21   :  { %p4794_p2 = por %p4793_p1, %p4792_p0 }
  0x23   :  { %p4795_p3 = pnand %p4794_p2, %p4788_p13 }
  0x25   :  { %4798 = shalt.err (!%p4795_p3)
}
  0x26   :  { %s8109_s11 = smov 128   ;;  %s8110_s12 = smov 8  }
  0x27   :  { %41 = dma.hbm_to_vmem [thread:$0]  %s8107_s2, 2048, %s36_s30, [#allocation6], %s8109_s11, %s8109_s11, %s8110_s12  }
  0x28   :  { %4825 = dma.done.wait [#allocation8], 48  }
  0x29   :  { %4826 = vsyncadd [#allocation8], 4294967248 }
  0x2a   :  { %4827 = dma.done.wait [#allocation9], 16  }
  0x2b   :  { %4828 = vsyncadd [#allocation9], 4294967280 }
  0x2c   :  { %4829 = dma.done.wait [#allocation6], 2048  }
  0x2d   :  { %4830 = vsyncadd [#allocation6], 4294965248 }
  0x2e   :  { %51 = sfence }
  0x2f   :  { %vm52_vm0 = vcmask 174080   ;;  %vm57_vm1 = vcmask 23552   ;;  %vm59_vm2 = vcmask 17408   ;;  %v4842_v0 = vmov 0.0   ;;  %s4931_s2 = smov 0  }
  0x30   :  { %53 = vst.msk [vmem:[#allocation2] sm:$0x7] %vm52_vm0, %v4842_v0  ;;  %54 = vst.msk [vmem:[#allocation2 + $0x10] sm:$0x7] %vm52_vm0, %v4842_v0  ;;  %vm87_vm3 = vcmask 21504   ;;  %vm63_vm4 = vcmask 179352  }
  0x31   :  { %55 = vst.msk [vmem:[#allocation2 + $0x7] sm:$0x7] %vm52_vm0, %v4842_v0  ;;  %56 = vst.msk [vmem:[#allocation2 + $0x17] sm:$0x7] %vm52_vm0, %v4842_v0  ;;  %vm65_vm5 = vcmask 173208   ;;  %vm94_vm6 = vcmask 177304  }
  0x32   :  { %69 = vst.msk [vmem:[#allocation3] sm:$0x7] %vm52_vm0, %v4842_v0  ;;  %70 = vst.msk [vmem:[#allocation3 + $0x10] sm:$0x7] %vm52_vm0, %v4842_v0 }
  0x33   :  { %71 = vst.msk [vmem:[#allocation3 + $0x7] sm:$0x7] %vm52_vm0, %v4842_v0  ;;  %72 = vst.msk [vmem:[#allocation3 + $0x17] sm:$0x7] %vm52_vm0, %v4842_v0 }
  0x34   :  { %81 = vst.msk [vmem:[#allocation4] sm:$0x7] %vm52_vm0, %v4842_v0  ;;  %82 = vst.msk [vmem:[#allocation4 + $0x18] sm:$0x7] %vm52_vm0, %v4842_v0 }
  0x35   :  { %83 = vst.msk [vmem:[#allocation4 + $0x13] sm:$0x7] %vm52_vm0, %v4842_v0  ;;  %84 = vst.msk [vmem:[#allocation4 + $0x2b] sm:$0x7] %vm52_vm0, %v4842_v0 }
  0x36   :  { %86 = vst.msk [vmem:[#allocation4 + $0x8] sm:$0xff] %vm57_vm1, %v4842_v0  ;;  %90 = vst.msk [vmem:[#allocation4 + $0x20] sm:$0xff] %vm57_vm1, %v4842_v0 }
  0x37   :  { %58 = vst.msk [vmem:[#allocation2] sm:$0xff] %vm57_vm1, %v4842_v0  ;;  %61 = vst.msk [vmem:[#allocation2 + $0x10] sm:$0xff] %vm57_vm1, %v4842_v0 }
  0x38   :  { %73 = vst.msk [vmem:[#allocation3] sm:$0xff] %vm57_vm1, %v4842_v0  ;;  %75 = vst.msk [vmem:[#allocation3 + $0x10] sm:$0xff] %vm57_vm1, %v4842_v0 }
  0x39   :  { %85 = vst.msk [vmem:[#allocation4] sm:$0xff] %vm57_vm1, %v4842_v0  ;;  %89 = vst.msk [vmem:[#allocation4 + $0x18] sm:$0xff] %vm57_vm1, %v4842_v0 }
  0x3a   :  { %60 = vst.msk [vmem:[#allocation2 + $0x8] sm:$0x3] %vm59_vm2, %v4842_v0  ;;  %62 = vst.msk [vmem:[#allocation2 + $0x18] sm:$0x3] %vm59_vm2, %v4842_v0 }
  0x3b   :  { %74 = vst.msk [vmem:[#allocation3 + $0x8] sm:$0x3] %vm59_vm2, %v4842_v0  ;;  %76 = vst.msk [vmem:[#allocation3 + $0x18] sm:$0x3] %vm59_vm2, %v4842_v0 }
  0x3c   :  { %88 = vst.msk [vmem:[#allocation4 + $0x10] sm:$0x3f] %vm87_vm3, %v4842_v0  ;;  %91 = vst.msk [vmem:[#allocation4 + $0x28] sm:$0x3f] %vm87_vm3, %v4842_v0 }
  0x3d   :  { %93 = vst.msk [vmem:[#allocation4 + $0x8] sm:$0xff] %vm63_vm4, %v4842_v0  ;;  %97 = vst.msk [vmem:[#allocation4 + $0x20] sm:$0xff] %vm63_vm4, %v4842_v0 }
  0x3e   :  { %64 = vst.msk [vmem:[#allocation2] sm:$0xff] %vm63_vm4, %v4842_v0  ;;  %67 = vst.msk [vmem:[#allocation2 + $0x10] sm:$0xff] %vm63_vm4, %v4842_v0 }
  0x3f   :  { %77 = vst.msk [vmem:[#allocation3] sm:$0xff] %vm63_vm4, %v4842_v0  ;;  %79 = vst.msk [vmem:[#allocation3 + $0x10] sm:$0xff] %vm63_vm4, %v4842_v0 }
  0x40   :  { %92 = vst.msk [vmem:[#allocation4] sm:$0xff] %vm63_vm4, %v4842_v0  ;;  %96 = vst.msk [vmem:[#allocation4 + $0x18] sm:$0xff] %vm63_vm4, %v4842_v0 }
  0x41   :  { %66 = vst.msk [vmem:[#allocation2 + $0x8] sm:$0x3] %vm65_vm5, %v4842_v0  ;;  %68 = vst.msk [vmem:[#allocation2 + $0x18] sm:$0x3] %vm65_vm5, %v4842_v0 }
  0x42   :  { %78 = vst.msk [vmem:[#allocation3 + $0x8] sm:$0x3] %vm65_vm5, %v4842_v0  ;;  %80 = vst.msk [vmem:[#allocation3 + $0x18] sm:$0x3] %vm65_vm5, %v4842_v0 }
  0x43   :  { %95 = vst.msk [vmem:[#allocation4 + $0x10] sm:$0x3f] %vm94_vm6, %v4842_v0  ;;  %98 = vst.msk [vmem:[#allocation4 + $0x28] sm:$0x3f] %vm94_vm6, %v4842_v0 }
  0x44 LB: > { %s8111_s15 = sshll.u32 %s4835_s2, 6  ;;  %vm115_vm7 = vcmask 130048   ;;  %vm156_vm8 = vcmask 1041409   ;;  %vm158_vm9 = vcmask 1042434   ;;  %vm160_vm10 = vcmask 1043459   ;;  %s4843_s17 = smov 3   ;;  %s4835_s2 = sphi %s4931_s2, %s104_s2  }
  0x45   : > { %s4939_s16 = scalar_lea.vmem [#allocation11], %s8111_s15  ;;  %vm165_vm11 = vcmask 150552   ;;  %s4413_s18 = sld [smem:[#allocation5 + $0x2]]  ;;  %vm440_vm12 = vcmask 1042432   ;;  %vm452_vm13 = vcmask 1041408   ;;  %vm377_vm14 = vcmask 154648  }
  0x46   : > { %v107_v1 = vld [vmem:[%s4939_s16] sm:$0xff]  ;;  %v108_v2 = vld [vmem:[%s4939_s16 + $0x8] sm:$0xff]  ;;  %v109_v3 = vld [vmem:[%s4939_s16 + $0x10] sm:$0xff]  ;;  %s4406_s19 = sld [smem:[#allocation5 + $0x1]]  ;;  %s4427_s20 = sld [smem:[#allocation5 + $0x4]]  ;;  %vm255_vm15 = vcmask 154712  }
  0x47   : > { %v110_v4 = vld [vmem:[%s4939_s16 + $0x18] sm:$0xff]  ;;  %v111_v5 = vld [vmem:[%s4939_s16 + $0x20] sm:$0xff]  ;;  %v112_v6 = vld [vmem:[%s4939_s16 + $0x28] sm:$0xff]  ;;  %v4948_v7 = vsel %vm115_vm7, %v107_v1, -inf  ;;  %v4951_v8 = vsel %vm115_vm7, %v108_v2, -inf  ;;  %v4954_v9 = vsel %vm115_vm7, %v109_v3, -inf }
  0x48   : > { %v113_v10 = vld [vmem:[%s4939_s16 + $0x30] sm:$0xff]  ;;  %v114_v11 = vld [vmem:[%s4939_s16 + $0x38] sm:$0xff]  ;;  %v118_v12 = vmax.f32 %v4948_v7, %v4951_v8  ;;  %v4961_v13 = vsel %vm115_vm7, %v110_v4, -inf  ;;  %v4964_v14 = vsel %vm115_vm7, %v111_v5, -inf  ;;  %v4967_v15 = vsel %vm115_vm7, %v112_v6, -inf  ;;  %219 = vmax.xlane.f32.xlu1 %v4948_v7  ;;  %s4420_s21 = sld [smem:[#allocation5 + $0x3]] }
  0x49   : > { %v127_v16 = vmax.f32 %v4954_v9, %v4961_v13  ;;  %v136_v17 = vmax.f32 %v4964_v14, %v4967_v15  ;;  %v4975_v18 = vsel %vm115_vm7, %v113_v10, -inf  ;;  %v4978_v19 = vsel %vm115_vm7, %v114_v11, -inf  ;;  %s5058_s22 = sld [smem:[#allocation5 + $0x6]]  ;;  %s5060_s23 = sld [smem:[#allocation5 + $0x5]] }
  0x4a   : > { %v119_v20 = vrot.slane %v118_v12, 4  ;;  %v145_v21 = vmax.f32 %v4975_v18, %v4978_v19  ;;  %v4983_v22 = vsel %vm115_vm7, %v107_v1, 0.0  ;;  %v4986_v23 = vsel %vm115_vm7, %v108_v2, 0.0  ;;  %s5062_s24 = sld [smem:[#allocation5 + $0x8]]  ;;  %s5064_s1 = sld [smem:[#allocation5 + $0xf]] }
  0x4b   : > { %v128_v24 = vrot.slane %v127_v16, 4  ;;  %v137_v25 = vrot.slane %v136_v17, 4  ;;  %v169_v26 = vadd.f32 %v4986_v23, %v4983_v22  ;;  %v4991_v27 = vsel %vm115_vm7, %v109_v3, 0.0  ;;  %s5072_s25 = sld [smem:[#allocation5 + $0x16]]  ;;  %s5074_s26 = sld [smem:[#allocation5 + $0x1d]] }
  0x4c   : > { %v120_v28 = vmax.f32 %v118_v12, %v119_v20  ;;  %v146_v29 = vrot.slane %v145_v21, 4  ;;  %v4994_v30 = vsel %vm115_vm7, %v110_v4, 0.0  ;;  %v4997_v31 = vsel %vm115_vm7, %v111_v5, 0.0  ;;  %221 = vmax.xlane.f32.xlu1 %v4951_v8  ;;  %s4844_s27 = smov 126   ;;  %s8114_s28 = smov 127  }
  0x4d   : > { %v129_v32 = vmax.f32 %v127_v16, %v128_v24  ;;  %v138_v33 = vmax.f32 %v136_v17, %v137_v25  ;;  %v170_v34 = vrot.slane %v169_v26, 4  ;;  %v178_v35 = vadd.f32 %v4994_v30, %v4991_v27  ;;  %s5087_s29 = sld [smem:[#allocation5 + $0x10]]  ;;  %s5089_s30 = sld [smem:[#allocation5 + $0x9]] }
  0x4e   : > { %v121_v36 = vrot.slane %v120_v28, 2  ;;  %v147_v37 = vmax.f32 %v145_v21, %v146_v29  ;;  %v5003_v38 = vsel %vm115_vm7, %v112_v6, 0.0  ;;  %v5006_v39 = vsel %vm115_vm7, %v113_v10, 0.0  ;;  %s4846_s4 = smov 124   ;;  %s4847_s5 = smov 125  }
  0x4f   : > { %v130_v40 = vrot.slane %v129_v32, 2  ;;  %v139_v41 = vrot.slane %v138_v33, 2  ;;  %v171_v42 = vadd.f32 %v170_v34, %v169_v26  ;;  %v179_v43 = vrot.slane %v178_v35, 4  ;;  %s5093_s6 = sld [smem:[#allocation5 + $0x1e]]  ;;  %s5099_s7 = sld [smem:[#allocation5 + $0x17]] }
  0x50   : > { %v122_v44 = vmax.f32 %v120_v28, %v121_v36  ;;  %v148_v45 = vrot.slane %v147_v37, 2  ;;  %v187_v46 = vadd.f32 %v5003_v38, %v4997_v31  ;;  %v5011_v47 = vsel %vm115_vm7, %v114_v11, 0.0  ;;  %225 = vmax.xlane.f32.xlu1 %v4961_v13  ;;  %s5101_s8 = sld [smem:[#allocation5 + $0xa]]  ;;  %s5107_s0 = sld [smem:[#allocation5 + $0x11]] }
  0x51   : > { %v131_v48 = vmax.f32 %v129_v32, %v130_v40  ;;  %v140_v49 = vmax.f32 %v138_v33, %v139_v41  ;;  %v172_v50 = vrot.slane %v171_v42, 2  ;;  %v180_v51 = vadd.f32 %v179_v43, %v178_v35  ;;  %s5109_s9 = sld [smem:[#allocation5 + $0x18]]  ;;  %s8112_s10 = smov 122  }
  0x52   : > { %v123_v52 = vrot.slane %v122_v44, 1  ;;  %v149_v53 = vmax.f32 %v147_v37, %v148_v45  ;;  %v188_v54 = vrot.slane %v187_v46, 4  ;;  %v196_v55 = vadd.f32 %v5011_v47, %v5006_v39  ;;  %s8116_s13 = smov 123   ;;  %s5113_s14 = sld [smem:[#allocation5 + $0x1f]] }
  0x53   : > { %v132_v56 = vrot.slane %v131_v48, 1  ;;  %v141_v57 = vrot.slane %v140_v49, 1  ;;  %v173_v58 = vadd.f32 %v172_v50, %v171_v42  ;;  %v181_v59 = vrot.slane %v180_v51, 2  ;;  %s5155_s11 = sld [smem:[#allocation5 + $0x22]]  ;;  %s5157_s12 = sld [smem:[#allocation5 + $0x1b]] }
  0x54   : > { %v124_v60 = vmax.f32 %v122_v44, %v123_v52  ;;  %v150_v61 = vrot.slane %v149_v53, 1  ;;  %v189_v62 = vadd.f32 %v188_v54, %v187_v46  ;;  %v197_v63 = vrot.slane %v196_v55, 4  ;;  %227 = vmax.xlane.f32.xlu1 %v4964_v14  ;;  %s5163_s15 = sld [smem:[#allocation5 + $0x25]] }
  0x55   : > { %v133_v0 = vmax.f32 %v131_v48, %v132_v56  ;;  %v142_v1 = vmax.f32 %v140_v49, %v141_v57  ;;  %v174_v2 = vrot.slane %v173_v58, 1  ;;  %v182_v3 = vadd.f32 %v181_v59, %v180_v51 }
  0x56   : > { %v151_v4 = vmax.f32 %v149_v53, %v150_v61  ;;  %v190_v5 = vrot.slane %v189_v62, 2  ;;  %v198_v6 = vadd.f32 %v197_v63, %v196_v55  ;;  %v366_v21 = vmax.f32 %v4951_v8, %v4967_v15 }
  0x57   : > { %v157_v10 = vsel %vm156_vm8, %v133_v0, %v124_v60  ;;  %v175_v11 = vadd.f32 %v174_v2, %v173_v58  ;;  %v183_v12 = vrot.slane %v182_v3, 1  ;;  %v367_v32 = vmax.f32 %v4961_v13, %v4978_v19 }
  0x58   : > { %v159_v16 = vsel %vm158_vm9, %v142_v1, %v157_v10  ;;  %v191_v17 = vadd.f32 %v190_v5, %v189_v62  ;;  %v199_v20 = vrot.slane %v198_v6, 2  ;;  %229 = vmax.xlane.f32.xlu1 %v4967_v15  ;;  %v380_v13 = vadd.f32 %v4991_v27, %v4983_v22 }
  0x59   : > { %v161_v24 = vsel %vm160_vm10, %v151_v4, %v159_v16  ;;  %v184_v25 = vadd.f32 %v183_v12, %v182_v3  ;;  %v203_v26 = vmul.f32 0.0625, %v175_v11  ;;  %v368_v36 = vmax.f32 %v366_v21, %v367_v32 }
  0x5a   : > { %162 = vrot.lane.b32.xlu0 %v161_v24, %s4843_s17  ;;  %v192_v28 = vrot.slane %v191_v17, 1  ;;  %v200_v29 = vadd.f32 %v199_v20, %v198_v6  ;;  %v364_v43 = vmax.f32 %v4954_v9, %v4975_v18  ;;  %v381_v44 = vadd.f32 %v380_v13, %v4997_v31 }
  0x5b   : > { %v204_v33 = vmul.f32 0.0625, %v184_v25  ;;  %v383_v45 = vadd.f32 %v4994_v30, %v4986_v23  ;;  %v599_v50 = vstv %s4420_s21  ;;  %v809_v54 = vstv %s5058_s22  ;;  %s5125_s21 = sld [smem:[#allocation5 + $0x19]]  ;;  %s5131_s22 = sld [smem:[#allocation5 + $0xc]] }
  0x5c   : > { %v193_v34 = vadd.f32 %v192_v28, %v191_v17  ;;  %v201_v35 = vrot.slane %v200_v29, 1  ;;  %231 = vmax.xlane.f32.xlu1 %v4975_v18  ;;  %v382_v48 = vadd.f32 %v381_v44, %v5006_v39  ;;  %v529_v18 = vstv %s4413_s18  ;;  %s5117_s18 = sld [smem:[#allocation5 + $0xb]] }
  0x5d   : > { %v211_v8 = vsel %vm156_vm8, %v204_v33, %v203_v26  ;;  %v384_v49 = vadd.f32 %v383_v45, %v5003_v38  ;;  %v739_v55 = vstv %s5060_s23  ;;  %v467_v56 = vstv %s5062_s24  ;;  %s5133_s23 = sld [smem:[#allocation5 + $0x13]]  ;;  %s5137_s24 = sld [smem:[#allocation5 + $0x1a]] }
  0x5e   : > { %v202_v15 = vadd.f32 %v201_v35, %v200_v29  ;;  %v205_v37 = vmul.f32 0.0625, %v193_v34  ;;  %v476_v57 = vstv %s5064_s1  ;;  %v485_v63 = vstv %s5072_s25  ;;  %s5139_s1 = sld [smem:[#allocation5 + $0x21]]  ;;  %s5141_s25 = sld [smem:[#allocation5 + $0x2b]] }
  0x5f   : > { %v494_v0 = vstv %s5074_s26  ;;  %v546_v6 = vstv %s5087_s29  ;;  %v537_v10 = vstv %s5089_s30  ;;  %s5143_s26 = sld [smem:[#allocation5 + $0x2c]]  ;;  %s5151_s30 = sld [smem:[#allocation5 + $0xd]]  ;;  %v564_v21 = vstv %s5093_s6 }
  0x60   : > { %v206_v40 = vmul.f32 0.0625, %v202_v15  ;;  %v212_v41 = vsel %vm158_vm9, %v205_v37, %v211_v8  ;;  %233 = vmax.xlane.f32.xlu1 %v4978_v19  ;;  %v363_v19 = vmax.f32 %v4948_v7, %v4964_v14  ;;  %v385_v7 = vadd.f32 %v384_v49, %v5011_v47  ;;  %s5149_s29 = sld [smem:[#allocation5 + $0x14]]  ;;  %s5171_s6 = sld [smem:[#allocation5 + $0x23]]  ;;  %v5179_v37 = vld [vmem:[#allocation2 + $0x8] sm:$0x3] }
  0x61   : > { %v555_v24 = vstv %s5099_s7  ;;  %v607_v25 = vstv %s5101_s8  ;;  %v616_v26 = vstv %s5107_s0  ;;  %v625_v28 = vstv %s5109_s9  ;;  %s5173_s7 = sld [smem:[#allocation5 + $0x2a]]  ;;  %s5185_s8 = sld [smem:[#allocation5 + $0x2d]] }
  0x62   : > { %v213_v42 = vsel %vm160_vm10, %v206_v40, %v212_v41  ;;  %v365_v46 = vmax.f32 %v363_v19, %v364_v43  ;;  %v387_v14 = vmul.f32 0.25, %v385_v7  ;;  %v634_v29 = vstv %s5113_s14  ;;  %s5191_s0 = sld [smem:[#allocation5 + $0x7]]  ;;  %s5193_s9 = sld [smem:[#allocation5 + $0xe]] }
  0x63   : > { %214 = vrot.lane.b32.xlu0 %v213_v42, %s4843_s17  ;;  %v677_v40 = vstv %s5117_s18  ;;  %v695_v42 = vstv %s5125_s21  ;;  %v747_v13 = vstv %s5131_s22  ;;  %s5203_s14 = sld [smem:[#allocation5]]  ;;  %s5205_s18 = sld [smem:[#allocation5 + $0x15]]  ;;  %vm2343_vm0 = vcmask 1046528  }
  0x64   : > { %289 = vadd.xlane.f32.xlu1 %v4983_v22  ;;  %v386_v22 = vmul.f32 0.25, %v382_v48  ;;  %v756_v19 = vstv %s5133_s23  ;;  %v765_v43 = vstv %s5137_s24  ;;  %v774_v44 = vstv %s5139_s1  ;;  %s5317_s21 = sld [smem:[#allocation5 + $0x2f]]  ;;  %s8123_s22 = smov 123  }
  0x65   : > { %v586_v48 = vstv %s5143_s26  ;;  %s5543_s23 = sld [smem:[#allocation5 + $0x47]]  ;;  %s5545_s24 = sld [smem:[#allocation5 + $0x40]]  ;;  %vm2361_vm1 = vcmask 1045504   ;;  %vm2379_vm2 = vcmask 1044480   ;;  %vm2397_vm3 = vcmask 1043456  }
  0x66   : > { %s5549_s1 = sld [smem:[#allocation5 + $0x55]]  ;;  %s4461_s26 = sld [smem:[#allocation5 + $0x5c]] }
  0x68   : > { %291 = vadd.xlane.f32.xlu1 %v4986_v23  ;;  %v459_v23 = vstv %s4406_s19  ;;  %s5119_s19 = sld [smem:[#allocation5 + $0x24]] }
  0x6c   : > { %293 = vadd.xlane.f32.xlu1 %v4991_v27 }
  0x6e   : > { %v503_v33 = vstv %s5119_s19  ;;  %s5538_s19 = sld [smem:[#allocation5 + $0x32]] }
  0x6f   : > { %v5199_v45 = vmul.f32 %v503_v33, %v5179_v37 }
  0x70   : > { %297 = vadd.xlane.f32.xlu1 %v4997_v31 }
  0x74   : > { %301 = vadd.xlane.f32.xlu1 %v5006_v39 }
  0x82   : > { %223 = vmax.xlane.f32.xlu0 %v4954_v9 }
  0x85   : > { %371 = vrot.lane.b32.xlu1 %v365_v46, %s4843_s17  ;;  %v516_v46 = vstv %s5141_s25  ;;  %s4459_s25 = sld [smem:[#allocation5 + $0x4e]] }
  0x86   : > { %295 = vadd.xlane.f32.xlu0 %v4994_v30 }
  0x89   : > { %390 = vrot.lane.b32.xlu1 %v386_v22, %s4843_s17 }
  0x8a   : > { %299 = vadd.xlane.f32.xlu0 %v5003_v38 }
  0x8d   : > { %392 = vrot.lane.b32.xlu1 %v387_v14, %s4843_s17 }
  0x8e   : > { %303 = vadd.xlane.f32.xlu0 %v5011_v47  ;;  %v669_v47 = vstv %s4427_s20  ;;  %s5123_s20 = sld [smem:[#allocation5 + $0x20]] }
  0x94   : > { %v704_v41 = vstv %s5123_s20  ;;  %s5299_s20 = sld [smem:[#allocation5 + $0x28]] }
  0xa4   : > { %373 = vrot.lane.b32.xlu0 %v368_v36, %s4843_s17  ;;  %s5115_s17 = sld [smem:[#allocation5 + $0x12]] }
  0xaa   : > { %v686_v32 = vstv %s5115_s17  ;;  %s5278_s17 = sld [smem:[#allocation5 + $0x61]] }
  0xcc   : > { %v163_v9 = vpop.permute.xlu0 %162 }
  0xcd   : > { %166 = vst.msk [vmem:[#allocation2 + $0x3] sm:$0xf] %vm165_vm11, %v163_v9 }
  0xd4   : > { %v5066_v27 = vld [vmem:[#allocation2] sm:$0xff] }
  0xd5   : > { %v530_v30 = vmul.f32 %v529_v18, %v5066_v27  ;;  %v460_v31 = vmul.f32 %v459_v23, %v5066_v27  ;;  %v5070_v38 = vpop.xlane.xlu1 %219  ;;  %v215_v39 = vpop.permute.xlu0 %214  ;;  %v670_v51 = vmul.f32 %v669_v47, %v5066_v27  ;;  %v600_v52 = vmul.f32 %v599_v50, %v5066_v27 }
  0xd6   : > { %218 = vst.msk [vmem:[#allocation2 + $0x13] sm:$0xf] %vm165_vm11, %v215_v39  ;;  %v810_v58 = vmul.f32 %v809_v54, %v5066_v27  ;;  %v740_v59 = vmul.f32 %v739_v55, %v5066_v27  ;;  %v468_v60 = vmul.f32 %v467_v56, %v5066_v27  ;;  %v477_v61 = vmul.f32 %v476_v57, %v5066_v27 }
  0xd7   : > { %532 = vrot.lane.b32.xlu1 %v530_v30, %s4844_s27  ;;  %462 = vrot.lane.b32.xlu0 %v460_v31, %s8114_s28  ;;  %v486_v3 = vmul.f32 %v485_v63, %v5066_v27  ;;  %v495_v4 = vmul.f32 %v494_v0, %v5066_v27  ;;  %v547_v16 = vmul.f32 %v546_v6, %v5066_v27  ;;  %v826_v18 = vstv %s5149_s29  ;;  %s5572_s29 = sld [smem:[#allocation5 + $0x33]] }
  0xd8   : > { %v470_v1 = vrot.slane %v468_v60, 1  ;;  %v479_v2 = vrot.slane %v477_v61, 2  ;;  %v538_v17 = vmul.f32 %v537_v10, %v5066_v27  ;;  %v565_v36 = vmul.f32 %v564_v21, %v5066_v27 }
  0xd9   : > { %v5081_v53 = vpop.xlane.xlu1 %221  ;;  %v488_v11 = vrot.slane %v486_v3, 3  ;;  %v497_v12 = vrot.slane %v495_v4, 4  ;;  %v549_v34 = vrot.slane %v547_v16, 2  ;;  %v556_v8 = vmul.f32 %v555_v24, %v5066_v27 }
  0xda   : > { %v540_v35 = vrot.slane %v538_v17, 1  ;;  %v567_v49 = vrot.slane %v565_v36, 4  ;;  %v608_v7 = vmul.f32 %v607_v25, %v5066_v27  ;;  %v617_v14 = vmul.f32 %v616_v26, %v5066_v27 }
  0xdb   : > { %672 = vrot.lane.b32.xlu1 %v670_v51, %s4846_s4  ;;  %602 = vrot.lane.b32.xlu0 %v600_v52, %s4847_s5  ;;  %v558_v22 = vrot.slane %v556_v8, 3  ;;  %v817_v23 = vstv %s5151_s30  ;;  %v844_v30 = vstv %s5155_s11  ;;  %v5220_v39 = vmul.f32 %v516_v46, %v5179_v37  ;;  %s8124_s11 = smov 122   ;;  %s5574_s30 = sld [smem:[#allocation5 + $0x41]] }
  0xdc   : > { %v835_v31 = vstv %s5157_s12  ;;  %v573_v47 = vstv %s5163_s15  ;;  %v509_v51 = vrot.slane %v5199_v45, 5  ;;  %v5232_v52 = vmul.f32 %v586_v48, %v5179_v37  ;;  %s5454_s12 = sld [smem:[#allocation5 + $0x30]]  ;;  %s5462_s15 = sld [smem:[#allocation5 + $0x29]] }
  0xdd   : > { %v5103_v62 = vpop.xlane.xlu1 %225  ;;  %v435_v54 = vstv %s5171_s6  ;;  %v447_v55 = vstv %s5173_s7  ;;  %v610_v56 = vrot.slane %v608_v7, 1  ;;  %v619_v57 = vrot.slane %v617_v14, 2  ;;  %s5280_s6 = sld [smem:[#allocation5 + $0x5a]]  ;;  %s5287_s7 = sld [smem:[#allocation5 + $0x54]] }
  0xde   : > { %v243_v61 = vlaneseq  ;;  %v5243_v63 = vmul.f32 %v573_v47, %v5179_v37  ;;  %v414_v3 = vstv %s5193_s9  ;;  %v437_v4 = vmul.f32 %v435_v54, %v5179_v37  ;;  %s4466_s9 = sld [smem:[#allocation5 + $0x4f]] }
  0xdf   : > { %812 = vrot.lane.b32.xlu1 %v810_v58, %s8112_s10  ;;  %742 = vrot.lane.b32.xlu0 %v740_v59, %s8116_s13  ;;  %s5165_s10 = sld [smem:[#allocation5 + $0x26]]  ;;  %s5226_s13 = sld [smem:[#allocation5 + $0x1c]]  ;;  %v626_v58 = vmul.f32 %v625_v28, %v5066_v27  ;;  %v635_v59 = vmul.f32 %v634_v29, %v5066_v27  ;;  %v449_v6 = vmul.f32 %v447_v55, %v5179_v37  ;;  %v522_v10 = vrot.slane %v5220_v39, 6 }
  0xe0   : > { %v421_v16 = vstv %s5205_s18  ;;  %v687_v24 = vmul.f32 %v686_v32, %v5066_v27  ;;  %v678_v25 = vmul.f32 %v677_v40, %v5066_v27  ;;  %v244_v28 = vand.u32 127, %v243_v61  ;;  %s4468_s18 = sld [smem:[#allocation5 + $0x5d]] }
  0xe1   : > { %v5127_v5 = vpop.xlane.xlu1 %227  ;;  %v628_v17 = vrot.slane %v626_v58, 3  ;;  %v637_v21 = vrot.slane %v635_v59, 4  ;;  %v442_v8 = vrot.slane %v437_v4, 5  ;;  %v454_v40 = vrot.slane %v449_v6, 6 }
  0xe2   : > { %v422_v14 = vmul.f32 %v421_v16, %v5066_v27  ;;  %v696_v58 = vmul.f32 %v695_v42, %v5066_v27  ;;  %v448_v6 = vmul.f32 %v447_v55, %v5066_v27  ;;  %v5303_v16 = vshrl.u32 %v243_v61, 7 }
  0xe3   : > { %471 = vrot.lane.b32.xlu1 %v470_v1, %s8114_s28  ;;  %480 = vrot.lane.b32.xlu0 %v479_v2, %s8114_s28  ;;  %v656_v1 = vstv %s5185_s8  ;;  %v407_v2 = vstv %s5191_s0  ;;  %s5289_s0 = sld [smem:[#allocation5 + $0x5b]]  ;;  %v250_v42 = vadd.s32 4294967285, %v244_v28  ;;  %v757_v55 = vmul.f32 %v756_v19, %v5066_v27  ;;  %s4463_s8 = sld [smem:[#allocation5 + $0x3a]] }
  0xe4   : > { %v5270_v29 = vmul.f32 %v656_v1, %v5179_v37  ;;  %8122 = vst [vmem:[#allocation17_spill] sm:$0xff] %v5303_v16 }
  0xe5   : > { %v5147_v20 = vpop.xlane.xlu1 %229  ;;  %v643_v50 = vstv %s5165_s10  ;;  %v428_v32 = vstv %s5226_s13  ;;  %s5297_s13 = sld [smem:[#allocation5 + $0x27]]  ;;  %v5324_v19 = vsub.s32 %v250_v42, %v5303_v16  ;;  %s8125_s10 = smov 127  }
  0xe6   : > { %v5248_v0 = vmul.f32 %v643_v50, %v5179_v37  ;;  %v429_v4 = vmul.f32 %v428_v32, %v5066_v27  ;;  %v579_v32 = vrot.slane %v5243_v63, 5 }
  0xe7   : > { %489 = vrot.lane.b32.xlu1 %v488_v11, %s8114_s28  ;;  %498 = vrot.lane.b32.xlu0 %v497_v12, %s8114_s28  ;;  %s5224_s28 = sld [smem:[#allocation5 + $0x2e]]  ;;  %v592_v11 = vrot.slane %v5232_v52, 6  ;;  %v403_v12 = vstv %s5203_s14  ;;  %s4465_s14 = sld [smem:[#allocation5 + $0x48]] }
  0xe9   : > { %v5177_v15 = vpop.xlane.xlu1 %231 }
  0xeb   : > { %550 = vrot.lane.b32.xlu1 %v549_v34, %s4844_s27  ;;  %541 = vrot.lane.b32.xlu0 %v540_v35, %s4844_s27  ;;  %v408_v34 = vmul.f32 %v407_v2, %v5066_v27  ;;  %v415_v35 = vmul.f32 %v414_v3, %v5066_v27  ;;  %v436_v2 = vmul.f32 %v435_v54, %v5066_v27 }
  0xed   : > { %v5209_v9 = vpop.xlane.xlu1 %233  ;;  %v726_v36 = vstv %s5224_s28  ;;  %v410_v7 = vrot.slane %v408_v34, 1  ;;  %v417_v3 = vrot.slane %v415_v35, 2  ;;  %v441_v54 = vrot.slane %v436_v2, 5  ;;  %s5518_s28 = sld [smem:[#allocation5 + $0x39]] }
  0xee   : > { %v698_v34 = vrot.slane %v696_v58, 3  ;;  %v748_v35 = vmul.f32 %v747_v13, %v5066_v27  ;;  %v913_v58 = vstv %s5287_s7  ;;  %v924_v2 = vstv %s5289_s0  ;;  %s5600_s7 = sld [smem:[#allocation5 + $0x34]]  ;;  %s4472_s0 = sld [smem:[#allocation5 + $0x49]] }
  0xef   : > { %568 = vrot.lane.b32.xlu1 %v567_v49, %s4844_s27  ;;  %559 = vrot.lane.b32.xlu0 %v558_v22, %s4844_s27  ;;  %v705_v49 = vmul.f32 %v704_v41, %v5066_v27  ;;  %v404_v22 = vmul.f32 %v403_v12, %v5066_v27  ;;  %v245_v12 = vadd.s32 4294967293, %v244_v28  ;;  %v443_v28 = vsel %vm440_vm12, %v441_v54, %v442_v8 }
  0xf0   : > { %v649_v8 = vrot.slane %v5248_v0, 5  ;;  %v5346_v42 = vmul.f32 %v726_v36, %v5179_v37  ;;  %v713_v54 = vstv %s5297_s13  ;;  %s4471_s13 = sld [smem:[#allocation5 + $0x42]] }
  0xf1   : > { %v5238_v60 = vpop.xlane.xlu1 %289  ;;  %v412_v41 = vadd.f32 %v410_v7, %v404_v22  ;;  %v431_v22 = vrot.slane %v429_v4, 4  ;;  %v5321_v7 = vsub.s32 %v245_v12, %v5303_v16  ;;  %v766_v4 = vmul.f32 %v765_v43, %v5066_v27 }
  0xf3   : > { %611 = vrot.lane.b32.xlu1 %v610_v56, %s4847_s5  ;;  %620 = vrot.lane.b32.xlu0 %v619_v57, %s4847_s5  ;;  %v689_v56 = vrot.slane %v687_v24, 2  ;;  %v680_v57 = vrot.slane %v678_v25, 1  ;;  %v424_v24 = vrot.slane %v422_v14, 3  ;;  %v453_v25 = vrot.slane %v448_v6, 6 }
  0xf4   : > { %v1342_v14 = vstv %s5278_s17  ;;  %v775_v6 = vmul.f32 %v774_v44, %v5066_v27  ;;  %s4467_s17 = sld [smem:[#allocation5 + $0x56]] }
  0xf5   : > { %v5265_v26 = vpop.xlane.xlu1 %291  ;;  %v455_v13 = vsel %vm452_vm13, %v453_v25, %v454_v40  ;;  %v1329_v40 = vstv %s5280_s6  ;;  %v249_v25 = vrot.slane %v5070_v38, %v5321_v7  ;;  %v818_v38 = vmul.f32 %v817_v23, %v5066_v27  ;;  %s5593_s6 = sld [smem:[#allocation5 + $0x3b]] }
  0xf7   : > { %629 = vrot.lane.b32.xlu1 %v628_v17, %s4847_s5  ;;  %638 = vrot.lane.b32.xlu0 %v637_v21, %s4847_s5  ;;  %v707_v17 = vrot.slane %v705_v49, 4  ;;  %v419_v21 = vadd.f32 %v417_v3, %v412_v41  ;;  %v750_v41 = vrot.slane %v748_v35, 1  ;;  %v759_v3 = vrot.slane %v757_v55, 2 }
  0xf9   : > { %v5294_v59 = vpop.xlane.xlu1 %293  ;;  %v426_v49 = vadd.f32 %v424_v24, %v419_v21 }
  0xfb   : > { %690 = vrot.lane.b32.xlu1 %v689_v56, %s4846_s4  ;;  %681 = vrot.lane.b32.xlu0 %v680_v57, %s4846_s4  ;;  %v5330_v56 = vld [vmem:[#allocation2 + $0x18] sm:$0x3]  ;;  %v433_v57 = vadd.f32 %v431_v22, %v426_v49  ;;  %v777_v49 = vrot.slane %v775_v6, 4  ;;  %v827_v22 = vmul.f32 %v826_v18, %v5066_v27  ;;  %v845_v18 = vmul.f32 %v844_v30, %v5066_v27 }
  0xfc   : > { %v1344_v43 = vmul.f32 %v1342_v14, %v5330_v56  ;;  %v1331_v44 = vmul.f32 %v1329_v40, %v5330_v56  ;;  %v5357_v24 = vmul.f32 %v913_v58, %v5330_v56  ;;  %v5368_v55 = vmul.f32 %v924_v2, %v5330_v56 }
  0xfd   : > { %v5313_v61 = vpop.xlane.xlu1 %297  ;;  %v445_v21 = vadd.f32 %v443_v28, %v433_v57  ;;  %v768_v28 = vrot.slane %v766_v4, 3 }
  0xfe   : > { %v1348_v4 = vrot.slane %v1344_v43, 6  ;;  %v1335_v6 = vrot.slane %v1331_v44, 5  ;;  %v517_v43 = vmul.f32 %v516_v46, %v5066_v27  ;;  %v587_v46 = vmul.f32 %v586_v48, %v5066_v27 }
  0xff   : > { %708 = vrot.lane.b32.xlu1 %v707_v17, %s4846_s4  ;;  %699 = vrot.lane.b32.xlu0 %v698_v34, %s4846_s4  ;;  %v8118_v17 = vstv %s5299_s20  ;;  %v254_v34 = vrot.slane %v5081_v53, %v5324_v19  ;;  %v5363_v35 = vadd.f32 %v455_v13, %v445_v21  ;;  %v5380_v13 = vmul.f32 %v713_v54, %v5179_v37 }
 0x100   : > { %v5394_v23 = vmul.f32 %v8118_v17, %v5179_v37  ;;  %v836_v21 = vmul.f32 %v835_v31, %v5066_v27  ;;  %v829_v53 = vrot.slane %v827_v22, 2  ;;  %v820_v17 = vrot.slane %v818_v38, 1 }
 0x101   : > { %v5341_v12 = vpop.xlane.xlu1 %301  ;;  %v256_v30 = vsel %vm255_vm15, %v254_v34, %v249_v25  ;;  %v264_v31 = vrot.slane %v5103_v62, %v5324_v19  ;;  %v847_v25 = vrot.slane %v845_v18, 4  ;;  %v574_v62 = vmul.f32 %v573_v47, %v5066_v27 }
 0x102   : > { %v278_v38 = vrot.slane %v5177_v15, %v5321_v7  ;;  %v521_v48 = vrot.slane %v517_v43, 6  ;;  %v591_v43 = vrot.slane %v587_v46, 6  ;;  %v719_v52 = vrot.slane %v5380_v13, 5 }
 0x103   : > { %751 = vrot.lane.b32.xlu1 %v750_v41, %s8123_s22  ;;  %760 = vrot.lane.b32.xlu0 %v759_v3, %s8123_s22  ;;  %v796_v41 = vstv %s5317_s21  ;;  %v5384_v3 = vld [vmem:[#allocation2 + $0x10] sm:$0xff]  ;;  %v789_v0 = vrot.slane %v5394_v23, 5  ;;  %s4473_s21 = sld [smem:[#allocation5 + $0x50]] }
 0x104   : > { %v914_v47 = vmul.f32 %v913_v58, %v5384_v3  ;;  %v305_v58 = vmul.f32 0.0625, %v5238_v60  ;;  %v798_v63 = vmul.f32 %v796_v41, %v5179_v37 }
 0x105   : > { %v372_v57 = vpop.permute.xlu1 %371 }
 0x106   : > { %378 = vst.msk [vmem:[#allocation4 + $0x3] sm:$0xff] %vm377_vm14, %v372_v57  ;;  %v504_v57 = vmul.f32 %v503_v33, %v5066_v27  ;;  %v269_v33 = vrot.slane %v5127_v5, %v5321_v7  ;;  %v5426_v5 = vmul.f32 %v643_v50, %v5066_v27  ;;  %v282_v50 = vrot.slane %v5209_v9, %v5324_v19 }
 0x107   : > { %769 = vrot.lane.b32.xlu1 %v768_v28, %s8123_s22  ;;  %778 = vrot.lane.b32.xlu0 %v777_v49, %s8123_s22  ;;  %v919_v28 = vrot.slane %v5357_v24, 5  ;;  %v930_v49 = vrot.slane %v5368_v55, 6  ;;  %v1343_v24 = vmul.f32 %v1342_v14, %v5384_v3  ;;  %v1330_v55 = vmul.f32 %v1329_v40, %v5384_v3 }
 0x108   : > { %v838_v14 = vrot.slane %v836_v21, 3  ;;  %v508_v34 = vrot.slane %v504_v57, 5  ;;  %v657_v9 = vmul.f32 %v656_v1, %v5066_v27  ;;  %v306_v57 = vmul.f32 0.0625, %v5265_v26 }
 0x109   : > { %v391_v44 = vpop.permute.xlu1 %390  ;;  %v1347_v22 = vrot.slane %v1343_v24, 6  ;;  %v1334_v40 = vrot.slane %v1330_v55, 5  ;;  %v578_v55 = vrot.slane %v574_v62, 5 }
 0x10a   : > { %397 = vst.msk [vmem:[#allocation4 + $0x1b] sm:$0xff] %vm377_vm14, %v391_v44  ;;  %v510_v60 = vsel %vm440_vm12, %v508_v34, %v509_v51  ;;  %v324_v51 = vrot.slane %v305_v58, %v5321_v7  ;;  %v661_v34 = vrot.slane %v657_v9, 6 }
 0x10b   : > { %830 = vrot.lane.b32.xlu1 %v829_v53, %s8124_s11  ;;  %821 = vrot.lane.b32.xlu0 %v820_v17, %s8124_s11  ;;  %v273_v17 = vrot.slane %v5147_v20, %v5324_v19  ;;  %v5439_v18 = vsel %vm452_vm13, %v1347_v22, %v1348_v4  ;;  %v5442_v21 = vsel %vm440_vm12, %v1334_v40, %v1335_v6  ;;  %v918_v4 = vrot.slane %v914_v47, 5 }
 0x10c   : > { %v925_v20 = vmul.f32 %v924_v2, %v5384_v3  ;;  %v307_v2 = vmul.f32 0.0625, %v5294_v59  ;;  %v523_v59 = vsel %vm452_vm13, %v521_v48, %v522_v10  ;;  %v727_v22 = vmul.f32 %v726_v36, %v5066_v27 }
 0x10d   : > { %v393_v53 = vpop.permute.xlu1 %392  ;;  %v274_v24 = vsel %vm255_vm15, %v273_v17, %v269_v33  ;;  %v5465_v1 = vsel %vm440_vm12, %v918_v4, %v919_v28  ;;  %v328_v28 = vrot.slane %v306_v57, %v5324_v19  ;;  %v580_v40 = vsel %vm440_vm12, %v578_v55, %v579_v32 }
 0x10e   : > { %398 = vst.msk [vmem:[#allocation4 + $0x23] sm:$0xff] %vm377_vm14, %v393_v53  ;;  %v929_v44 = vrot.slane %v925_v20, 6  ;;  %v333_v46 = vrot.slane %v307_v2, %v5321_v7  ;;  %v311_v48 = vmul.f32 0.0625, %v5341_v12  ;;  %v731_v47 = vrot.slane %v727_v22, 6 }
 0x10f   : > { %v224_v15 = vpop.xlane.xlu0 %223  ;;  %848 = vrot.lane.b32.xlu1 %v847_v25, %s8124_s11  ;;  %839 = vrot.lane.b32.xlu0 %v838_v14, %s8124_s11  ;;  %v283_v25 = vsel %vm255_vm15, %v282_v50, %v278_v38  ;;  %v648_v14 = vrot.slane %v5426_v5, 5  ;;  %v329_v36 = vsel %vm255_vm15, %v328_v28, %v324_v51  ;;  %v8126_v50 = vstv %s5299_s20  ;;  %s4474_s20 = sld [smem:[#allocation5 + $0x57]] }
 0x110   : > { %v260_v6 = vrot.slane %v224_v15, %v5321_v7  ;;  %v5473_v33 = vsel %vm452_vm13, %v929_v44, %v930_v49  ;;  %v784_v13 = vmul.f32 %v8126_v50, %v5066_v27  ;;  %v853_v20 = vstv %s5462_s15  ;;  %s5622_s15 = sld [smem:[#allocation5 + $0x35]] }
 0x111   : > { %v650_v53 = vsel %vm440_vm12, %v648_v14, %v649_v8  ;;  %v8127_v15 = vrot.slane %v5270_v29, 6  ;;  %v797_v57 = vmul.f32 %v796_v41, %v5066_v27  ;;  %v802_v8 = vrot.slane %v798_v63, 6 }
 0x112   : > { %v265_v26 = vsel %vm255_vm15, %v264_v31, %v260_v6  ;;  %v732_v31 = vrot.slane %v5346_v42, 6  ;;  %v593_v42 = vsel %vm452_vm13, %v591_v43, %v592_v11  ;;  %v866_v11 = vstv %s5454_s12  ;;  %s5611_s12 = sld [smem:[#allocation5 + $0x5e]] }
 0x113   : > { %v284_v45 = vsel %vm156_vm8, %v265_v26, %v256_v30  ;;  %511 = vrot.lane.b32.xlu1 %v510_v60, %s8125_s10  ;;  %524 = vrot.lane.b32.xlu0 %v523_v59, %s8125_s10  ;;  %v296_v39 = vpop.xlane.xlu0 %295  ;;  %v309_v30 = vmul.f32 0.0625, %v5313_v61  ;;  %v714_v61 = vmul.f32 %v713_v54, %v5066_v27  ;;  %v663_v58 = vsel %vm452_vm13, %v661_v34, %v8127_v15 }
 0x114   : > { %v285_v10 = vsel %vm158_vm9, %v274_v24, %v284_v45  ;;  %v308_v49 = vmul.f32 0.0625, %v296_v39  ;;  %v868_v6 = vmul.f32 %v866_v11, %v5179_v37  ;;  %v855_v43 = vmul.f32 %v853_v20, %v5179_v37 }
 0x115   : > { %v286_v62 = vsel %vm160_vm10, %v283_v25, %v285_v10  ;;  %v342_v54 = vrot.slane %v309_v30, %v5321_v7  ;;  %v718_v9 = vrot.slane %v714_v61, 5  ;;  %v351_v41 = vrot.slane %v311_v48, %v5321_v7 }
 0x116   : > { %288 = vst.msk [vmem:[#allocation3 + $0x3] sm:$0xf] %vm165_vm11, %v286_v62  ;;  %v337_v5 = vrot.slane %v308_v49, %v5324_v19  ;;  %v733_v24 = vsel %vm452_vm13, %v731_v47, %v732_v31  ;;  %v788_v60 = vrot.slane %v784_v13, 5  ;;  %v867_v55 = vmul.f32 %v866_v11, %v5066_v27 }
 0x117   : > { %594 = vrot.lane.b32.xlu1 %v593_v42, %s4844_s27  ;;  %581 = vrot.lane.b32.xlu0 %v580_v40, %s4844_s27  ;;  %v300_v32 = vpop.xlane.xlu0 %299  ;;  %v854_v23 = vmul.f32 %v853_v20, %v5066_v27  ;;  %v720_v26 = vsel %vm440_vm12, %v718_v9, %v719_v52  ;;  %v801_v25 = vrot.slane %v797_v57, 6  ;;  %v872_v45 = vrot.slane %v868_v6, 6 }
 0x118   : > { %v338_v17 = vsel %vm255_vm15, %v337_v5, %v333_v46  ;;  %v310_v38 = vmul.f32 0.0625, %v300_v32  ;;  %v859_v51 = vrot.slane %v855_v43, 5  ;;  %v790_v31 = vsel %vm440_vm12, %v788_v60, %v789_v0 }
 0x119   : > { %v357_v4 = vsel %vm156_vm8, %v338_v17, %v329_v36  ;;  %v803_v39 = vsel %vm452_vm13, %v801_v25, %v802_v8  ;;  %v871_v10 = vrot.slane %v867_v55, 6  ;;  %v858_v46 = vrot.slane %v854_v23, 5 }
 0x11a   : > { %v346_v12 = vrot.slane %v310_v38, %v5324_v19  ;;  %v935_v30 = vstv %s5538_s19  ;;  %v961_v34 = vstv %s5543_s23  ;;  %v952_v22 = vstv %s5545_s24  ;;  %s5628_s19 = sld [smem:[#allocation5 + $0x3c]]  ;;  %s5640_s23 = sld [smem:[#allocation5 + $0x51]] }
 0x11b   : > { %651 = vrot.lane.b32.xlu1 %v650_v53, %s4847_s5  ;;  %664 = vrot.lane.b32.xlu0 %v663_v58, %s4847_s5  ;;  %v304_v29 = vpop.xlane.xlu0 %303  ;;  %v873_v62 = vsel %vm452_vm13, %v871_v10, %v872_v45  ;;  %v860_v14 = vsel %vm440_vm12, %v858_v46, %v859_v51  ;;  %v979_v42 = vstv %s5549_s1  ;;  %v936_v61 = vmul.f32 %v935_v30, %v5384_v3  ;;  %s5642_s24 = sld [smem:[#allocation5 + $0x4a]]  ;;  %s5646_s1 = sld [smem:[#allocation5 + $0x5f]] }
 0x11c   : > { %v347_v2 = vsel %vm255_vm15, %v346_v12, %v342_v54  ;;  %v312_v44 = vmul.f32 0.0625, %v304_v29  ;;  %v962_v5 = vmul.f32 %v961_v34, %v5384_v3  ;;  %v953_v36 = vmul.f32 %v952_v22, %v5384_v3 }
 0x11d   : > { %v358_v37 = vsel %vm158_vm9, %v347_v2, %v357_v4  ;;  %v980_v52 = vmul.f32 %v979_v42, %v5384_v3  ;;  %v981_v63 = vmul.f32 %v979_v42, %v5330_v56  ;;  %v970_v11 = vstv %s4459_s25  ;;  %s5648_s25 = sld [smem:[#allocation5 + $0x58]] }
 0x11e   : > { %v355_v59 = vrot.slane %v312_v44, %v5324_v19  ;;  %v943_v19 = vstv %s5518_s28  ;;  %v992_v32 = vstv %s4461_s26  ;;  %v964_v17 = vrot.slane %v962_v5, 3  ;;  %s5624_s28 = sld [smem:[#allocation5 + $0x43]]  ;;  %s5667_s26 = sld [smem:[#allocation5 + $0x3d]] }
 0x11f   : > { %734 = vrot.lane.b32.xlu1 %v733_v24, %s4846_s4  ;;  %721 = vrot.lane.b32.xlu0 %v720_v26, %s4846_s4  ;;  %v374_v27 = vpop.permute.xlu0 %373  ;;  %v944_v49 = vmul.f32 %v943_v19, %v5384_v3  ;;  %v955_v54 = vrot.slane %v953_v36, 2  ;;  %v971_v38 = vmul.f32 %v970_v11, %v5384_v3  ;;  %v984_v48 = vrot.slane %v980_v52, 5 }
 0x120   : > { %v356_v7 = vsel %vm255_vm15, %v355_v59, %v351_v41  ;;  %379 = vst.msk [vmem:[#allocation4 + $0xb] sm:$0xff] %vm377_vm14, %v374_v27  ;;  %v985_v53 = vrot.slane %v981_v63, 5  ;;  %v993_v47 = vmul.f32 %v992_v32, %v5384_v3  ;;  %v994_v50 = vmul.f32 %v992_v32, %v5330_v56 }
 0x121   : > { %v359_v28 = vsel %vm160_vm10, %v356_v7, %v358_v37  ;;  %v946_v40 = vrot.slane %v944_v49, 1  ;;  %v973_v13 = vrot.slane %v971_v38, 4  ;;  %v1005_v20 = vstv %s5572_s29  ;;  %s5682_s29 = sld [smem:[#allocation5 + $0x36]] }
 0x122   : > { %362 = vst.msk [vmem:[#allocation3 + $0x13] sm:$0xf] %vm165_vm11, %v359_v28  ;;  %v1022_v15 = vstv %s5574_s30  ;;  %v986_v58 = vsel %vm440_vm12, %v984_v48, %v985_v53  ;;  %v997_v9 = vrot.slane %v993_v47, 6  ;;  %v998_v57 = vrot.slane %v994_v50, 6  ;;  %s5688_s30 = sld [smem:[#allocation5 + $0x4b]] }
 0x123   : > { %791 = vrot.lane.b32.xlu1 %v790_v31, %s8123_s22  ;;  %804 = vrot.lane.b32.xlu0 %v803_v39, %s8123_s22  ;;  %v1013_v12 = vstv %s4463_s8  ;;  %v1006_v0 = vmul.f32 %v1005_v20, %v5384_v3  ;;  %v1023_v8 = vmul.f32 %v1022_v15, %v5384_v3  ;;  %v1040_v29 = vstv %s4466_s9  ;;  %s5690_s8 = sld [smem:[#allocation5 + $0x44]]  ;;  %s5694_s9 = sld [smem:[#allocation5 + $0x59]] }
 0x124   : > { %v1014_v4 = vmul.f32 %v1013_v12, %v5384_v3  ;;  %v999_v6 = vsel %vm452_vm13, %v997_v9, %v998_v57  ;;  %v1031_v43 = vstv %s4465_s14  ;;  %v1062_v2 = vstv %s4468_s18  ;;  %s5701_s14 = sld [smem:[#allocation5 + $0x52]]  ;;  %s5705_s18 = sld [smem:[#allocation5 + $0x60]] }
 0x125   : > { %v1049_v41 = vstv %s4467_s17  ;;  %v1025_v44 = vrot.slane %v1023_v8, 2  ;;  %v1041_v60 = vmul.f32 %v1040_v29, %v5384_v3  ;;  %v1032_v55 = vmul.f32 %v1031_v43, %v5384_v3  ;;  %s5727_s17 = sld [smem:[#allocation5 + $0x37]] }
 0x126   : > { %v1016_v24 = vrot.slane %v1014_v4, 1  ;;  %v1063_v23 = vmul.f32 %v1062_v2, %v5384_v3  ;;  %v1064_v26 = vmul.f32 %v1062_v2, %v5330_v56  ;;  %v1050_v25 = vmul.f32 %v1049_v41, %v5384_v3 }
 0x127   : > { %874 = vrot.lane.b32.xlu1 %v873_v62, %s8124_s11  ;;  %861 = vrot.lane.b32.xlu0 %v860_v14, %s8124_s11  ;;  %v1051_v37 = vmul.f32 %v1049_v41, %v5330_v56  ;;  %v1043_v59 = vrot.slane %v1041_v60, 4  ;;  %v1034_v27 = vrot.slane %v1032_v55, 3  ;;  %v1083_v7 = vstv %s5593_s6  ;;  %s5729_s6 = sld [smem:[#allocation5 + $0x45]] }
 0x128   : > { %v1067_v45 = vrot.slane %v1063_v23, 6  ;;  %v1068_v51 = vrot.slane %v1064_v26, 6  ;;  %v1054_v19 = vrot.slane %v1050_v25, 5  ;;  %v1084_v31 = vmul.f32 %v1083_v7, %v5384_v3 }
 0x129   : > { %v1055_v28 = vrot.slane %v1051_v37, 5  ;;  %v1075_v39 = vstv %s5600_s7  ;;  %v1101_v49 = vstv %s4472_s0  ;;  %v1092_v30 = vstv %s4471_s13  ;;  %s5734_s7 = sld [smem:[#allocation5 + $0x3e]]  ;;  %s4494_s0 = sld [smem:[#allocation5 + $0x53]] }
 0x12a   : > { %v1069_v10 = vsel %vm452_vm13, %v1067_v45, %v1068_v51  ;;  %v1119_v62 = vstv %s4474_s20  ;;  %v1086_v14 = vrot.slane %v1084_v31, 1  ;;  %v1076_v34 = vmul.f32 %v1075_v39, %v5384_v3  ;;  %s4493_s13 = sld [smem:[#allocation5 + $0x4c]]  ;;  %s4507_s20 = sld [smem:[#allocation5 + $0x6a]] }
 0x12b   : > { %947 = vrot.lane.b32.xlu1 %v946_v40, %s8125_s10  ;;  %938 = vrot.lane.b32.xlu0 %v936_v61, %s8125_s10  ;;  %v1056_v46 = vsel %vm440_vm12, %v1054_v19, %v1055_v28  ;;  %v1102_v22 = vmul.f32 %v1101_v49, %v5384_v3  ;;  %v1093_v42 = vmul.f32 %v1092_v30, %v5384_v3  ;;  %v1110_v5 = vstv %s4473_s21  ;;  %s5774_s21 = sld [smem:[#allocation5 + $0x63]] }
 0x12c   : > { %v1120_v40 = vmul.f32 %v1119_v62, %v5384_v3  ;;  %v1121_v61 = vmul.f32 %v1119_v62, %v5330_v56  ;;  %v1132_v36 = vstv %s5611_s12  ;;  %v1145_v20 = vstv %s5622_s15  ;;  %s5776_s12 = sld [smem:[#allocation5 + $0x78]]  ;;  %s5778_s15 = sld [smem:[#allocation5 + $0x71]] }
 0x12d   : > { %v1104_v11 = vrot.slane %v1102_v22, 3  ;;  %v1095_v32 = vrot.slane %v1093_v42, 2  ;;  %v1133_v48 = vmul.f32 %v1132_v36, %v5384_v3  ;;  %v1134_v53 = vmul.f32 %v1132_v36, %v5330_v56 }
 0x12e   : > { %v1125_v38 = vrot.slane %v1121_v61, 5  ;;  %v1162_v15 = vstv %s5624_s28  ;;  %v1153_v12 = vstv %s5628_s19  ;;  %v1146_v4 = vmul.f32 %v1145_v20, %v5384_v3  ;;  %s5782_s28 = sld [smem:[#allocation5 + $0x86]]  ;;  %s5790_s19 = sld [smem:[#allocation5 + $0x7f]] }
 0x12f   : > { %965 = vrot.lane.b32.xlu1 %v964_v17, %s8125_s10  ;;  %956 = vrot.lane.b32.xlu0 %v955_v54, %s8125_s10  ;;  %v1111_v17 = vmul.f32 %v1110_v5, %v5384_v3  ;;  %v1124_v54 = vrot.slane %v1120_v40, 5  ;;  %v1137_v9 = vrot.slane %v1133_v48, 6  ;;  %v1138_v57 = vrot.slane %v1134_v53, 6 }
 0x130   : > { %v1154_v29 = vmul.f32 %v1153_v12, %v5384_v3  ;;  %v1180_v2 = vstv %s5640_s23  ;;  %v1171_v41 = vstv %s5642_s24  ;;  %v1223_v39 = vstv %s5667_s26  ;;  %s5794_s23 = sld [smem:[#allocation5 + $0x8d]]  ;;  %s5815_s24 = sld [smem:[#allocation5 + $0x64]] }
 0x131   : > { %v1139_v43 = vsel %vm452_vm13, %v1137_v9, %v1138_v57  ;;  %v1181_v25 = vmul.f32 %v1180_v2, %v5384_v3  ;;  %v1172_v37 = vmul.f32 %v1171_v41, %v5384_v3  ;;  %v1215_v22 = vstv %s5682_s29  ;;  %s5840_s26 = sld [smem:[#allocation5 + $0x8e]]  ;;  %s5844_s29 = sld [smem:[#allocation5 + $0x80]] }
 0x132   : > { %v1156_v26 = vrot.slane %v1154_v29, 1  ;;  %v1241_v61 = vstv %s5688_s30  ;;  %v1232_v5 = vstv %s5690_s8  ;;  %v1259_v36 = vstv %s5694_s9  ;;  %s5846_s30 = sld [smem:[#allocation5 + $0x79]]  ;;  %s5850_s8 = sld [smem:[#allocation5 + $0x87]] }
 0x133   : > { %987 = vrot.lane.b32.xlu1 %v986_v58, %s8125_s10  ;;  %974 = vrot.lane.b32.xlu0 %v973_v13, %s8125_s10  ;;  %v1113_v13 = vrot.slane %v1111_v17, 4  ;;  %v1126_v58 = vsel %vm440_vm12, %v1124_v54, %v1125_v38  ;;  %v1183_v28 = vrot.slane %v1181_v25, 4  ;;  %v1174_v31 = vrot.slane %v1172_v37, 3  ;;  %s5863_s9 = sld [smem:[#allocation5 + $0x6c]] }
 0x134   : > { %v1216_v54 = vmul.f32 %v1215_v22, %v5384_v3  ;;  %v1242_v38 = vmul.f32 %v1241_v61, %v5384_v3  ;;  %v1233_v48 = vmul.f32 %v1232_v5, %v5384_v3  ;;  %v1260_v53 = vmul.f32 %v1259_v36, %v5384_v3 }
 0x135   : > { %v1250_v20 = vstv %s5701_s14  ;;  %s5880_s14 = sld [smem:[#allocation5 + $0x65]] }
 0x136   : > { %v1244_v57 = vrot.slane %v1242_v38, 3  ;;  %v1235_v12 = vrot.slane %v1233_v48, 2  ;;  %v5796_v38 = vld [vmem:[#allocation3] sm:$0xff] }
 0x137   : > { %1008 = vrot.lane.b32.xlu1 %v1006_v0, %s4844_s27  ;;  %1000 = vrot.lane.b32.xlu0 %v999_v6, %s8125_s10  ;;  %v1163_v6 = vmul.f32 %v1162_v15, %v5384_v3  ;;  %v1272_v15 = vstv %s5705_s18  ;;  %s5882_s18 = sld [smem:[#allocation5 + $0x7a]] }
 0x138   : > { %v1274_v2 = vmul.f32 %v1272_v15, %v5330_v56 }
 0x139   : > { %v1165_v23 = vrot.slane %v1163_v6, 2  ;;  %v1264_v6 = vrot.slane %v1260_v53, 5 }
 0x13b   : > { %1026 = vrot.lane.b32.xlu1 %v1025_v44, %s4844_s27  ;;  %1017 = vrot.lane.b32.xlu0 %v1016_v24, %s4844_s27  ;;  %v1202_v44 = vstv %s5646_s1  ;;  %v1189_v24 = vstv %s5648_s25  ;;  %s5824_s1 = sld [smem:[#allocation5 + $0x72]]  ;;  %s5826_s25 = sld [smem:[#allocation5 + $0x6b]] }
 0x13c   : > { %v1190_v7 = vmul.f32 %v1189_v24, %v5384_v3  ;;  %v1191_v45 = vmul.f32 %v1189_v24, %v5330_v56 }
 0x13e   : > { %v1194_v49 = vrot.slane %v1190_v7, 5  ;;  %v1195_v30 = vrot.slane %v1191_v45, 5 }
 0x13f   : > { %1044 = vrot.lane.b32.xlu1 %v1043_v59, %s4844_s27  ;;  %1035 = vrot.lane.b32.xlu0 %v1034_v27, %s4844_s27  ;;  %v1203_v59 = vmul.f32 %v1202_v44, %v5384_v3  ;;  %v1204_v27 = vmul.f32 %v1202_v44, %v5330_v56 }
 0x140   : > { %v1196_v40 = vsel %vm440_vm12, %v1194_v49, %v1195_v30 }
 0x143   : > { %1070 = vrot.lane.b32.xlu1 %v1069_v10, %s4844_s27  ;;  %1057 = vrot.lane.b32.xlu0 %v1056_v46, %s4844_s27  ;;  %v1207_v10 = vrot.slane %v1203_v59, 6  ;;  %v1208_v46 = vrot.slane %v1204_v27, 6  ;;  %v1278_v59 = vrot.slane %v1274_v2, 6  ;;  %v1293_v27 = vstv %s5734_s7  ;;  %s5895_s7 = sld [smem:[#allocation5 + $0x81]] }
 0x145   : > { %v1209_v42 = vsel %vm452_vm13, %v1207_v10, %v1208_v46  ;;  %v1320_v10 = vstv %s4494_s0  ;;  %v1311_v46 = vstv %s4493_s13  ;;  %s5903_s0 = sld [smem:[#allocation5 + $0x8f]]  ;;  %s5922_s13 = sld [smem:[#allocation5 + $0x66]] }
 0x147   : > { %1087 = vrot.lane.b32.xlu1 %v1086_v14, %s4847_s5  ;;  %1078 = vrot.lane.b32.xlu0 %v1076_v34, %s4847_s5  ;;  %v1224_v34 = vmul.f32 %v1223_v39, %v5384_v3 }
 0x149   : > { %v5633_v52 = vpop.permute.xlu1 %532  ;;  %v5635_v63 = vpop.permute.xlu0 %462  ;;  %v1226_v17 = vrot.slane %v1224_v34, 1 }
 0x14b   : > { %1105 = vrot.lane.b32.xlu1 %v1104_v11, %s4847_s5  ;;  %1096 = vrot.lane.b32.xlu0 %v1095_v32, %s4847_s5 }
 0x14d   : > { %v5650_v47 = vpop.permute.xlu1 %672  ;;  %v5652_v50 = vpop.permute.xlu0 %602 }
 0x14f   : > { %1127 = vrot.lane.b32.xlu1 %v1126_v58, %s4847_s5  ;;  %1114 = vrot.lane.b32.xlu0 %v1113_v13, %s4847_s5  ;;  %v1261_v13 = vmul.f32 %v1259_v36, %v5330_v56 }
 0x151   : > { %v5660_v0 = vpop.permute.xlu1 %812  ;;  %v5662_v8 = vpop.permute.xlu0 %742  ;;  %v1265_v29 = vrot.slane %v1261_v13, 5 }
 0x153   : > { %1148 = vrot.lane.b32.xlu1 %v1146_v4, %s4846_s4  ;;  %1140 = vrot.lane.b32.xlu0 %v1139_v43, %s4847_s5  ;;  %v1251_v4 = vmul.f32 %v1250_v20, %v5384_v3  ;;  %v1273_v43 = vmul.f32 %v1272_v15, %v5384_v3  ;;  %v1266_v25 = vsel %vm440_vm12, %v1264_v6, %v1265_v29  ;;  %v1447_v20 = vstv %s5776_s12  ;;  %s5948_s12 = sld [smem:[#allocation5 + $0x90]] }
 0x154   : > { %v1438_v15 = vstv %s5778_s15  ;;  %s5952_s15 = sld [smem:[#allocation5 + $0x82]] }
 0x155   : > { %v5676_v60 = vpop.permute.xlu1 %471  ;;  %v5678_v55 = vpop.permute.xlu0 %480  ;;  %v1253_v24 = vrot.slane %v1251_v4, 4  ;;  %v1277_v37 = vrot.slane %v1273_v43, 6  ;;  %v1439_v2 = vmul.f32 %v1438_v15, %v5796_v38 }
 0x157   : > { %1166 = vrot.lane.b32.xlu1 %v1165_v23, %s4846_s4  ;;  %1157 = vrot.lane.b32.xlu0 %v1156_v26, %s4846_s4  ;;  %v1285_v23 = vstv %s5727_s17  ;;  %v1302_v26 = vstv %s5729_s6  ;;  %v1279_v39 = vsel %vm452_vm13, %v1277_v37, %v1278_v59  ;;  %s5888_s17 = sld [smem:[#allocation5 + $0x73]]  ;;  %s5892_s6 = sld [smem:[#allocation5 + $0x88]] }
 0x158   : > { %v1286_v45 = vmul.f32 %v1285_v23, %v5384_v3  ;;  %v1478_v23 = vstv %s5794_s23  ;;  %s5981_s23 = sld [smem:[#allocation5 + $0x6e]] }
 0x159   : > { %v5696_v51 = vpop.permute.xlu1 %489  ;;  %v5698_v19 = vpop.permute.xlu0 %498 }
 0x15b   : > { %1184 = vrot.lane.b32.xlu1 %v1183_v28, %s4846_s4  ;;  %1175 = vrot.lane.b32.xlu0 %v1174_v31, %s4846_s4  ;;  %v1303_v28 = vmul.f32 %v1302_v26, %v5384_v3  ;;  %v1294_v31 = vmul.f32 %v1293_v27, %v5384_v3  ;;  %v1441_v27 = vrot.slane %v1439_v2, 2  ;;  %v1517_v2 = vstv %s5846_s30  ;;  %s6021_s30 = sld [smem:[#allocation5 + $0x91]] }
 0x15d   : > { %v5707_v62 = vpop.permute.xlu1 %550  ;;  %v5709_v14 = vpop.permute.xlu0 %541  ;;  %v1305_v34 = vrot.slane %v1303_v28, 2  ;;  %v1296_v22 = vrot.slane %v1294_v31, 1 }
 0x15f   : > { %1210 = vrot.lane.b32.xlu1 %v1209_v42, %s4846_s4  ;;  %1197 = vrot.lane.b32.xlu0 %v1196_v40, %s4846_s4  ;;  %v1321_v42 = vmul.f32 %v1320_v10, %v5384_v3  ;;  %v1312_v40 = vmul.f32 %v1311_v46, %v5384_v3 }
 0x161   : > { %v5720_v11 = vpop.permute.xlu1 %568  ;;  %v5722_v32 = vpop.permute.xlu0 %559  ;;  %v1323_v3 = vrot.slane %v1321_v42, 4  ;;  %v1314_v36 = vrot.slane %v1312_v40, 3  ;;  %v1491_v42 = vstv %s5815_s24  ;;  %v1508_v40 = vstv %s5824_s1  ;;  %s5998_s24 = sld [smem:[#allocation5 + $0x67]]  ;;  %s6000_s1 = sld [smem:[#allocation5 + $0x7c]] }
 0x162   : > { %v1509_v15 = vmul.f32 %v1508_v40, %v5796_v38 }
 0x163   : > { %1227 = vrot.lane.b32.xlu1 %v1226_v17, %s8123_s22  ;;  %1218 = vrot.lane.b32.xlu0 %v1216_v54, %s8123_s22  ;;  %v465_v17 = vadd.f32 %v5635_v63, %v5363_v35  ;;  %v1429_v54 = vstv %s4507_s20  ;;  %v1421_v63 = vstv %s5774_s21  ;;  %s5931_s20 = sld [smem:[#allocation5 + $0x74]]  ;;  %s5933_s21 = sld [smem:[#allocation5 + $0x6d]] }
 0x164   : > { %v1430_v35 = vmul.f32 %v1429_v54, %v5796_v38  ;;  %v1422_v43 = vmul.f32 %v1421_v63, %v5796_v38 }
 0x165   : > { %v5739_v58 = vpop.permute.xlu1 %611  ;;  %v5741_v9 = vpop.permute.xlu0 %620  ;;  %v474_v48 = vadd.f32 %v5676_v60, %v465_v17 }
 0x166   : > { %v1432_v29 = vrot.slane %v1430_v35, 1 }
 0x167   : > { %1245 = vrot.lane.b32.xlu1 %v1244_v57, %s8123_s22  ;;  %1236 = vrot.lane.b32.xlu0 %v1235_v12, %s8123_s22  ;;  %v5811_v57 = vld [vmem:[#allocation3 + $0x8] sm:$0x3]  ;;  %v1465_v12 = vstv %s5782_s28  ;;  %v483_v60 = vadd.f32 %v5678_v55, %v474_v48  ;;  %s5954_s28 = sld [smem:[#allocation5 + $0x7b]] }
 0x168   : > { %v1467_v55 = vmul.f32 %v1465_v12, %v5811_v57  ;;  %v1480_v10 = vmul.f32 %v1478_v23, %v5811_v57 }
 0x169   : > { %v5748_v41 = vpop.permute.xlu1 %629  ;;  %v5750_v44 = vpop.permute.xlu0 %638  ;;  %v492_v26 = vadd.f32 %v5696_v51, %v483_v60  ;;  %v1548_v60 = vstv %s5840_s26  ;;  %s6010_s26 = sld [smem:[#allocation5 + $0x8a]] }
 0x16a   : > { %v1471_v31 = vrot.slane %v1467_v55, 5  ;;  %v1484_v48 = vrot.slane %v1480_v10, 6 }
 0x16b   : > { %1267 = vrot.lane.b32.xlu1 %v1266_v25, %s8123_s22  ;;  %1254 = vrot.lane.b32.xlu0 %v1253_v24, %s8123_s22  ;;  %v1456_v24 = vstv %s5790_s19  ;;  %v501_v51 = vadd.f32 %v5698_v19, %v492_v26  ;;  %s5958_s19 = sld [smem:[#allocation5 + $0x89]] }
 0x16d   : > { %v5758_v56 = vpop.permute.xlu1 %690  ;;  %v5760_v7 = vpop.permute.xlu0 %681 }
 0x16f   : > { %1288 = vrot.lane.b32.xlu1 %v1286_v45, %s8124_s11  ;;  %1280 = vrot.lane.b32.xlu0 %v1279_v39, %s8123_s22  ;;  %v1457_v45 = vmul.f32 %v1456_v24, %v5796_v38  ;;  %v1479_v39 = vmul.f32 %v1478_v23, %v5796_v38  ;;  %v1550_v24 = vmul.f32 %v1548_v60, %v5811_v57 }
 0x171   : > { %v5768_v49 = vpop.permute.xlu1 %708  ;;  %v5770_v30 = vpop.permute.xlu0 %699  ;;  %v1483_v54 = vrot.slane %v1479_v39, 6 }
 0x173   : > { %1306 = vrot.lane.b32.xlu1 %v1305_v34, %s8124_s11  ;;  %1297 = vrot.lane.b32.xlu0 %v1296_v22, %s8124_s11  ;;  %v1459_v22 = vrot.slane %v1457_v45, 4  ;;  %v1518_v45 = vmul.f32 %v1517_v2, %v5796_v38 }
 0x175   : > { %v5784_v61 = vpop.permute.xlu1 %751  ;;  %v5786_v5 = vpop.permute.xlu0 %760 }
 0x177   : > { %1324 = vrot.lane.b32.xlu1 %v1323_v3, %s8124_s11  ;;  %1315 = vrot.lane.b32.xlu0 %v1314_v36, %s8124_s11  ;;  %v1499_v3 = vstv %s5826_s25  ;;  %s6006_s25 = sld [smem:[#allocation5 + $0x75]] }
 0x179   : > { %v5799_v53 = vpop.permute.xlu1 %769  ;;  %v5801_v13 = vpop.permute.xlu0 %778 }
 0x17b   : > { %1350 = vrot.lane.b32.xlu1 %v5439_v18, %s8124_s11  ;;  %1337 = vrot.lane.b32.xlu0 %v5442_v21, %s8124_s11  ;;  %v1448_v18 = vmul.f32 %v1447_v20, %v5796_v38  ;;  %v1466_v21 = vmul.f32 %v1465_v12, %v5796_v38  ;;  %v1492_v20 = vmul.f32 %v1491_v42, %v5796_v38  ;;  %v1569_v42 = vstv %s5863_s9  ;;  %s6051_s9 = sld [smem:[#allocation5 + $0x76]] }
 0x17c   : > { %v1500_v12 = vmul.f32 %v1499_v3, %v5796_v38 }
 0x17d   : > { %v5817_v4 = vpop.permute.xlu1 %830  ;;  %v5819_v6 = vpop.permute.xlu0 %821  ;;  %v1450_v59 = vrot.slane %v1448_v18, 3  ;;  %v1470_v28 = vrot.slane %v1466_v21, 5  ;;  %v1526_v18 = vstv %s5844_s29  ;;  %v1535_v21 = vstv %s5850_s8  ;;  %s6013_s29 = sld [smem:[#allocation5 + $0x83]]  ;;  %s6042_s8 = sld [smem:[#allocation5 + $0x68]] }
 0x17e   : > { %v1537_v39 = vmul.f32 %v1535_v21, %v5811_v57 }
 0x17f   : > { %1433 = vrot.lane.b32.xlu1 %v1432_v29, %s8125_s10  ;;  %1424 = vrot.lane.b32.xlu0 %v1422_v43, %s8125_s10  ;;  %v1472_v17 = vsel %vm440_vm12, %v1470_v28, %v1471_v31  ;;  %v1485_v43 = vsel %vm452_vm13, %v1483_v54, %v1484_v48  ;;  %v1536_v31 = vmul.f32 %v1535_v21, %v5796_v38 }
 0x181   : > { %v5835_v25 = vpop.permute.xlu1 %848  ;;  %v5837_v37 = vpop.permute.xlu0 %839 }
 0x183   : > { %1451 = vrot.lane.b32.xlu1 %v1450_v59, %s8125_s10  ;;  %1442 = vrot.lane.b32.xlu0 %v1441_v27, %s8125_s10  ;;  %v1511_v59 = vrot.slane %v1509_v15, 2  ;;  %v1502_v27 = vrot.slane %v1500_v12, 1 }
 0x185   : > { %v512_v46 = vpop.permute.xlu1 %511  ;;  %v525_v34 = vpop.permute.xlu0 %524 }
 0x186   : > { %v514_v36 = vadd.f32 %v512_v46, %v501_v51 }
 0x187   : > { %1473 = vrot.lane.b32.xlu1 %v1472_v17, %s8125_s10  ;;  %1460 = vrot.lane.b32.xlu0 %v1459_v22, %s8125_s10  ;;  %v1554_v22 = vrot.slane %v1550_v24, 6  ;;  %v1541_v17 = vrot.slane %v1537_v39, 5 }
 0x188   : > { %v527_v19 = vadd.f32 %v525_v34, %v514_v36  ;;  %v1520_v34 = vrot.slane %v1518_v45, 3  ;;  %v1540_v36 = vrot.slane %v1536_v31, 5  ;;  %v1618_v45 = vstv %s5903_s0  ;;  %s6090_s0 = sld [smem:[#allocation5 + $0x31]] }
 0x189   : > { %v595_v35 = vpop.permute.xlu1 %594  ;;  %v582_v63 = vpop.permute.xlu0 %581 }
 0x18a   : > { %v535_v29 = vadd.f32 %v5633_v52, %v527_v19  ;;  %v1527_v52 = vmul.f32 %v1526_v18, %v5796_v38  ;;  %v1570_v19 = vmul.f32 %v1569_v42, %v5796_v38  ;;  %v1596_v18 = vstv %s5895_s7  ;;  %s6078_s7 = sld [smem:[#allocation5 + $0x8b]] }
 0x18b   : > { %1494 = vrot.lane.b32.xlu1 %v1492_v20, %s4844_s27  ;;  %1486 = vrot.lane.b32.xlu0 %v1485_v43, %s8125_s10  ;;  %v1587_v20 = vstv %s5882_s18  ;;  %s6068_s18 = sld [smem:[#allocation5 + $0x92]] }
 0x18c   : > { %v544_v55 = vadd.f32 %v5709_v14, %v535_v29  ;;  %v1549_v14 = vmul.f32 %v1548_v60, %v5796_v38  ;;  %v1529_v46 = vrot.slane %v1527_v52, 4  ;;  %v1542_v60 = vsel %vm440_vm12, %v1540_v36, %v1541_v17 }
 0x18d   : > { %v5874_v23 = vpop.permute.xlu1 %651  ;;  %v5876_v26 = vpop.permute.xlu0 %664  ;;  %v1578_v29 = vstv %s5888_s17  ;;  %v1588_v24 = vmul.f32 %v1587_v20, %v5796_v38  ;;  %v1631_v17 = vstv %s5922_s13  ;;  %s6072_s17 = sld [smem:[#allocation5 + $0x84]]  ;;  %s6095_s13 = sld [smem:[#allocation5 + $0x38]] }
 0x18e   : > { %v553_v28 = vadd.f32 %v5707_v62, %v544_v55  ;;  %v1553_v3 = vrot.slane %v1549_v14, 6 }
 0x18f   : > { %1512 = vrot.lane.b32.xlu1 %v1511_v59, %s4844_s27  ;;  %1503 = vrot.lane.b32.xlu0 %v1502_v27, %s4844_s27  ;;  %v1579_v59 = vmul.f32 %v1578_v29, %v5796_v38  ;;  %v1590_v39 = vrot.slane %v1588_v24, 3  ;;  %v1666_v24 = vstv %s5952_s15  ;;  %s6115_s15 = sld [smem:[#allocation5 + $0x4d]] }
 0x190   : > { %v562_v10 = vadd.f32 %v5722_v32, %v553_v28  ;;  %v1555_v12 = vsel %vm452_vm13, %v1553_v3, %v1554_v22 }
 0x191   : > { %v5897_v51 = vpop.permute.xlu1 %734  ;;  %v5899_v62 = vpop.permute.xlu0 %721 }
 0x192   : > { %v571_v40 = vadd.f32 %v5720_v11, %v562_v10  ;;  %v1561_v11 = vstv %s5880_s14  ;;  %v1581_v10 = vrot.slane %v1579_v59, 2  ;;  %v1657_v59 = vstv %s5954_s28  ;;  %s6053_s14 = sld [smem:[#allocation5 + $0x6f]]  ;;  %s6122_s28 = sld [smem:[#allocation5 + $0x94]] }
 0x193   : > { %1530 = vrot.lane.b32.xlu1 %v1529_v46, %s4844_s27  ;;  %1521 = vrot.lane.b32.xlu0 %v1520_v34, %s4844_s27  ;;  %v1562_v55 = vmul.f32 %v1561_v11, %v5796_v38  ;;  %v1597_v46 = vmul.f32 %v1596_v18, %v5796_v38  ;;  %v1688_v18 = vstv %s5948_s12  ;;  %s6113_s12 = sld [smem:[#allocation5 + $0x46]] }
 0x194   : > { %v584_v32 = vadd.f32 %v582_v63, %v571_v40  ;;  %v1605_v63 = vstv %s5892_s6  ;;  %s6074_s6 = sld [smem:[#allocation5 + $0x7d]] }
 0x195   : > { %v5907_v54 = vpop.permute.xlu1 %791  ;;  %v5909_v48 = vpop.permute.xlu0 %804  ;;  %v1606_v27 = vmul.f32 %v1605_v63, %v5796_v38  ;;  %v1607_v52 = vmul.f32 %v1605_v63, %v5811_v57  ;;  %v1632_v63 = vmul.f32 %v1631_v17, %v5796_v38  ;;  %v1709_v17 = vstv %s5981_s23  ;;  %s6132_s23 = sld [smem:[#allocation5 + $0xb7]] }
 0x196   : > { %v597_v15 = vadd.f32 %v595_v35, %v584_v32  ;;  %v1572_v35 = vrot.slane %v1570_v19, 1  ;;  %v1648_v32 = vstv %s5931_s20  ;;  %v1639_v19 = vstv %s5933_s21  ;;  %s6097_s20 = sld [smem:[#allocation5 + $0x3f]]  ;;  %s6107_s21 = sld [smem:[#allocation5 + $0x9b]] }
 0x197   : > { %1556 = vrot.lane.b32.xlu1 %v1555_v12, %s4844_s27  ;;  %1543 = vrot.lane.b32.xlu0 %v1542_v60, %s4844_s27  ;;  %v1610_v22 = vrot.slane %v1606_v27, 5  ;;  %v1611_v42 = vrot.slane %v1607_v52, 5  ;;  %v1690_v27 = vmul.f32 %v1688_v18, %v5811_v57 }
 0x198   : > { %v605_v43 = vadd.f32 %v5652_v50, %v597_v15 }
 0x199   : > { %v5924_v2 = vpop.permute.xlu1 %874  ;;  %v5926_v21 = vpop.permute.xlu0 %861  ;;  %v1612_v20 = vsel %vm440_vm12, %v1610_v22, %v1611_v42 }
 0x19a   : > { %v614_v50 = vadd.f32 %v5739_v58, %v605_v43  ;;  %v1620_v58 = vmul.f32 %v1618_v45, %v5811_v57  ;;  %v1640_v43 = vmul.f32 %v1639_v19, %v5796_v38 }
 0x19b   : > { %1573 = vrot.lane.b32.xlu1 %v1572_v35, %s4847_s5  ;;  %1564 = vrot.lane.b32.xlu0 %v1562_v55, %s4847_s5 }
 0x19c   : > { %v623_v28 = vadd.f32 %v5741_v9, %v614_v50  ;;  %v1619_v9 = vmul.f32 %v1618_v45, %v5796_v38  ;;  %v1624_v12 = vrot.slane %v1620_v58, 6 }
 0x19d   : > { %v5942_v14 = vpop.permute.xlu1 %947  ;;  %v5944_v31 = vpop.permute.xlu0 %938 }
 0x19e   : > { %v632_v34 = vadd.f32 %v5748_v41, %v623_v28  ;;  %v1599_v41 = vrot.slane %v1597_v46, 4  ;;  %v1623_v15 = vrot.slane %v1619_v9, 6 }
 0x19f   : > { %1591 = vrot.lane.b32.xlu1 %v1590_v39, %s4847_s5  ;;  %1582 = vrot.lane.b32.xlu0 %v1581_v10, %s4847_s5  ;;  %v1642_v39 = vrot.slane %v1640_v43, 1  ;;  %v1658_v10 = vmul.f32 %v1657_v59, %v5796_v38 }
 0x1a0   : > { %v641_v40 = vadd.f32 %v5750_v44, %v632_v34  ;;  %v1625_v55 = vsel %vm452_vm13, %v1623_v15, %v1624_v12 }
 0x1a1   : > { %v5961_v3 = vpop.permute.xlu1 %965  ;;  %v5963_v36 = vpop.permute.xlu0 %956 }
 0x1a2   : > { %v654_v11 = vadd.f32 %v5874_v23, %v641_v40  ;;  %v1649_v23 = vmul.f32 %v1648_v32, %v5796_v38  ;;  %v1660_v40 = vrot.slane %v1658_v10, 3  ;;  %v1758_v10 = vstv %s6021_s30  ;;  %s6166_s30 = sld [smem:[#allocation5 + $0x70]] }
 0x1a3   : > { %1613 = vrot.lane.b32.xlu1 %v1612_v20, %s4847_s5  ;;  %1600 = vrot.lane.b32.xlu0 %v1599_v41, %s4847_s5  ;;  %v1694_v41 = vrot.slane %v1690_v27, 6 }
 0x1a4   : > { %v667_v44 = vadd.f32 %v5876_v26, %v654_v11  ;;  %v1675_v26 = vstv %s5958_s19  ;;  %v1651_v28 = vrot.slane %v1649_v23, 2  ;;  %s6130_s19 = sld [smem:[#allocation5 + $0xa9]] }
 0x1a5   : > { %v5973_v60 = vpop.permute.xlu1 %987  ;;  %v5975_v29 = vpop.permute.xlu0 %974  ;;  %v1676_v58 = vmul.f32 %v1675_v26, %v5796_v38  ;;  %v1677_v34 = vmul.f32 %v1675_v26, %v5811_v57 }
 0x1a6   : > { %v675_v35 = vadd.f32 %v5650_v47, %v667_v44  ;;  %v1667_v47 = vmul.f32 %v1666_v24, %v5796_v38  ;;  %v1701_v44 = vstv %s5998_s24  ;;  %v1736_v24 = vstv %s6013_s29  ;;  %s6138_s24 = sld [smem:[#allocation5 + $0xa2]]  ;;  %s6164_s29 = sld [smem:[#allocation5 + $0xbe]] }
 0x1a7   : > { %1634 = vrot.lane.b32.xlu1 %v1632_v63, %s4846_s4  ;;  %1626 = vrot.lane.b32.xlu0 %v1625_v55, %s4847_s5  ;;  %v1680_v11 = vrot.slane %v1676_v58, 5  ;;  %v1681_v20 = vrot.slane %v1677_v34, 5  ;;  %v1727_v63 = vstv %s6000_s1  ;;  %s6142_s1 = sld [smem:[#allocation5 + $0x62]] }
 0x1a8   : > { %v684_v50 = vadd.f32 %v5760_v7, %v675_v35  ;;  %v1689_v7 = vmul.f32 %v1688_v18, %v5796_v38  ;;  %v1669_v9 = vrot.slane %v1667_v47, 4  ;;  %v1718_v35 = vstv %s6006_s25  ;;  %s6144_s25 = sld [smem:[#allocation5 + $0x69]] }
 0x1a9   : > { %v5992_v52 = vpop.permute.xlu1 %1008  ;;  %v5994_v45 = vpop.permute.xlu0 %1000  ;;  %v1682_v18 = vsel %vm440_vm12, %v1680_v11, %v1681_v20  ;;  %v1728_v27 = vmul.f32 %v1727_v63, %v5796_v38  ;;  %v1771_v20 = vstv %s6042_s8  ;;  %s6187_s8 = sld [smem:[#allocation5 + $0x77]] }
 0x1aa   : > { %v693_v46 = vadd.f32 %v5758_v56, %v684_v50  ;;  %v1693_v19 = vrot.slane %v1689_v7, 6  ;;  %v1702_v50 = vmul.f32 %v1701_v44, %v5796_v38 }
 0x1ab   : > { %1652 = vrot.lane.b32.xlu1 %v1651_v28, %s4846_s4  ;;  %1643 = vrot.lane.b32.xlu0 %v1642_v39, %s4846_s4  ;;  %v1719_v28 = vmul.f32 %v1718_v35, %v5796_v38  ;;  %v1730_v34 = vrot.slane %v1728_v27, 3  ;;  %v1772_v35 = vmul.f32 %v1771_v20, %v5796_v38  ;;  %v1797_v27 = vstv %s6074_s6  ;;  %s6219_s6 = sld [smem:[#allocation5 + $0xb1]] }
 0x1ac   : > { %v702_v22 = vadd.f32 %v5770_v30, %v693_v46  ;;  %v1695_v43 = vsel %vm452_vm13, %v1693_v19, %v1694_v41 }
 0x1ad   : > { %v6015_v42 = vpop.permute.xlu1 %1026  ;;  %v6017_v56 = vpop.permute.xlu0 %1017 }
 0x1ae   : > { %v711_v32 = vadd.f32 %v5768_v49, %v702_v22  ;;  %v1710_v49 = vmul.f32 %v1709_v17, %v5796_v38  ;;  %v1721_v22 = vrot.slane %v1719_v28, 2  ;;  %v1815_v28 = vstv %s6078_s7  ;;  %s6221_s7 = sld [smem:[#allocation5 + $0xaa]] }
 0x1af   : > { %1670 = vrot.lane.b32.xlu1 %v1669_v9, %s4846_s4  ;;  %1661 = vrot.lane.b32.xlu0 %v1660_v40, %s4846_s4  ;;  %v1737_v9 = vmul.f32 %v1736_v24, %v5796_v38  ;;  %v1828_v24 = vstv %s6068_s18  ;;  %s6201_s18 = sld [smem:[#allocation5 + $0x9c]] }
 0x1b0   : > { %v724_v30 = vadd.f32 %v5899_v62, %v711_v32  ;;  %v1745_v62 = vstv %s6010_s26  ;;  %s6158_s26 = sld [smem:[#allocation5 + $0xb0]] }
 0x1b1   : > { %v6026_v15 = vpop.permute.xlu1 %1044  ;;  %v6028_v12 = vpop.permute.xlu0 %1035  ;;  %v1746_v39 = vmul.f32 %v1745_v62, %v5796_v38  ;;  %v1747_v47 = vmul.f32 %v1745_v62, %v5811_v57 }
 0x1b2   : > { %v737_v23 = vadd.f32 %v5897_v51, %v724_v30  ;;  %v1712_v51 = vrot.slane %v1710_v49, 1  ;;  %v1788_v30 = vstv %s6051_s9  ;;  %v1779_v49 = vstv %s6053_s14  ;;  %s6190_s9 = sld [smem:[#allocation5 + $0x95]]  ;;  %s6199_s14 = sld [smem:[#allocation5 + $0xa3]] }
 0x1b3   : > { %1696 = vrot.lane.b32.xlu1 %v1695_v43, %s4846_s4  ;;  %1683 = vrot.lane.b32.xlu0 %v1682_v18, %s4846_s4  ;;  %v1750_v41 = vrot.slane %v1746_v39, 5  ;;  %v1751_v17 = vrot.slane %v1747_v47, 5  ;;  %v1789_v62 = vmul.f32 %v1788_v30, %v5796_v38  ;;  %v1830_v39 = vmul.f32 %v1828_v24, %v5811_v57 }
 0x1b4   : > { %v745_v55 = vadd.f32 %v5662_v8, %v737_v23 }
 0x1b5   : > { %v6044_v59 = vpop.permute.xlu1 %1070  ;;  %v6046_v26 = vpop.permute.xlu0 %1057  ;;  %v1752_v63 = vsel %vm440_vm12, %v1750_v41, %v1751_v17  ;;  %v885_v17 = vstv %s6095_s13  ;;  %s6228_s13 = sld [smem:[#allocation5 + $0x7e]] }
 0x1b6   : > { %v754_v8 = vadd.f32 %v5784_v61, %v745_v55  ;;  %v1760_v61 = vmul.f32 %v1758_v10, %v5811_v57  ;;  %v1780_v55 = vmul.f32 %v1779_v49, %v5796_v38  ;;  %v1834_v49 = vrot.slane %v1830_v39, 6 }
 0x1b7   : > { %1713 = vrot.lane.b32.xlu1 %v1712_v51, %s8123_s22  ;;  %1704 = vrot.lane.b32.xlu0 %v1702_v50, %s8123_s22  ;;  %v1806_v50 = vstv %s6072_s17  ;;  %v1923_v39 = vstv %s6130_s19  ;;  %s6215_s17 = sld [smem:[#allocation5 + $0xbf]]  ;;  %s6284_s19 = sld [smem:[#allocation5 + $0xa4]] }
 0x1b8   : > { %v763_v46 = vadd.f32 %v5786_v5, %v754_v8  ;;  %v1759_v5 = vmul.f32 %v1758_v10, %v5796_v38  ;;  %v1764_v43 = vrot.slane %v1760_v61, 6  ;;  %v1791_v10 = vrot.slane %v1789_v62, 2 }
 0x1b9   : > { %v6062_v7 = vpop.permute.xlu1 %1087  ;;  %v6064_v58 = vpop.permute.xlu0 %1078  ;;  %v1816_v61 = vmul.f32 %v1815_v28, %v5796_v38  ;;  %v906_v62 = vstv %s6115_s15  ;;  %s6276_s15 = sld [smem:[#allocation5 + $0x96]] }
 0x1ba   : > { %v772_v40 = vadd.f32 %v5799_v53, %v763_v46  ;;  %v1739_v53 = vrot.slane %v1737_v9, 4  ;;  %v1763_v23 = vrot.slane %v1759_v5, 6  ;;  %v1782_v46 = vrot.slane %v1780_v55, 1 }
 0x1bb   : > { %1731 = vrot.lane.b32.xlu1 %v1730_v34, %s8123_s22  ;;  %1722 = vrot.lane.b32.xlu0 %v1721_v22, %s8123_s22  ;;  %v1807_v34 = vmul.f32 %v1806_v50, %v5796_v38  ;;  %v1798_v22 = vmul.f32 %v1797_v27, %v5796_v38  ;;  %v1829_v9 = vmul.f32 %v1828_v24, %v5796_v38  ;;  %v892_v5 = vstv %s6097_s20  ;;  %s6232_s20 = sld [smem:[#allocation5 + $0x85]] }
 0x1bc   : > { %v781_v32 = vadd.f32 %v5801_v13, %v772_v40  ;;  %v1765_v51 = vsel %vm452_vm13, %v1763_v23, %v1764_v43  ;;  %v1817_v40 = vmul.f32 %v1815_v28, %v5811_v57 }
 0x1bd   : > { %v6081_v19 = vpop.permute.xlu1 %1105  ;;  %v6083_v11 = vpop.permute.xlu0 %1096  ;;  %v1809_v20 = vrot.slane %v1807_v34, 4  ;;  %v1800_v30 = vrot.slane %v1798_v22, 3  ;;  %v1833_v43 = vrot.slane %v1829_v9, 6  ;;  %v1914_v9 = vstv %s6138_s24  ;;  %s6298_s24 = sld [smem:[#allocation5 + $0xb2]] }
 0x1be   : > { %v794_v44 = vadd.f32 %v5907_v54, %v781_v32 }
 0x1bf   : > { %1753 = vrot.lane.b32.xlu1 %v1752_v63, %s8123_s22  ;;  %1740 = vrot.lane.b32.xlu0 %v1739_v53, %s8123_s22  ;;  %v6155_v63 = vld [vmem:[#allocation3 + $0x10] sm:$0xff]  ;;  %v1835_v22 = vsel %vm452_vm13, %v1833_v43, %v1834_v49 }
 0x1c0   : > { %v807_v13 = vadd.f32 %v5909_v48, %v794_v44  ;;  %v1905_v44 = vstv %s6107_s21  ;;  %s6249_s21 = sld [smem:[#allocation5 + $0x8c]] }
 0x1c1   : > { %v6099_v54 = vpop.permute.xlu1 %1127  ;;  %v6101_v18 = vpop.permute.xlu0 %1114  ;;  %v1906_v28 = vmul.f32 %v1905_v44, %v6155_v63  ;;  %v1924_v44 = vmul.f32 %v1923_v39, %v6155_v63 }
 0x1c2   : > { %v815_v48 = vadd.f32 %v5660_v0, %v807_v13  ;;  %v1820_v13 = vrot.slane %v1816_v61, 5  ;;  %v1367_v61 = vstv %s6142_s1  ;;  %s6304_s1 = sld [smem:[#allocation5 + $0xc0]] }
 0x1c3   : > { %1774 = vrot.lane.b32.xlu1 %v1772_v35, %s8124_s11  ;;  %1766 = vrot.lane.b32.xlu0 %v1765_v51, %s8123_s22  ;;  %v899_v35 = vstv %s6113_s12  ;;  %s6259_s12 = sld [smem:[#allocation5 + $0x9d]] }
 0x1c4   : > { %v824_v8 = vadd.f32 %v5819_v6, %v815_v48 }
 0x1c5   : > { %v6124_v0 = vpop.permute.xlu1 %1148  ;;  %v6126_v47 = vpop.permute.xlu0 %1140 }
 0x1c6   : > { %v833_v6 = vadd.f32 %v5817_v4, %v824_v8  ;;  %v881_v4 = vstv %s6090_s0  ;;  %v1897_v8 = vstv %s6122_s28  ;;  %s6225_s0 = sld [smem:[#allocation5 + $0xb8]]  ;;  %s6278_s28 = sld [smem:[#allocation5 + $0xab]] }
 0x1c7   : > { %1792 = vrot.lane.b32.xlu1 %v1791_v10, %s8124_s11  ;;  %1783 = vrot.lane.b32.xlu0 %v1782_v46, %s8124_s11  ;;  %v6176_v10 = vld [vmem:[#allocation3 + $0x18] sm:$0x3]  ;;  %v1941_v46 = vstv %s6132_s23  ;;  %v1898_v49 = vmul.f32 %v1897_v8, %v6155_v63  ;;  %s6286_s23 = sld [smem:[#allocation5 + $0xb9]] }
 0x1c8   : > { %v842_v41 = vadd.f32 %v5837_v37, %v833_v6  ;;  %v1821_v37 = vrot.slane %v1817_v40, 5  ;;  %v1371_v40 = vstv %s6144_s25  ;;  %s6329_s25 = sld [smem:[#allocation5 + $0x97]] }
 0x1c9   : > { %v6150_v32 = vpop.permute.xlu1 %1166  ;;  %v6152_v53 = vpop.permute.xlu0 %1157 }
 0x1ca   : > { %v851_v23 = vadd.f32 %v5835_v25, %v842_v41  ;;  %v4738_v25 = vld [vmem:[#allocation2 + $0x10] sm:$0xff]  ;;  %v1822_v6 = vsel %vm440_vm12, %v1820_v13, %v1821_v37  ;;  %v1942_v37 = vmul.f32 %v1941_v46, %v6155_v63 }
 0x1cb   : > { %1810 = vrot.lane.b32.xlu1 %v1809_v20, %s8124_s11  ;;  %1801 = vrot.lane.b32.xlu0 %v1800_v30, %s8124_s11  ;;  %v882_v55 = vmul.f32 %v4738_v25, %v881_v4  ;;  %v886_v24 = vmul.f32 %v4738_v25, %v885_v17  ;;  %v893_v48 = vmul.f32 %v4738_v25, %v892_v5  ;;  %v1908_v30 = vrot.slane %v1906_v28, 1 }
 0x1cc   : > { %v864_v51 = vadd.f32 %v5926_v21, %v851_v23  ;;  %v900_v21 = vmul.f32 %v4738_v25, %v899_v35  ;;  %v907_v17 = vmul.f32 %v4738_v25, %v906_v62  ;;  %v1915_v23 = vmul.f32 %v1914_v9, %v6155_v63 }
 0x1cd   : > { %v6169_v50 = vpop.permute.xlu1 %1184  ;;  %v6171_v27 = vpop.permute.xlu0 %1175  ;;  %v888_v41 = vrot.slane %v886_v24, 1  ;;  %v895_v43 = vrot.slane %v893_v48, 2  ;;  %v1932_v35 = vstv %s6158_s26  ;;  %v1954_v62 = vstv %s6164_s29  ;;  %s6331_s26 = sld [smem:[#allocation5 + $0xa5]]  ;;  %s6334_s29 = sld [smem:[#allocation5 + $0x9e]] }
 0x1ce   : > { %v877_v34 = vadd.f32 %v5924_v2, %v864_v51  ;;  %v1943_v2 = vmul.f32 %v1941_v46, %v6176_v10  ;;  %v1378_v25 = vstv %s6166_s30  ;;  %v902_v24 = vrot.slane %v900_v21, 3  ;;  %s6341_s30 = sld [smem:[#allocation5 + $0xb3]] }
 0x1cf   : > { %1836 = vrot.lane.b32.xlu1 %v1835_v22, %s8124_s11  ;;  %1823 = vrot.lane.b32.xlu0 %v1822_v6, %s8124_s11  ;;  %v909_v51 = vrot.slane %v907_v17, 4  ;;  %v1372_v28 = vmul.f32 %v1371_v40, %v5796_v38  ;;  %v1926_v48 = vrot.slane %v1924_v44, 3  ;;  %v1933_v22 = vmul.f32 %v1932_v35, %v6155_v63 }
 0x1d0   : > { %v883_v4 = vadd.f32 %v882_v55, %v877_v34  ;;  %v1917_v34 = vrot.slane %v1915_v23, 2  ;;  %v1947_v46 = vrot.slane %v1943_v2, 5  ;;  %v1946_v9 = vrot.slane %v1942_v37, 5 }
 0x1d1   : > { %v6192_v5 = vpop.permute.xlu1 %1210  ;;  %v6194_v20 = vpop.permute.xlu0 %1197  ;;  %v1956_v21 = vmul.f32 %v1954_v62, %v6176_v10  ;;  %v1385_v40 = vstv %s6187_s8  ;;  %v1368_v17 = vmul.f32 %v1367_v61, %v5796_v38  ;;  %v1374_v2 = vrot.slane %v1372_v28, 1  ;;  %s6345_s8 = sld [smem:[#allocation5 + $0xac]] }
 0x1d2   : > { %v890_v13 = vadd.f32 %v888_v41, %v883_v4  ;;  %v1955_v41 = vmul.f32 %v1954_v62, %v6155_v63  ;;  %v1935_v23 = vrot.slane %v1933_v22, 4  ;;  %v1975_v37 = vstv %s6201_s18  ;;  %s6363_s18 = sld [smem:[#allocation5 + $0x9f]] }
 0x1d3   : > { %1909 = vrot.lane.b32.xlu1 %v1908_v30, %s8125_s10  ;;  %1900 = vrot.lane.b32.xlu0 %v1898_v49, %s8125_s10  ;;  %v1379_v30 = vmul.f32 %v1378_v25, %v5796_v38  ;;  %v1948_v62 = vsel %vm440_vm12, %v1946_v9, %v1947_v46  ;;  %v1960_v61 = vrot.slane %v1956_v21, 6  ;;  %v2024_v22 = vstv %s6215_s17  ;;  %s6372_s17 = sld [smem:[#allocation5 + $0x98]] }
 0x1d4   : > { %v897_v55 = vadd.f32 %v895_v43, %v890_v13  ;;  %v1967_v43 = vstv %s6190_s9  ;;  %v1984_v13 = vstv %s6199_s14  ;;  %v2002_v9 = vstv %s6219_s6  ;;  %s6347_s9 = sld [smem:[#allocation5 + $0xc1]]  ;;  %s6351_s14 = sld [smem:[#allocation5 + $0xba]] }
 0x1d5   : > { %v6210_v8 = vpop.permute.xlu1 %1227  ;;  %v6212_v39 = vpop.permute.xlu0 %1218  ;;  %v1985_v46 = vmul.f32 %v1984_v13, %v6155_v63  ;;  %v2011_v21 = vstv %s6225_s0  ;;  %s6377_s6 = sld [smem:[#allocation5 + $0xad]]  ;;  %s6383_s0 = sld [smem:[#allocation5 + $0xbb]] }
 0x1d6   : > { %v904_v6 = vadd.f32 %v902_v24, %v897_v55  ;;  %v1959_v55 = vrot.slane %v1955_v41, 6  ;;  %v1376_v24 = vadd.f32 %v1374_v2, %v1368_v17  ;;  %v1993_v41 = vstv %s6221_s7  ;;  %s6379_s7 = sld [smem:[#allocation5 + $0xa6]] }
 0x1d7   : > { %1927 = vrot.lane.b32.xlu1 %v1926_v48, %s8125_s10  ;;  %1918 = vrot.lane.b32.xlu0 %v1917_v34, %s8125_s10  ;;  %v1968_v34 = vmul.f32 %v1967_v43, %v6155_v63  ;;  %v1987_v13 = vrot.slane %v1985_v46, 2 }
 0x1d8   : > { %v911_v4 = vadd.f32 %v909_v51, %v904_v6  ;;  %v1381_v51 = vrot.slane %v1379_v30, 2  ;;  %v1961_v6 = vsel %vm452_vm13, %v1959_v55, %v1960_v61  ;;  %v1399_v30 = vstv %s6232_s20  ;;  %s6392_s20 = sld [smem:[#allocation5 + $0xc2]] }
 0x1d9   : > { %v6234_v49 = vpop.permute.xlu1 %1245  ;;  %v6236_v44 = vpop.permute.xlu0 %1236  ;;  %v2025_v55 = vmul.f32 %v2024_v22, %v6155_v63  ;;  %v2012_v61 = vmul.f32 %v2011_v21, %v6155_v63 }
 0x1da   : > { %v922_v35 = vadd.f32 %v5465_v1, %v911_v4  ;;  %v1386_v1 = vmul.f32 %v1385_v40, %v5796_v38  ;;  %v1392_v40 = vstv %s6228_s13  ;;  %v2026_v4 = vmul.f32 %v2024_v22, %v6176_v10  ;;  %s6388_s13 = sld [smem:[#allocation5 + $0xb4]] }
 0x1db   : > { %1949 = vrot.lane.b32.xlu1 %v1948_v62, %s8125_s10  ;;  %1936 = vrot.lane.b32.xlu0 %v1935_v23, %s8125_s10  ;;  %v1383_v17 = vadd.f32 %v1381_v51, %v1376_v24  ;;  %v1994_v62 = vmul.f32 %v1993_v41, %v6155_v63  ;;  %v2013_v24 = vmul.f32 %v2011_v21, %v6176_v10  ;;  %v2029_v16 = vrot.slane %v2025_v55, 6 }
 0x1dc   : > { %v6246_v25 = vadd.f32 %v5473_v33, %v922_v35  ;;  %v1976_v33 = vmul.f32 %v1975_v37, %v6155_v63  ;;  %v1388_v2 = vrot.slane %v1386_v1, 3  ;;  %v2003_v35 = vmul.f32 %v2002_v9, %v6155_v63 }
 0x1dd   : > { %v6251_v28 = vpop.permute.xlu1 %1267  ;;  %v6253_v48 = vpop.permute.xlu0 %1254  ;;  %v1393_v51 = vmul.f32 %v1392_v40, %v5796_v38  ;;  %v1400_v1 = vmul.f32 %v1399_v30, %v5796_v38  ;;  %v1996_v41 = vrot.slane %v1994_v62, 3  ;;  %v2030_v21 = vrot.slane %v2026_v4, 6 }
 0x1de   : > { %v1978_v37 = vrot.slane %v1976_v33, 1  ;;  %v1390_v46 = vadd.f32 %v1388_v2, %v1383_v17  ;;  %v1410_v33 = vstv %s6249_s21  ;;  %v2005_v9 = vrot.slane %v2003_v35, 4  ;;  %s6406_s21 = sld [smem:[#allocation5 + $0x99]] }
 0x1df   : > { %1970 = vrot.lane.b32.xlu1 %v1968_v34, %s4844_s27  ;;  %1962 = vrot.lane.b32.xlu0 %v1961_v6, %s8125_s10  ;;  %v1401_v34 = vmul.f32 %v1399_v30, %v5811_v57  ;;  %v2045_v40 = vstv %s6259_s12  ;;  %v1404_v17 = vrot.slane %v1400_v1, 5  ;;  %v1411_v30 = vmul.f32 %v1410_v33, %v5796_v38  ;;  %s6412_s12 = sld [smem:[#allocation5 + $0xa7]] }
 0x1e0   : > { %v1412_v4 = vmul.f32 %v1410_v33, %v5811_v57 }
 0x1e1   : > { %v6270_v23 = vpop.permute.xlu1 %1288  ;;  %v6272_v43 = vpop.permute.xlu0 %1280  ;;  %v1405_v2 = vrot.slane %v1401_v34, 5  ;;  %v2054_v34 = vstv %s6284_s19  ;;  %v1415_v57 = vrot.slane %v1411_v30, 6  ;;  %v2094_v30 = vstv %s6304_s1  ;;  %s6424_s19 = sld [smem:[#allocation5 + $0xae]]  ;;  %s6447_s1 = sld [smem:[#allocation5 + $0xcc]] }
 0x1e2   : > { %8128 = vst [vmem:[#allocation18_spill] sm:$0xff] %v6270_v23  ;;  %v2016_v23 = vrot.slane %v2012_v61, 5  ;;  %v2046_v61 = vmul.f32 %v2045_v40, %v6155_v63 }
 0x1e3   : > { %1988 = vrot.lane.b32.xlu1 %v1987_v13, %s4844_s27  ;;  %1979 = vrot.lane.b32.xlu0 %v1978_v37, %s4844_s27  ;;  %v2017_v13 = vrot.slane %v2013_v24, 5  ;;  %v1395_v37 = vrot.slane %v1393_v51, 4  ;;  %v2037_v24 = vstv %s6276_s15  ;;  %v2063_v51 = vstv %s6278_s28  ;;  %s6414_s15 = sld [smem:[#allocation5 + $0xa0]]  ;;  %s6421_s28 = sld [smem:[#allocation5 + $0xb5]] }
 0x1e4   : > { %v1406_v38 = vsel %vm440_vm12, %v1404_v17, %v1405_v2  ;;  %v2038_v33 = vmul.f32 %v2037_v24, %v6155_v63  ;;  %v2072_v17 = vstv %s6298_s24  ;;  %s6433_s24 = sld [smem:[#allocation5 + $0xbc]] }
 0x1e5   : > { %v6293_v22 = vpop.permute.xlu1 %1306  ;;  %v6295_v6 = vpop.permute.xlu0 %1297  ;;  %v1397_v35 = vadd.f32 %v1395_v37, %v1390_v46  ;;  %v2018_v1 = vsel %vm440_vm12, %v2016_v23, %v2017_v13  ;;  %v1416_v46 = vrot.slane %v1412_v4, 6  ;;  %v2064_v37 = vmul.f32 %v2063_v51, %v6155_v63 }
 0x1e6   : > { %v2055_v13 = vmul.f32 %v2054_v34, %v6155_v63 }
 0x1e7   : > { %2006 = vrot.lane.b32.xlu1 %v2005_v9, %s4844_s27  ;;  %1997 = vrot.lane.b32.xlu0 %v1996_v41, %s4844_s27  ;;  %v2031_v9 = vsel %vm452_vm13, %v2029_v16, %v2030_v21  ;;  %v2081_v41 = vstv %s6286_s23  ;;  %v1408_v40 = vadd.f32 %v1406_v38, %v1397_v35  ;;  %v2048_v21 = vrot.slane %v2046_v61, 1  ;;  %s6429_s23 = sld [smem:[#allocation5 + $0xc3]] }
 0x1e8   : > { %v1417_v2 = vsel %vm452_vm13, %v1415_v57, %v1416_v46  ;;  %v2066_v35 = vrot.slane %v2064_v37, 3  ;;  %v2057_v51 = vrot.slane %v2055_v13, 2  ;;  %v2073_v38 = vmul.f32 %v2072_v17, %v6155_v63 }
 0x1e9   : > { %v6306_v62 = vpop.permute.xlu1 %1324  ;;  %v6308_v55 = vpop.permute.xlu0 %1315  ;;  %v1419_v4 = vadd.f32 %v1417_v2, %v1408_v40 }
 0x1ea   : > { %v2075_v13 = vrot.slane %v2073_v38, 4 }
 0x1eb   : > { %2032 = vrot.lane.b32.xlu1 %v2031_v9, %s4844_s27  ;;  %2019 = vrot.lane.b32.xlu0 %v2018_v1, %s4844_s27  ;;  %v2082_v9 = vmul.f32 %v2081_v41, %v6155_v63  ;;  %v2083_v1 = vmul.f32 %v2081_v41, %v6176_v10 }
 0x1ed   : > { %v6322_v16 = vpop.permute.xlu1 %1350  ;;  %v6324_v23 = vpop.permute.xlu0 %1337  ;;  %v2086_v34 = vrot.slane %v2082_v9, 5  ;;  %v2087_v41 = vrot.slane %v2083_v1, 5  ;;  %v2107_v9 = vstv %s6329_s25  ;;  %v2124_v1 = vstv %s6331_s26  ;;  %s6456_s25 = sld [smem:[#allocation5 + $0xc5]]  ;;  %s6461_s26 = sld [smem:[#allocation5 + $0xd3]] }
 0x1ee   : > { %8129 = vst [vmem:[#allocation19_spill] sm:$0xff] %v6322_v16 }
 0x1ef   : > { %2049 = vrot.lane.b32.xlu1 %v2048_v21, %s4847_s5  ;;  %2040 = vrot.lane.b32.xlu0 %v2038_v33, %s4847_s5  ;;  %v2095_v21 = vmul.f32 %v2094_v30, %v6155_v63  ;;  %v2096_v33 = vmul.f32 %v2094_v30, %v6176_v10  ;;  %v2088_v37 = vsel %vm440_vm12, %v2086_v34, %v2087_v41  ;;  %v2142_v41 = vstv %s6341_s30  ;;  %s6488_s30 = sld [smem:[#allocation5 + $0xe1]] }
 0x1f1   : > { %v1434_v61 = vpop.permute.xlu1 %1433  ;;  %v1425_v24 = vpop.permute.xlu0 %1424  ;;  %v2099_v2 = vrot.slane %v2095_v21, 6  ;;  %v2100_v30 = vrot.slane %v2096_v33, 6  ;;  %v2133_v33 = vstv %s6345_s8  ;;  %s6497_s8 = sld [smem:[#allocation5 + $0xe8]] }
 0x1f2   : > { %v1427_v16 = vadd.f32 %v1425_v24, %v1419_v4  ;;  %v2115_v4 = vstv %s6334_s29  ;;  %s6468_s29 = sld [smem:[#allocation5 + $0xda]] }
 0x1f3   : > { %2067 = vrot.lane.b32.xlu1 %v2066_v35, %s4847_s5  ;;  %2058 = vrot.lane.b32.xlu0 %v2057_v51, %s4847_s5  ;;  %v2125_v35 = vmul.f32 %v2124_v1, %v6155_v63  ;;  %v2108_v51 = vmul.f32 %v2107_v9, %v6155_v63  ;;  %v2116_v34 = vmul.f32 %v2115_v4, %v6155_v63 }
 0x1f4   : > { %v1436_v57 = vadd.f32 %v1434_v61, %v1427_v16  ;;  %v2101_v21 = vsel %vm452_vm13, %v2099_v2, %v2100_v30  ;;  %v2134_v4 = vmul.f32 %v2133_v33, %v6155_v63 }
 0x1f5   : > { %v1452_v46 = vpop.permute.xlu1 %1451  ;;  %v1443_v40 = vpop.permute.xlu0 %1442 }
 0x1f6   : > { %v1445_v17 = vadd.f32 %v1443_v40, %v1436_v57  ;;  %v2164_v57 = vstv %s6347_s9  ;;  %s6510_s9 = sld [smem:[#allocation5 + $0xef]] }
 0x1f7   : > { %2089 = vrot.lane.b32.xlu1 %v2088_v37, %s4847_s5  ;;  %2076 = vrot.lane.b32.xlu0 %v2075_v13, %s4847_s5  ;;  %v2127_v37 = vrot.slane %v2125_v35, 2  ;;  %v2143_v13 = vmul.f32 %v2142_v41, %v6155_v63  ;;  %v2165_v2 = vmul.f32 %v2164_v57, %v6155_v63  ;;  %v2166_v30 = vmul.f32 %v2164_v57, %v6176_v10 }
 0x1f8   : > { %v1454_v16 = vadd.f32 %v1452_v46, %v1445_v17  ;;  %v2151_v46 = vstv %s6351_s14  ;;  %v2118_v17 = vrot.slane %v2116_v34, 1  ;;  %v2185_v57 = vstv %s6363_s18  ;;  %s6523_s14 = sld [smem:[#allocation5 + $0x93]]  ;;  %s6528_s18 = sld [smem:[#allocation5 + $0x9a]] }
 0x1f9   : > { %v1474_v61 = vpop.permute.xlu1 %1473  ;;  %v1461_v24 = vpop.permute.xlu0 %1460  ;;  %v2152_v35 = vmul.f32 %v2151_v46, %v6155_v63  ;;  %v2170_v33 = vrot.slane %v2166_v30, 6  ;;  %v2203_v30 = vstv %s6377_s6  ;;  %s6534_s6 = sld [smem:[#allocation5 + $0xcd]] }
 0x1fa   : > { %v1463_v38 = vadd.f32 %v1461_v24, %v1454_v16 }
 0x1fb   : > { %2110 = vrot.lane.b32.xlu1 %v2108_v51, %s4846_s4  ;;  %2102 = vrot.lane.b32.xlu0 %v2101_v21, %s4847_s5  ;;  %v2145_v51 = vrot.slane %v2143_v13, 4  ;;  %v2169_v21 = vrot.slane %v2165_v2, 6  ;;  %v2186_v13 = vmul.f32 %v2185_v57, %v6155_v63  ;;  %v2177_v2 = vstv %s6372_s17  ;;  %s6530_s17 = sld [smem:[#allocation5 + $0xa1]] }
 0x1fc   : > { %v1476_v40 = vadd.f32 %v1474_v61, %v1463_v38  ;;  %v2153_v61 = vmul.f32 %v2151_v46, %v6176_v10  ;;  %v2136_v38 = vrot.slane %v2134_v4, 3 }
 0x1fd   : > { %v1495_v9 = vpop.permute.xlu1 %1494  ;;  %v1487_v1 = vpop.permute.xlu0 %1486  ;;  %v2171_v4 = vsel %vm452_vm13, %v2169_v21, %v2170_v33 }
 0x1fe   : > { %v1489_v16 = vadd.f32 %v1487_v1, %v1476_v40  ;;  %v2156_v1 = vrot.slane %v2152_v35, 5  ;;  %v2157_v46 = vrot.slane %v2153_v61, 5  ;;  %v941_v35 = vadd.f32 %v5944_v31, %v6246_v25 }
 0x1ff   : > { %2128 = vrot.lane.b32.xlu1 %v2127_v37, %s4846_s4  ;;  %2119 = vrot.lane.b32.xlu0 %v2118_v17, %s4846_s4  ;;  %v2178_v31 = vmul.f32 %v2177_v2, %v6155_v63 }
 0x200   : > { %v1497_v24 = vadd.f32 %v1495_v9, %v1489_v16  ;;  %v2194_v16 = vstv %s6379_s7  ;;  %s6540_s7 = sld [smem:[#allocation5 + $0xc6]] }
 0x201   : > { %v1513_v34 = vpop.permute.xlu1 %1512  ;;  %v1504_v41 = vpop.permute.xlu0 %1503  ;;  %v2195_v25 = vmul.f32 %v2194_v16, %v6155_v63 }
 0x202   : > { %v1506_v40 = vadd.f32 %v1504_v41, %v1497_v24  ;;  %v2158_v24 = vsel %vm440_vm12, %v2156_v1, %v2157_v46  ;;  %v2188_v41 = vrot.slane %v2186_v13, 1  ;;  %v950_v1 = vadd.f32 %v5942_v14, %v941_v35 }
 0x203   : > { %2146 = vrot.lane.b32.xlu1 %v2145_v51, %s4846_s4  ;;  %2137 = vrot.lane.b32.xlu0 %v2136_v38, %s4846_s4  ;;  %v2221_v51 = vstv %s6383_s0  ;;  %v2204_v38 = vmul.f32 %v2203_v30, %v6155_v63  ;;  %v2234_v13 = vstv %s6392_s20  ;;  %v2197_v30 = vrot.slane %v2195_v25, 2  ;;  %s6546_s0 = sld [smem:[#allocation5 + $0xd4]]  ;;  %s6552_s20 = sld [smem:[#allocation5 + $0xaf]] }
 0x204   : > { %v1515_v37 = vadd.f32 %v1513_v34, %v1506_v40  ;;  %v2222_v57 = vmul.f32 %v2221_v51, %v6155_v63  ;;  %v2223_v40 = vmul.f32 %v2221_v51, %v6176_v10  ;;  %v959_v14 = vadd.f32 %v5963_v36, %v950_v1 }
 0x205   : > { %v1531_v9 = vpop.permute.xlu1 %1530  ;;  %v1522_v17 = vpop.permute.xlu0 %1521  ;;  %v2235_v51 = vmul.f32 %v2234_v13, %v6155_v63  ;;  %v2264_v25 = vstv %s6412_s12  ;;  %s6562_s12 = sld [smem:[#allocation5 + $0xdb]] }
 0x206   : > { %v1524_v61 = vadd.f32 %v1522_v17, %v1515_v37  ;;  %v2212_v37 = vstv %s6388_s13  ;;  %v2206_v17 = vrot.slane %v2204_v38, 3  ;;  %v2226_v16 = vrot.slane %v2222_v57, 5  ;;  %s6550_s13 = sld [smem:[#allocation5 + $0xa8]] }
 0x207   : > { %2172 = vrot.lane.b32.xlu1 %v2171_v4, %s4846_s4  ;;  %2159 = vrot.lane.b32.xlu0 %v2158_v24, %s4846_s4  ;;  %v2213_v24 = vmul.f32 %v2212_v37, %v6155_v63  ;;  %v2247_v38 = vstv %s6406_s21  ;;  %v2255_v57 = vstv %s6414_s15  ;;  %s6556_s21 = sld [smem:[#allocation5 + $0xb6]]  ;;  %s6576_s15 = sld [smem:[#allocation5 + $0xbd]] }
 0x208   : > { %v1533_v34 = vadd.f32 %v1531_v9, %v1524_v61  ;;  %v2227_v61 = vrot.slane %v2223_v40, 5  ;;  %v968_v40 = vadd.f32 %v5961_v3, %v959_v14  ;;  %v2273_v3 = vstv %s6424_s19  ;;  %s6599_s19 = sld [smem:[#allocation5 + $0xe9]] }
 0x209   : > { %v1557_v21 = vpop.permute.xlu1 %1556  ;;  %v1544_v33 = vpop.permute.xlu0 %1543  ;;  %v2215_v36 = vrot.slane %v2213_v24, 4 }
 0x20a   : > { %v1546_v46 = vadd.f32 %v1544_v33, %v1533_v34  ;;  %v2236_v34 = vmul.f32 %v2234_v13, %v6176_v10 }
 0x20b   : > { %2189 = vrot.lane.b32.xlu1 %v2188_v41, %s8123_s22  ;;  %2180 = vrot.lane.b32.xlu0 %v2178_v31, %s8123_s22  ;;  %v2228_v31 = vsel %vm440_vm12, %v2226_v16, %v2227_v61  ;;  %v2282_v16 = vstv %s6421_s28  ;;  %v977_v61 = vadd.f32 %v5975_v29, %v968_v40  ;;  %v2274_v29 = vmul.f32 %v2273_v3, %v6155_v63  ;;  %s6585_s28 = sld [smem:[#allocation5 + $0xe2]] }
 0x20c   : > { %v1559_v9 = vadd.f32 %v1557_v21, %v1546_v46  ;;  %v2239_v46 = vrot.slane %v2235_v51, 6  ;;  %v2240_v37 = vrot.slane %v2236_v34, 6  ;;  %v2291_v51 = vstv %s6433_s24  ;;  %s4621_s24 = sld [smem:[#allocation5 + $0xce]] }
 0x20d   : > { %v1574_v4 = vpop.permute.xlu1 %1573  ;;  %v1565_v2 = vpop.permute.xlu0 %1564 }
 0x20e   : > { %v1567_v35 = vadd.f32 %v1565_v2, %v1559_v9  ;;  %v2265_v9 = vmul.f32 %v2264_v25, %v6155_v63  ;;  %v2248_v2 = vmul.f32 %v2247_v38, %v6155_v63  ;;  %v2241_v14 = vsel %vm452_vm13, %v2239_v46, %v2240_v37 }
 0x20f   : > { %2207 = vrot.lane.b32.xlu1 %v2206_v17, %s8123_s22  ;;  %2198 = vrot.lane.b32.xlu0 %v2197_v30, %s8123_s22  ;;  %v2256_v30 = vmul.f32 %v2255_v57, %v6155_v63  ;;  %v2283_v38 = vmul.f32 %v2282_v16, %v6155_v63  ;;  %v990_v57 = vadd.f32 %v5973_v60, %v977_v61  ;;  %v2456_v60 = vstv %s6447_s1  ;;  %s6657_s1 = sld [smem:[#allocation5 + $0xc7]] }
 0x210   : > { %v1576_v41 = vadd.f32 %v1574_v4, %v1567_v35  ;;  %v2304_v35 = vstv %s6429_s23  ;;  %v2293_v46 = vmul.f32 %v2291_v51, %v6176_v10  ;;  %s6618_s23 = sld [smem:[#allocation5 + $0xf0]] }
 0x211   : > { %v1592_v21 = vpop.permute.xlu1 %1591  ;;  %v1583_v33 = vpop.permute.xlu0 %1582  ;;  %v2306_v25 = vmul.f32 %v2304_v35, %v6176_v10  ;;  %v1003_v16 = vadd.f32 %v5994_v45, %v990_v57 }
 0x212   : > { %v1585_v1 = vadd.f32 %v1583_v33, %v1576_v41  ;;  %v2267_v41 = vrot.slane %v2265_v9, 2  ;;  %v2297_v61 = vrot.slane %v2293_v46, 5 }
 0x213   : > { %2229 = vrot.lane.b32.xlu1 %v2228_v31, %s8123_s22  ;;  %2216 = vrot.lane.b32.xlu0 %v2215_v36, %s8123_s22  ;;  %v2258_v31 = vrot.slane %v2256_v30, 1  ;;  %v2305_v36 = vmul.f32 %v2304_v35, %v6155_v63  ;;  %v2310_v30 = vrot.slane %v2306_v25, 6  ;;  %v6478_v35 = vld [vmem:[#allocation4 + $0x10] sm:$0x3f] }
 0x214   : > { %v1594_v13 = vadd.f32 %v1592_v21, %v1585_v1  ;;  %v2292_v1 = vmul.f32 %v2291_v51, %v6155_v63 }
 0x215   : > { %v1614_v17 = vpop.permute.xlu1 %1613  ;;  %v1601_v4 = vpop.permute.xlu0 %1600 }
 0x216   : > { %v1603_v24 = vadd.f32 %v1601_v4, %v1594_v13  ;;  %v2285_v13 = vrot.slane %v2283_v38, 4  ;;  %v2276_v4 = vrot.slane %v2274_v29, 3  ;;  %v2296_v10 = vrot.slane %v2292_v1, 5 }
 0x217   : > { %2250 = vrot.lane.b32.xlu1 %v2248_v2, %s8124_s11  ;;  %2242 = vrot.lane.b32.xlu0 %v2241_v14, %s8123_s22  ;;  %v2309_v2 = vrot.slane %v2305_v36, 6  ;;  %v6476_v14 = vld [vmem:[#allocation4 + $0x8] sm:$0xff]  ;;  %v1011_v29 = vadd.f32 %v5992_v52, %v1003_v16 }
 0x218   : > { %v1616_v34 = vadd.f32 %v1614_v17, %v1603_v24  ;;  %v6474_v24 = vld [vmem:[#allocation4] sm:$0xff]  ;;  %v2458_v45 = vmul.f32 %v2456_v60, %v6476_v14  ;;  %v2298_v57 = vsel %vm440_vm12, %v2296_v10, %v2297_v61 }
 0x219   : > { %v1635_v21 = vpop.permute.xlu1 %1634  ;;  %v1627_v33 = vpop.permute.xlu0 %1626  ;;  %v2311_v25 = vsel %vm452_vm13, %v2309_v2, %v2310_v30 }
 0x21a   : > { %v1629_v40 = vadd.f32 %v1627_v33, %v1616_v34  ;;  %v2442_v34 = vstv %s6456_s25  ;;  %v2457_v33 = vmul.f32 %v2456_v60, %v6474_v24  ;;  %s4622_s25 = sld [smem:[#allocation5 + $0xd5]] }
 0x21b   : > { %2268 = vrot.lane.b32.xlu1 %v2267_v41, %s8124_s11  ;;  %2259 = vrot.lane.b32.xlu0 %v2258_v31, %s8124_s11  ;;  %v2477_v31 = vstv %s6461_s26  ;;  %s4623_s26 = sld [smem:[#allocation5 + $0xdc]] }
 0x21c   : > { %v1637_v37 = vadd.f32 %v1635_v21, %v1629_v40  ;;  %v2459_v21 = vmul.f32 %v2456_v60, %v6478_v35  ;;  %v2444_v40 = vmul.f32 %v2442_v34, %v6476_v14  ;;  %v2479_v46 = vmul.f32 %v2477_v31, %v6476_v14 }
 0x21d   : > { %v1653_v9 = vpop.permute.xlu1 %1652  ;;  %v1644_v17 = vpop.permute.xlu0 %1643  ;;  %v2463_v30 = vrot.slane %v2457_v33, 1  ;;  %v1020_v60 = vadd.f32 %v6017_v56, %v1011_v29 }
 0x21e   : > { %v1646_v3 = vadd.f32 %v1644_v17, %v1637_v37  ;;  %v2480_v37 = vmul.f32 %v2477_v31, %v6478_v35  ;;  %v2443_v17 = vmul.f32 %v2442_v34, %v6474_v24  ;;  %v2466_v2 = vrot.slane %v2459_v21, 1 }
 0x21f   : > { %2286 = vrot.lane.b32.xlu1 %v2285_v13, %s8124_s11  ;;  %2277 = vrot.lane.b32.xlu0 %v2276_v4, %s8124_s11  ;;  %v2498_v13 = vstv %s6468_s29  ;;  %v2464_v4 = vrot.slane %v2458_v45, 1  ;;  %s4624_s29 = sld [smem:[#allocation5 + $0xe3]] }
 0x220   : > { %v1655_v51 = vadd.f32 %v1653_v9, %v1646_v3  ;;  %v2478_v3 = vmul.f32 %v2477_v31, %v6474_v24  ;;  %v2500_v10 = vmul.f32 %v2498_v13, %v6476_v14  ;;  %v2487_v34 = vrot.slane %v2480_v37, 2 }
 0x221   : > { %v1671_v41 = vpop.permute.xlu1 %1670  ;;  %v1662_v38 = vpop.permute.xlu0 %1661  ;;  %v2467_v56 = vsel %vm2343_vm0, %v2464_v4, %v2466_v2  ;;  %v2465_v21 = vsel %vm2343_vm0, %v2463_v30, %v2464_v4  ;;  %v2499_v33 = vmul.f32 %v2498_v13, %v6474_v24  ;;  %v1029_v31 = vadd.f32 %v6015_v42, %v1020_v60 }
 0x222   : > { %v1664_v36 = vadd.f32 %v1662_v38, %v1655_v51  ;;  %v2485_v51 = vrot.slane %v2479_v46, 2 }
 0x223   : > { %2312 = vrot.lane.b32.xlu1 %v2311_v25, %s8124_s11  ;;  %2299 = vrot.lane.b32.xlu0 %v2298_v57, %s8124_s11  ;;  %v2519_v25 = vstv %s6488_s30  ;;  %v1038_v4 = vadd.f32 %v6028_v12, %v1029_v31  ;;  %v2561_v31 = vstv %s6510_s9  ;;  %s4625_s30 = sld [smem:[#allocation5 + $0xea]]  ;;  %s4628_s9 = sld [smem:[#allocation5 + $0xcf]] }
 0x224   : > { %v1673_v1 = vadd.f32 %v1671_v41, %v1664_v36  ;;  %v2501_v41 = vmul.f32 %v2498_v13, %v6478_v35  ;;  %v2484_v36 = vrot.slane %v2478_v3, 2  ;;  %v2521_v42 = vmul.f32 %v2519_v25, %v6476_v14 }
 0x225   : > { %v1697_v52 = vpop.permute.xlu1 %1696  ;;  %v1684_v9 = vpop.permute.xlu0 %1683  ;;  %v2520_v60 = vmul.f32 %v2519_v25, %v6474_v24 }
 0x226   : > { %v1686_v16 = vadd.f32 %v1684_v9, %v1673_v1  ;;  %v2506_v1 = vrot.slane %v2500_v10, 3  ;;  %v2508_v46 = vrot.slane %v2501_v41, 3  ;;  %v2522_v9 = vmul.f32 %v2519_v25, %v6478_v35 }
 0x227   : > { %2449 = vrot.lane.b32.xlu1 %v2444_v40, %s8125_s10  ;;  %2447 = vrot.lane.b32.xlu0 %v2443_v17, %s8125_s10  ;;  %v2488_v40 = vsel %vm2361_vm1, %v2485_v51, %v2487_v34  ;;  %v2540_v17 = vstv %s6497_s8  ;;  %v2486_v30 = vsel %vm2361_vm1, %v2484_v36, %v2485_v51  ;;  %v2527_v41 = vrot.slane %v2521_v42, 4  ;;  %s4626_s8 = sld [smem:[#allocation5 + $0xf1]] }
 0x228   : > { %v1699_v61 = vadd.f32 %v1697_v52, %v1686_v16  ;;  %v2505_v52 = vrot.slane %v2499_v33, 3  ;;  %v2509_v3 = vsel %vm2379_vm2, %v2506_v1, %v2508_v46  ;;  %v2542_v10 = vmul.f32 %v2540_v17, %v6476_v14 }
 0x229   : > { %v1714_v38 = vpop.permute.xlu1 %1713  ;;  %v1705_v45 = vpop.permute.xlu0 %1704  ;;  %v2543_v12 = vmul.f32 %v2540_v17, %v6478_v35  ;;  %v2526_v33 = vrot.slane %v2520_v60, 4  ;;  %v2564_v46 = vmul.f32 %v2561_v31, %v6478_v35 }
 0x22a   : > { %v1707_v29 = vadd.f32 %v1705_v45, %v1699_v61  ;;  %v2507_v34 = vsel %vm2379_vm2, %v2505_v52, %v2506_v1  ;;  %v2541_v45 = vmul.f32 %v2540_v17, %v6474_v24  ;;  %v2548_v36 = vrot.slane %v2542_v10, 5 }
 0x22b   : > { %2470 = vrot.lane.b32.xlu1 %v2467_v56, %s8125_s10  ;;  %2468 = vrot.lane.b32.xlu0 %v2465_v21, %s8125_s10  ;;  %v1047_v56 = vadd.f32 %v6026_v15, %v1038_v4  ;;  %v2550_v25 = vrot.slane %v2543_v12, 5  ;;  %v2563_v15 = vmul.f32 %v2561_v31, %v6476_v14  ;;  %v2528_v42 = vsel %vm2397_vm3, %v2526_v33, %v2527_v41 }
 0x22c   : > { %v1716_v57 = vadd.f32 %v1714_v38, %v1707_v29  ;;  %v2529_v38 = vrot.slane %v2522_v9, 4  ;;  %v2547_v9 = vrot.slane %v2541_v45, 5  ;;  %v1843_v4 = vstv %s6523_s14  ;;  %s6737_s14 = sld [smem:[#allocation5 + $0xc8]] }
 0x22d   : > { %v1732_v37 = vpop.permute.xlu1 %1731  ;;  %v1723_v13 = vpop.permute.xlu0 %1722  ;;  %v2596_v12 = vstv %s6534_s6  ;;  %s4631_s6 = sld [smem:[#allocation5 + $0xe4]] }
 0x22e   : > { %v1725_v2 = vadd.f32 %v1723_v13, %v1716_v57  ;;  %v2530_v1 = vsel %vm2397_vm3, %v2527_v41, %v2529_v38  ;;  %v1060_v13 = vadd.f32 %v6046_v26, %v1047_v56  ;;  %v2549_v41 = vsel %vm440_vm12, %v2547_v9, %v2548_v36 }
 0x22f   : > { %2491 = vrot.lane.b32.xlu1 %v2488_v40, %s8125_s10  ;;  %2489 = vrot.lane.b32.xlu0 %v2486_v30, %s8125_s10  ;;  %v1854_v30 = vstv %s6530_s17  ;;  %v1844_v38 = vmul.f32 %v1843_v4, %v6155_v63  ;;  %v2598_v33 = vmul.f32 %v2596_v12, %v6476_v14  ;;  %v1875_v9 = vstv %s6556_s21  ;;  %s4630_s17 = sld [smem:[#allocation5 + $0xdd]]  ;;  %s4636_s21 = sld [smem:[#allocation5 + $0xd7]] }
 0x230   : > { %v1734_v16 = vadd.f32 %v1732_v37, %v1725_v2  ;;  %v2562_v37 = vmul.f32 %v2561_v31, %v6474_v24  ;;  %v1847_v2 = vstv %s6528_s18  ;;  %v6574_v56 = vmul.f32 %v1854_v30, %v6155_v63  ;;  %s4629_s18 = sld [smem:[#allocation5 + $0xd6]] }
 0x231   : > { %v1754_v61 = vpop.permute.xlu1 %1753  ;;  %v1741_v51 = vpop.permute.xlu0 %1740  ;;  %v6571_v45 = vmul.f32 %v1847_v2, %v6155_v63  ;;  %v2599_v31 = vmul.f32 %v2596_v12, %v6478_v35  ;;  %v2617_v63 = vstv %s6546_s0  ;;  %v2604_v4 = vrot.slane %v2598_v33, 1  ;;  %s4633_s0 = sld [smem:[#allocation5 + $0xf2]] }
 0x232   : > { %v1743_v21 = vadd.f32 %v1741_v51, %v1734_v16  ;;  %v2569_v16 = vrot.slane %v2563_v15, 6  ;;  %v2568_v10 = vrot.slane %v2562_v37, 6  ;;  %v1868_v37 = vstv %s6552_s20  ;;  %s6826_s20 = sld [smem:[#allocation5 + $0xc9]] }
 0x233   : > { %2512 = vrot.lane.b32.xlu1 %v2509_v3, %s8125_s10  ;;  %2510 = vrot.lane.b32.xlu0 %v2507_v34, %s8125_s10  ;;  %v2571_v3 = vrot.slane %v2564_v46, 6  ;;  %v2551_v34 = vsel %vm440_vm12, %v2548_v36, %v2550_v25  ;;  %v1861_v46 = vstv %s6550_s13  ;;  %v2606_v2 = vrot.slane %v2599_v31, 1  ;;  %s4635_s13 = sld [smem:[#allocation5 + $0xd0]] }
 0x234   : > { %v1756_v29 = vadd.f32 %v1754_v61, %v1743_v21  ;;  %v1073_v61 = vadd.f32 %v6044_v59, %v1060_v13  ;;  %v2582_v21 = vstv %s6540_s7  ;;  %v1850_v13 = vrot.slane %v6571_v45, 1  ;;  %s4632_s7 = sld [smem:[#allocation5 + $0xeb]] }
 0x235   : > { %v1775_v57 = vpop.permute.xlu1 %1774  ;;  %v1767_v40 = vpop.permute.xlu0 %1766  ;;  %v2572_v25 = vsel %vm452_vm13, %v2569_v16, %v2571_v3  ;;  %v1886_v33 = vstv %s6576_s15  ;;  %s4638_s15 = sld [smem:[#allocation5 + $0xe5]] }
 0x236   : > { %v1769_v52 = vadd.f32 %v1767_v40, %v1756_v29  ;;  %v2597_v40 = vmul.f32 %v2596_v12, %v6474_v24  ;;  %v2638_v12 = vstv %s6562_s12  ;;  %s4637_s12 = sld [smem:[#allocation5 + $0xde]] }
 0x237   : > { %2533 = vrot.lane.b32.xlu1 %v2530_v1, %s8125_s10  ;;  %2531 = vrot.lane.b32.xlu0 %v2528_v42, %s8125_s10  ;;  %v1081_v1 = vadd.f32 %v6064_v58, %v1073_v61  ;;  %v2584_v42 = vmul.f32 %v2582_v21, %v6476_v14  ;;  %v2619_v58 = vmul.f32 %v2617_v63, %v6476_v14 }
 0x238   : > { %v1777_v17 = vadd.f32 %v1775_v57, %v1769_v52  ;;  %v2570_v57 = vsel %vm452_vm13, %v2568_v10, %v2569_v16  ;;  %v1857_v52 = vrot.slane %v6574_v56, 2  ;;  %v4739_v16 = vld [vmem:[#allocation3 + $0x10] sm:$0xff]  ;;  %v2603_v10 = vrot.slane %v2597_v40, 1 }
 0x239   : > { %v1793_v26 = vpop.permute.xlu1 %1792  ;;  %v1784_v60 = vpop.permute.xlu0 %1783  ;;  %v1862_v3 = vmul.f32 %v4739_v16, %v1861_v46  ;;  %v1090_v61 = vadd.f32 %v6062_v7, %v1081_v1  ;;  %v1869_v45 = vmul.f32 %v4739_v16, %v1868_v37  ;;  %v1876_v56 = vmul.f32 %v4739_v16, %v1875_v9 }
 0x23a   : > { %v1786_v51 = vadd.f32 %v1784_v60, %v1777_v17  ;;  %v2583_v60 = vmul.f32 %v2582_v21, %v6474_v24  ;;  %v2640_v7 = vmul.f32 %v2638_v12, %v6476_v14  ;;  %v2605_v40 = vsel %vm2343_vm0, %v2603_v10, %v2604_v4 }
 0x23b   : > { %2554 = vrot.lane.b32.xlu1 %v2551_v34, %s8125_s10  ;;  %2552 = vrot.lane.b32.xlu0 %v2549_v41, %s8125_s10  ;;  %v2620_v34 = vmul.f32 %v2617_v63, %v6478_v35  ;;  %v2618_v41 = vmul.f32 %v2617_v63, %v6474_v24  ;;  %v2641_v63 = vmul.f32 %v2638_v12, %v6478_v35 }
 0x23c   : > { %v1795_v59 = vadd.f32 %v1793_v26, %v1786_v51  ;;  %v2639_v1 = vmul.f32 %v2638_v12, %v6474_v24  ;;  %v1099_v46 = vadd.f32 %v6083_v11, %v1090_v61 }
 0x23d   : > { %v1811_v29 = vpop.permute.xlu1 %1810  ;;  %v1802_v36 = vpop.permute.xlu0 %1801  ;;  %v2648_v12 = vrot.slane %v2641_v63, 3 }
 0x23e   : > { %v1804_v15 = vadd.f32 %v1802_v36, %v1795_v59  ;;  %v4740_v59 = vld [vmem:[#allocation3 + $0x18] sm:$0x3]  ;;  %v2625_v36 = vrot.slane %v2619_v58, 2  ;;  %v1887_v58 = vmul.f32 %v4739_v16, %v1886_v33  ;;  %v2645_v61 = vrot.slane %v2639_v1, 3 }
 0x23f   : > { %2575 = vrot.lane.b32.xlu1 %v2572_v25, %s8125_s10  ;;  %2573 = vrot.lane.b32.xlu0 %v2570_v57, %s8125_s10  ;;  %v1877_v21 = vmul.f32 %v4740_v59, %v1875_v9  ;;  %v2624_v9 = vrot.slane %v2618_v41, 2  ;;  %v2680_v16 = vstv %s6599_s19  ;;  %s4640_s19 = sld [smem:[#allocation5 + $0xf3]] }
 0x240   : > { %v1813_v17 = vadd.f32 %v1811_v29, %v1804_v15  ;;  %v2607_v29 = vsel %vm2343_vm0, %v2604_v4, %v2606_v2  ;;  %v2659_v15 = vstv %s6585_s28  ;;  %v1871_v2 = vrot.slane %v1869_v45, 4  ;;  %s4639_s28 = sld [smem:[#allocation5 + $0xec]] }
 0x241   : > { %v1837_v30 = vpop.permute.xlu1 %1836  ;;  %v1824_v26 = vpop.permute.xlu0 %1823  ;;  %v2662_v11 = vmul.f32 %v2659_v15, %v6478_v35  ;;  %v1880_v45 = vrot.slane %v1876_v56, 5  ;;  %v2682_v63 = vmul.f32 %v2680_v16, %v6476_v14  ;;  %v2681_v1 = vmul.f32 %v2680_v16, %v6474_v24 }
 0x242   : > { %v1826_v51 = vadd.f32 %v1824_v26, %v1813_v17  ;;  %v1864_v17 = vrot.slane %v1862_v3, 3  ;;  %v2646_v26 = vrot.slane %v2640_v7, 3  ;;  %v2660_v3 = vmul.f32 %v2659_v15, %v6474_v24 }
 0x243   : > { %2589 = vrot.lane.b32.xlu1 %v2584_v42, %s4844_s27  ;;  %2587 = vrot.lane.b32.xlu0 %v2583_v60, %s4844_s27  ;;  %v2627_v42 = vrot.slane %v2620_v34, 2  ;;  %v2661_v60 = vmul.f32 %v2659_v15, %v6476_v14 }
 0x244   : > { %v1839_v31 = vadd.f32 %v1837_v30, %v1826_v51  ;;  %v1888_v30 = vmul.f32 %v4740_v59, %v1886_v33  ;;  %v1108_v51 = vadd.f32 %v6081_v19, %v1099_v46  ;;  %v1881_v59 = vrot.slane %v1877_v21, 5 }
 0x245   : > { %v6609_v25 = vpop.permute.xlu1 %1909  ;;  %v6611_v57 = vpop.permute.xlu0 %1900  ;;  %v2628_v41 = vsel %vm2361_vm1, %v2625_v36, %v2627_v42  ;;  %v1891_v33 = vrot.slane %v1887_v58, 6  ;;  %v2667_v7 = vrot.slane %v2661_v60, 4  ;;  %v2666_v56 = vrot.slane %v2660_v3, 4 }
 0x246   : > { %v1845_v37 = vadd.f32 %v1844_v38, %v1839_v31  ;;  %v1892_v31 = vrot.slane %v1888_v30, 6  ;;  %v2683_v21 = vmul.f32 %v2680_v16, %v6478_v35  ;;  %v1117_v15 = vadd.f32 %v6101_v18, %v1108_v51 }
 0x247   : > { %2610 = vrot.lane.b32.xlu1 %v2607_v29, %s4844_s27  ;;  %2608 = vrot.lane.b32.xlu0 %v2605_v40, %s4844_s27  ;;  %v2669_v40 = vrot.slane %v2662_v11, 4  ;;  %v2701_v42 = vstv %s6618_s23  ;;  %v2687_v11 = vrot.slane %v2681_v1, 5  ;;  %s6902_s23 = sld [smem:[#allocation5 + $0xd1]] }
 0x248   : > { %v1852_v4 = vadd.f32 %v1850_v13, %v1845_v37  ;;  %v2626_v13 = vsel %vm2361_vm1, %v2624_v9, %v2625_v36  ;;  %v2649_v36 = vsel %vm2379_vm2, %v2646_v26, %v2648_v12  ;;  %v2647_v37 = vsel %vm2379_vm2, %v2645_v61, %v2646_v26 }
 0x249   : > { %v6624_v38 = vpop.permute.xlu1 %1927  ;;  %v6626_v10 = vpop.permute.xlu0 %1918  ;;  %v1882_v9 = vsel %vm440_vm12, %v1880_v45, %v1881_v59  ;;  %v1893_v58 = vsel %vm452_vm13, %v1891_v33, %v1892_v31  ;;  %v2670_v30 = vsel %vm2397_vm3, %v2667_v7, %v2669_v40  ;;  %v2690_v26 = vrot.slane %v2683_v21, 5 }
 0x24a   : > { %v1859_v34 = vadd.f32 %v1857_v52, %v1852_v4  ;;  %v2688_v4 = vrot.slane %v2682_v63, 5  ;;  %v2703_v12 = vmul.f32 %v2701_v42, %v6476_v14  ;;  %v1130_v61 = vadd.f32 %v6099_v54, %v1117_v15 }
 0x24b   : > { %2631 = vrot.lane.b32.xlu1 %v2628_v41, %s4844_s27  ;;  %2629 = vrot.lane.b32.xlu0 %v2626_v13, %s4844_s27  ;;  %v2704_v16 = vmul.f32 %v2701_v42, %v6478_v35  ;;  %v2702_v51 = vmul.f32 %v2701_v42, %v6474_v24  ;;  %v2722_v63 = vstv %s6657_s1  ;;  %v2757_v21 = vstv %s4622_s25  ;;  %s6924_s1 = sld [smem:[#allocation5 + $0xca]]  ;;  %s6928_s25 = sld [smem:[#allocation5 + $0xd8]] }
 0x24c   : > { %v1866_v29 = vadd.f32 %v1864_v17, %v1859_v34  ;;  %v2691_v13 = vsel %vm440_vm12, %v2688_v4, %v2690_v26  ;;  %v2689_v45 = vsel %vm440_vm12, %v2687_v11, %v2688_v4  ;;  %v2709_v54 = vrot.slane %v2703_v12, 6 }
 0x24d   : > { %v6636_v19 = vpop.permute.xlu1 %1949  ;;  %v6638_v52 = vpop.permute.xlu0 %1936  ;;  %v1143_v59 = vadd.f32 %v6126_v47, %v1130_v61  ;;  %v2711_v33 = vrot.slane %v2704_v16, 6  ;;  %v2708_v31 = vrot.slane %v2702_v51, 6  ;;  %v2760_v42 = vmul.f32 %v2757_v21, %v6478_v35 }
 0x24e   : > { %v1873_v46 = vadd.f32 %v1871_v2, %v1866_v29  ;;  %v2668_v2 = vsel %vm2397_vm3, %v2666_v56, %v2667_v7  ;;  %v2736_v29 = vstv %s4621_s24  ;;  %v2758_v4 = vmul.f32 %v2757_v21, %v6474_v24  ;;  %s6910_s24 = sld [smem:[#allocation10]] }
 0x24f   : > { %2652 = vrot.lane.b32.xlu1 %v2649_v36, %s4844_s27  ;;  %2650 = vrot.lane.b32.xlu0 %v2647_v37, %s4844_s27  ;;  %v2738_v36 = vmul.f32 %v2736_v29, %v6476_v14  ;;  %v2739_v56 = vmul.f32 %v2736_v29, %v6478_v35  ;;  %v1151_v47 = vadd.f32 %v6124_v0, %v1143_v59  ;;  %v2778_v12 = vstv %s4623_s26  ;;  %s6931_s26 = sld [smem:[#allocation5 + $0xcb]] }
 0x250   : > { %v1884_v17 = vadd.f32 %v1882_v9, %v1873_v46  ;;  %v2712_v1 = vsel %vm452_vm13, %v2709_v54, %v2711_v33  ;;  %v2710_v15 = vsel %vm452_vm13, %v2708_v31, %v2709_v54  ;;  %v2737_v46 = vmul.f32 %v2736_v29, %v6474_v24 }
 0x251   : > { %v6651_v60 = vpop.permute.xlu1 %1970  ;;  %v6653_v18 = vpop.permute.xlu0 %1962  ;;  %v2759_v37 = vmul.f32 %v2757_v21, %v6476_v14  ;;  %v2724_v0 = vmul.f32 %v2722_v63, %v6476_v14  ;;  %v2746_v26 = vrot.slane %v2739_v56, 1  ;;  %v2767_v16 = vrot.slane %v2760_v42, 2 }
 0x252   : > { %v6660_v3 = vadd.f32 %v1893_v58, %v1884_v17  ;;  %v2723_v58 = vmul.f32 %v2722_v63, %v6474_v24  ;;  %v2743_v11 = vrot.slane %v2737_v46, 1  ;;  %v2780_v54 = vmul.f32 %v2778_v12, %v6476_v14 }
 0x253   : > { %2673 = vrot.lane.b32.xlu1 %v2670_v30, %s4844_s27  ;;  %2671 = vrot.lane.b32.xlu0 %v2668_v2, %s4844_s27  ;;  %v2744_v30 = vrot.slane %v2738_v36, 1  ;;  %v1160_v2 = vadd.f32 %v6152_v53, %v1151_v47  ;;  %v2765_v61 = vrot.slane %v2759_v37, 2  ;;  %v2781_v59 = vmul.f32 %v2778_v12, %v6478_v35 }
 0x254   : > { %v2799_v53 = vstv %s4624_s29  ;;  %v2779_v63 = vmul.f32 %v2778_v12, %v6474_v24  ;;  %s6935_s29 = sld [smem:[#allocation5 + $0xd2]] }
 0x255   : > { %v6666_v34 = vpop.permute.xlu1 %1988  ;;  %v6668_v41 = vpop.permute.xlu0 %1979  ;;  %v1169_v33 = vadd.f32 %v6150_v32, %v1160_v2  ;;  %v2747_v31 = vsel %vm2343_vm0, %v2744_v30, %v2746_v26  ;;  %v2745_v29 = vsel %vm2343_vm0, %v2743_v11, %v2744_v30  ;;  %v2801_v36 = vmul.f32 %v2799_v53, %v6476_v14 }
 0x256   : > { %v2802_v56 = vmul.f32 %v2799_v53, %v6478_v35  ;;  %v2768_v32 = vsel %vm2361_vm1, %v2765_v61, %v2767_v16  ;;  %v2788_v46 = vrot.slane %v2781_v59, 3  ;;  %v2785_v42 = vrot.slane %v2779_v63, 3 }
 0x257   : > { %2694 = vrot.lane.b32.xlu1 %v2691_v13, %s4844_s27  ;;  %2692 = vrot.lane.b32.xlu0 %v2689_v45, %s4844_s27  ;;  %v2764_v45 = vrot.slane %v2758_v4, 2  ;;  %v1178_v37 = vadd.f32 %v6171_v27, %v1169_v33  ;;  %v2807_v30 = vrot.slane %v2801_v36, 4  ;;  %v2841_v59 = vstv %s4626_s8  ;;  %s6949_s8 = sld [smem:[#allocation5 + $0xc4]] }
 0x258   : > { %v2809_v4 = vrot.slane %v2802_v56, 4  ;;  %v2843_v36 = vmul.f32 %v2841_v59, %v6476_v14 }
 0x259   : > { %v6675_v7 = vpop.permute.xlu1 %2006  ;;  %v6677_v40 = vpop.permute.xlu0 %1997  ;;  %v1187_v16 = vadd.f32 %v6169_v50, %v1178_v37 }
 0x25b   : > { %2715 = vrot.lane.b32.xlu1 %v2712_v1, %s4844_s27  ;;  %2713 = vrot.lane.b32.xlu0 %v2710_v15, %s4844_s27  ;;  %v2766_v1 = vsel %vm2361_vm1, %v2764_v45, %v2765_v61  ;;  %v2786_v15 = vrot.slane %v2780_v54, 3  ;;  %v1200_v56 = vadd.f32 %v6194_v20, %v1187_v16  ;;  %v2849_v20 = vrot.slane %v2843_v36, 6 }
 0x25d   : > { %v6690_v9 = vpop.permute.xlu1 %2032  ;;  %v6692_v17 = vpop.permute.xlu0 %2019  ;;  %v2789_v11 = vsel %vm2379_vm2, %v2786_v15, %v2788_v46  ;;  %v2787_v45 = vsel %vm2379_vm2, %v2785_v42, %v2786_v15  ;;  %v2842_v15 = vmul.f32 %v2841_v59, %v6474_v24 }
 0x25f   : > { %2729 = vrot.lane.b32.xlu1 %v2724_v0, %s4847_s5  ;;  %2727 = vrot.lane.b32.xlu0 %v2723_v58, %s4847_s5  ;;  %v2800_v0 = vmul.f32 %v2799_v53, %v6474_v24  ;;  %v2820_v58 = vstv %s4625_s30  ;;  %v2810_v53 = vsel %vm2397_vm3, %v2807_v30, %v2809_v4  ;;  %v2848_v4 = vrot.slane %v2842_v15, 6  ;;  %s6942_s30 = sld [smem:[#allocation5 + $0xdf]] }
 0x260   : > { %v2822_v12 = vmul.f32 %v2820_v58, %v6476_v14  ;;  %v2823_v27 = vmul.f32 %v2820_v58, %v6478_v35  ;;  %v2821_v61 = vmul.f32 %v2820_v58, %v6474_v24  ;;  %v1213_v58 = vadd.f32 %v6192_v5, %v1200_v56 }
 0x261   : > { %v6700_v51 = vpop.permute.xlu1 %2049  ;;  %v6702_v13 = vpop.permute.xlu0 %2040  ;;  %v2806_v54 = vrot.slane %v2800_v0, 4 }
 0x262   : > { %v2830_v63 = vrot.slane %v2823_v27, 5  ;;  %v2827_v50 = vrot.slane %v2821_v61, 5  ;;  %v2862_v61 = vstv %s6737_s14  ;;  %s6955_s14 = sld [smem:[#allocation5 + $0xe0]] }
 0x263   : > { %2750 = vrot.lane.b32.xlu1 %v2747_v31, %s4847_s5  ;;  %2748 = vrot.lane.b32.xlu0 %v2745_v29, %s4847_s5  ;;  %v2828_v29 = vrot.slane %v2822_v12, 5 }
 0x265   : > { %v6714_v21 = vpop.permute.xlu1 %2067  ;;  %v6716_v47 = vpop.permute.xlu0 %2058  ;;  %v2831_v42 = vsel %vm440_vm12, %v2828_v29, %v2830_v63  ;;  %v2829_v0 = vsel %vm440_vm12, %v2827_v50, %v2828_v29  ;;  %v2864_v63 = vmul.f32 %v2862_v61, %v6476_v14  ;;  %v2863_v50 = vmul.f32 %v2862_v61, %v6474_v24 }
 0x267   : > { %2771 = vrot.lane.b32.xlu1 %v2768_v32, %s4847_s5  ;;  %2769 = vrot.lane.b32.xlu0 %v2766_v1, %s4847_s5  ;;  %v2808_v32 = vsel %vm2397_vm3, %v2806_v54, %v2807_v30  ;;  %v2844_v1 = vmul.f32 %v2841_v59, %v6478_v35  ;;  %v2897_v54 = vstv %s4629_s18  ;;  %v1221_v59 = vadd.f32 %v6212_v39, %v1213_v58  ;;  %s6965_s18 = sld [smem:[#allocation5 + $0xe6]] }
 0x268   : > { %v2899_v36 = vmul.f32 %v2897_v54, %v6476_v14  ;;  %v2900_v56 = vmul.f32 %v2897_v54, %v6478_v35 }
 0x269   : > { %v6724_v2 = vpop.permute.xlu1 %2089  ;;  %v6726_v26 = vpop.permute.xlu0 %2076  ;;  %v2851_v30 = vrot.slane %v2844_v1, 6 }
 0x26b   : > { %2792 = vrot.lane.b32.xlu1 %v2789_v11, %s4847_s5  ;;  %2790 = vrot.lane.b32.xlu0 %v2787_v45, %s4847_s5  ;;  %v2876_v11 = vstv %s4628_s9  ;;  %v2852_v5 = vsel %vm452_vm13, %v2849_v20, %v2851_v30  ;;  %v2905_v30 = vrot.slane %v2899_v36, 2  ;;  %s6951_s9 = sld [smem:[#allocation5 + $0xd9]] }
 0x26c   : > { %v2878_v16 = vmul.f32 %v2876_v11, %v6476_v14  ;;  %v2879_v45 = vmul.f32 %v2876_v11, %v6478_v35  ;;  %v2877_v29 = vmul.f32 %v2876_v11, %v6474_v24 }
 0x26d   : > { %v6739_v33 = vpop.permute.xlu1 %2110  ;;  %v6741_v31 = vpop.permute.xlu0 %2102 }
 0x26e   : > { %8130 = vst [vmem:[#allocation20_spill] sm:$0xff] %v6739_v33  ;;  %8131 = vst [vmem:[#allocation21_spill] sm:$0xff] %v6741_v31  ;;  %v2884_v1 = vrot.slane %v2878_v16, 1  ;;  %v2886_v15 = vrot.slane %v2879_v45, 1  ;;  %v2883_v58 = vrot.slane %v2877_v29, 1  ;;  %v2939_v29 = vstv %s4631_s6  ;;  %s6991_s6 = sld [smem:[#allocation5 + $0xed]] }
 0x26f   : > { %2813 = vrot.lane.b32.xlu1 %v2810_v53, %s4847_s5  ;;  %2811 = vrot.lane.b32.xlu0 %v2808_v32, %s4847_s5  ;;  %v2850_v53 = vsel %vm452_vm13, %v2848_v4, %v2849_v20  ;;  %v1230_v20 = vadd.f32 %v6210_v8, %v1221_v59  ;;  %v2907_v4 = vrot.slane %v2900_v56, 2 }
 0x270   : > { %v2887_v16 = vsel %vm2343_vm0, %v2884_v1, %v2886_v15  ;;  %v2885_v59 = vsel %vm2343_vm0, %v2883_v58, %v2884_v1  ;;  %v2941_v15 = vmul.f32 %v2939_v29, %v6476_v14  ;;  %v2940_v1 = vmul.f32 %v2939_v29, %v6474_v24 }
 0x271   : > { %v6750_v46 = vpop.permute.xlu1 %2128  ;;  %v6752_v37 = vpop.permute.xlu0 %2119  ;;  %v1239_v8 = vadd.f32 %v6236_v44, %v1230_v20  ;;  %v2942_v44 = vmul.f32 %v2939_v29, %v6478_v35 }
 0x272   : > { %8132 = vst [vmem:[#allocation22_spill] sm:$0xff] %v6750_v46  ;;  %8133 = vst [vmem:[#allocation23_spill] sm:$0xff] %v6752_v37  ;;  %v2947_v29 = vrot.slane %v2941_v15, 4 }
 0x273   : > { %2834 = vrot.lane.b32.xlu1 %v2831_v42, %s4847_s5  ;;  %2832 = vrot.lane.b32.xlu0 %v2829_v0, %s4847_s5  ;;  %v2898_v42 = vmul.f32 %v2897_v54, %v6474_v24  ;;  %v2918_v0 = vstv %s4630_s17  ;;  %s6979_s17 = sld [smem:[#allocation5 + $0xe7]] }
 0x274   : > { %v2920_v11 = vmul.f32 %v2918_v0, %v6476_v14  ;;  %v2921_v54 = vmul.f32 %v2918_v0, %v6478_v35  ;;  %v3240_v37 = vstv %s6991_s6  ;;  %s7499_s6 = sld [smem:[#allocation5 + $0x122]] }
 0x275   : > { %v6759_v12 = vpop.permute.xlu1 %2146  ;;  %v6761_v27 = vpop.permute.xlu0 %2137  ;;  %v2904_v45 = vrot.slane %v2898_v42, 2  ;;  %v2960_v42 = vstv %s4632_s7  ;;  %s7002_s7 = sld [smem:[#allocation5 + $0xee]] }
 0x276   : > { %8134 = vst [vmem:[#allocation24_spill] sm:$0xff] %v6759_v12  ;;  %8135 = vst [vmem:[#allocation25_spill] sm:$0xff] %v6761_v27  ;;  %v2928_v58 = vrot.slane %v2921_v54, 3 }
 0x277   : > { %2855 = vrot.lane.b32.xlu1 %v2852_v5, %s4847_s5  ;;  %2853 = vrot.lane.b32.xlu0 %v2850_v53, %s4847_s5  ;;  %v2919_v53 = vmul.f32 %v2918_v0, %v6474_v24  ;;  %v1248_v0 = vadd.f32 %v6234_v49, %v1239_v8  ;;  %v2906_v20 = vsel %vm2361_vm1, %v2904_v45, %v2905_v30  ;;  %v2981_v8 = vstv %s4633_s0  ;;  %s7035_s0 = sld [smem:[#allocation5 + $0xf4]] }
 0x278   : > { %v2961_v49 = vmul.f32 %v2960_v42, %v6474_v24 }
 0x279   : > { %v6776_v39 = vpop.permute.xlu1 %2172  ;;  %v6778_v32 = vpop.permute.xlu0 %2159 }
 0x27a   : > { %8136 = vst [vmem:[#allocation26_spill] sm:$0xff] %v6776_v39  ;;  %8137 = vst [vmem:[#allocation27_spill] sm:$0xff] %v6778_v32 }
 0x27b   : > { %2869 = vrot.lane.b32.xlu1 %v2864_v63, %s4846_s4  ;;  %2867 = vrot.lane.b32.xlu0 %v2863_v50, %s4846_s4  ;;  %v2908_v63 = vsel %vm2361_vm1, %v2905_v30, %v2907_v4  ;;  %v2926_v50 = vrot.slane %v2920_v11, 3  ;;  %v2962_v4 = vmul.f32 %v2960_v42, %v6476_v14  ;;  %v2963_v11 = vmul.f32 %v2960_v42, %v6478_v35 }
 0x27c   : > { %v1257_v30 = vadd.f32 %v6253_v48, %v1248_v0  ;;  %v2967_v48 = vrot.slane %v2961_v49, 5  ;;  %v2983_v0 = vmul.f32 %v2981_v8, %v6476_v14 }
 0x27d   : > { %v6785_v61 = vpop.permute.xlu1 %2189  ;;  %v6787_v5 = vpop.permute.xlu0 %2180  ;;  %v2929_v45 = vsel %vm2379_vm2, %v2926_v50, %v2928_v58  ;;  %v2970_v42 = vrot.slane %v2963_v11, 5  ;;  %v2982_v58 = vmul.f32 %v2981_v8, %v6474_v24 }
 0x27e   : > { %8138 = vst [vmem:[#allocation28_spill] sm:$0xff] %v6785_v61  ;;  %8139 = vst [vmem:[#allocation29_spill] sm:$0xff] %v6787_v5  ;;  %v2946_v61 = vrot.slane %v2940_v1, 4 }
 0x27f   : > { %2890 = vrot.lane.b32.xlu1 %v2887_v16, %s4846_s4  ;;  %2888 = vrot.lane.b32.xlu0 %v2885_v59, %s4846_s4  ;;  %v2925_v16 = vrot.slane %v2919_v53, 3  ;;  %v2968_v53 = vrot.slane %v2962_v4, 5 }
 0x280   : > { %v2948_v1 = vsel %vm2397_vm3, %v2946_v61, %v2947_v29 }
 0x281   : > { %v6797_v36 = vpop.permute.xlu1 %2207  ;;  %v6799_v56 = vpop.permute.xlu0 %2198  ;;  %v2927_v54 = vsel %vm2379_vm2, %v2925_v16, %v2926_v50  ;;  %v1270_v50 = vadd.f32 %v6251_v28, %v1257_v30  ;;  %v2971_v16 = vsel %vm440_vm12, %v2968_v53, %v2970_v42  ;;  %v2969_v4 = vsel %vm440_vm12, %v2967_v48, %v2968_v53 }
 0x282   : > { %8140 = vst [vmem:[#allocation30_spill] sm:$0xff] %v6797_v36  ;;  %8141 = vst [vmem:[#allocation31_spill] sm:$0xff] %v6799_v56  ;;  %v2949_v56 = vrot.slane %v2942_v44, 4  ;;  %v3016_v28 = vstv %s4635_s13  ;;  %v2988_v30 = vrot.slane %v2982_v58, 6  ;;  %v3002_v53 = vstv %s6826_s20  ;;  %s7078_s13 = sld [smem:[#allocation5 + $0xfd]]  ;;  %s7107_s20 = sld [smem:[#allocation5 + $0xf6]] }
 0x283   : > { %2911 = vrot.lane.b32.xlu1 %v2908_v63, %s4846_s4  ;;  %2909 = vrot.lane.b32.xlu0 %v2906_v20, %s4846_s4  ;;  %v2984_v20 = vmul.f32 %v2981_v8, %v6478_v35  ;;  %v1283_v11 = vadd.f32 %v6272_v43, %v1270_v50  ;;  %v8150_v43 = vld [vmem:[#allocation18_spill] sm:$0xff] }
 0x284   : > { %v2950_v44 = vsel %vm2397_vm3, %v2947_v29, %v2949_v56  ;;  %v2989_v29 = vrot.slane %v2983_v0, 6  ;;  %v3017_v0 = vmul.f32 %v3016_v28, %v6474_v24 }
 0x285   : > { %v6810_v59 = vpop.permute.xlu1 %2229  ;;  %v6812_v36 = vpop.permute.xlu0 %2216  ;;  %v2991_v49 = vrot.slane %v2984_v20, 6  ;;  %v1291_v42 = vadd.f32 %v8150_v43, %v1283_v11  ;;  %v3004_v11 = vmul.f32 %v3002_v53, %v6476_v14 }
 0x286   : > { %8142 = vst [vmem:[#allocation32_spill] sm:$0xff] %v6810_v59  ;;  %8143 = vst [vmem:[#allocation33_spill] sm:$0xff] %v6812_v36  ;;  %v2990_v50 = vsel %vm452_vm13, %v2988_v30, %v2989_v29  ;;  %v3023_v30 = vrot.slane %v3017_v0, 1  ;;  %v3219_v36 = vstv %s6965_s18  ;;  %s7446_s18 = sld [smem:[#allocation5 + $0x114]] }
 0x287   : > { %2932 = vrot.lane.b32.xlu1 %v2929_v45, %s4846_s4  ;;  %2930 = vrot.lane.b32.xlu0 %v2927_v54, %s4846_s4  ;;  %v3018_v45 = vmul.f32 %v3016_v28, %v6476_v14  ;;  %v3019_v54 = vmul.f32 %v3016_v28, %v6478_v35  ;;  %v2992_v48 = vsel %vm452_vm13, %v2989_v29, %v2991_v49 }
 0x288   : > { %v3003_v49 = vmul.f32 %v3002_v53, %v6474_v24  ;;  %v1300_v28 = vadd.f32 %v6295_v6, %v1291_v42  ;;  %v3079_v42 = vstv %s4638_s15  ;;  %s7190_s15 = sld [smem:[#allocation5 + $0x112]] }
 0x289   : > { %v6820_v63 = vpop.permute.xlu1 %2250  ;;  %v6822_v15 = vpop.permute.xlu0 %2242  ;;  %v3024_v20 = vrot.slane %v3018_v45, 1  ;;  %v3026_v58 = vrot.slane %v3019_v54, 1 }
 0x28a   : > { %8144 = vst [vmem:[#allocation34_spill] sm:$0xff] %v6820_v63  ;;  %8145 = vst [vmem:[#allocation35_spill] sm:$0xff] %v6822_v15 }
 0x28b   : > { %2953 = vrot.lane.b32.xlu1 %v2950_v44, %s4846_s4  ;;  %2951 = vrot.lane.b32.xlu0 %v2948_v1, %s4846_s4  ;;  %v3037_v1 = vstv %s4636_s21  ;;  %v3027_v45 = vsel %vm2343_vm0, %v3024_v20, %v3026_v58  ;;  %v3025_v0 = vsel %vm2343_vm0, %v3023_v30, %v3024_v20  ;;  %v3081_v58 = vmul.f32 %v3079_v42, %v6476_v14  ;;  %v6887_v20 = vld [vmem:[#allocation4] sm:$0xff]  ;;  %s7118_s21 = sld [smem:[#allocation5 + $0x104]] }
 0x28c   : > { %v3040_v29 = vmul.f32 %v3037_v1, %v6478_v35  ;;  %v3038_v43 = vmul.f32 %v3037_v1, %v6474_v24 }
 0x28d   : > { %v6834_v56 = vpop.permute.xlu1 %2268  ;;  %v6836_v61 = vpop.permute.xlu0 %2259 }
 0x28e   : > { %8146 = vst [vmem:[#allocation36_spill] sm:$0xff] %v6834_v56  ;;  %8147 = vst [vmem:[#allocation37_spill] sm:$0xff] %v6836_v61  ;;  %v3047_v53 = vrot.slane %v3040_v29, 2 }
 0x28f   : > { %2974 = vrot.lane.b32.xlu1 %v2971_v16, %s4846_s4  ;;  %2972 = vrot.lane.b32.xlu0 %v2969_v4, %s4846_s4  ;;  %v3039_v16 = vmul.f32 %v3037_v1, %v6476_v14  ;;  %v1309_v1 = vadd.f32 %v6293_v22, %v1300_v28 }
 0x291   : > { %v6845_v8 = vpop.permute.xlu1 %2286  ;;  %v6847_v44 = vpop.permute.xlu0 %2277  ;;  %v3045_v54 = vrot.slane %v3039_v16, 2  ;;  %v3082_v16 = vmul.f32 %v3079_v42, %v6478_v35  ;;  %v1318_v30 = vadd.f32 %v6308_v55, %v1309_v1 }
 0x292   : > { %8148 = vst [vmem:[#allocation38_spill] sm:$0xff] %v6845_v8  ;;  %8149 = vst [vmem:[#allocation39_spill] sm:$0xff] %v6847_v44 }
 0x293   : > { %2995 = vrot.lane.b32.xlu1 %v2992_v48, %s4846_s4  ;;  %2993 = vrot.lane.b32.xlu0 %v2990_v50, %s4846_s4  ;;  %v3058_v48 = vstv %s4637_s12  ;;  %v3048_v56 = vsel %vm2361_vm1, %v3045_v54, %v3047_v53  ;;  %s7155_s12 = sld [smem:[#allocation5 + $0x10b]] }
 0x294   : > { %v3061_v6 = vmul.f32 %v3058_v48, %v6478_v35  ;;  %v3087_v35 = vrot.slane %v3081_v58, 4 }
 0x295   : > { %v6857_v4 = vpop.permute.xlu1 %2312  ;;  %v6859_v8 = vpop.permute.xlu0 %2299 }
 0x296   : > { %8151 = vst [vmem:[#allocation18_spill] sm:$0xff] %v6857_v4  ;;  %8152 = vst [vmem:[#allocation40_spill] sm:$0xff] %v6859_v8  ;;  %v3060_v8 = vmul.f32 %v3058_v48, %v6476_v14  ;;  %v3068_v28 = vrot.slane %v3061_v6, 3  ;;  %v3100_v14 = vstv %s4639_s28  ;;  %s7200_s28 = sld [smem:[#allocation5 + $0x119]] }
 0x297   : > { %3009 = vrot.lane.b32.xlu1 %v3004_v11, %s8123_s22  ;;  %3007 = vrot.lane.b32.xlu0 %v3003_v49, %s8123_s22  ;;  %v3044_v11 = vrot.slane %v3038_v43, 2  ;;  %v3059_v49 = vmul.f32 %v3058_v48, %v6474_v24  ;;  %v3080_v24 = vmul.f32 %v6887_v20, %v3079_v42  ;;  %v6899_v42 = vld [vmem:[#allocation4 + $0x8] sm:$0xff]  ;;  %v3101_v58 = vmul.f32 %v6887_v20, %v3100_v14 }
 0x298   : > { %v3066_v22 = vrot.slane %v3060_v8, 3  ;;  %v3102_v55 = vmul.f32 %v6899_v42, %v3100_v14 }
 0x299   : > { %v6869_v50 = vpop.permute.xlu1 %2449  ;;  %v6871_v4 = vpop.permute.xlu0 %2447  ;;  %v3046_v43 = vsel %vm2361_vm1, %v3044_v11, %v3045_v54  ;;  %v3065_v48 = vrot.slane %v3059_v49, 3  ;;  %v3086_v6 = vrot.slane %v3080_v24, 4  ;;  %v3121_v54 = vstv %s4640_s19  ;;  %v6906_v11 = vld [vmem:[#allocation4 + $0x10] sm:$0x3f]  ;;  %s7248_s19 = sld [smem:[#allocation5 + $0x120]] }
 0x29a   : > { %v3069_v53 = vsel %vm2379_vm2, %v3066_v22, %v3068_v28  ;;  %v3103_v49 = vmul.f32 %v6906_v11, %v3100_v14  ;;  %v3107_v14 = vrot.slane %v3101_v58, 5 }
 0x29b   : > { %3030 = vrot.lane.b32.xlu1 %v3027_v45, %s8123_s22  ;;  %3028 = vrot.lane.b32.xlu0 %v3025_v0, %s8123_s22  ;;  %v3089_v45 = vrot.slane %v3082_v16, 4  ;;  %v3067_v1 = vsel %vm2379_vm2, %v3065_v48, %v3066_v22  ;;  %v1903_v16 = vadd.f32 %v6611_v57, %v6660_v3  ;;  %v3088_v24 = vsel %vm2397_vm3, %v3086_v6, %v3087_v35 }
 0x29c   : > { %v3124_v48 = vmul.f32 %v6906_v11, %v3121_v54  ;;  %v3110_v3 = vrot.slane %v3103_v49, 5 }
 0x29d   : > { %v6882_v29 = vpop.permute.xlu1 %2470  ;;  %v6884_v44 = vpop.permute.xlu0 %2468  ;;  %v3090_v28 = vsel %vm2397_vm3, %v3087_v35, %v3089_v45  ;;  %v3122_v45 = vmul.f32 %v6887_v20, %v3121_v54 }
 0x29f   : > { %3051 = vrot.lane.b32.xlu1 %v3048_v56, %s8123_s22  ;;  %3049 = vrot.lane.b32.xlu0 %v3046_v43, %s8123_s22  ;;  %v1327_v56 = vadd.f32 %v6306_v62, %v1318_v30  ;;  %v3108_v30 = vrot.slane %v3102_v55, 5  ;;  %v3123_v43 = vmul.f32 %v6899_v42, %v3121_v54  ;;  %v3131_v55 = vrot.slane %v3124_v48, 6 }
 0x2a0   : > { %v3156_v54 = vstv %s6902_s23  ;;  %v3128_v58 = vrot.slane %v3122_v45, 6  ;;  %v3142_v48 = vstv %s6924_s1  ;;  %s7275_s23 = sld [smem:[#allocation5 + $0xfe]]  ;;  %s7303_s1 = sld [smem:[#allocation5 + $0x105]] }
 0x2a1   : > { %v6894_v0 = vpop.permute.xlu1 %2491  ;;  %v6896_v8 = vpop.permute.xlu0 %2489  ;;  %v1340_v57 = vadd.f32 %v6324_v23, %v1327_v56  ;;  %v3129_v6 = vrot.slane %v3123_v43, 6  ;;  %v8153_v56 = vld [vmem:[#allocation19_spill] sm:$0xff]  ;;  %v3109_v49 = vsel %vm440_vm12, %v3107_v14, %v3108_v30 }
 0x2a3   : > { %3072 = vrot.lane.b32.xlu1 %v3069_v53, %s8123_s22  ;;  %3070 = vrot.lane.b32.xlu0 %v3067_v1, %s8123_s22  ;;  %v1912_v53 = vadd.f32 %v6609_v25, %v1903_v16  ;;  %v1353_v25 = vadd.f32 %v8153_v56, %v1340_v57  ;;  %v3111_v1 = vsel %vm440_vm12, %v3108_v30, %v3110_v3  ;;  %v1354_v16 = vstv %s6910_s24  ;;  %s7295_s24 = sld [smem:[#allocation5 + $0xf7]] }
 0x2a4   : > { %v3159_v30 = vmul.f32 %v6906_v11, %v3156_v54  ;;  %v3157_v57 = vmul.f32 %v6887_v20, %v3156_v54  ;;  %v3132_v14 = vsel %vm452_vm13, %v3129_v6, %v3131_v55  ;;  %v3130_v45 = vsel %vm452_vm13, %v3128_v58, %v3129_v6 }
 0x2a5   : > { %v6917_v62 = vpop.permute.xlu1 %2512  ;;  %v6919_v22 = vpop.permute.xlu0 %2510  ;;  %v1355_v3 = vadd.f32 %v1354_v16, %v1353_v25 }
 0x2a6   : > { %v3166_v6 = vrot.slane %v3159_v30, 1  ;;  %v3163_v16 = vrot.slane %v3157_v57, 1 }
 0x2a7   : > { %3093 = vrot.lane.b32.xlu1 %v3090_v28, %s8123_s22  ;;  %3091 = vrot.lane.b32.xlu0 %v3088_v24, %s8123_s22  ;;  %v1921_v28 = vadd.f32 %v6626_v10, %v1912_v53  ;;  %v3158_v24 = vmul.f32 %v6899_v42, %v3156_v54  ;;  %v3177_v53 = vstv %s6928_s25  ;;  %v3144_v54 = vmul.f32 %v6899_v42, %v3142_v48  ;;  %s7325_s25 = sld [smem:[#allocation5 + $0x10c]] }
 0x2a8   : > { %v3180_v61 = vmul.f32 %v6906_v11, %v3177_v53  ;;  %v3178_v63 = vmul.f32 %v6887_v20, %v3177_v53 }
 0x2a9   : > { %v6937_v35 = vpop.permute.xlu1 %2533  ;;  %v6939_v23 = vpop.permute.xlu0 %2531  ;;  %v1930_v56 = vadd.f32 %v6624_v38, %v1921_v28  ;;  %v3164_v55 = vrot.slane %v3158_v24, 1  ;;  %v3143_v38 = vmul.f32 %v6887_v20, %v3142_v48  ;;  %v3179_v28 = vmul.f32 %v6899_v42, %v3177_v53 }
 0x2aa   : > { %v7000_v48 = vstv %s6951_s9  ;;  %v3187_v5 = vrot.slane %v3180_v61, 2  ;;  %v3184_v39 = vrot.slane %v3178_v63, 2  ;;  %v3221_v61 = vmul.f32 %v6899_v42, %v3219_v36  ;;  %s7427_s9 = sld [smem:[#allocation5 + $0x106]] }
 0x2ab   : > { %3114 = vrot.lane.b32.xlu1 %v3111_v1, %s8123_s22  ;;  %3112 = vrot.lane.b32.xlu0 %v3109_v49, %s8123_s22  ;;  %v6972_v1 = vstv %s6931_s26  ;;  %v6977_v49 = vstv %s6935_s29  ;;  %v1939_v24 = vadd.f32 %v6638_v52, %v1930_v56  ;;  %v3167_v52 = vsel %vm2343_vm0, %v3164_v55, %v3166_v6  ;;  %s7350_s26 = sld [smem:[#allocation5 + $0x113]]  ;;  %s7357_s29 = sld [smem:[#allocation5 + $0x11a]] }
 0x2ac   : > { %v6997_v15 = vmul.f32 %v6906_v11, %v6972_v1  ;;  %v7008_v57 = vmul.f32 %v6906_v11, %v6977_v49  ;;  %v3165_v59 = vsel %vm2343_vm0, %v3163_v16, %v3164_v55  ;;  %v7027_v27 = vmul.f32 %v6906_v11, %v7000_v48 }
 0x2ad   : > { %v6959_v43 = vpop.permute.xlu1 %2554  ;;  %v6961_v10 = vpop.permute.xlu0 %2552  ;;  %v1952_v6 = vadd.f32 %v6636_v19, %v1939_v24  ;;  %v7039_v19 = vstv %s6979_s17  ;;  %v3220_v24 = vmul.f32 %v6887_v20, %v3219_v36  ;;  %s7468_s17 = sld [smem:[#allocation5 + $0x11b]] }
 0x2ae   : > { %8154 = vst [vmem:[#allocation19_spill] sm:$0xff] %v6959_v43  ;;  %8155 = vst [vmem:[#allocation41_spill] sm:$0xff] %v6961_v10  ;;  %v2347_v12 = vrot.slane %v6997_v15, 1  ;;  %v7043_v15 = vmul.f32 %v6899_v42, %v6972_v1 }
 0x2af   : > { %3135 = vrot.lane.b32.xlu1 %v3132_v14, %s8123_s22  ;;  %3133 = vrot.lane.b32.xlu0 %v3130_v45, %s8123_s22  ;;  %v3198_v14 = vstv %s6942_s30  ;;  %v4497_v45 = vmul.f32 -1.442695, %v1355_v3  ;;  %v7011_v3 = vstv %s6955_s14  ;;  %s7388_s30 = sld [smem:[#allocation5 + $0xff]]  ;;  %s7437_s14 = sld [smem:[#allocation5 + $0x10d]] }
 0x2b0   : > { %v3200_v53 = vmul.f32 %v6899_v42, %v3198_v14  ;;  %v3199_v32 = vmul.f32 %v6887_v20, %v3198_v14  ;;  %v7031_v55 = vmul.f32 %v6906_v11, %v7011_v3 }
 0x2b1   : > { %v6982_v25 = vpop.permute.xlu1 %2575  ;;  %v6984_v58 = vpop.permute.xlu0 %2573  ;;  %4722 = vpow2.f32 %v4497_v45 }
 0x2b2   : > { %8156 = vst [vmem:[#allocation42_spill] sm:$0xff] %v6982_v25  ;;  %8157 = vst [vmem:[#allocation43_spill] sm:$0xff] %v6984_v58  ;;  %v3205_v46 = vrot.slane %v3199_v32, 3  ;;  %v3227_v32 = vrot.slane %v3221_v61, 4  ;;  %v8165_v58 = vrot.slane %v7043_v15, 1 }
 0x2b3   : > { %3149 = vrot.lane.b32.xlu1 %v3144_v54, %s8124_s11  ;;  %3147 = vrot.lane.b32.xlu0 %v3143_v38, %s8124_s11  ;;  %v3185_v54 = vrot.slane %v3179_v28, 2  ;;  %v3201_v38 = vmul.f32 %v6906_v11, %v3198_v14  ;;  %v3206_v14 = vrot.slane %v3200_v53, 3  ;;  %v7062_v53 = vstv %s7002_s7  ;;  %s7518_s7 = sld [smem:[#allocation5 + $0x107]] }
 0x2b5   : > { %v7015_v56 = vpop.permute.xlu1 %2589  ;;  %v7017_v30 = vpop.permute.xlu0 %2587  ;;  %v3208_v45 = vrot.slane %v3201_v38, 3  ;;  %v3186_v63 = vsel %vm2361_vm1, %v3184_v39, %v3185_v54  ;;  %v3207_v61 = vsel %vm2379_vm2, %v3205_v46, %v3206_v14  ;;  %v3241_v39 = vmul.f32 %v6887_v20, %v3240_v37 }
 0x2b6   : > { %8158 = vst [vmem:[#allocation44_spill] sm:$0xff] %v7015_v56  ;;  %8159 = vst [vmem:[#allocation45_spill] sm:$0xff] %v7017_v30  ;;  %v1965_v30 = vadd.f32 %v6653_v18, %v1952_v6  ;;  %v7070_v18 = vmul.f32 %v6899_v42, %v6977_v49  ;;  %v3226_v6 = vrot.slane %v3220_v24, 4  ;;  %v8164_v24 = vstv %s6949_s8 }
 0x2b7   : > { %3170 = vrot.lane.b32.xlu1 %v3167_v52, %s8124_s11  ;;  %3168 = vrot.lane.b32.xlu0 %v3165_v59, %s8124_s11  ;;  %v3222_v59 = vmul.f32 %v6906_v11, %v3219_v36  ;;  %v3188_v52 = vsel %vm2361_vm1, %v3185_v54, %v3187_v5  ;;  %v7082_v5 = vmul.f32 %v6906_v11, %v7062_v53 }
 0x2b8   : > { %v3209_v56 = vsel %vm2379_vm2, %v3206_v14, %v3208_v45  ;;  %v2348_v45 = vsel %vm2343_vm0, %v8165_v58, %v2347_v12  ;;  %v3228_v12 = vsel %vm2397_vm3, %v3226_v6, %v3227_v32  ;;  %v7140_v6 = vld [vmem:[#allocation4 + $0x20] sm:$0xff] }
 0x2b9   : > { %v7046_v16 = vpop.permute.xlu1 %2610  ;;  %v7048_v28 = vpop.permute.xlu0 %2608  ;;  %v3229_v38 = vrot.slane %v3222_v59, 4 }
 0x2ba   : > { %8160 = vst [vmem:[#allocation46_spill] sm:$0xff] %v7046_v16  ;;  %8161 = vst [vmem:[#allocation47_spill] sm:$0xff] %v7048_v28  ;;  %v7059_v16 = vmul.f32 %v6906_v11, %v7039_v19  ;;  %v3261_v28 = vstv %s7035_s0  ;;  %s7527_s0 = sld [smem:[#allocation5 + $0xf9]] }
 0x2bb   : > { %3191 = vrot.lane.b32.xlu1 %v3188_v52, %s8124_s11  ;;  %3189 = vrot.lane.b32.xlu0 %v3186_v63, %s8124_s11  ;;  %v3242_v52 = vmul.f32 %v6899_v42, %v3240_v37  ;;  %v3243_v63 = vmul.f32 %v6906_v11, %v3240_v37  ;;  %v4723_v33 = vpop.eup %4722  ;;  %v7105_v37 = vmul.f32 %v6899_v42, %v7011_v3 }
 0x2bc   : > { %v3230_v14 = vsel %vm2397_vm3, %v3227_v32, %v3229_v38  ;;  %v3263_v59 = vmul.f32 %v6899_v42, %v3261_v28  ;;  %v3264_v46 = vmul.f32 %v6906_v11, %v3261_v28  ;;  %v3262_v25 = vmul.f32 %v6887_v20, %v3261_v28 }
 0x2bd   : > { %v7072_v36 = vpop.permute.xlu1 %2631  ;;  %v7074_v54 = vpop.permute.xlu0 %2629  ;;  %v3248_v58 = vrot.slane %v3242_v52, 5  ;;  %v1359_v10 = vadd.f32 1.0, %v4723_v33  ;;  %v7123_v38 = vmul.f32 %v6899_v42, %v7039_v19  ;;  %v2337_v32 = vmul.f32 %v6887_v20, %v6972_v1  ;;  %v7142_v1 = vld [vmem:[#allocation4 + $0x28] sm:$0x3f] }
 0x2be   : > { %8162 = vst [vmem:[#allocation48_spill] sm:$0xff] %v7072_v36  ;;  %8163 = vst [vmem:[#allocation49_spill] sm:$0xff] %v7074_v54  ;;  %v1973_v54 = vadd.f32 %v6651_v60, %v1965_v30  ;;  %v2332_v36 = vmul.f32 %v6899_v42, %v8164_v24  ;;  %v7101_v60 = vmul.f32 %v6899_v42, %v7000_v48  ;;  %v3247_v24 = vrot.slane %v3241_v39, 5 }
 0x2bf   : > { %3212 = vrot.lane.b32.xlu1 %v3209_v56, %s8124_s11  ;;  %3210 = vrot.lane.b32.xlu0 %v3207_v61, %s8124_s11  ;;  %v3250_v61 = vrot.slane %v3243_v63, 5  ;;  %v7133_v33 = vmul.f32 %v6899_v42, %v7062_v53  ;;  %v8169_v63 = vrot.slane %v7008_v57, 2  ;;  %v3407_v11 = vstv %s7078_s13  ;;  %s7541_s13 = sld [smem:[#allocation5 + $0x10e]] }
 0x2c0   : > { %v2352_v52 = vadd.f32 %v2348_v45, %v2332_v36  ;;  %v3269_v43 = vrot.slane %v3263_v59, 6  ;;  %v3271_v36 = vrot.slane %v3264_v46, 6  ;;  %v3268_v45 = vrot.slane %v3262_v25, 6 }
 0x2c1   : > { %v7109_v30 = vpop.permute.xlu1 %2652  ;;  %v7111_v56 = vpop.permute.xlu0 %2650  ;;  %4724 = vrcp.f32 %v1359_v10  ;;  %v2344_v31 = vrot.slane %v2337_v32, 1  ;;  %v8171_v10 = vrot.slane %v7027_v27, 3  ;;  %v2391_v27 = vmul.f32 %v6887_v20, %v7011_v3 }
 0x2c2   : > { %8166 = vst [vmem:[#allocation50_spill] sm:$0xff] %v7109_v30  ;;  %8167 = vst [vmem:[#allocation51_spill] sm:$0xff] %v7111_v56  ;;  %v1982_v30 = vadd.f32 %v6668_v41, %v1973_v54  ;;  %v8168_v41 = vstv %s6949_s8  ;;  %v7138_v54 = vld [vmem:[#allocation4 + $0x18] sm:$0xff]  ;;  %v3249_v56 = vsel %vm440_vm12, %v3247_v24, %v3248_v58  ;;  %v2373_v24 = vmul.f32 %v6887_v20, %v7000_v48  ;;  %s7403_s8 = sld [smem:[#allocation5 + $0xf8]] }
 0x2c3   : > { %3233 = vrot.lane.b32.xlu1 %v3230_v14, %s8124_s11  ;;  %3231 = vrot.lane.b32.xlu0 %v3228_v12, %s8124_s11  ;;  %v2331_v39 = vmul.f32 %v6887_v20, %v8168_v41  ;;  %v8170_v14 = vrot.slane %v7070_v18, 2  ;;  %v3251_v41 = vsel %vm440_vm12, %v3248_v58, %v3250_v61  ;;  %v3393_v61 = vstv %s7107_s20  ;;  %s7569_s20 = sld [smem:[#allocation5 + $0x115]] }
 0x2c4   : > { %v1991_v57 = vadd.f32 %v6666_v34, %v1982_v30  ;;  %v3410_v58 = vmul.f32 %v3407_v11, %v7142_v1  ;;  %v3408_v59 = vmul.f32 %v3407_v11, %v7138_v54  ;;  %v8172_v34 = vrot.slane %v7101_v60, 3 }
 0x2c5   : > { %v2366_v12 = vsel %vm2361_vm1, %v8170_v14, %v8169_v63  ;;  %v7149_v28 = vpop.permute.xlu1 %2673  ;;  %v7151_v42 = vpop.permute.xlu0 %2671  ;;  %v2355_v63 = vmul.f32 %v6887_v20, %v6977_v49  ;;  %v3409_v14 = vmul.f32 %v3407_v11, %v7140_v6  ;;  %v8173_v49 = vrot.slane %v7031_v55, 4 }
 0x2c6   : > { %v2370_v25 = vadd.f32 %v2366_v12, %v2352_v52  ;;  %v2384_v46 = vsel %vm2379_vm2, %v8172_v34, %v8171_v10  ;;  %v8174_v30 = vrot.slane %v7105_v37, 4  ;;  %v3272_v52 = vsel %vm452_vm13, %v3269_v43, %v3271_v36 }
 0x2c7   : > { %3254 = vrot.lane.b32.xlu1 %v3251_v41, %s8124_s11  ;;  %3252 = vrot.lane.b32.xlu0 %v3249_v56, %s8124_s11  ;;  %v3270_v12 = vsel %vm452_vm13, %v3268_v45, %v3269_v43  ;;  %v3428_v55 = vstv %s7118_s21  ;;  %v2000_v41 = vadd.f32 %v6677_v40, %v1991_v57  ;;  %v8175_v10 = vrot.slane %v7043_v15, 1  ;;  %s7583_s21 = sld [smem:[#allocation5 + $0x11c]] }
 0x2c8   : > { %v7177_v56 = vsel %vm2397_vm3, %v8174_v30, %v8173_v49  ;;  %v2362_v34 = vrot.slane %v2355_v63, 2  ;;  %v3395_v3 = vmul.f32 %v3393_v61, %v7140_v6  ;;  %v3394_v36 = vmul.f32 %v3393_v61, %v7138_v54 }
 0x2c9   : > { %v7181_v32 = vpop.permute.xlu1 %2694  ;;  %v7183_v11 = vpop.permute.xlu0 %2692  ;;  %v2346_v48 = vsel %vm2343_vm0, %v2344_v31, %v8175_v10  ;;  %v3415_v43 = vrot.slane %v3409_v14, 1  ;;  %v3417_v45 = vrot.slane %v3410_v58, 1  ;;  %v3414_v49 = vrot.slane %v3408_v59, 1 }
 0x2ca   : > { %v3430_v31 = vmul.f32 %v3428_v55, %v7140_v6  ;;  %v3431_v57 = vmul.f32 %v3428_v55, %v7142_v1  ;;  %v3429_v63 = vmul.f32 %v3428_v55, %v7138_v54  ;;  %v3449_v30 = vstv %s7155_s12  ;;  %s7595_s12 = sld [smem:[#allocation5 + $0x123]] }
 0x2cb   : > { %3275 = vrot.lane.b32.xlu1 %v3272_v52, %s8124_s11  ;;  %3273 = vrot.lane.b32.xlu0 %v3270_v12, %s8124_s11  ;;  %v7210_v52 = vadd.f32 %v2384_v46, %v2370_v25  ;;  %v2380_v12 = vrot.slane %v2373_v24, 3  ;;  %v7214_v61 = vmul.f32 %v6887_v20, %v7039_v19  ;;  %v7218_v14 = vmul.f32 %v6887_v20, %v7062_v53  ;;  %v4725_v53 = vpop.eup %4724 }
 0x2cc   : > { %v2009_v58 = vadd.f32 %v6675_v7, %v2000_v41  ;;  %v2351_v59 = vadd.f32 %v2346_v48, %v2331_v39  ;;  %v2398_v10 = vrot.slane %v2391_v27, 4  ;;  %v8177_v25 = vrot.slane %v7070_v18, 2 }
 0x2cd   : > { %v7202_v40 = vpop.permute.xlu1 %2715  ;;  %v7204_v15 = vpop.permute.xlu0 %2713  ;;  %v3418_v19 = vsel %vm2343_vm0, %v3415_v43, %v3417_v45  ;;  %v3451_v24 = vmul.f32 %v3449_v30, %v7140_v6  ;;  %v4850_v55 = vmov 1966171168   ;;  %v3416_v39 = vsel %vm2343_vm0, %v3414_v49, %v3415_v43 }
 0x2ce   : > { %8176 = vst [vmem:[#allocation52_spill] sm:$0xff] %v7204_v15  ;;  %v2364_v46 = vsel %vm2361_vm1, %v2362_v34, %v8177_v25  ;;  %v4251_v20 = vunpack.c.l.s4 %v4850_v55  ;;  %v3436_v27 = vrot.slane %v3430_v31, 2  ;;  %v3438_v41 = vrot.slane %v3431_v57, 2 }
 0x2cf   : > { %3400 = vrot.lane.b32.xlu1 %v3395_v3, %s8125_s10  ;;  %3398 = vrot.lane.b32.xlu0 %v3394_v36, %s8125_s10  ;;  %v3435_v48 = vrot.slane %v3429_v63, 2  ;;  %v3452_v18 = vmul.f32 %v3449_v30, %v7142_v1  ;;  %v3450_v34 = vmul.f32 %v3449_v30, %v7138_v54  ;;  %v3470_v3 = vstv %s7190_s15  ;;  %v8181_v63 = vld [vmem:[#allocation17_spill] sm:$0xff]  ;;  %s7631_s15 = sld [smem:[#allocation5 + $0xfc]] }
 0x2d0   : > { %v4252_v36 = vunpack.c.0.s8 %v4251_v20  ;;  %v2022_v45 = vadd.f32 %v6692_v17, %v2009_v58  ;;  %v8179_v55 = vrot.slane %v7101_v60, 3  ;;  %v8180_v43 = vrot.slane %v7105_v37, 4 }
 0x2d1   : > { %v7228_v15 = vpop.permute.xlu1 %2729  ;;  %v7230_v7 = vpop.permute.xlu0 %2727  ;;  %v3457_v31 = vrot.slane %v3451_v24, 3  ;;  %v3491_v57 = vstv %s7200_s28  ;;  %v1362_v17 = vmul.f32 0.33333334, %v4725_v53  ;;  %v3439_v37 = vsel %vm2361_vm1, %v3436_v27, %v3438_v41  ;;  %s7645_s28 = sld [smem:[#allocation5 + $0xf5]] }
 0x2d2   : > { %8178 = vst [vmem:[#allocation53_spill] sm:$0xff] %v7230_v7  ;;  %v2382_v7 = vsel %vm2379_vm2, %v2380_v12, %v8179_v55  ;;  %v7244_v49 = vsel %vm2397_vm3, %v2398_v10, %v8180_v43  ;;  %v4255_v30 = vsub.s32 %v4252_v36, %v8181_v63  ;;  %v3472_v12 = vmul.f32 %v3470_v3, %v7140_v6 }
 0x2d3   : > { %3421 = vrot.lane.b32.xlu1 %v3418_v19, %s8125_s10  ;;  %3419 = vrot.lane.b32.xlu0 %v3416_v39, %s8125_s10  ;;  %v3473_v10 = vmul.f32 %v3470_v3, %v7142_v1  ;;  %v3471_v19 = vmul.f32 %v3470_v3, %v7138_v54  ;;  %v3437_v20 = vsel %vm2361_vm1, %v3435_v48, %v3436_v27  ;;  %v3459_v39 = vrot.slane %v3452_v18, 3 }
 0x2d4   : > { %v3456_v24 = vrot.slane %v3450_v34, 3  ;;  %v4256_v55 = vrot.slane %v1362_v17, %v4255_v30  ;;  %v2035_v53 = vadd.f32 %v6690_v9, %v2022_v45  ;;  %v2369_v36 = vadd.f32 %v2364_v46, %v2351_v59 }
 0x2d5   : > { %v7252_v58 = vpop.permute.xlu1 %2750  ;;  %v7254_v60 = vpop.permute.xlu0 %2748  ;;  %v2415_v43 = vrot.slane %v7214_v61, 5  ;;  %v3493_v41 = vmul.f32 %v3491_v57, %v7140_v6  ;;  %v3494_v25 = vmul.f32 %v3491_v57, %v7142_v1  ;;  %v7268_v3 = vsub.s32 0, %v8181_v63 }
 0x2d6   : > { %v4264_v27 = vrot.slane %v4256_v55, %v4255_v30  ;;  %v4257_v48 = vcombine.high %v4256_v55, %v4256_v55  ;;  %v3478_v59 = vrot.slane %v3472_v12, 4  ;;  %v3480_v61 = vrot.slane %v3473_v10, 4 }
 0x2d7   : > { %3442 = vrot.lane.b32.xlu1 %v3439_v37, %s8125_s10  ;;  %3440 = vrot.lane.b32.xlu0 %v3437_v20, %s8125_s10  ;;  %v3477_v46 = vrot.slane %v3471_v19, 4  ;;  %v3492_v34 = vmul.f32 %v3491_v57, %v7138_v54  ;;  %v3460_v45 = vsel %vm2379_vm2, %v3457_v31, %v3459_v39  ;;  %v3458_v17 = vsel %vm2379_vm2, %v3456_v24, %v3457_v31 }
 0x2d8   : > { %v7280_v37 = vrot.slane %v4264_v27, %v7268_v3  ;;  %v4271_v20 = vrot.slane %v4257_v48, %v4255_v30  ;;  %v2043_v55 = vadd.f32 %v6702_v13, %v2035_v53  ;;  %v2387_v63 = vadd.f32 %v2382_v7, %v2369_v36 }
 0x2d9   : > { %v7270_v18 = vpop.permute.xlu1 %2771  ;;  %v7272_v9 = vpop.permute.xlu0 %2769  ;;  %v3512_v12 = vstv %s7248_s19  ;;  %v4272_v10 = vcombine.high %v4264_v27, %v4264_v27  ;;  %v3499_v57 = vrot.slane %v3493_v41, 5  ;;  %v3501_v19 = vrot.slane %v3494_v25, 5  ;;  %s7647_s19 = sld [smem:[#allocation5 + $0x103]] }
 0x2da   : > { %8182 = vst [vmem:[#allocation54_spill] sm:$0xff] %v7272_v9  ;;  %v7287_v9 = vrot.slane %v4271_v20, %v7268_v3  ;;  %v4273_v39 = vcombine.high %v4271_v20, %v4271_v20  ;;  %v3481_v30 = vsel %vm2397_vm3, %v3478_v59, %v3480_v61  ;;  %v3479_v13 = vsel %vm2397_vm3, %v3477_v46, %v3478_v59 }
 0x2db   : > { %3463 = vrot.lane.b32.xlu1 %v3460_v45, %s8125_s10  ;;  %3461 = vrot.lane.b32.xlu0 %v3458_v17, %s8125_s10  ;;  %v3498_v7 = vrot.slane %v3492_v34, 5  ;;  %v7298_v53 = vrot.slane %v4272_v10, %v7268_v3  ;;  %v3514_v25 = vmul.f32 %v3512_v12, %v7140_v6  ;;  %v3515_v36 = vmul.f32 %v3512_v12, %v7142_v1 }
 0x2dc   : > { %v3513_v41 = vmul.f32 %v3512_v12, %v7138_v54  ;;  %v7306_v27 = vrot.slane %v4273_v39, %v7268_v3  ;;  %v2052_v48 = vadd.f32 %v6700_v51, %v2043_v55  ;;  %v2435_v59 = vrot.slane %v7082_v5, 6 }
 0x2dd   : > { %v7289_v31 = vpop.permute.xlu1 %2792  ;;  %v7291_v24 = vpop.permute.xlu0 %2790  ;;  %v2406_v61 = vadd.f32 %v7177_v56, %v7210_v52  ;;  %v2405_v46 = vadd.f32 %v7244_v49, %v2387_v63  ;;  %v8183_v34 = vrot.slane %v7059_v16, 5  ;;  %v8184_v45 = vrot.slane %v7123_v38, 5 }
 0x2de   : > { %v2433_v20 = vrot.slane %v7133_v33, 6  ;;  %v2432_v56 = vrot.slane %v7218_v14, 6  ;;  %v3502_v16 = vsel %vm440_vm12, %v3499_v57, %v3501_v19  ;;  %v3547_v63 = vstv %s7275_s23  ;;  %s7657_s23 = sld [smem:[#allocation5 + $0x10a]] }
 0x2df   : > { %3484 = vrot.lane.b32.xlu1 %v3481_v30, %s8125_s10  ;;  %3482 = vrot.lane.b32.xlu0 %v3479_v13, %s8125_s10  ;;  %v2419_v17 = vsel %vm440_vm12, %v8184_v45, %v8183_v34  ;;  %v8185_v51 = vmov %v8184_v45  ;;  %v3500_v55 = vsel %vm440_vm12, %v3498_v7, %v3499_v57  ;;  %v3520_v12 = vrot.slane %v3514_v25, 6 }
 0x2e0   : > { %v2417_v5 = vsel %vm440_vm12, %v2415_v43, %v8185_v51  ;;  %v3522_v33 = vrot.slane %v3515_v36, 6  ;;  %v3519_v10 = vrot.slane %v3513_v41, 6  ;;  %v2061_v38 = vadd.f32 %v6716_v47, %v2052_v48 }
 0x2e1   : > { %v7327_v52 = vpop.permute.xlu1 %2813  ;;  %v7329_v49 = vpop.permute.xlu0 %2811  ;;  %v2423_v43 = vadd.f32 %v2419_v17, %v2406_v61  ;;  %v2422_v14 = vadd.f32 %v2417_v5, %v2405_v46  ;;  %v2436_v39 = vsel %vm452_vm13, %v2433_v20, %v2435_v59  ;;  %v2434_v19 = vsel %vm452_vm13, %v2432_v56, %v2433_v20 }
 0x2e2   : > { %v3549_v30 = vmul.f32 %v3547_v63, %v7140_v6  ;;  %v3550_v57 = vmul.f32 %v3547_v63, %v7142_v1  ;;  %v3533_v47 = vstv %s7295_s24  ;;  %v3548_v25 = vmul.f32 %v3547_v63, %v7138_v54  ;;  %s7685_s24 = sld [smem:[#allocation5 + $0x118]] }
 0x2e3   : > { %3505 = vrot.lane.b32.xlu1 %v3502_v16, %s8125_s10  ;;  %3503 = vrot.lane.b32.xlu0 %v3500_v55, %s8125_s10  ;;  %v3523_v36 = vsel %vm452_vm13, %v3520_v12, %v3522_v33  ;;  %v3521_v41 = vsel %vm452_vm13, %v3519_v10, %v3520_v12  ;;  %v3568_v48 = vstv %s7303_s1  ;;  %v2070_v59 = vadd.f32 %v6714_v21, %v2061_v38  ;;  %s7699_s1 = sld [smem:[#allocation5 + $0x11f]] }
 0x2e4   : > { %v2440_v61 = vadd.f32 %v2436_v39, %v2423_v43  ;;  %v2439_v46 = vadd.f32 %v2434_v19, %v2422_v14  ;;  %v3535_v34 = vmul.f32 %v3533_v47, %v7140_v6  ;;  %v3555_v45 = vrot.slane %v3549_v30, 1 }
 0x2e5   : > { %v7341_v13 = vpop.permute.xlu1 %2834  ;;  %v7343_v7 = vpop.permute.xlu0 %2832  ;;  %v3557_v17 = vrot.slane %v3550_v57, 1  ;;  %v3589_v20 = vstv %s7325_s25  ;;  %v3534_v56 = vmul.f32 %v3533_v47, %v7138_v54  ;;  %v3554_v21 = vrot.slane %v3548_v25, 1  ;;  %s7759_s25 = sld [smem:[#allocation10 + $0x1]] }
 0x2e6   : > { %v3570_v16 = vmul.f32 %v3568_v48, %v7140_v6  ;;  %v3571_v63 = vmul.f32 %v3568_v48, %v7142_v1  ;;  %v2454_v55 = vadd.f32 %v6869_v50, %v2440_v61  ;;  %v2453_v12 = vadd.f32 %v6871_v4, %v2439_v46 }
 0x2e7   : > { %3526 = vrot.lane.b32.xlu1 %v3523_v36, %s8125_s10  ;;  %3524 = vrot.lane.b32.xlu0 %v3521_v41, %s8125_s10  ;;  %v3569_v33 = vmul.f32 %v3568_v48, %v7138_v54  ;;  %v2079_v10 = vadd.f32 %v6726_v26, %v2070_v59  ;;  %v3591_v38 = vmul.f32 %v3589_v20, %v7140_v6  ;;  %s7377_s10 = sld [smem:[#allocation5 + $0x121]]  ;;  %v3610_v36 = vstv %s7350_s26 }
 0x2e8   : > { %v3592_v43 = vmul.f32 %v3589_v20, %v7142_v1  ;;  %v2475_v14 = vadd.f32 %v6882_v29, %v2454_v55  ;;  %v2474_v39 = vadd.f32 %v6884_v44, %v2453_v12  ;;  %v3558_v50 = vsel %vm2343_vm0, %v3555_v45, %v3557_v17  ;;  %s7775_s26 = sld [smem:[#allocation5 + $0x101]] }
 0x2e9   : > { %v7359_v51 = vpop.permute.xlu1 %2855  ;;  %v7361_v5 = vpop.permute.xlu0 %2853  ;;  %v3556_v19 = vsel %vm2343_vm0, %v3554_v21, %v3555_v45  ;;  %v3576_v30 = vrot.slane %v3570_v16, 2  ;;  %v3578_v57 = vrot.slane %v3571_v63, 2  ;;  %v3590_v47 = vmul.f32 %v3589_v20, %v7138_v54  ;;  %v8186_v16 = vld [vmem:[#allocation21_spill] sm:$0xff] }
 0x2ea   : > { %v2496_v25 = vadd.f32 %v6894_v0, %v2475_v14  ;;  %v2495_v29 = vadd.f32 %v6896_v8, %v2474_v39  ;;  %v3575_v44 = vrot.slane %v3569_v33, 2  ;;  %v2092_v41 = vadd.f32 %v6724_v2, %v2079_v10  ;;  %v8187_v33 = vld [vmem:[#allocation19_spill] sm:$0xff] }
 0x2eb   : > { %3540 = vrot.lane.b32.xlu1 %v3535_v34, %s4844_s27  ;;  %3538 = vrot.lane.b32.xlu0 %v3534_v56, %s4844_s27  ;;  %v3597_v48 = vrot.slane %v3591_v38, 3  ;;  %v3599_v59 = vrot.slane %v3592_v43, 3  ;;  %v3631_v34 = vstv %s7357_s29  ;;  %v3579_v45 = vsel %vm2361_vm1, %v3576_v30, %v3578_v57  ;;  %s7804_s29 = sld [smem:[#allocation5 + $0x108]] }
 0x2ec   : > { %v2517_v61 = vadd.f32 %v6917_v62, %v2496_v25  ;;  %v2516_v46 = vadd.f32 %v6919_v22, %v2495_v29  ;;  %v3596_v17 = vrot.slane %v3590_v47, 3  ;;  %v3612_v2 = vmul.f32 %v3610_v36, %v7140_v6  ;;  %v8189_v47 = vld [vmem:[#allocation42_spill] sm:$0xff]  ;;  %v8190_v29 = vld [vmem:[#allocation43_spill] sm:$0xff] }
 0x2ed   : > { %v7379_v4 = vpop.permute.xlu1 %2869  ;;  %v7381_v26 = vpop.permute.xlu0 %2867  ;;  %v3613_v20 = vmul.f32 %v3610_v36, %v7142_v1  ;;  %v3577_v22 = vsel %vm2361_vm1, %v3575_v44, %v3576_v30  ;;  %v3611_v21 = vmul.f32 %v3610_v36, %v7138_v54  ;;  %v2105_v63 = vadd.f32 %v8186_v16, %v2092_v41 }
 0x2ee   : > { %v2538_v56 = vadd.f32 %v6937_v35, %v2517_v61  ;;  %v2537_v62 = vadd.f32 %v6939_v23, %v2516_v46  ;;  %v3600_v55 = vsel %vm2379_vm2, %v3597_v48, %v3599_v59  ;;  %v3633_v12 = vmul.f32 %v3631_v34, %v7140_v6  ;;  %v8188_v35 = vld [vmem:[#allocation41_spill] sm:$0xff]  ;;  %v8191_v59 = vld [vmem:[#allocation20_spill] sm:$0xff] }
 0x2ef   : > { %3561 = vrot.lane.b32.xlu1 %v3558_v50, %s4844_s27  ;;  %3559 = vrot.lane.b32.xlu0 %v3556_v19, %s4844_s27  ;;  %v3634_v23 = vmul.f32 %v3631_v34, %v7142_v1  ;;  %v3652_v43 = vstv %s7377_s10  ;;  %v3598_v50 = vsel %vm2379_vm2, %v3596_v17, %v3597_v48  ;;  %v3618_v19 = vrot.slane %v3612_v2, 4  ;;  %v8193_v2 = vld [vmem:[#allocation45_spill] sm:$0xff]  ;;  %s7815_s10 = sld [smem:[#allocation5 + $0xfa]] }
 0x2f0   : > { %v2559_v10 = vadd.f32 %v8187_v33, %v2538_v56  ;;  %v2558_v38 = vadd.f32 %v8188_v35, %v2537_v62  ;;  %v3620_v30 = vrot.slane %v3613_v20, 4  ;;  %v3632_v57 = vmul.f32 %v3631_v34, %v7138_v54  ;;  %v8194_v33 = vld [vmem:[#allocation46_spill] sm:$0xff]  ;;  %v8195_v35 = vld [vmem:[#allocation47_spill] sm:$0xff] }
 0x2f1   : > { %v7396_v0 = vpop.permute.xlu1 %2890  ;;  %v7398_v8 = vpop.permute.xlu0 %2888  ;;  %v3617_v36 = vrot.slane %v3611_v21, 4  ;;  %v3687_v41 = vstv %s7388_s30  ;;  %v2113_v61 = vadd.f32 %v8191_v59, %v2105_v63  ;;  %v3639_v48 = vrot.slane %v3633_v12, 5  ;;  %s7833_s30 = sld [smem:[#allocation5 + $0x10f]] }
 0x2f2   : > { %v2580_v25 = vadd.f32 %v8189_v47, %v2559_v10  ;;  %v2579_v44 = vadd.f32 %v8190_v29, %v2558_v38  ;;  %v3654_v46 = vmul.f32 %v3652_v43, %v7140_v6  ;;  %v3655_v34 = vmul.f32 %v3652_v43, %v7142_v1 }
 0x2f3   : > { %3582 = vrot.lane.b32.xlu1 %v3579_v45, %s4844_s27  ;;  %3580 = vrot.lane.b32.xlu0 %v3577_v22, %s4844_s27  ;;  %v8192_v45 = vld [vmem:[#allocation44_spill] sm:$0xff]  ;;  %v3641_v56 = vrot.slane %v3634_v23, 5  ;;  %v3653_v62 = vmul.f32 %v3652_v43, %v7138_v54  ;;  %v3621_v16 = vsel %vm2397_vm3, %v3618_v19, %v3620_v30  ;;  %v3638_v63 = vrot.slane %v3632_v57, 5 }
 0x2f4   : > { %v2594_v17 = vadd.f32 %v8192_v45, %v2580_v25  ;;  %v2593_v20 = vadd.f32 %v8193_v2, %v2579_v44  ;;  %v3689_v12 = vmul.f32 %v3687_v41, %v7140_v6  ;;  %v3619_v23 = vsel %vm2397_vm3, %v3617_v36, %v3618_v19  ;;  %v8197_v25 = vld [vmem:[#allocation48_spill] sm:$0xff]  ;;  %v8198_v44 = vld [vmem:[#allocation49_spill] sm:$0xff] }
 0x2f5   : > { %v7418_v14 = vpop.permute.xlu1 %2911  ;;  %v7420_v39 = vpop.permute.xlu0 %2909  ;;  %v3690_v43 = vmul.f32 %v3687_v41, %v7142_v1  ;;  %v3660_v30 = vrot.slane %v3654_v46, 6  ;;  %v3662_v57 = vrot.slane %v3655_v34, 6  ;;  %v3642_v45 = vsel %vm440_vm12, %v3639_v48, %v3641_v56  ;;  %v8199_v34 = vld [vmem:[#allocation50_spill] sm:$0xff] }
 0x2f6   : > { %v2615_v10 = vadd.f32 %v8194_v33, %v2594_v17  ;;  %v2614_v38 = vadd.f32 %v8195_v35, %v2593_v20  ;;  %v3659_v17 = vrot.slane %v3653_v62, 6  ;;  %v3640_v36 = vsel %vm440_vm12, %v3638_v63, %v3639_v48  ;;  %v8200_v33 = vld [vmem:[#allocation51_spill] sm:$0xff]  ;;  %v8201_v56 = vld [vmem:[#allocation22_spill] sm:$0xff] }
 0x2f7   : > { %3603 = vrot.lane.b32.xlu1 %v3600_v55, %s4844_s27  ;;  %3601 = vrot.lane.b32.xlu0 %v3598_v50, %s4844_s27  ;;  %v3673_v55 = vstv %s7403_s8  ;;  %v8196_v50 = vld [vmem:[#allocation23_spill] sm:$0xff]  ;;  %v3695_v20 = vrot.slane %v3689_v12, 1  ;;  %v3688_v46 = vmul.f32 %v3687_v41, %v7138_v54  ;;  %v3697_v35 = vrot.slane %v3690_v43, 1  ;;  %s7871_s8 = sld [smem:[#allocation5 + $0x116]] }
 0x2f8   : > { %v2122_v47 = vadd.f32 %v8196_v50, %v2113_v61  ;;  %v2636_v29 = vadd.f32 %v8197_v25, %v2615_v10  ;;  %v2635_v59 = vadd.f32 %v8198_v44, %v2614_v38  ;;  %v3675_v61 = vmul.f32 %v3673_v55, %v7140_v6 }
 0x2f9   : > { %v7439_v22 = vpop.permute.xlu1 %2932  ;;  %v7441_v21 = vpop.permute.xlu0 %2930  ;;  %v3708_v38 = vstv %s7427_s9  ;;  %v3663_v48 = vsel %vm452_vm13, %v3660_v30, %v3662_v57  ;;  %v3674_v63 = vmul.f32 %v3673_v55, %v7138_v54  ;;  %v3729_v43 = vstv %s7437_s14  ;;  %s7906_s9 = sld [smem:[#allocation5 + $0x124]]  ;;  %s7946_s14 = sld [smem:[#allocation5 + $0x102]] }
 0x2fa   : > { %v2656_v10 = vadd.f32 %v8200_v33, %v2635_v59  ;;  %v2131_v62 = vadd.f32 %v8201_v56, %v2122_v47  ;;  %v3694_v47 = vrot.slane %v3688_v46, 1  ;;  %v3711_v44 = vmul.f32 %v3708_v38, %v7142_v1 }
 0x2fb   : > { %3624 = vrot.lane.b32.xlu1 %v3621_v16, %s4844_s27  ;;  %3622 = vrot.lane.b32.xlu0 %v3619_v23, %s4844_s27  ;;  %v2657_v16 = vadd.f32 %v8199_v34, %v2636_v29  ;;  %v3661_v23 = vsel %vm452_vm13, %v3659_v17, %v3660_v30  ;;  %v3710_v29 = vmul.f32 %v3708_v38, %v7140_v6  ;;  %v3750_v59 = vstv %s7446_s18  ;;  %v8202_v30 = vld [vmem:[#allocation25_spill] sm:$0xff]  ;;  %s7963_s18 = sld [smem:[#allocation5 + $0xfb]] }
 0x2fc   : > { %v2677_v12 = vadd.f32 %v7151_v42, %v2656_v10  ;;  %v3709_v42 = vmul.f32 %v3708_v38, %v7138_v54  ;;  %v3731_v17 = vmul.f32 %v3729_v43, %v7140_v6  ;;  %v3718_v56 = vrot.slane %v3711_v44, 2 }
 0x2fd   : > { %v7458_v2 = vpop.permute.xlu1 %2953  ;;  %v7460_v19 = vpop.permute.xlu0 %2951  ;;  %v2678_v41 = vadd.f32 %v7149_v28, %v2657_v16  ;;  %v3698_v28 = vsel %vm2343_vm0, %v3695_v20, %v3697_v35  ;;  %v3752_v16 = vmul.f32 %v3750_v59, %v7140_v6  ;;  %v3696_v35 = vsel %vm2343_vm0, %v3694_v47, %v3695_v20 }
 0x2fe   : > { %v2698_v55 = vadd.f32 %v7183_v11, %v2677_v12  ;;  %v3730_v11 = vmul.f32 %v3729_v43, %v7138_v54  ;;  %v3716_v38 = vrot.slane %v3710_v29, 2  ;;  %v3751_v12 = vmul.f32 %v3750_v59, %v7138_v54 }
 0x2ff   : > { %3645 = vrot.lane.b32.xlu1 %v3642_v45, %s4844_s27  ;;  %3643 = vrot.lane.b32.xlu0 %v3640_v36, %s4844_s27  ;;  %v2699_v57 = vadd.f32 %v7181_v32, %v2678_v41  ;;  %v2140_v45 = vadd.f32 %v8202_v30, %v2131_v62  ;;  %v3732_v36 = vmul.f32 %v3729_v43, %v7142_v1  ;;  %v8203_v32 = vld [vmem:[#allocation52_spill] sm:$0xff]  ;;  %v3715_v20 = vrot.slane %v3709_v42, 2 }
 0x300   : > { %v2719_v34 = vadd.f32 %v8203_v32, %v2698_v55  ;;  %v3753_v62 = vmul.f32 %v3750_v59, %v7142_v1  ;;  %v8205_v43 = vld [vmem:[#allocation24_spill] sm:$0xff]  ;;  %v3737_v47 = vrot.slane %v3731_v17, 3  ;;  %v3736_v55 = vrot.slane %v3730_v11, 3 }
 0x301   : > { %v7479_v50 = vpop.permute.xlu1 %2974  ;;  %v7481_v25 = vpop.permute.xlu0 %2972  ;;  %v2720_v46 = vadd.f32 %v7202_v40, %v2699_v57  ;;  %v2149_v57 = vadd.f32 %v8205_v43, %v2140_v45  ;;  %v3739_v29 = vrot.slane %v3732_v36, 3  ;;  %v3758_v30 = vrot.slane %v3752_v16, 4 }
 0x302   : > { %v3760_v45 = vrot.slane %v3753_v62, 4  ;;  %v3719_v36 = vsel %vm2361_vm1, %v3716_v38, %v3718_v56  ;;  %v3757_v32 = vrot.slane %v3751_v12, 4  ;;  %v3717_v16 = vsel %vm2361_vm1, %v3715_v20, %v3716_v38  ;;  %v8208_v20 = vld [vmem:[#allocation26_spill] sm:$0xff] }
 0x303   : > { %3666 = vrot.lane.b32.xlu1 %v3663_v48, %s4844_s27  ;;  %3664 = vrot.lane.b32.xlu0 %v3661_v23, %s4844_s27  ;;  %v2734_v40 = vadd.f32 %v7228_v15, %v2720_v46  ;;  %v8204_v48 = vld [vmem:[#allocation53_spill] sm:$0xff]  ;;  %v3771_v23 = vstv %s7468_s17  ;;  %s7511_s27 = sld [smem:[#allocation5 + $0x100]]  ;;  %v3740_v62 = vsel %vm2379_vm2, %v3737_v47, %v3739_v29  ;;  %s7972_s17 = sld [smem:[#allocation5 + $0x109]] }
 0x304   : > { %v2733_v41 = vadd.f32 %v8204_v48, %v2719_v34  ;;  %v3772_v42 = vmul.f32 %v3771_v23, %v7138_v54  ;;  %v8207_v34 = vld [vmem:[#allocation27_spill] sm:$0xff]  ;;  %v3738_v48 = vsel %vm2379_vm2, %v3736_v55, %v3737_v47  ;;  %v3848_v55 = vstv %s7518_s7  ;;  %s8000_s7 = sld [smem:[#allocation5 + $0x11e]] }
 0x305   : > { %v7501_v33 = vpop.permute.xlu1 %2995  ;;  %v7503_v10 = vpop.permute.xlu0 %2993  ;;  %v2755_v44 = vadd.f32 %v7252_v58, %v2734_v40  ;;  %v2162_v11 = vadd.f32 %v8207_v34, %v2149_v57 }
 0x306   : > { %v2754_v15 = vadd.f32 %v7254_v60, %v2733_v41  ;;  %v8206_v60 = vld [vmem:[#allocation54_spill] sm:$0xff]  ;;  %v3792_v41 = vstv %s7499_s6  ;;  %s7977_s6 = sld [smem:[#allocation5 + $0x110]] }
 0x307   : > { %3680 = vrot.lane.b32.xlu1 %v3675_v61, %s4847_s5  ;;  %3678 = vrot.lane.b32.xlu0 %v3674_v63, %s4847_s5  ;;  %v3773_v61 = vmul.f32 %v3771_v23, %v7140_v6  ;;  %v3774_v63 = vmul.f32 %v3771_v23, %v7142_v1  ;;  %v2776_v58 = vadd.f32 %v7270_v18, %v2755_v44  ;;  %v3778_v23 = vrot.slane %v3772_v42, 5 }
 0x308   : > { %v2775_v17 = vadd.f32 %v8206_v60, %v2754_v15  ;;  %v2175_v47 = vadd.f32 %v8208_v20, %v2162_v11  ;;  %v3794_v29 = vmul.f32 %v3792_v41, %v7140_v6  ;;  %v3795_v44 = vmul.f32 %v3792_v41, %v7142_v1 }
 0x309   : > { %v7520_v59 = vpop.permute.xlu1 %3009  ;;  %v7522_v46 = vpop.permute.xlu0 %3007  ;;  %v2797_v40 = vadd.f32 %v7289_v31, %v2776_v58  ;;  %v3781_v38 = vrot.slane %v3774_v63, 5  ;;  %v3827_v57 = vstv %s7511_s27  ;;  %v3813_v42 = vstv %s7527_s0  ;;  %s7988_s27 = sld [smem:[#allocation5 + $0x117]]  ;;  %s8224_s0 = sshll.u32 %s4835_s2, 6 }
 0x30a   : > { %v2796_v18 = vadd.f32 %v7291_v24, %v2775_v17  ;;  %v3759_v24 = vsel %vm2397_vm3, %v3757_v32, %v3758_v30  ;;  %v3829_v58 = vmul.f32 %v3827_v57, %v7140_v6  ;;  %v3830_v60 = vmul.f32 %v3827_v57, %v7142_v1  ;;  %s104_s2 = sadd.s32 1, %s4835_s2  }
 0x30b   : > { %3701 = vrot.lane.b32.xlu1 %v3698_v28, %s4847_s5  ;;  %3699 = vrot.lane.b32.xlu0 %v3696_v35, %s4847_s5  ;;  %v3761_v28 = vsel %vm2397_vm3, %v3758_v30, %v3760_v45  ;;  %v3779_v35 = vrot.slane %v3773_v61, 5  ;;  %v2818_v43 = vadd.f32 %v7327_v52, %v2797_v40  ;;  %v3828_v17 = vmul.f32 %v3827_v57, %v7138_v54  ;;  %v8210_v57 = vld [vmem:[#allocation28_spill] sm:$0xff]  ;;  %p101_p4 = scmp.ge.s32.totalorder %s104_s2, 2  }
 0x30c   : > { %v2817_v31 = vadd.f32 %v7329_v49, %v2796_v18  ;;  %v3793_v49 = vmul.f32 %v3792_v41, %v7138_v54  ;;  %v3800_v34 = vrot.slane %v3794_v29, 6  ;;  %v3850_v11 = vmul.f32 %v3848_v55, %v7140_v6 }
 0x30d   : > { %v7543_v56 = vpop.permute.xlu1 %3030  ;;  %v7545_v12 = vpop.permute.xlu0 %3028  ;;  %v2839_v15 = vadd.f32 %v7341_v13, %v2818_v43  ;;  %v3782_v61 = vsel %vm440_vm12, %v3779_v35, %v3781_v38  ;;  %v3780_v63 = vsel %vm440_vm12, %v3778_v23, %v3779_v35  ;;  %v3869_v18 = vstv %s7541_s13  ;;  %s4362_s13 = scalar_lea.vmem [#allocation12], %s8224_s0 }
 0x30e   : > { %v2838_v52 = vadd.f32 %v7343_v7, %v2817_v31  ;;  %v3835_v38 = vrot.slane %v3829_v58, 1  ;;  %v3849_v23 = vmul.f32 %v3848_v55, %v7138_v54  ;;  %v3834_v31 = vrot.slane %v3828_v17, 1 }
 0x30f   : > { %3722 = vrot.lane.b32.xlu1 %v3719_v36, %s4847_s5  ;;  %3720 = vrot.lane.b32.xlu0 %v3717_v16, %s4847_s5  ;;  %v2860_v13 = vadd.f32 %v7359_v51, %v2839_v15  ;;  %v8209_v36 = vld [vmem:[#allocation29_spill] sm:$0xff]  ;;  %v3851_v16 = vmul.f32 %v3848_v55, %v7142_v1 }
 0x310   : > { %v2859_v7 = vadd.f32 %v7361_v5, %v2838_v52  ;;  %v2183_v32 = vadd.f32 %v8209_v36, %v2175_v47  ;;  %v3802_v5 = vrot.slane %v3795_v44, 6  ;;  %v3856_v47 = vrot.slane %v3850_v11, 2 }
 0x311   : > { %v7561_v45 = vpop.permute.xlu1 %3051  ;;  %v7563_v30 = vpop.permute.xlu0 %3049  ;;  %v2874_v40 = vadd.f32 %v7379_v4, %v2860_v13  ;;  %v3858_v29 = vrot.slane %v3851_v16, 2  ;;  %v3871_v44 = vmul.f32 %v3869_v18, %v7140_v6  ;;  %v3814_v52 = vmul.f32 %v3813_v42, %v7138_v54 }
 0x312   : > { %v2873_v51 = vadd.f32 %v7381_v26, %v2859_v7  ;;  %v3837_v26 = vrot.slane %v3830_v60, 1  ;;  %v2192_v20 = vadd.f32 %v8210_v57, %v2183_v32  ;;  %v3855_v58 = vrot.slane %v3849_v23, 2  ;;  %v8211_v60 = vld [vmem:[#allocation31_spill] sm:$0xff]  ;;  %v8212_v23 = vld [vmem:[#allocation30_spill] sm:$0xff] }
 0x313   : > { %3743 = vrot.lane.b32.xlu1 %v3740_v62, %s4847_s5  ;;  %3741 = vrot.lane.b32.xlu0 %v3738_v48, %s4847_s5  ;;  %v3799_v62 = vrot.slane %v3793_v49, 6  ;;  %v7590_v48 = vmul.f32 %v3813_v42, %v7140_v6  ;;  %v2895_v43 = vadd.f32 %v7396_v0, %v2874_v40  ;;  %v3890_v13 = vstv %s7569_s20 }
 0x314   : > { %v2894_v4 = vadd.f32 %v7398_v8, %v2873_v51  ;;  %v3803_v8 = vsel %vm452_vm13, %v3800_v34, %v3802_v5  ;;  %v3870_v42 = vmul.f32 %v3869_v18, %v7138_v54  ;;  %v2201_v17 = vadd.f32 %v8211_v60, %v2192_v20 }
 0x315   : > { %v7585_v41 = vpop.permute.xlu1 %3072  ;;  %v7587_v35 = vpop.permute.xlu0 %3070  ;;  %v2916_v15 = vadd.f32 %v7418_v14, %v2895_v43  ;;  %v7622_v36 = vsel %vm2343_vm0, %v3834_v31, %v3835_v38  ;;  %v7625_v32 = vsel %vm2361_vm1, %v3856_v47, %v3858_v29  ;;  %v3892_v11 = vmul.f32 %v3890_v13, %v7140_v6 }
 0x316   : > { %v2915_v0 = vadd.f32 %v7420_v39, %v2894_v4  ;;  %v7615_v39 = vsel %vm2343_vm0, %v3835_v38, %v3837_v26  ;;  %v3911_v16 = vstv %s7583_s21  ;;  %v7638_v40 = vsel %vm2361_vm1, %v3855_v58, %v3856_v47  ;;  %v8213_v58 = vld [vmem:[#allocation33_spill] sm:$0xff] }
 0x317   : > { %3764 = vrot.lane.b32.xlu1 %v3761_v28, %s4847_s5  ;;  %3762 = vrot.lane.b32.xlu0 %v3759_v24, %s4847_s5  ;;  %v3801_v28 = vsel %vm452_vm13, %v3799_v62, %v3800_v34  ;;  %v3872_v24 = vmul.f32 %v3869_v18, %v7142_v1  ;;  %v2937_v7 = vadd.f32 %v7439_v22, %v2916_v15  ;;  %v3877_v22 = vrot.slane %v3871_v44, 3 }
 0x318   : > { %v2936_v14 = vadd.f32 %v7441_v21, %v2915_v0  ;;  %v3893_v5 = vmul.f32 %v3890_v13, %v7142_v1  ;;  %v3891_v18 = vmul.f32 %v3890_v13, %v7138_v54  ;;  %v3876_v62 = vrot.slane %v3870_v42, 3 }
 0x319   : > { %v7605_v49 = vpop.permute.xlu1 %3093  ;;  %v7607_v55 = vpop.permute.xlu0 %3091  ;;  %v2958_v21 = vadd.f32 %v7458_v2, %v2937_v7  ;;  %v3879_v51 = vrot.slane %v3872_v24, 3  ;;  %v3932_v38 = vstv %s7595_s12  ;;  %v2210_v43 = vadd.f32 %v8212_v23, %v2201_v17  ;;  %v7731_v23 = vld [vmem:[#allocation4 + $0x28] sm:$0x3f] }
 0x31a   : > { %v2957_v34 = vadd.f32 %v7460_v19, %v2936_v14  ;;  %v3913_v4 = vmul.f32 %v3911_v16, %v7140_v6  ;;  %v3914_v26 = vmul.f32 %v3911_v16, %v7142_v1  ;;  %v3898_v31 = vrot.slane %v3892_v11, 4  ;;  %v8214_v11 = vld [vmem:[#allocation32_spill] sm:$0xff] }
 0x31b   : > { %3785 = vrot.lane.b32.xlu1 %v3782_v61, %s4847_s5  ;;  %3783 = vrot.lane.b32.xlu0 %v3780_v63, %s4847_s5  ;;  %v2979_v2 = vadd.f32 %v7479_v50, %v2958_v21  ;;  %v3912_v57 = vmul.f32 %v3911_v16, %v7138_v54  ;;  %v3900_v29 = vrot.slane %v3893_v5, 4  ;;  %v3897_v44 = vrot.slane %v3891_v18, 4 }
 0x31c   : > { %v2978_v19 = vadd.f32 %v7481_v25, %v2957_v34  ;;  %v3934_v15 = vmul.f32 %v3932_v38, %v7140_v6  ;;  %v3935_v0 = vmul.f32 %v3932_v38, %v7142_v1  ;;  %v2219_v24 = vadd.f32 %v8213_v58, %v2210_v43 }
 0x31d   : > { %v7633_v61 = vpop.permute.xlu1 %3114  ;;  %v7635_v63 = vpop.permute.xlu0 %3112  ;;  %v3000_v50 = vadd.f32 %v7501_v33, %v2979_v2  ;;  %v3919_v1 = vrot.slane %v3913_v4, 5  ;;  %v3918_v14 = vrot.slane %v3912_v57, 5  ;;  %v7683_v42 = vstv %s7631_s15 }
 0x31e   : > { %v2999_v25 = vadd.f32 %v7503_v10, %v2978_v19  ;;  %v3285_v21 = vstv %s7645_s28  ;;  %v7697_v34 = vstv %s7647_s19  ;;  %v2232_v16 = vadd.f32 %v8214_v11, %v2219_v24 }
 0x31f   : > { %3806 = vrot.lane.b32.xlu1 %v3803_v8, %s4847_s5  ;;  %3804 = vrot.lane.b32.xlu0 %v3801_v28, %s4847_s5  ;;  %v3014_v33 = vadd.f32 %v7520_v59, %v3000_v50  ;;  %v7668_v8 = vsel %vm2379_vm2, %v3877_v22, %v3879_v51  ;;  %v7671_v28 = vsel %vm2379_vm2, %v3876_v62, %v3877_v22  ;;  %s7673_s5 = sld [smem:[#allocation5 + $0x111]]  ;;  %v3921_v59 = vrot.slane %v3914_v26, 5 }
 0x320   : > { %v3013_v10 = vadd.f32 %v7522_v46, %v2999_v25  ;;  %v3933_v46 = vmul.f32 %v3932_v38, %v7138_v54  ;;  %v3940_v22 = vrot.slane %v3934_v15, 6  ;;  %v3942_v54 = vrot.slane %v3935_v0, 6  ;;  %v7724_v38 = vld [vmem:[#allocation4 + $0x20] sm:$0xff] }
 0x321   : > { %v7659_v20 = vpop.permute.xlu1 %3135  ;;  %v7661_v47 = vpop.permute.xlu0 %3133  ;;  %v3035_v13 = vadd.f32 %v7543_v56, %v3014_v33  ;;  %v7707_v51 = vsel %vm440_vm12, %v3919_v1, %v3921_v59  ;;  %v7716_v2 = vsel %vm440_vm12, %v3918_v14, %v3919_v1  ;;  %v3311_v26 = vmul.f32 %v7731_v23, %v7697_v34  ;;  %v8215_v25 = vld [vmem:[#allocation35_spill] sm:$0xff] }
 0x322   : > { %v3034_v7 = vadd.f32 %v7545_v12, %v3013_v10  ;;  %v7722_v62 = vsel %vm452_vm13, %v3940_v22, %v3942_v54  ;;  %v7780_v59 = vstv %s7699_s1 }
 0x323   : > { %3820 = vrot.lane.b32.xlu1 %v7590_v48, %s4846_s4  ;;  %3818 = vrot.lane.b32.xlu0 %v3814_v52, %s4846_s4  ;;  %v7688_v48 = vsel %vm2397_vm3, %v3898_v31, %v3900_v29  ;;  %v7691_v52 = vsel %vm2397_vm3, %v3897_v44, %v3898_v31  ;;  %v3056_v56 = vadd.f32 %v7561_v45, %v3035_v13  ;;  %v3939_v45 = vrot.slane %v3933_v46, 6  ;;  %v8216_v46 = vld [vmem:[#allocation34_spill] sm:$0xff] }
 0x324   : > { %v3055_v12 = vadd.f32 %v7563_v30, %v3034_v7  ;;  %v7711_v30 = vmul.f32 %v7683_v42, %v7140_v6  ;;  %v7729_v6 = vmul.f32 %v7724_v38, %v3285_v21  ;;  %v2245_v31 = vadd.f32 %v8215_v25, %v2232_v16 }
 0x325   : > { %v3150_v60 = vpop.permute.xlu1 %3149  ;;  %v3148_v17 = vpop.permute.xlu0 %3147  ;;  %v3077_v5 = vadd.f32 %v7585_v41, %v3056_v56  ;;  %v3294_v41 = vmul.f32 %v7731_v23, %v7683_v42  ;;  %v7744_v50 = vstv %s7673_s5  ;;  %v7752_v57 = vsel %vm452_vm13, %v3939_v45, %v3940_v22 }
 0x326   : > { %v3076_v18 = vadd.f32 %v7587_v35, %v3055_v12  ;;  %v7737_v35 = vmul.f32 %v7724_v38, %v7697_v34  ;;  %v7771_v58 = vmul.f32 %v7724_v38, %v7744_v50  ;;  %v3345_v24 = vmul.f32 %v7731_v23, %v7744_v50 }
 0x327   : > { %3841 = vrot.lane.b32.xlu1 %v7615_v39, %s4846_s4  ;;  %3839 = vrot.lane.b32.xlu0 %v7622_v36, %s4846_s4  ;;  %v7719_v39 = vstv %s7657_s23  ;;  %v3098_v43 = vadd.f32 %v7605_v49, %v3077_v5  ;;  %v3299_v49 = vrot.slane %v7711_v30, 1  ;;  %v3301_v33 = vrot.slane %v3294_v41, 1 }
 0x328   : > { %v3097_v4 = vadd.f32 %v7607_v55, %v3076_v18  ;;  %v7757_v55 = vmul.f32 %v7724_v38, %v7719_v39  ;;  %v3316_v10 = vrot.slane %v7737_v35, 2  ;;  %v3318_v1 = vrot.slane %v3311_v26, 2  ;;  %v8217_v18 = vld [vmem:[#allocation37_spill] sm:$0xff] }
 0x329   : > { %v3171_v19 = vpop.permute.xlu1 %3170  ;;  %v3169_v36 = vpop.permute.xlu0 %3168  ;;  %v3119_v29 = vadd.f32 %v7633_v61, %v3098_v43  ;;  %v2253_v13 = vadd.f32 %v8216_v46, %v2245_v31  ;;  %v3352_v11 = vrot.slane %v3345_v24, 4  ;;  %v7802_v16 = vmul.f32 %v7724_v38, %v7780_v59  ;;  %v7823_v43 = vld [vmem:[#allocation4 + $0x18] sm:$0xff] }
 0x32a   : > { %v3118_v44 = vadd.f32 %v7635_v63, %v3097_v4  ;;  %v3333_v22 = vrot.slane %v7757_v55, 3  ;;  %v7809_v45 = vsel %vm2361_vm1, %v3316_v10, %v3318_v1  ;;  %v7813_v5 = vmul.f32 %v7731_v23, %v7780_v59 }
 0x32b   : > { %3862 = vrot.lane.b32.xlu1 %v7625_v32, %s4846_s4  ;;  %3860 = vrot.lane.b32.xlu0 %v7638_v40, %s4846_s4  ;;  %v3328_v32 = vmul.f32 %v7731_v23, %v7719_v39  ;;  %v7766_v40 = vstv %s7685_s24  ;;  %v3140_v61 = vadd.f32 %v7659_v20, %v3119_v29  ;;  %v2262_v41 = vadd.f32 %v8217_v18, %v2253_v13 }
 0x32c   : > { %v3139_v63 = vadd.f32 %v7661_v47, %v3118_v44  ;;  %v7789_v7 = vmul.f32 %v7724_v38, %v7766_v40  ;;  %v3362_v20 = vmul.f32 %v7731_v23, %v7766_v40  ;;  %v3292_v4 = vmul.f32 %v7823_v43, %v7683_v42 }
 0x32d   : > { %v3192_v15 = vpop.permute.xlu1 %3191  ;;  %v3190_v0 = vpop.permute.xlu0 %3189  ;;  %v3154_v14 = vadd.f32 %v3150_v60, %v3140_v61  ;;  %v3335_v54 = vrot.slane %v3328_v32, 3  ;;  %v2316_v26 = vstv %s7759_s25  ;;  %v3384_v32 = vrot.slane %v7802_v16, 6 }
 0x32e   : > { %v3153_v47 = vadd.f32 %v3148_v17, %v3139_v63  ;;  %v3309_v42 = vmul.f32 %v7823_v43, %v7697_v34  ;;  %v3386_v24 = vrot.slane %v7813_v5, 6  ;;  %v3286_v61 = vmul.f32 %v7823_v43, %v3285_v21  ;;  %v8218_v63 = vld [vmem:[#allocation36_spill] sm:$0xff] }
 0x32f   : > { %3883 = vrot.lane.b32.xlu1 %v7668_v8, %s4846_s4  ;;  %3881 = vrot.lane.b32.xlu0 %v7671_v28, %s4846_s4  ;;  %v7797_v8 = vsel %vm2343_vm0, %v3299_v49, %v3301_v33  ;;  %v3350_v28 = vrot.slane %v7771_v58, 4  ;;  %v3175_v60 = vadd.f32 %v3171_v19, %v3154_v14  ;;  %v3367_v19 = vrot.slane %v7789_v7, 5 }
 0x330   : > { %v3174_v17 = vadd.f32 %v3169_v36, %v3153_v47  ;;  %v3369_v36 = vrot.slane %v3362_v20, 5  ;;  %v2271_v1 = vadd.f32 %v8218_v63, %v2262_v41  ;;  %v3298_v46 = vrot.slane %v3292_v4, 1  ;;  %v8219_v41 = vld [vmem:[#allocation39_spill] sm:$0xff] }
 0x331   : > { %v3213_v56 = vpop.permute.xlu1 %3212  ;;  %v3211_v12 = vpop.permute.xlu0 %3210  ;;  %v3196_v25 = vadd.f32 %v3192_v15, %v3175_v60  ;;  %v7838_v44 = vsel %vm2397_vm3, %v3350_v28, %v3352_v11  ;;  %v3967_v15 = vstv %s7775_s26  ;;  %v3326_v13 = vmul.f32 %v7823_v43, %v7719_v39 }
 0x332   : > { %v3195_v31 = vadd.f32 %v3190_v0, %v3174_v17  ;;  %v7856_v34 = vsel %vm440_vm12, %v3367_v19, %v3369_v36  ;;  %v3969_v14 = vmul.f32 %v7724_v38, %v3967_v15  ;;  %v3970_v47 = vmul.f32 %v7731_v23, %v3967_v15 }
 0x333   : > { %3904 = vrot.lane.b32.xlu1 %v7688_v48, %s4846_s4  ;;  %3902 = vrot.lane.b32.xlu0 %v7691_v52, %s4846_s4  ;;  %v7831_v48 = vsel %vm2379_vm2, %v3333_v22, %v3335_v54  ;;  %v3217_v0 = vadd.f32 %v3213_v56, %v3196_v25  ;;  %v3315_v56 = vrot.slane %v3309_v42, 2  ;;  %v3988_v11 = vstv %s7804_s29 }
 0x334   : > { %v3216_v33 = vadd.f32 %v3211_v12, %v3195_v31  ;;  %v7868_v12 = vmul.f32 %v7823_v43, %v7766_v40  ;;  %v3953_v17 = vstv %s7815_s10  ;;  %v3968_v18 = vmul.f32 %v7823_v43, %v3967_v15 }
 0x335   : > { %v3234_v52 = vpop.permute.xlu1 %3233  ;;  %v3232_v29 = vpop.permute.xlu0 %3231  ;;  %v2280_v36 = vadd.f32 %v8219_v41, %v2271_v1  ;;  %v3332_v40 = vrot.slane %v3326_v13, 3  ;;  %v7885_v4 = vmul.f32 %v7823_v43, %v7780_v59  ;;  %v3975_v25 = vrot.slane %v3969_v14, 1  ;;  %v8220_v1 = vld [vmem:[#allocation38_spill] sm:$0xff] }
 0x336   : > { %v3238_v21 = vadd.f32 %v3234_v52, %v3217_v0  ;;  %v3237_v20 = vadd.f32 %v3232_v29, %v3216_v33  ;;  %v3977_v31 = vrot.slane %v3970_v47, 1  ;;  %v3990_v52 = vmul.f32 %v7724_v38, %v3988_v11 }
 0x337   : > { %3925 = vrot.lane.b32.xlu1 %v7707_v51, %s4846_s4  ;;  %3923 = vrot.lane.b32.xlu0 %v7716_v2, %s4846_s4  ;;  %v7864_v2 = vmul.f32 %v7823_v43, %v7744_v50  ;;  %v3300_v50 = vsel %vm2343_vm0, %v3298_v46, %v3299_v49  ;;  %v4009_v29 = vstv %s7833_s30  ;;  %v3955_v30 = vmul.f32 %v7724_v38, %v3953_v17 }
 0x338   : > { %v3954_v49 = vmul.f32 %v7823_v43, %v3953_v17  ;;  %v3991_v15 = vmul.f32 %v7731_v23, %v3988_v11  ;;  %v3974_v33 = vrot.slane %v3968_v18, 1  ;;  %v3989_v63 = vmul.f32 %v7823_v43, %v3988_v11 }
 0x339   : > { %v3255_v51 = vpop.permute.xlu1 %3254  ;;  %v3253_v54 = vpop.permute.xlu0 %3252  ;;  %v2289_v46 = vadd.f32 %v8220_v1, %v2280_v36  ;;  %v3334_v35 = vsel %vm2379_vm2, %v3332_v40, %v3333_v22  ;;  %v4011_v13 = vmul.f32 %v7724_v38, %v4009_v29  ;;  %v3978_v14 = vsel %vm2343_vm0, %v3975_v25, %v3977_v31 }
 0x33a   : > { %v3259_v39 = vadd.f32 %v3255_v51, %v3238_v21  ;;  %v3258_v60 = vadd.f32 %v3253_v54, %v3237_v20  ;;  %v3996_v47 = vrot.slane %v3990_v52, 2  ;;  %v3998_v22 = vrot.slane %v3991_v15, 2 }
 0x33b   : > { %3946 = vrot.lane.b32.xlu1 %v7722_v62, %s4846_s4  ;;  %3944 = vrot.lane.b32.xlu0 %v7752_v57, %s4846_s4  ;;  %v3317_v62 = vsel %vm2361_vm1, %v3315_v56, %v3316_v10  ;;  %s7896_s4 = sld [smem:[#allocation5 + $0x11d]]  ;;  %v3349_v10 = vrot.slane %v7864_v2, 4  ;;  %v4012_v54 = vmul.f32 %v7731_v23, %v4009_v29  ;;  %v4010_v56 = vmul.f32 %v7823_v43, %v4009_v29 }
 0x33c   : > { %v4030_v2 = vstv %s7871_s8  ;;  %v3366_v18 = vrot.slane %v7868_v12, 5  ;;  %v3383_v41 = vrot.slane %v7885_v4, 6  ;;  %v4017_v36 = vrot.slane %v4011_v13, 3 }
 0x33d   : > { %v3276_v42 = vpop.permute.xlu1 %3275  ;;  %v3274_v57 = vpop.permute.xlu0 %3273  ;;  %v3999_v12 = vsel %vm2361_vm1, %v3996_v47, %v3998_v22  ;;  %v4019_v29 = vrot.slane %v4012_v54, 3  ;;  %v4016_v4 = vrot.slane %v4010_v56, 3 }
 0x33e   : > { %v3280_v0 = vadd.f32 %v3276_v42, %v3259_v39  ;;  %v3279_v59 = vadd.f32 %v3274_v57, %v3258_v60  ;;  %v3976_v60 = vsel %vm2343_vm0, %v3974_v33, %v3975_v25  ;;  %v4031_v42 = vmul.f32 %v7823_v43, %v4030_v2 }
 0x33f   : > { %3960 = vrot.lane.b32.xlu1 %v3955_v30, %s8123_s22  ;;  %3958 = vrot.lane.b32.xlu0 %v3954_v49, %s8123_s22  ;;  %v4072_v33 = vstv %s7906_s9  ;;  %v4020_v58 = vsel %vm2379_vm2, %v4017_v36, %v4019_v29  ;;  %v3385_v22 = vsel %vm452_vm13, %v3383_v41, %v3384_v32 }
 0x340   : > { %v3289_v21 = vadd.f32 %v7729_v6, %v3280_v0  ;;  %v3288_v20 = vadd.f32 %v3286_v61, %v3279_v59  ;;  %v3995_v6 = vrot.slane %v3989_v63, 2  ;;  %v8221_v61 = vld [vmem:[#allocation40_spill] sm:$0xff]  ;;  %v3351_v0 = vsel %vm2397_vm3, %v3349_v10, %v3350_v28 }
 0x341   : > { %v7910_v55 = vpop.permute.xlu1 %3400  ;;  %v7912_v51 = vpop.permute.xlu0 %3398  ;;  %v2302_v17 = vadd.f32 %v8221_v61, %v2289_v46  ;;  %v3368_v59 = vsel %vm440_vm12, %v3366_v18, %v3367_v19  ;;  %v4018_v28 = vsel %vm2379_vm2, %v4016_v4, %v4017_v36  ;;  %v4037_v7 = vrot.slane %v4031_v42, 4 }
 0x342   : > { %v3306_v11 = vadd.f32 %v7797_v8, %v3289_v21  ;;  %v3305_v39 = vadd.f32 %v3300_v50, %v3288_v20  ;;  %v4032_v8 = vmul.f32 %v7724_v38, %v4030_v2  ;;  %v4033_v50 = vmul.f32 %v7731_v23, %v4030_v2 }
 0x343   : > { %3981 = vrot.lane.b32.xlu1 %v3978_v14, %s8123_s22  ;;  %3979 = vrot.lane.b32.xlu0 %v3976_v60, %s8123_s22  ;;  %v3997_v49 = vsel %vm2361_vm1, %v3995_v6, %v3996_v47  ;;  %v3387_v47 = vsel %vm452_vm13, %v3384_v32, %v3386_v24  ;;  %v4074_v5 = vmul.f32 %v7724_v38, %v4072_v33 }
 0x344   : > { %v3323_v40 = vadd.f32 %v7809_v45, %v3306_v11  ;;  %v3322_v31 = vadd.f32 %v3317_v62, %v3305_v39  ;;  %v4051_v45 = vstv %s7896_s4  ;;  %v8222_v62 = vld [vmem:[#allocation18_spill] sm:$0xff]  ;;  %v4038_v1 = vrot.slane %v4032_v8, 4 }
 0x345   : > { %v3422_v25 = vpop.permute.xlu1 %3421  ;;  %v3420_v52 = vpop.permute.xlu0 %3419  ;;  %v2315_v15 = vadd.f32 %v8222_v62, %v2302_v17  ;;  %v4040_v46 = vrot.slane %v4033_v50, 4  ;;  %v4053_v19 = vmul.f32 %v7724_v38, %v4051_v45  ;;  %v4054_v20 = vmul.f32 %v7731_v23, %v4051_v45 }
 0x346   : > { %v3340_v57 = vadd.f32 %v7831_v48, %v3323_v40  ;;  %v3339_v30 = vadd.f32 %v3334_v35, %v3322_v31  ;;  %v4039_v24 = vsel %vm2397_vm3, %v4037_v7, %v4038_v1  ;;  %v4075_v16 = vmul.f32 %v7731_v23, %v4072_v33 }
 0x347   : > { %4002 = vrot.lane.b32.xlu1 %v3999_v12, %s8123_s22  ;;  %4000 = vrot.lane.b32.xlu0 %v3997_v49, %s8123_s22  ;;  %v2317_v14 = vadd.f32 %v2316_v26, %v2315_v15  ;;  %v4041_v26 = vsel %vm2397_vm3, %v4038_v1, %v4040_v46  ;;  %v4059_v11 = vrot.slane %v4053_v19, 5  ;;  %v4073_v32 = vmul.f32 %v7823_v43, %v4072_v33 }
 0x348   : > { %v3357_v48 = vadd.f32 %v7838_v44, %v3340_v57  ;;  %v3356_v63 = vadd.f32 %v3351_v0, %v3339_v30  ;;  %v4052_v44 = vmul.f32 %v7823_v43, %v4051_v45  ;;  %v4061_v6 = vrot.slane %v4054_v20, 5 }
 0x349   : > { %v3443_v35 = vpop.permute.xlu1 %3442  ;;  %v3441_v13 = vpop.permute.xlu0 %3440  ;;  %v4597_v17 = vmul.f32 -1.442695, %v2317_v14  ;;  %v4080_v31 = vrot.slane %v4074_v5, 6  ;;  %v4082_v8 = vrot.slane %v4075_v16, 6  ;;  %v4079_v50 = vrot.slane %v4073_v32, 6 }
 0x34a   : > { %v3374_v10 = vadd.f32 %v7856_v34, %v3357_v48  ;;  %v3373_v21 = vadd.f32 %v3368_v59, %v3356_v63  ;;  %v4058_v61 = vrot.slane %v4052_v44, 5  ;;  %v4062_v29 = vsel %vm440_vm12, %v4059_v11, %v4061_v6 }
 0x34b   : > { %4023 = vrot.lane.b32.xlu1 %v4020_v58, %s8123_s22  ;;  %4021 = vrot.lane.b32.xlu0 %v4018_v28, %s8123_s22  ;;  %4726 = vpow2.f32 %v4597_v17  ;;  %v4083_v62 = vsel %vm452_vm13, %v4080_v31, %v4082_v8  ;;  %v4081_v15 = vsel %vm452_vm13, %v4079_v50, %v4080_v31  ;;  %v4128_v48 = vstv %s7972_s17 }
 0x34c   : > { %v3391_v34 = vadd.f32 %v3387_v47, %v3374_v10  ;;  %v3390_v54 = vadd.f32 %v3385_v22, %v3373_v21  ;;  %v4060_v4 = vsel %vm440_vm12, %v4058_v61, %v4059_v11  ;;  %v4130_v19 = vmul.f32 %v7724_v38, %v4128_v48 }
 0x34d   : > { %v3464_v56 = vpop.permute.xlu1 %3463  ;;  %v3462_v2 = vpop.permute.xlu0 %3461  ;;  %v4131_v10 = vmul.f32 %v7731_v23, %v4128_v48  ;;  %v4129_v21 = vmul.f32 %v7823_v43, %v4128_v48  ;;  %v4149_v20 = vstv %s7977_s6  ;;  %v4170_v16 = vstv %s7988_s27 }
 0x34e   : > { %v3405_v39 = vadd.f32 %v7910_v55, %v3391_v34  ;;  %v3404_v60 = vadd.f32 %v7912_v51, %v3390_v54  ;;  %v4107_v55 = vstv %s7946_s14  ;;  %v4151_v34 = vmul.f32 %v7724_v38, %v4149_v20 }
 0x34f   : > { %4044 = vrot.lane.b32.xlu1 %v4041_v26, %s8123_s22  ;;  %4042 = vrot.lane.b32.xlu0 %v4039_v24, %s8123_s22  ;;  %v4109_v57 = vmul.f32 %v7724_v38, %v4107_v55  ;;  %v4110_v30 = vmul.f32 %v7731_v23, %v4107_v55  ;;  %v4108_v33 = vmul.f32 %v7823_v43, %v4107_v55  ;;  %v4138_v24 = vrot.slane %v4131_v10, 2 }
 0x350   : > { %v3426_v18 = vadd.f32 %v3422_v25, %v3405_v39  ;;  %v3425_v41 = vadd.f32 %v3420_v52, %v3404_v60  ;;  %v4093_v25 = vstv %s7963_s18  ;;  %v4152_v54 = vmul.f32 %v7731_v23, %v4149_v20 }
 0x351   : > { %v3485_v36 = vpop.permute.xlu1 %3484  ;;  %v3483_v40 = vpop.permute.xlu0 %3482  ;;  %v4095_v63 = vmul.f32 %v7724_v38, %v4093_v25  ;;  %v4094_v1 = vmul.f32 %v7823_v43, %v4093_v25  ;;  %v4117_v58 = vrot.slane %v4110_v30, 1  ;;  %v4114_v47 = vrot.slane %v4108_v33, 1 }
 0x352   : > { %v3447_v51 = vadd.f32 %v3443_v35, %v3426_v18  ;;  %v3446_v12 = vadd.f32 %v3441_v13, %v3425_v41  ;;  %v4115_v13 = vrot.slane %v4109_v57, 1  ;;  %v4135_v11 = vrot.slane %v4129_v21, 2 }
 0x353   : > { %4065 = vrot.lane.b32.xlu1 %v4062_v29, %s8123_s22  ;;  %4063 = vrot.lane.b32.xlu0 %v4060_v4, %s8123_s22  ;;  %v4150_v6 = vmul.f32 %v7823_v43, %v4149_v20  ;;  %v4157_v17 = vrot.slane %v4151_v34, 3  ;;  %v4159_v18 = vrot.slane %v4152_v54, 3  ;;  %v4172_v41 = vmul.f32 %v7724_v38, %v4170_v16 }
 0x354   : > { %v3468_v52 = vadd.f32 %v3464_v56, %v3447_v51  ;;  %v3467_v42 = vadd.f32 %v3462_v2, %v3446_v12  ;;  %v4118_v22 = vsel %vm2343_vm0, %v4115_v13, %v4117_v58  ;;  %v4136_v2 = vrot.slane %v4130_v19, 2 }
 0x355   : > { %v3506_v49 = vpop.permute.xlu1 %3505  ;;  %v3504_v45 = vpop.permute.xlu0 %3503  ;;  %v4116_v60 = vsel %vm2343_vm0, %v4114_v47, %v4115_v13  ;;  %v4173_v50 = vmul.f32 %v7731_v23, %v4170_v16  ;;  %v4191_v55 = vstv %s8000_s7  ;;  %v4156_v29 = vrot.slane %v4150_v6, 3 }
 0x356   : > { %v3489_v0 = vadd.f32 %v3485_v36, %v3468_v52  ;;  %v3488_v59 = vadd.f32 %v3483_v40, %v3467_v42  ;;  %v4727_v26 = vpop.eup %4726  ;;  %v4139_v31 = vsel %vm2361_vm1, %v4136_v2, %v4138_v24  ;;  %v4137_v8 = vsel %vm2361_vm1, %v4135_v11, %v4136_v2  ;;  %v8223_v11 = vld [vmem:[#allocation17_spill] sm:$0xff] }
 0x357   : > { %4086 = vrot.lane.b32.xlu1 %v4083_v62, %s8123_s22  ;;  %4084 = vrot.lane.b32.xlu0 %v4081_v15, %s8123_s22  ;;  %s8012_s22 = sld [smem:[#allocation5 + $0x125]]  ;;  %v2321_v61 = vadd.f32 1.0, %v4727_v26  ;;  %v4171_v4 = vmul.f32 %v7823_v43, %v4170_v16  ;;  %v4160_v25 = vsel %vm2379_vm2, %v4157_v17, %v4159_v18  ;;  %v4178_v52 = vrot.slane %v4172_v41, 4 }
 0x358   : > { %v3510_v46 = vadd.f32 %v3506_v49, %v3489_v0  ;;  %v3509_v35 = vadd.f32 %v3504_v45, %v3488_v59  ;;  %v4180_v30 = vrot.slane %v4173_v50, 4  ;;  %v4193_v49 = vmul.f32 %v7724_v38, %v4191_v55 }
 0x359   : > { %v3527_v28 = vpop.permute.xlu1 %3526  ;;  %v3525_v7 = vpop.permute.xlu0 %3524  ;;  %4728 = vrcp.f32 %v2321_v61  ;;  %v4194_v45 = vmul.f32 %v7731_v23, %v4191_v55  ;;  %v4192_v62 = vmul.f32 %v7823_v43, %v4191_v55  ;;  %v4158_v59 = vsel %vm2379_vm2, %v4156_v29, %v4157_v17 }
 0x35a   : > { %v3531_v44 = vadd.f32 %v3527_v28, %v3510_v46  ;;  %v3530_v14 = vadd.f32 %v3525_v7, %v3509_v35  ;;  %v4177_v33 = vrot.slane %v4171_v4, 4  ;;  %v4181_v46 = vsel %vm2397_vm3, %v4178_v52, %v4180_v30 }
 0x35b   : > { %4100 = vrot.lane.b32.xlu1 %v4095_v63, %s8124_s11  ;;  %4098 = vrot.lane.b32.xlu0 %v4094_v1, %s8124_s11  ;;  %v4199_v35 = vrot.slane %v4193_v49, 5  ;;  %v4201_v13 = vrot.slane %v4194_v45, 5  ;;  %v4198_v58 = vrot.slane %v4192_v62, 5  ;;  %v4315_v16 = vsub.s32 1, %v8223_v11 }
 0x35c   : > { %v4179_v28 = vsel %vm2397_vm3, %v4177_v33, %v4178_v52  ;;  %v4326_v6 = vsub.s32 2, %v8223_v11  ;;  %v4337_v41 = vsub.s32 3, %v8223_v11 }
 0x35d   : > { %v3541_v5 = vpop.permute.xlu1 %3540  ;;  %v3539_v56 = vpop.permute.xlu0 %3538  ;;  %v4212_v48 = vstv %s8012_s22  ;;  %v4200_v47 = vsel %vm440_vm12, %v4198_v58, %v4199_v35 }
 0x35e   : > { %v3545_v32 = vadd.f32 %v3541_v5, %v3531_v44  ;;  %v3544_v39 = vadd.f32 %v3539_v56, %v3530_v14  ;;  %v4214_v7 = vmul.f32 %v7724_v38, %v4212_v48  ;;  %v4215_v19 = vmul.f32 %v7731_v23, %v4212_v48 }
 0x35f   : > { %4121 = vrot.lane.b32.xlu1 %v4118_v22, %s8124_s11  ;;  %4119 = vrot.lane.b32.xlu0 %v4116_v60, %s8124_s11  ;;  %v4213_v10 = vmul.f32 %v7823_v43, %v4212_v48  ;;  %v4202_v44 = vsel %vm440_vm12, %v4199_v35, %v4201_v13 }
 0x360   : > { %v4220_v22 = vrot.slane %v4214_v7, 6  ;;  %v4222_v34 = vrot.slane %v4215_v19, 6 }
 0x361   : > { %v3562_v36 = vpop.permute.xlu1 %3561  ;;  %v3560_v40 = vpop.permute.xlu0 %3559  ;;  %v4219_v54 = vrot.slane %v4213_v10, 6 }
 0x362   : > { %v3566_v51 = vadd.f32 %v3562_v36, %v3545_v32  ;;  %v3565_v12 = vadd.f32 %v3560_v40, %v3544_v39  ;;  %v4223_v26 = vsel %vm452_vm13, %v4220_v22, %v4222_v34 }
 0x363   : > { %4142 = vrot.lane.b32.xlu1 %v4139_v31, %s8124_s11  ;;  %4140 = vrot.lane.b32.xlu0 %v4137_v8, %s8124_s11  ;;  %v4729_v14 = vpop.eup %4728  ;;  %v4221_v5 = vsel %vm452_vm13, %v4219_v54, %v4220_v22 }
 0x364   : > { %v2324_v43 = vmul.f32 0.33333334, %v4729_v14 }
 0x365   : > { %v3583_v42 = vpop.permute.xlu1 %3582  ;;  %v3581_v57 = vpop.permute.xlu0 %3580 }
 0x366   : > { %v8026_v15 = vadd.f32 %v3583_v42, %v3566_v51  ;;  %v8028_v0 = vadd.f32 %v3581_v57, %v3565_v12  ;;  %v4305_v24 = vrot.slane %v2324_v43, %v7268_v3  ;;  %v4316_v60 = vrot.slane %v2324_v43, %v4315_v16 }
 0x367   : > { %4163 = vrot.lane.b32.xlu1 %v4160_v25, %s8124_s11  ;;  %4161 = vrot.lane.b32.xlu0 %v4158_v59, %s8124_s11  ;;  %v4327_v18 = vrot.slane %v2324_v43, %v4326_v6  ;;  %v4338_v40 = vrot.slane %v2324_v43, %v4337_v41 }
 0x369   : > { %v8034_v63 = vpop.permute.xlu1 %3603  ;;  %v8036_v1 = vpop.permute.xlu0 %3601 }
 0x36a   : > { %v3608_v48 = vadd.f32 %v8034_v63, %v8026_v15 }
 0x36b   : > { %4184 = vrot.lane.b32.xlu1 %v4181_v46, %s8124_s11  ;;  %4182 = vrot.lane.b32.xlu0 %v4179_v28, %s8124_s11  ;;  %v3607_v46 = vadd.f32 %v8036_v1, %v8028_v0 }
 0x36d   : > { %v3625_v21 = vpop.permute.xlu1 %3624  ;;  %v3623_v20 = vpop.permute.xlu0 %3622 }
 0x36e   : > { %v3629_v58 = vadd.f32 %v3625_v21, %v3608_v48  ;;  %v3628_v28 = vadd.f32 %v3623_v20, %v3607_v46 }
 0x36f   : > { %4205 = vrot.lane.b32.xlu1 %v4202_v44, %s8124_s11  ;;  %4203 = vrot.lane.b32.xlu0 %v4200_v47, %s8124_s11 }
 0x371   : > { %v3646_v38 = vpop.permute.xlu1 %3645  ;;  %v3644_v23 = vpop.permute.xlu0 %3643 }
 0x372   : > { %v3650_v7 = vadd.f32 %v3646_v38, %v3629_v58  ;;  %v3649_v19 = vadd.f32 %v3644_v23, %v3628_v28 }
 0x373   : > { %4226 = vrot.lane.b32.xlu1 %v4223_v26, %s8124_s11  ;;  %4224 = vrot.lane.b32.xlu0 %v4221_v5, %s8124_s11  ;;  %s4598_s11 = sld [smem:[#allocation10 + $0x2]] }
 0x375   : > { %v3667_v56 = vpop.permute.xlu1 %3666  ;;  %v3665_v2 = vpop.permute.xlu0 %3664 }
 0x376   : > { %v3671_v14 = vadd.f32 %v3667_v56, %v3650_v7  ;;  %v3670_v47 = vadd.f32 %v3665_v2, %v3649_v19 }
 0x377   : > { %4311 = vbcast.lane.b32.xlu1 %v4305_v24, 264  ;;  %4307 = vbcast.lane.b32.xlu0 %v4305_v24, 256 }
 0x379   : > { %v3681_v32 = vpop.permute.xlu1 %3680  ;;  %v3679_v39 = vpop.permute.xlu0 %3678 }
 0x37a   : > { %v3685_v22 = vadd.f32 %v3681_v32, %v3671_v14  ;;  %v3684_v34 = vadd.f32 %v3679_v39, %v3670_v47 }
 0x37b   : > { %4322 = vbcast.lane.b32.xlu1 %v4316_v60, 264  ;;  %4318 = vbcast.lane.b32.xlu0 %v4316_v60, 256 }
 0x37d   : > { %v3702_v61 = vpop.permute.xlu1 %3701  ;;  %v3700_v17 = vpop.permute.xlu0 %3699 }
 0x37e   : > { %v3706_v26 = vadd.f32 %v3702_v61, %v3685_v22  ;;  %v3705_v5 = vadd.f32 %v3700_v17, %v3684_v34 }
 0x37f   : > { %4333 = vbcast.lane.b32.xlu1 %v4327_v18, 264  ;;  %4329 = vbcast.lane.b32.xlu0 %v4327_v18, 256 }
 0x381   : > { %v3723_v36 = vpop.permute.xlu1 %3722  ;;  %v3721_v3 = vpop.permute.xlu0 %3720 }
 0x382   : > { %v3727_v15 = vadd.f32 %v3723_v36, %v3706_v26  ;;  %v3726_v63 = vadd.f32 %v3721_v3, %v3705_v5 }
 0x383   : > { %4344 = vbcast.lane.b32.xlu1 %v4338_v40, 264  ;;  %4340 = vbcast.lane.b32.xlu0 %v4338_v40, 256 }
 0x385   : > { %v3744_v31 = vpop.permute.xlu1 %3743  ;;  %v3742_v8 = vpop.permute.xlu0 %3741 }
 0x386   : > { %v3748_v1 = vadd.f32 %v3744_v31, %v3727_v15  ;;  %v3747_v11 = vadd.f32 %v3742_v8, %v3726_v63 }
 0x389   : > { %v3765_v50 = vpop.permute.xlu1 %3764  ;;  %v3763_v55 = vpop.permute.xlu0 %3762 }
 0x38a   : > { %v3769_v21 = vadd.f32 %v3765_v50, %v3748_v1  ;;  %v3768_v20 = vadd.f32 %v3763_v55, %v3747_v11 }
 0x38d   : > { %v3786_v51 = vpop.permute.xlu1 %3785  ;;  %v3784_v12 = vpop.permute.xlu0 %3783 }
 0x38e   : > { %v3790_v16 = vadd.f32 %v3786_v51, %v3769_v21  ;;  %v3789_v60 = vadd.f32 %v3784_v12, %v3768_v20 }
 0x391   : > { %v3807_v29 = vpop.permute.xlu1 %3806  ;;  %v3805_v4 = vpop.permute.xlu0 %3804 }
 0x392   : > { %v3811_v56 = vadd.f32 %v3807_v29, %v3790_v16  ;;  %v3810_v2 = vadd.f32 %v3805_v4, %v3789_v60 }
 0x395   : > { %v3821_v25 = vpop.permute.xlu1 %3820  ;;  %v3819_v52 = vpop.permute.xlu0 %3818 }
 0x396   : > { %v3825_v6 = vadd.f32 %v3821_v25, %v3811_v56  ;;  %v3824_v18 = vadd.f32 %v3819_v52, %v3810_v2 }
 0x399   : > { %v3842_v42 = vpop.permute.xlu1 %3841  ;;  %v3840_v57 = vpop.permute.xlu0 %3839 }
 0x39a   : > { %v3846_v61 = vadd.f32 %v3842_v42, %v3825_v6  ;;  %v3845_v17 = vadd.f32 %v3840_v57, %v3824_v18 }
 0x39d   : > { %v3863_v30 = vpop.permute.xlu1 %3862  ;;  %v3861_v49 = vpop.permute.xlu0 %3860 }
 0x39e   : > { %v3867_v3 = vadd.f32 %v3863_v30, %v3846_v61  ;;  %v3866_v40 = vadd.f32 %v3861_v49, %v3845_v17 }
 0x3a1   : > { %v3884_v45 = vpop.permute.xlu1 %3883  ;;  %v3882_v62 = vpop.permute.xlu0 %3881 }
 0x3a2   : > { %v3888_v31 = vadd.f32 %v3884_v45, %v3867_v3  ;;  %v3887_v8 = vadd.f32 %v3882_v62, %v3866_v40 }
 0x3a5   : > { %v3905_v59 = vpop.permute.xlu1 %3904  ;;  %v3903_v33 = vpop.permute.xlu0 %3902 }
 0x3a6   : > { %v3909_v48 = vadd.f32 %v3905_v59, %v3888_v31  ;;  %v3908_v46 = vadd.f32 %v3903_v33, %v3887_v8 }
 0x3a9   : > { %v3926_v35 = vpop.permute.xlu1 %3925  ;;  %v3924_v13 = vpop.permute.xlu0 %3923 }
 0x3aa   : > { %v3930_v51 = vadd.f32 %v3926_v35, %v3909_v48  ;;  %v3929_v12 = vadd.f32 %v3924_v13, %v3908_v46 }
 0x3ad   : > { %v3947_v10 = vpop.permute.xlu1 %3946  ;;  %v3945_v44 = vpop.permute.xlu0 %3944 }
 0x3ae   : > { %v3951_v58 = vadd.f32 %v3947_v10, %v3930_v51  ;;  %v3950_v28 = vadd.f32 %v3945_v44, %v3929_v12 }
 0x3b1   : > { %v3961_v54 = vpop.permute.xlu1 %3960  ;;  %v3959_v43 = vpop.permute.xlu0 %3958 }
 0x3b2   : > { %v3965_v25 = vadd.f32 %v3961_v54, %v3951_v58  ;;  %v3964_v52 = vadd.f32 %v3959_v43, %v3950_v28 }
 0x3b5   : > { %v3982_v24 = vpop.permute.xlu1 %3981  ;;  %v3980_v0 = vpop.permute.xlu0 %3979 }
 0x3b6   : > { %v3986_v7 = vadd.f32 %v3982_v24, %v3965_v25  ;;  %v3985_v19 = vadd.f32 %v3980_v0, %v3964_v52 }
 0x3b9   : > { %v4003_v38 = vpop.permute.xlu1 %4002  ;;  %v4001_v23 = vpop.permute.xlu0 %4000 }
 0x3ba   : > { %v4007_v30 = vadd.f32 %v4003_v38, %v3986_v7  ;;  %v4006_v49 = vadd.f32 %v4001_v23, %v3985_v19 }
 0x3bd   : > { %v4024_v32 = vpop.permute.xlu1 %4023  ;;  %v4022_v39 = vpop.permute.xlu0 %4021 }
 0x3be   : > { %v4028_v14 = vadd.f32 %v4024_v32, %v4007_v30  ;;  %v4027_v47 = vadd.f32 %v4022_v39, %v4006_v49  ;;  %v4232_v32 = vstv %s4598_s11 }
 0x3c1   : > { %v4045_v41 = vpop.permute.xlu1 %4044  ;;  %v4043_v36 = vpop.permute.xlu0 %4042 }
 0x3c2   : > { %v4049_v59 = vadd.f32 %v4045_v41, %v4028_v14  ;;  %v4048_v33 = vadd.f32 %v4043_v36, %v4027_v47 }
 0x3c5   : > { %v4066_v50 = vpop.permute.xlu1 %4065  ;;  %v4064_v55 = vpop.permute.xlu0 %4063 }
 0x3c6   : > { %v4070_v22 = vadd.f32 %v4066_v50, %v4049_v59  ;;  %v4069_v34 = vadd.f32 %v4064_v55, %v4048_v33 }
 0x3c9   : > { %v4087_v29 = vpop.permute.xlu1 %4086  ;;  %v4085_v4 = vpop.permute.xlu0 %4084 }
 0x3ca   : > { %v4091_v10 = vadd.f32 %v4087_v29, %v4070_v22  ;;  %v4090_v44 = vadd.f32 %v4085_v4, %v4069_v34  ;;  %v4747_v34 = vld [vmem:[%s4939_s16 + $0x8] sm:$0xff] }
 0x3cd   : > { %v4101_v42 = vpop.permute.xlu1 %4100  ;;  %v4099_v57 = vpop.permute.xlu0 %4098 }
 0x3ce   : > { %v4105_v26 = vadd.f32 %v4101_v42, %v4091_v10  ;;  %v4104_v5 = vadd.f32 %v4099_v57, %v4090_v44  ;;  %v4748_v10 = vld [vmem:[%s4939_s16 + $0x18] sm:$0xff] }
 0x3d1   : > { %v4122_v45 = vpop.permute.xlu1 %4121  ;;  %v4120_v62 = vpop.permute.xlu0 %4119 }
 0x3d2   : > { %v4126_v15 = vadd.f32 %v4122_v45, %v4105_v26  ;;  %v4125_v63 = vadd.f32 %v4120_v62, %v4104_v5  ;;  %v4751_v5 = vld [vmem:[%s4939_s16] sm:$0xff] }
 0x3d5   : > { %v4143_v35 = vpop.permute.xlu1 %4142  ;;  %v4141_v13 = vpop.permute.xlu0 %4140 }
 0x3d6   : > { %v4147_v1 = vadd.f32 %v4143_v35, %v4126_v15  ;;  %v4146_v11 = vadd.f32 %v4141_v13, %v4125_v63  ;;  %v4752_v63 = vld [vmem:[%s4939_s16 + $0x10] sm:$0xff] }
 0x3d9   : > { %v4164_v54 = vpop.permute.xlu1 %4163  ;;  %v4162_v43 = vpop.permute.xlu0 %4161 }
 0x3da   : > { %v4168_v21 = vadd.f32 %v4164_v54, %v4147_v1  ;;  %v4167_v20 = vadd.f32 %v4162_v43, %v4146_v11  ;;  %v4750_v43 = vld [vmem:[%s4939_s16 + $0x38] sm:$0xff]  ;;  %v4754_v11 = vld [vmem:[%s4939_s16 + $0x30] sm:$0xff] }
 0x3dd   : > { %v4185_v24 = vpop.permute.xlu1 %4184  ;;  %v4183_v0 = vpop.permute.xlu0 %4182 }
 0x3de   : > { %v4189_v16 = vadd.f32 %v4185_v24, %v4168_v21  ;;  %v4188_v60 = vadd.f32 %v4183_v0, %v4167_v20  ;;  %v4753_v0 = vld [vmem:[%s4939_s16 + $0x20] sm:$0xff] }
 0x3e1   : > { %v4206_v38 = vpop.permute.xlu1 %4205  ;;  %v4204_v23 = vpop.permute.xlu0 %4203 }
 0x3e2   : > { %v4210_v56 = vadd.f32 %v4206_v38, %v4189_v16  ;;  %v4209_v2 = vadd.f32 %v4204_v23, %v4188_v60 }
 0x3e5   : > { %v4227_v39 = vpop.permute.xlu1 %4226  ;;  %v4225_v6 = vpop.permute.xlu0 %4224 }
 0x3e6   : > { %v4231_v18 = vadd.f32 %v4227_v39, %v4210_v56  ;;  %v4230_v61 = vadd.f32 %v4225_v6, %v4209_v2 }
 0x3e8   : > { %v4234_v17 = vadd.f32 %v4232_v32, %v4231_v18  ;;  %v4233_v41 = vadd.f32 %v4232_v32, %v4230_v61 }
 0x3e9   : > { %v4312_v40 = vpop.permute.xlu1 %4311  ;;  %v4308_v8 = vpop.permute.xlu0 %4307 }
 0x3ea   : > { %v4698_v36 = vmul.f32 -1.442695, %v4234_v17  ;;  %v4697_v3 = vmul.f32 -1.442695, %v4233_v41 }
 0x3ec   : > { %4730 = vpow2.f32 %v4698_v36 }
 0x3ed   : > { %4732 = vpow2.f32 %v4697_v3  ;;  %v4323_v46 = vpop.permute.xlu1 %4322  ;;  %v4319_v51 = vpop.permute.xlu0 %4318 }
 0x3f1   : > { %v4334_v12 = vpop.permute.xlu1 %4333  ;;  %v4330_v29 = vpop.permute.xlu0 %4329 }
 0x3f5   : > { %v4345_v45 = vpop.permute.xlu1 %4344  ;;  %v4341_v35 = vpop.permute.xlu0 %4340 }
 0x3f6   : > { %v4731_v31 = vpop.eup %4730 }
 0x3f7   : > { %v4733_v50 = vpop.eup %4732  ;;  %v4242_v55 = vadd.f32 1.0, %v4731_v31 }
 0x3f8   : > { %v4241_v48 = vadd.f32 1.0, %v4733_v50 }
 0x3f9   : > { %4734 = vrcp.f32 %v4242_v55 }
 0x3fa   : > { %4736 = vrcp.f32 %v4241_v48 }
 0x403   : > { %v4735_v4 = vpop.eup %4734 }
 0x404   : > { %v4737_v58 = vpop.eup %4736  ;;  %v4248_v28 = vmul.f32 0.33333334, %v4735_v4 }
 0x405   : > { %v4247_v25 = vmul.f32 0.33333334, %v4737_v58 }
 0x406   : > { %v4295_v52 = vadd.f32 %v7280_v37, %v4248_v28  ;;  %v4297_v42 = vadd.f32 %v7287_v9, %v4248_v28  ;;  %v4299_v57 = vadd.f32 %v7298_v53, %v4248_v28  ;;  %v4301_v7 = vadd.f32 %v7306_v27, %v4248_v28 }
 0x407   : > { %v4294_v19 = vadd.f32 %v7280_v37, %v4247_v25  ;;  %v4296_v30 = vadd.f32 %v7287_v9, %v4247_v25  ;;  %v4298_v49 = vadd.f32 %v7298_v53, %v4247_v25  ;;  %v4300_v62 = vadd.f32 %v7306_v27, %v4247_v25  ;;  %v4749_v27 = vld [vmem:[%s4939_s16 + $0x28] sm:$0xff]  ;;  %s4851_s16 = smov (%p101_p4), [#allocation12]  }
 0x408   : > { %v4347_v14 = vadd.f32 %v4312_v40, %v4295_v52  ;;  %v4349_v47 = vadd.f32 %v4323_v46, %v4297_v42  ;;  %v4351_v59 = vadd.f32 %v4334_v12, %v4299_v57  ;;  %v4353_v33 = vadd.f32 %v4345_v45, %v4301_v7  ;;  %s4376_s20 = sshll.u32 (%p101_p4), %s4851_s16, 4  ;;  %s4377_s20 = int_to_ptr.vmem [resolvable:$true] %s4376_s20 }
 0x409   : > { %v4346_v13 = vadd.f32 %v4308_v8, %v4294_v19  ;;  %v4348_v37 = vadd.f32 %v4319_v51, %v4296_v30  ;;  %v4350_v22 = vadd.f32 %v4330_v29, %v4298_v49  ;;  %v4352_v9 = vadd.f32 %v4341_v35, %v4300_v62  ;;  %103 = sbr.rel (!%p101_p4) target bundleno = 68 (0x44), region = 56  ;;  %s4799_s21 = scalar_lea.vmem (%p101_p4), %s4377_s20, 2048 }
 0x40a   : > { %v4355_v53 = vmul.f32 %v4747_v34, %v4347_v14  ;;  %v4357_v44 = vmul.f32 %v4748_v10, %v4349_v47  ;;  %v4359_v54 = vmul.f32 %v4749_v27, %v4351_v59  ;;  %v4361_v26 = vmul.f32 %v4750_v43, %v4353_v33  ;;  %p4800_p5 = scmp.ne.s32.totalorder (%p101_p4), %s4377_s20, %s4799_s21  ;;  %p4804_p6 = scmp.lt.s32.totalorder (%p101_p4), %s4377_s20, %s4377_s20 }
 0x40b   : > { %v4354_v15 = vmul.f32 %v4751_v5, %v4346_v13  ;;  %v4356_v24 = vmul.f32 %v4752_v63, %v4348_v37  ;;  %v4358_v1 = vmul.f32 %v4753_v0, %v4350_v22  ;;  %v4360_v21 = vmul.f32 %v4754_v11, %v4352_v9  ;;  %p4805_p7 = scmp.lt.s32.totalorder (%p101_p4), %s4799_s21, %s4799_s21 }
 0x40c   : > { %4364 = vst.msk [vmem:[%s4362_s13 + $0x8] sm:$0xff] %vm115_vm7, %v4355_v53  ;;  %4366 = vst.msk [vmem:[%s4362_s13 + $0x18] sm:$0xff] %vm115_vm7, %v4357_v44 }
 0x40d   : > { %4368 = vst.msk [vmem:[%s4362_s13 + $0x28] sm:$0xff] %vm115_vm7, %v4359_v54  ;;  %4370 = vst.msk [vmem:[%s4362_s13 + $0x38] sm:$0xff] %vm115_vm7, %v4361_v26  ;;  %p4806_p8 = por (%p101_p4), %p4805_p7, %p4804_p6 }
 0x40e   : > { %4363 = vst.msk [vmem:[%s4362_s13] sm:$0xff] %vm115_vm7, %v4354_v15  ;;  %4365 = vst.msk [vmem:[%s4362_s13 + $0x10] sm:$0xff] %vm115_vm7, %v4356_v24 }
 0x40f   : > { %4367 = vst.msk [vmem:[%s4362_s13 + $0x20] sm:$0xff] %vm115_vm7, %v4358_v1  ;;  %4369 = vst.msk [vmem:[%s4362_s13 + $0x30] sm:$0xff] %vm115_vm7, %v4360_v21  ;;  %p4807_p9 = pnand (%p101_p4), %p4806_p8, %p4800_p5 }
 0x411   :  { %4810 = shalt.err (!%p4807_p9)
}
 0x412   :  { %s4811_s28 = scalar_lea.hbm %s8108_s3, 2048 }
 0x413   :  { %p4812_p10 = scmp.ne.s32.totalorder %s8108_s3, %s4811_s28  ;;  %p4815_p11 = scmp.lt.u32.totalorder %s4811_s28, %s8108_s3 }
 0x415   :  { %p4817_p12 = pnand %p4815_p11, %p4812_p10 }
 0x417   :  { %4820 = shalt.err (!%p4817_p12)
}
 0x418   :  { %s8225_s24 = smov 8   ;;  %s8226_s1 = smov 128  }
 0x419   :  { %4382 = dma.vmem_to_hbm [thread:$0]  %s4377_s20, 2048, %s8108_s3, [#allocation7], %s8226_s1, %s8226_s1, %s8225_s24  }
 0x41a   :  { %4831 = dma.done.wait [#allocation7], 2048  }
 0x41b   :  { %4832 = vsyncadd [#allocation7], 4294965248 }
 0x41c   :  { %4386 = vsyncpa [#allocation6], 1 }
 0x41d   :  { %4387 = vsyncpa [#allocation7], 1 }
 0x41e   :  { %4388 = vsyncpa [#allocation8], 1 }
 0x41f   :  { %4389 = vsyncpa [#allocation9], 1 }

</bundles_post_ra>
